<compile_context>
chip_gen: v7x
topology: tpu7x:2x2x1
jax: 0.10.0
libtpu: 0.0.40
codegen_flags: <defaults>
</compile_context>

<pallas_src>
import jax
import jax.numpy as jnp
from jax.experimental import pallas as pl
from jax.experimental.pallas import tpu as pltpu

D_IN = 1024
D_HID = 512
EPS = 1e-5


def residual_mlp_kernel(x_ref, w1_ref, c1_ref, w2_ref, c2_ref, wf_ref, bf_ref, o_ref):
    # x tile: (TB, 1024). Cast to bf16 for the MXU only if the producer handed f32.
    x = x_ref[...]
    if x.dtype != jnp.bfloat16:
        x = x.astype(jnp.bfloat16)

    # fc1 with BN1 folded into weight columns / bias, then ReLU.
    h1 = jnp.dot(x, w1_ref[...], preferred_element_type=jnp.float32)
    h1 = jnp.maximum(h1 + c1_ref[...], 0.0)                      # (TB, 512) f32, residual tap

    # fc2 with BN2 folded, then ReLU.
    h2 = jnp.dot(h1.astype(jnp.bfloat16), w2_ref[...],
                 preferred_element_type=jnp.float32)
    h2 = jnp.maximum(h2 + c2_ref[...], 0.0)

    # residual add (post-ReLU tap, matching the PyTorch module); dropout is identity in eval mode.
    h = h2 + h1

    # final 512 -> 1 projection: VPU multiply + lane reduction.
    # keepdims output keeps the sublane-major reduction result in place (no XLU relayout).
    out = jnp.sum(h * wf_ref[...], axis=-1, keepdims=True)       # (TB, 1) f32
    o_ref[...] = out + bf_ref[...]


def _vmem_limit_bytes(tile_b):
    # Explicit budget so the tile choice is viable on v7x (64 MiB physical / 32 MiB default
    # scoped) and v5e (16 MiB default scoped); capped below v7x's physical VMEM.
    x_tile = tile_b * D_IN * 4 * 2                       # f32 x tile, double-buffered
    weights = (D_IN * D_HID + D_HID * D_HID) * 2 * 2     # bf16 weights, double-buffered
    temps = 4 * tile_b * D_HID * 4                       # h1 / h2 / bf16 x / acc (f32 upper bound)
    need = int((x_tile + weights + temps) * 1.5) + (4 << 20)
    return int(min(need, 48 << 20))


def residual_mlp_forward(x, params, *, tile_b=512):
    B = x.shape[0]
    tile_b = min(tile_b, B)
    assert B % tile_b == 0
    assert tile_b % 128 == 0 or tile_b == B, "tile_b should be lane-dense (multiple of 128)"
    w1, c1, w2, c2, wf_row, bf = params

    const = lambda shape: pl.BlockSpec(shape, lambda i: (0, 0))

    flops = 2 * B * (D_IN * D_HID + D_HID * D_HID) + 4 * B * D_HID
    bytes_accessed = (x.size * x.dtype.itemsize
                      + w1.size * 2 + w2.size * 2
                      + (c1.size + c2.size + wf_row.size + bf.size) * 4
                      + B * 4)

    out = pl.pallas_call(
        residual_mlp_kernel,
        out_shape=jax.ShapeDtypeStruct((B, 1), jnp.float32),
        grid_spec=pltpu.PrefetchScalarGridSpec(
            num_scalar_prefetch=0,
            grid=(B // tile_b,),
            in_specs=[
                pl.BlockSpec((tile_b, D_IN), lambda i: (i, 0)),   # x tile (streaming input)
                const((D_IN, D_HID)),                             # w1 (bf16, BN1 folded)
                const((1, D_HID)),                                # c1 (f32 combined bias)
                const((D_HID, D_HID)),                            # w2 (bf16, BN2 folded)
                const((1, D_HID)),                                # c2
                const((1, D_HID)),                                # wf as (1, 512) row, f32
                const((1, 1)),                                    # bf
            ],
            out_specs=pl.BlockSpec((tile_b, 1), lambda i: (i, 0)),
        ),
        compiler_params=pltpu.CompilerParams(
            dimension_semantics=("parallel",),
            vmem_limit_bytes=_vmem_limit_bytes(tile_b)),
        cost_estimate=pl.CostEstimate(
            flops=flops, transcendentals=0, bytes_accessed=bytes_accessed),
    )(x, w1, c1, w2, c2, wf_row, bf)
    return out[:, 0]   # (B,)  == .squeeze(1)


def make_params(key):
    ks = jax.random.split(key, 12)
    # Linear weights stored as (in, out) == PyTorch weight.T
    w1 = jax.random.normal(ks[0], (D_IN, D_HID), jnp.float32) * 0.02
    b1 = jax.random.normal(ks[1], (1, D_HID), jnp.float32) * 0.01
    w2 = jax.random.normal(ks[2], (D_HID, D_HID), jnp.float32) * 0.02
    b2 = jax.random.normal(ks[3], (1, D_HID), jnp.float32) * 0.01
    wf = jax.random.normal(ks[4], (D_HID, 1), jnp.float32) * 0.02
    bf = jax.random.normal(ks[5], (1, 1), jnp.float32) * 0.01

    # BatchNorm1d parameters + running statistics (eval mode)
    gamma1 = 1.0 + 0.1 * jax.random.normal(ks[6], (1, D_HID), jnp.float32)
    beta1 = 0.1 * jax.random.normal(ks[7], (1, D_HID), jnp.float32)
    mean1 = 0.1 * jax.random.normal(ks[8], (1, D_HID), jnp.float32)
    var1 = jnp.abs(1.0 + 0.1 * jax.random.normal(ks[9], (1, D_HID), jnp.float32))
    gamma2 = 1.0 + 0.1 * jax.random.normal(ks[10], (1, D_HID), jnp.float32)
    beta2 = 0.1 * jax.random.normal(ks[11], (1, D_HID), jnp.float32)
    mean2 = jnp.zeros((1, D_HID), jnp.float32)
    var2 = jnp.ones((1, D_HID), jnp.float32)

    s1 = gamma1 / jnp.sqrt(var1 + EPS)
    t1 = beta1 - mean1 * s1
    s2 = gamma2 / jnp.sqrt(var2 + EPS)
    t2 = beta2 - mean2 * s2

    # Fold BN into the linears (offline), quantize weights to bf16.
    w1f = (w1 * s1).astype(jnp.bfloat16)      # scale each output column
    c1 = b1 * s1 + t1                         # combined bias, f32
    w2f = (w2 * s2).astype(jnp.bfloat16)
    c2 = b2 * s2 + t2
    wf_row = wf.T                             # (1, 512) f32 for the VPU reduction
    return (w1f, c1, w2f, c2, wf_row, bf)


def reference_forward(x, params):
    # Pure-JAX reference mirroring the kernel's bf16 quantization points exactly.
    w1f, c1, w2f, c2, wf_row, bf = params
    w1 = w1f.astype(jnp.float32)
    w2 = w2f.astype(jnp.float32)
    xq = x.astype(jnp.bfloat16).astype(jnp.float32)
    h1 = jnp.maximum(jnp.dot(xq, w1, preferred_element_type=jnp.float32) + c1, 0.0)
    h1q = h1.astype(jnp.bfloat16).astype(jnp.float32)
    h2 = jnp.maximum(jnp.dot(h1q, w2, preferred_element_type=jnp.float32) + c2, 0.0)
    h = h2 + h1
    return jnp.sum(h * wf_row, axis=-1) + bf[0, 0]


if __name__ == "__main__":
    key = jax.random.PRNGKey(0)
    kx, kp = jax.random.split(key)
    B = 2048                     # 4 grid steps at tile_b=512 (>= 2 steps per TC on v7x)
    x = jax.random.normal(kx, (B, D_IN), jnp.float32)
    params = make_params(kp)

    out = jax.block_until_ready(residual_mlp_forward(x, params))
    ref = reference_forward(x, params)
    assert out.shape == (B,)
    assert jnp.allclose(out, ref, atol=1e-2, rtol=1e-2), float(jnp.max(jnp.abs(out - ref)))
    print("KERNEL_OK")
</pallas_src>

<mosaic_0001>
module attributes {stable_mosaic.version = 11 : i64} {
  func.func @residual_mlp_kernel(%arg0: i32, %arg1: memref<512x1024xf32, #tpu.memory_space<vmem>>, %arg2: memref<1024x512xbf16, #tpu.memory_space<vmem>>, %arg3: memref<1x512xf32, #tpu.memory_space<vmem>>, %arg4: memref<512x512xbf16, #tpu.memory_space<vmem>>, %arg5: memref<1x512xf32, #tpu.memory_space<vmem>>, %arg6: memref<1x512xf32, #tpu.memory_space<vmem>>, %arg7: memref<1x1xf32, #tpu.memory_space<vmem>>, %arg8: memref<512x1xf32, #tpu.memory_space<vmem>>) attributes {dimension_semantics = [#tpu.dimension_semantics<parallel>], iteration_bounds = array<i64: 4>, scalar_prefetch = 0 : i64, scratch_operands = 0 : i64, tpu.core_type = #tpu.core_type<tc>, window_params = [{transform_indices = @transform_0, window_bounds = array<i64: 512, 1024>}, {pipeline_mode = #tpu.pipeline_mode<synchronous>, transform_indices = @transform_1, window_bounds = array<i64: 1024, 512>}, {pipeline_mode = #tpu.pipeline_mode<synchronous>, transform_indices = @transform_2, window_bounds = array<i64: 1, 512>}, {pipeline_mode = #tpu.pipeline_mode<synchronous>, transform_indices = @transform_3, window_bounds = array<i64: 512, 512>}, {pipeline_mode = #tpu.pipeline_mode<synchronous>, transform_indices = @transform_4, window_bounds = array<i64: 1, 512>}, {pipeline_mode = #tpu.pipeline_mode<synchronous>, transform_indices = @transform_5, window_bounds = array<i64: 1, 512>}, {pipeline_mode = #tpu.pipeline_mode<synchronous>, transform_indices = @transform_6, window_bounds = array<i64: 1, 1>}, {transform_indices = @transform_7, window_bounds = array<i64: 512, 1>}]} {
    %c0 = arith.constant 0 : index
    %c0_0 = arith.constant 0 : index
    %0 = vector.load %arg1[%c0, %c0_0] : memref<512x1024xf32, #tpu.memory_space<vmem>>, vector<512x1024xf32>
    %1 = arith.truncf %0 : vector<512x1024xf32> to vector<512x1024xbf16>
    %c0_1 = arith.constant 0 : index
    %c0_2 = arith.constant 0 : index
    %2 = vector.load %arg2[%c0_1, %c0_2] : memref<1024x512xbf16, #tpu.memory_space<vmem>>, vector<1024x512xbf16>
    %cst = arith.constant dense<0.000000e+00> : vector<512x512xf32>
    %3 = tpu.matmul %1, %2, %cst {dimension_numbers = #tpu.dot_dimension_numbers<[1], [0], [0], [1], [0, 0, 1, 1], [], []>} : vector<512x1024xbf16>, vector<1024x512xbf16>, vector<512x512xf32> -> vector<512x512xf32>
    %c0_3 = arith.constant 0 : index
    %c0_4 = arith.constant 0 : index
    %4 = vector.load %arg3[%c0_3, %c0_4] : memref<1x512xf32, #tpu.memory_space<vmem>>, vector<1x512xf32>
    %5 = vector.broadcast %4 : vector<1x512xf32> to vector<512x512xf32>
    %6 = arith.addf %3, %5 : vector<512x512xf32>
    %cst_5 = arith.constant 0.000000e+00 : f32
    %7 = vector.broadcast %cst_5 : f32 to vector<512x512xf32>
    %8 = arith.maximumf %6, %7 : vector<512x512xf32>
    %9 = arith.truncf %8 : vector<512x512xf32> to vector<512x512xbf16>
    %c0_6 = arith.constant 0 : index
    %c0_7 = arith.constant 0 : index
    %10 = vector.load %arg4[%c0_6, %c0_7] : memref<512x512xbf16, #tpu.memory_space<vmem>>, vector<512x512xbf16>
    %cst_8 = arith.constant dense<0.000000e+00> : vector<512x512xf32>
    %11 = tpu.matmul %9, %10, %cst_8 {dimension_numbers = #tpu.dot_dimension_numbers<[1], [0], [0], [1], [0, 0, 1, 1], [], []>} : vector<512x512xbf16>, vector<512x512xbf16>, vector<512x512xf32> -> vector<512x512xf32>
    %c0_9 = arith.constant 0 : index
    %c0_10 = arith.constant 0 : index
    %12 = vector.load %arg5[%c0_9, %c0_10] : memref<1x512xf32, #tpu.memory_space<vmem>>, vector<1x512xf32>
    %13 = vector.broadcast %12 : vector<1x512xf32> to vector<512x512xf32>
    %14 = arith.addf %11, %13 : vector<512x512xf32>
    %cst_11 = arith.constant 0.000000e+00 : f32
    %15 = vector.broadcast %cst_11 : f32 to vector<512x512xf32>
    %16 = arith.maximumf %14, %15 : vector<512x512xf32>
    %17 = arith.addf %16, %8 : vector<512x512xf32>
    %c0_12 = arith.constant 0 : index
    %c0_13 = arith.constant 0 : index
    %18 = vector.load %arg6[%c0_12, %c0_13] : memref<1x512xf32, #tpu.memory_space<vmem>>, vector<1x512xf32>
    %19 = vector.broadcast %18 : vector<1x512xf32> to vector<512x512xf32>
    %20 = arith.mulf %17, %19 : vector<512x512xf32>
    %cst_14 = arith.constant dense<0.000000e+00> : vector<512xf32>
    %21 = vector.multi_reduction <add>, %20, %cst_14 [1] : vector<512x512xf32> to vector<512xf32>
    %22 = vector.shape_cast %21 : vector<512xf32> to vector<512x1xf32>
    %c0_15 = arith.constant 0 : index
    %c0_16 = arith.constant 0 : index
    %23 = vector.load %arg7[%c0_15, %c0_16] : memref<1x1xf32, #tpu.memory_space<vmem>>, vector<1x1xf32>
    %24 = vector.broadcast %23 : vector<1x1xf32> to vector<512x1xf32>
    %25 = arith.addf %22, %24 : vector<512x1xf32>
    %c0_17 = arith.constant 0 : index
    %c0_18 = arith.constant 0 : index
    %26 = vector.load %arg8[%c0_17, %c0_18] : memref<512x1xf32, #tpu.memory_space<vmem>>, vector<512x1xf32>
    tpu.vector_store %arg8[%c0_17, %c0_18], %25 {strides = array<i32>} : memref<512x1xf32, #tpu.memory_space<vmem>>, vector<512x1xf32>,
    return
  }
  func.func @transform_0(%arg0: i32) -> (i32, i32) {
    %c0_i32 = arith.constant 0 : i32
    %c0_i32_0 = arith.constant 0 : i32
    return %arg0, %c0_i32 : i32, i32
  }
  func.func @transform_1(%arg0: i32) -> (i32, i32) {
    %c0_i32 = arith.constant 0 : i32
    %c0_i32_0 = arith.constant 0 : i32
    %c0_i32_1 = arith.constant 0 : i32
    return %c0_i32, %c0_i32_0 : i32, i32
  }
  func.func @transform_2(%arg0: i32) -> (i32, i32) {
    %c0_i32 = arith.constant 0 : i32
    %c0_i32_0 = arith.constant 0 : i32
    %c0_i32_1 = arith.constant 0 : i32
    return %c0_i32, %c0_i32_0 : i32, i32
  }
  func.func @transform_3(%arg0: i32) -> (i32, i32) {
    %c0_i32 = arith.constant 0 : i32
    %c0_i32_0 = arith.constant 0 : i32
    %c0_i32_1 = arith.constant 0 : i32
    return %c0_i32, %c0_i32_0 : i32, i32
  }
  func.func @transform_4(%arg0: i32) -> (i32, i32) {
    %c0_i32 = arith.constant 0 : i32
    %c0_i32_0 = arith.constant 0 : i32
    %c0_i32_1 = arith.constant 0 : i32
    return %c0_i32, %c0_i32_0 : i32, i32
  }
  func.func @transform_5(%arg0: i32) -> (i32, i32) {
    %c0_i32 = arith.constant 0 : i32
    %c0_i32_0 = arith.constant 0 : i32
    %c0_i32_1 = arith.constant 0 : i32
    return %c0_i32, %c0_i32_0 : i32, i32
  }
  func.func @transform_6(%arg0: i32) -> (i32, i32) {
    %c0_i32 = arith.constant 0 : i32
    %c0_i32_0 = arith.constant 0 : i32
    %c0_i32_1 = arith.constant 0 : i32
    return %c0_i32, %c0_i32_0 : i32, i32
  }
  func.func @transform_7(%arg0: i32) -> (i32, i32) {
    %c0_i32 = arith.constant 0 : i32
    %c0_i32_0 = arith.constant 0 : i32
    return %arg0, %c0_i32 : i32, i32
  }
}

</mosaic_0001>

<bundles_post_ra>
// kernel: tpu_custom_call.1
= control target key start
LH: loop header
LB: loop body
LE: loop exit
PB: predicated region body
PF: predicated region fallthrough
CT: control target
= control target key end

     0   :  { %s17847_s0 = inlined_call_operand.hbm [shape: f32[2048,1024], index: 0, kind: input, shape index: {}]   ;;  %s17848_s1 = inlined_call_operand.hbm [shape: bf16[1024,512], index: 1, kind: input, shape index: {}]   ;;  %s17849_s2 = inlined_call_operand.hbm [shape: f32[1,512], index: 2, kind: input, shape index: {}]   ;;  %s17850_s3 = inlined_call_operand.hbm [shape: bf16[512,512], index: 3, kind: input, shape index: {}]   ;;  %s17851_s4 = inlined_call_operand.hbm [shape: f32[1,512], index: 4, kind: input, shape index: {}]   ;;  %s17852_s5 = inlined_call_operand.hbm [shape: f32[1,512], index: 5, kind: input, shape index: {}]   ;;  %s17853_s6 = inlined_call_operand.<no memory space> [shape: f32[1,1], index: 6, kind: input, shape index: {}]   ;;  %s17854_s7 = inlined_call_operand.vmem [shape: f32[2048,1], index: 7, kind: output, shape index: {}]  }
   0x1   :  { %v12_v0 = vstv %s17853_s6 }
   0x2   :  { %13 = vst [vmem:[#allocation2] sm:$0x1] %v12_v0 }
   0x3   :  { %14 = vsyncpa [#allocation4], 0 }
   0x4   :  { %16 = vsyncpa [#allocation4 + $0x1], 0 }
   0x5   :  { %17 = vsyncpa [#allocation6], 0 }
   0x6   :  { %18 = vsyncpa [#allocation9], 0 }
   0x7   :  { %19 = vsyncpa [#allocation12], 0  ;;  %s12358_s26 = smov 0   ;;  %s12360_s27 = smov 0  }
   0x8   :  { %s12362_s28 = smov 0   ;;  %s12364_s29 = smov 0  }
   0x9 LB: > { %s12305_s6 = smov [#allocation5]   ;;  %s9468_s8 = sadd.s32 4294967295, %s12303_s29   ;;  %s12303_s29 = sphi %s12364_s29, %s19365_s29   ;;  %s12299_s28 = sphi %s12362_s28, %s19364_s28   ;;  %s12295_s27 = sphi %s12360_s27, %s19363_s27   ;;  %s12291_s26 = sphi %s12358_s26, %s19362_s26  }
   0xa   : > { %s220_s30 = sshll.u32 %s12305_s6, 4  ;;  %p9470_p0 = scmp.ge.s32.totalorder %s12303_s29, 1  ;;  %s12387_s30 = int_to_ptr.vmem [resolvable:$true] %s220_s30 }
   0xb   : > { %p12382_p1 = scmp.eq.s32.totalorder %s9468_s8, 0  ;;  %p208_p2 = scmp.lt.s32.totalorder %s12303_s29, 5 }
   0xc   : > { %s12306_s11 = smov [#allocation8]   ;;  %s12307_s14 = smov [#allocation7]  }
   0xd   : > { %s18288_s9 = scalar_select %p12382_p1, 1, 0 }
   0xe   : > { %p12389_p3 = pnand %p9470_p0, %p208_p2  ;;  %s244_s12 = sshll.u32 %s12306_s11, 4  ;;  %s12401_s12 = int_to_ptr.vmem [resolvable:$true] %s244_s12 }
   0xf   : > { %s234_s15 = sshll.u32 %s12307_s14, 4  ;;  %s12087_s18 = scalar_lea.hbm %s17848_s1, 32768  ;;  %s12403_s15 = int_to_ptr.vmem [resolvable:$true] %s234_s15 }
  0x10   : > { %s18289_s10 = scalar_select %p12389_p3, 1, 0 }
  0x11   : > { %p11437_p4 = pneg %p12389_p3  ;;  %p12088_p6 = scmp.ne.s32.totalorder %s17848_s1, %s12087_s18 }
  0x12   : > { %p12094_p10 = scmp.lt.u32.totalorder %s12087_s18, %s17848_s1 }
  0x13   : > { %p12397_p5 = pnand %p11437_p4, %p12382_p1 }
  0x15   : > { %p12413_p7 = pneg %p12397_p5 }
  0x17   : > { %p12090_p8 = pnand %p12413_p7, %p12088_p6 }
  0x19   : > { %p12091_p9 = pneg %p12090_p8 }
  0x1b   : > { %p12096_p11 = pnand %p12094_p10, %p12091_p9 }
  0x1d   : > { %12099 = shalt.err (!%p12096_p11)
}
  0x1e   : > { %s12100_s24 = scalar_lea.vmem %s12387_s30, 32768  ;;  %p12108_p2 = scmp.lt.s32.totalorder %s12387_s30, %s12387_s30 }
  0x1f   : > { %p12101_p12 = scmp.ne.s32.totalorder %s12387_s30, %s12100_s24  ;;  %p12109_p4 = scmp.lt.s32.totalorder %s12100_s24, %s12100_s24 }
  0x21   : > { %p12103_p13 = pnand %p12101_p12, %p12413_p7  ;;  %p12110_p6 = por %p12109_p4, %p12108_p2 }
  0x23   : > { %p12104_p0 = pneg %p12103_p13 }
  0x25   : > { %p12111_p8 = pnand %p12110_p6, %p12104_p0 }
  0x27   : > { %12114 = shalt.err (!%p12111_p8)
}
  0x28   : > { %s12308_s25 = smov 256   ;;  %s12309_s6 = smov 16  }
  0x29   : > { %11440 = dma.hbm_to_vmem [thread:$0]  (!%p12397_p5), %s17848_s1, 32768, %s12387_s30, [#allocation6], %s12308_s25, %s12308_s25, %s12309_s6  }
  0x2a   : > { %s12115_s18 = scalar_lea.hbm %s17850_s3, 16384 }
  0x2b   : > { %p12116_p9 = scmp.ne.s32.totalorder %s17850_s3, %s12115_s18  ;;  %p12122_p12 = scmp.lt.u32.totalorder %s12115_s18, %s17850_s3 }
  0x2d   : > { %p12118_p10 = pnand %p12116_p9, %p12413_p7 }
  0x2f   : > { %p12119_p11 = pneg %p12118_p10 }
  0x31   : > { %p12124_p13 = pnand %p12122_p12, %p12119_p11 }
  0x33   : > { %12127 = shalt.err (!%p12124_p13)
}
  0x34   : > { %s12128_s30 = scalar_lea.vmem %s12401_s12, 16384  ;;  %p12136_p6 = scmp.lt.s32.totalorder %s12401_s12, %s12401_s12 }
  0x35   : > { %p12129_p0 = scmp.ne.s32.totalorder %s12401_s12, %s12128_s30  ;;  %p12137_p8 = scmp.lt.s32.totalorder %s12128_s30, %s12128_s30 }
  0x37   : > { %p12131_p2 = pnand %p12129_p0, %p12413_p7  ;;  %p12138_p9 = por %p12137_p8, %p12136_p6 }
  0x39   : > { %p12132_p4 = pneg %p12131_p2 }
  0x3b   : > { %p12139_p10 = pnand %p12138_p9, %p12132_p4 }
  0x3d   : > { %12142 = shalt.err (!%p12139_p10)
}
  0x3e   : > { %11446 = dma.hbm_to_vmem [thread:$0]  (!%p12397_p5), %s17850_s3, 16384, %s12401_s12, [#allocation9], %s12308_s25, %s12308_s25, %s12309_s6  }
  0x3f   : > { %s12143_s17 = scalar_lea.hbm %s17849_s2, 64 }
  0x40   : > { %p12144_p11 = scmp.ne.s32.totalorder %s17849_s2, %s12143_s17  ;;  %p12150_p0 = scmp.lt.u32.totalorder %s12143_s17, %s17849_s2 }
  0x42   : > { %p12146_p12 = pnand %p12144_p11, %p12413_p7 }
  0x44   : > { %p12147_p13 = pneg %p12146_p12 }
  0x46   : > { %p12152_p2 = pnand %p12150_p0, %p12147_p13 }
  0x48   : > { %12155 = shalt.err (!%p12152_p2)
}
  0x49   : > { %s12156_s12 = scalar_lea.vmem %s12403_s15, 64  ;;  %p12164_p9 = scmp.lt.s32.totalorder %s12403_s15, %s12403_s15 }
  0x4a   : > { %p12157_p4 = scmp.ne.s32.totalorder %s12403_s15, %s12156_s12  ;;  %p12165_p10 = scmp.lt.s32.totalorder %s12156_s12, %s12156_s12 }
  0x4c   : > { %p12159_p6 = pnand %p12157_p4, %p12413_p7  ;;  %p12166_p11 = por %p12165_p10, %p12164_p9 }
  0x4e   : > { %p12160_p8 = pneg %p12159_p6 }
  0x50   : > { %p12167_p12 = pnand %p12166_p11, %p12160_p8 }
  0x52   : > { %12170 = shalt.err (!%p12167_p12)
}
  0x53   : > { %11443 = dma.hbm_to_vmem [thread:$0]  (!%p12397_p5), %s17849_s2, 64, %s12403_s15, [#allocation6]  }
  0x54   : > { %s12310_s23 = smov [#allocation10]   ;;  %s12311_s24 = smov [#allocation11]  }
  0x55   : > { %s258_s30 = sshll.u32 %s12310_s23, 4  ;;  %s269_s11 = sshll.u32 %s12311_s24, 4  ;;  %s259_s30 = int_to_ptr.vmem [resolvable:$true] %s258_s30  ;;  %s270_s11 = int_to_ptr.vmem [resolvable:$true] %s269_s11 }
  0x56   : > { %s12171_s17 = scalar_lea.hbm %s17851_s4, 64 }
  0x57   : > { %p12172_p13 = scmp.ne.s32.totalorder %s17851_s4, %s12171_s17  ;;  %p12178_p4 = scmp.lt.u32.totalorder %s12171_s17, %s17851_s4 }
  0x59   : > { %p12174_p0 = pnand %p12172_p13, %p12413_p7 }
  0x5b   : > { %p12175_p2 = pneg %p12174_p0 }
  0x5d   : > { %p12180_p6 = pnand %p12178_p4, %p12175_p2 }
  0x5f   : > { %12183 = shalt.err (!%p12180_p6)
}
  0x60   : > { %s12184_s15 = scalar_lea.vmem %s259_s30, 64  ;;  %p12192_p11 = scmp.lt.s32.totalorder %s259_s30, %s259_s30 }
  0x61   : > { %p12185_p8 = scmp.ne.s32.totalorder %s259_s30, %s12184_s15  ;;  %p12193_p12 = scmp.lt.s32.totalorder %s12184_s15, %s12184_s15 }
  0x63   : > { %p12187_p9 = pnand %p12185_p8, %p12413_p7  ;;  %p12194_p3 = por %p12193_p12, %p12192_p11 }
  0x65   : > { %p12188_p10 = pneg %p12187_p9 }
  0x67   : > { %p12195_p1 = pnand %p12194_p3, %p12188_p10 }
  0x69   : > { %12198 = shalt.err (!%p12195_p1)
}
  0x6a   : > { %11449 = dma.hbm_to_vmem [thread:$0]  (!%p12397_p5), %s17851_s4, 64, %s259_s30, [#allocation9]  }
  0x6b   : > { %s12199_s24 = scalar_lea.hbm %s17852_s5, 64 }
  0x6c   : > { %p12200_p13 = scmp.ne.s32.totalorder %s17852_s5, %s12199_s24  ;;  %p12206_p1 = scmp.lt.u32.totalorder %s12199_s24, %s17852_s5 }
  0x6e   : > { %p12202_p0 = pnand %p12200_p13, %p12413_p7 }
  0x70   : > { %p12203_p3 = pneg %p12202_p0 }
  0x72   : > { %p12208_p2 = pnand %p12206_p1, %p12203_p3 }
  0x74   : > { %12211 = shalt.err (!%p12208_p2)
}
  0x75   : > { %s12212_s19 = scalar_lea.vmem %s270_s11, 64  ;;  %p12220_p9 = scmp.lt.s32.totalorder %s270_s11, %s270_s11 }
  0x76   : > { %p12213_p4 = scmp.ne.s32.totalorder %s270_s11, %s12212_s19  ;;  %p12221_p10 = scmp.lt.s32.totalorder %s12212_s19, %s12212_s19 }
  0x78   : > { %p12215_p6 = pnand %p12213_p4, %p12413_p7  ;;  %p12222_p11 = por %p12221_p10, %p12220_p9 }
  0x7a   : > { %p12216_p8 = pneg %p12215_p6 }
  0x7c   : > { %p12223_p12 = pnand %p12222_p11, %p12216_p8 }
  0x7e   : > { %12226 = shalt.err (!%p12223_p12)
}
  0x7f   : > { %11452 = dma.hbm_to_vmem [thread:$0]  (!%p12397_p5), %s17852_s5, 64, %s270_s11, [#allocation12]  }
  0x80   : > { %s12517_s21 = sadd.s32 1, %s12303_s29   ;;  %s32_s22 = sadd.s32 1, %s12299_s28 }
  0x81   : > { %s29_s13 = ssub.s32 %s12303_s29, %s12517_s21  ;;  %p39_p13 = scmp.ne.s32.totalorder %s12299_s28, %s12295_s27 }
  0x82   : > { %p30_p7 = scmp.eq.s32.totalorder %s29_s13, 0  ;;  %p40_p0 = scmp.eq.s32.totalorder %s12303_s29, 0 }
  0x83   : > { %p45_p3 = scmp.ne.s32.totalorder %s12295_s27, %s12291_s26  ;;  %p18292_p2 = scmp.ne.s32.totalorder %s18288_s9, 0 }
  0x84   : > { %s12528_s15 = scalar_select %p30_p7, %s12299_s28, %s32_s22  }
  0x85   : > { %p41_p1 = por %p40_p0, %p39_p13  ;;  %p12532_p4 = por %p18292_p2, %p45_p3 }
  0x86   : > { %p11462_p6 = scmp.lt.s32.totalorder %s12303_s29, 4  ;;  %s283_s25 = sand.u32 1, %s12299_s28  }
  0x87   : > { %s9477_s11 = sshll.u32 %s283_s25, 12  ;;  %s9878_s6 = sshll.u32 %s12303_s29, 16 }
  0x88   : > { %s12542_s14 = scalar_lea.hbm %s17847_s0, %s9878_s6  ;;  %s287_s26 = scalar_lea.vmem [#allocation3], %s9477_s11 }
  0x89   : > { %s295_s16 = sshll.u32 %s287_s26, 4  ;;  %p12546_p5 = pnand %p11462_p6, %p41_p1  ;;  %s12544_s16 = int_to_ptr.vmem [resolvable:$true] %s295_s16 }
  0x8a   : > { %s12550_s18 = scalar_lea.sflag [#allocation4], %s283_s25  ;;  %s12227_s19 = scalar_lea.hbm %s12542_s14, 65536 }
  0x8b   : > { %p12228_p8 = scmp.ne.s32.totalorder %s12542_s14, %s12227_s19  ;;  %p12229_p9 = pneg %p12546_p5 }
  0x8c   : > { %s12232_s13 = scalar_lea.hbm %s17847_s0, 262144  ;;  %p12233_p12 = scmp.lt.u32.totalorder %s12542_s14, %s17847_s0 }
  0x8d   : > { %p12230_p10 = pnand %p12229_p9, %p12228_p8  ;;  %p12234_p7 = scmp.lt.u32.totalorder %s12232_s13, %s12227_s19 }
  0x8e   : > { %p12236_p0 = scmp.lt.u32.totalorder %s12227_s19, %s12542_s14 }
  0x8f   : > { %p12231_p11 = pneg %p12230_p10  ;;  %p12235_p13 = por %p12234_p7, %p12233_p12 }
  0x91   : > { %p12237_p3 = por %p12236_p0, %p12235_p13 }
  0x93   : > { %p12238_p1 = pnand %p12237_p3, %p12231_p11 }
  0x95   : > { %12241 = shalt.err (!%p12238_p1)
}
  0x96   : > { %s12242_s25 = scalar_lea.vmem %s12544_s16, 65536  ;;  %s12312_s6 = smov [#allocation3]  }
  0x97   : > { %p12243_p2 = scmp.ne.s32.totalorder %s12544_s16, %s12242_s25  ;;  %s12247_s23 = sshll.u32 %s12312_s6, 4  ;;  %s12248_s23 = int_to_ptr.vmem [resolvable:$false] %s12247_s23 }
  0x98   : > { %s12249_s24 = scalar_lea.vmem %s12248_s23, 131072  ;;  %p12250_p10 = scmp.lt.s32.totalorder %s12544_s16, %s12248_s23 }
  0x99   : > { %p12245_p6 = pnand %p12243_p2, %p12229_p9  ;;  %p12251_p12 = scmp.lt.s32.totalorder %s12249_s24, %s12242_s25 }
  0x9b   : > { %p12246_p8 = pneg %p12245_p6  ;;  %p12252_p7 = por %p12251_p12, %p12250_p10 }
  0x9d   : > { %p12253_p13 = pnand %p12252_p7, %p12246_p8 }
  0x9f   : > { %12256 = shalt.err (!%p12253_p13)
}
  0xa0   : > { %s12313_s26 = smov 1024   ;;  %s12314_s19 = smov 64  }
  0xa1   : > { %11456 = dma.hbm_to_vmem [thread:$0]  (!%p12546_p5), %s12542_s14, 65536, %s12544_s16, %s12550_s18, %s12313_s26, %s12313_s26, %s12314_s19  }
  0xa2   : > { %p18295_p9 = scmp.ne.s32.totalorder %s18289_s10, 0 }
  0xa4   : > { %307 = sbr.rel (%p18295_p9) target bundleno = 2269 (0x8dd), region = 48 }
  0xab   : > { %s309_s30 = sand.u32 1, %s12295_s27  }
  0xac   : > { %s9482_s20 = sshll.u32 %s309_s30, 12  ;;  %s310_s13 = scalar_lea.sflag [#allocation4], %s309_s30 }
  0xad   : > { %s12581_s22 = scalar_lea.vmem [#allocation3], %s9482_s20 }
  0xae   : > { %12274 = dma.done.wait (%p12532_p4), %s310_s13, 65536  }
  0xaf   : > { %12276 = vsyncadd (%p12532_p4), %s310_s13, 4294901760  ;;  %p18296_p11 = scmp.ne.s32.totalorder %s18288_s9, 0 }
  0xb1   : > { %12278 = dma.done.wait (%p18296_p11), [#allocation6], 32832  }
  0xb2   : > { %12280 = vsyncadd (%p18296_p11), [#allocation6], 4294934464 }
  0xb3   : > { %12282 = dma.done.wait (%p18296_p11), [#allocation9], 16448  }
  0xb4   : > { %12284 = vsyncadd (%p18296_p11), [#allocation9], 4294950848 }
  0xb5   : > { %12286 = dma.done.wait (%p18296_p11), [#allocation12], 64  }
  0xb6   : > { %12288 = vsyncadd (%p18296_p11), [#allocation12], 4294967232  ;;  %v11509_v1 = vld [vmem:[#allocation5 + $0x4] ss:$16 sps:$4 sm:$0xff]   ;;  %v11511_v2 = vld [vmem:[#allocation5 + $0xc] ss:$16 sps:$4 sm:$0xff]  }
  0xb7   : > { %2697 = vmatprep.subr.bf16.mxu0 %v11509_v1  ;;  %v11513_v3 = vld [vmem:[#allocation5] ss:$16 sps:$4 sm:$0xff]   ;;  %v11514_v4 = vld [vmem:[#allocation5 + $0x8] ss:$16 sps:$4 sm:$0xff]   ;;  %4109 = vmatprep.subr.bf16.mxu1 %v11511_v2  ;;  %v11515_v5 = vld [vmem:[#allocation5 + $0x24] ss:$16 sps:$4 sm:$0xff]  }
  0xb8   : > { %2698 = vmatpush1.bf16.msra.mxu0 %v11513_v3  ;;  %4110 = vmatpush1.bf16.msra.mxu1 %v11514_v4  ;;  %v11517_v6 = vld [vmem:[#allocation5 + $0x2c] ss:$16 sps:$4 sm:$0xff]   ;;  %v11519_v7 = vld [vmem:[#allocation5 + $0x20] ss:$16 sps:$4 sm:$0xff]   ;;  %v11520_v8 = vld [vmem:[#allocation5 + $0x28] ss:$16 sps:$4 sm:$0xff]  }
  0xb9   : > { %2699 = vmatprep.subr.bf16.mxu0 %v11515_v5  ;;  %4111 = vmatprep.subr.bf16.mxu1 %v11517_v6  ;;  %v11521_v9 = vld [vmem:[#allocation5 + $0x44] ss:$16 sps:$4 sm:$0xff]   ;;  %v11523_v10 = vld [vmem:[#allocation5 + $0x4c] ss:$16 sps:$4 sm:$0xff]   ;;  %v11525_v11 = vld [vmem:[#allocation5 + $0x40] ss:$16 sps:$4 sm:$0xff]  }
  0xba   : > { %v11526_v12 = vld [vmem:[#allocation5 + $0x48] ss:$16 sps:$4 sm:$0xff]   ;;  %v11527_v13 = vld [vmem:[#allocation5 + $0x64] ss:$16 sps:$4 sm:$0xff]   ;;  %v11529_v14 = vld [vmem:[#allocation5 + $0x6c] ss:$16 sps:$4 sm:$0xff]  }
  0xbb   : > { %v11531_v15 = vld [vmem:[#allocation5 + $0x60] ss:$16 sps:$4 sm:$0xff]   ;;  %v11532_v16 = vld [vmem:[#allocation5 + $0x68] ss:$16 sps:$4 sm:$0xff]   ;;  %v11533_v17 = vld [vmem:[#allocation5 + $0x84] ss:$16 sps:$4 sm:$0xff]  }
  0xbc   : > { %2700 = vmatpush1.bf16.msra.mxu0 %v11519_v7  ;;  %4112 = vmatpush1.bf16.msra.mxu1 %v11520_v8  ;;  %v11535_v18 = vld [vmem:[#allocation5 + $0x8c] ss:$16 sps:$4 sm:$0xff]   ;;  %v11537_v19 = vld [vmem:[#allocation5 + $0x80] ss:$16 sps:$4 sm:$0xff]   ;;  %v11538_v20 = vld [vmem:[#allocation5 + $0x88] ss:$16 sps:$4 sm:$0xff]  }
  0xbd   : > { %2701 = vmatprep.subr.bf16.mxu0 %v11521_v9  ;;  %4113 = vmatprep.subr.bf16.mxu1 %v11523_v10  ;;  %v11539_v21 = vld [vmem:[#allocation5 + $0xa4] ss:$16 sps:$4 sm:$0xff]   ;;  %v11541_v22 = vld [vmem:[#allocation5 + $0xac] ss:$16 sps:$4 sm:$0xff]   ;;  %v11543_v23 = vld [vmem:[#allocation5 + $0xa0] ss:$16 sps:$4 sm:$0xff]  }
  0xbe   : > { %v11544_v24 = vld [vmem:[#allocation5 + $0xa8] ss:$16 sps:$4 sm:$0xff]   ;;  %v11545_v25 = vld [vmem:[#allocation5 + $0xc4] ss:$16 sps:$4 sm:$0xff]   ;;  %v11547_v26 = vld [vmem:[#allocation5 + $0xcc] ss:$16 sps:$4 sm:$0xff]  }
  0xbf   : > { %v11549_v27 = vld [vmem:[#allocation5 + $0xc0] ss:$16 sps:$4 sm:$0xff]   ;;  %v11550_v28 = vld [vmem:[#allocation5 + $0xc8] ss:$16 sps:$4 sm:$0xff]   ;;  %v11551_v29 = vld [vmem:[#allocation5 + $0xe4] ss:$16 sps:$4 sm:$0xff]  }
  0xc0   : > { %2702 = vmatpush1.bf16.msra.mxu0 %v11525_v11  ;;  %4114 = vmatpush1.bf16.msra.mxu1 %v11526_v12  ;;  %v11553_v30 = vld [vmem:[#allocation5 + $0xec] ss:$16 sps:$4 sm:$0xff]   ;;  %v11555_v31 = vld [vmem:[#allocation5 + $0xe0] ss:$16 sps:$4 sm:$0xff]   ;;  %v11556_v32 = vld [vmem:[#allocation5 + $0xe8] ss:$16 sps:$4 sm:$0xff]  }
  0xc1   : > { %2703 = vmatprep.subr.bf16.mxu0 %v11527_v13  ;;  %4115 = vmatprep.subr.bf16.mxu1 %v11529_v14  ;;  %v11557_v33 = vld [vmem:[#allocation5 + $0x104] ss:$16 sps:$4 sm:$0xff]   ;;  %v11559_v34 = vld [vmem:[#allocation5 + $0x10c] ss:$16 sps:$4 sm:$0xff]   ;;  %v11561_v35 = vld [vmem:[#allocation5 + $0x100] ss:$16 sps:$4 sm:$0xff]  }
  0xc2   : > { %v11562_v36 = vld [vmem:[#allocation5 + $0x108] ss:$16 sps:$4 sm:$0xff]   ;;  %v11563_v37 = vld [vmem:[#allocation5 + $0x124] ss:$16 sps:$4 sm:$0xff]   ;;  %v11565_v38 = vld [vmem:[#allocation5 + $0x12c] ss:$16 sps:$4 sm:$0xff]  }
  0xc3   : > { %v11567_v39 = vld [vmem:[#allocation5 + $0x120] ss:$16 sps:$4 sm:$0xff]   ;;  %v11568_v40 = vld [vmem:[#allocation5 + $0x128] ss:$16 sps:$4 sm:$0xff]   ;;  %v11569_v41 = vld [vmem:[#allocation5 + $0x144] ss:$16 sps:$4 sm:$0xff]  }
  0xc4   : > { %2704 = vmatpush1.bf16.msra.mxu0 %v11531_v15  ;;  %4116 = vmatpush1.bf16.msra.mxu1 %v11532_v16  ;;  %v11571_v42 = vld [vmem:[#allocation5 + $0x14c] ss:$16 sps:$4 sm:$0xff]   ;;  %v11573_v43 = vld [vmem:[#allocation5 + $0x140] ss:$16 sps:$4 sm:$0xff]   ;;  %v11574_v44 = vld [vmem:[#allocation5 + $0x148] ss:$16 sps:$4 sm:$0xff]  }
  0xc5   : > { %2705 = vmatprep.subr.bf16.mxu0 %v11533_v17  ;;  %4117 = vmatprep.subr.bf16.mxu1 %v11535_v18  ;;  %v11575_v45 = vld [vmem:[#allocation5 + $0x164] ss:$16 sps:$4 sm:$0xff]   ;;  %v11577_v46 = vld [vmem:[#allocation5 + $0x16c] ss:$16 sps:$4 sm:$0xff]   ;;  %v11579_v48 = vld [vmem:[#allocation5 + $0x160] ss:$16 sps:$4 sm:$0xff]  }
  0xc6   : > { %v372_v47 = vld [vmem:[%s12581_s22 + $0x8] sm:$0xff]  ;;  %v11581_v51 = vld [vmem:[#allocation5 + $0x184] ss:$16 sps:$4 sm:$0xff]   ;;  %v11585_v54 = vld [vmem:[#allocation5 + $0x180] ss:$16 sps:$4 sm:$0xff]   ;;  %s16638_s9 = sshll.u32 %s9468_s8, 6 }
  0xc7   : > { %v11580_v49 = vld [vmem:[#allocation5 + $0x168] ss:$16 sps:$4 sm:$0xff]   ;;  %v11583_v53 = vld [vmem:[#allocation5 + $0x18c] ss:$16 sps:$4 sm:$0xff]   ;;  %v11587_v56 = vld [vmem:[#allocation5 + $0x1a4] ss:$16 sps:$4 sm:$0xff]  }
  0xc8   : > { %2706 = vmatpush1.bf16.msra.mxu0 %v11537_v19  ;;  %4118 = vmatpush1.bf16.msra.mxu1 %v11538_v20  ;;  %v380_v50 = vld [vmem:[%s12581_s22 + $0x48] sm:$0xff]  ;;  %v11591_v58 = vld [vmem:[#allocation5 + $0x1a0] ss:$16 sps:$4 sm:$0xff]   ;;  %v11593_v60 = vld [vmem:[#allocation5 + $0x1c4] ss:$16 sps:$4 sm:$0xff]   ;;  %p366_p4 = scmp.lt.s32.totalorder %s16638_s9, 255 }
  0xc9   : > { %2707 = vmatprep.subr.bf16.mxu0 %v11539_v21  ;;  %4119 = vmatprep.subr.bf16.mxu1 %v11541_v22  ;;  %v884_v52 = vpack.c.bf16 %v380_v50, %v372_v47  ;;  %v11586_v55 = vld [vmem:[#allocation5 + $0x188] ss:$16 sps:$4 sm:$0xff]   ;;  %v11589_v57 = vld [vmem:[#allocation5 + $0x1ac] ss:$16 sps:$4 sm:$0xff]   ;;  %v11597_v62 = vld [vmem:[#allocation5 + $0x1c0] ss:$16 sps:$4 sm:$0xff]  }
  0xca   : > { %v11592_v59 = vld [vmem:[#allocation5 + $0x1a8] ss:$16 sps:$4 sm:$0xff]   ;;  %v11595_v61 = vld [vmem:[#allocation5 + $0x1cc] ss:$16 sps:$4 sm:$0xff]   ;;  %v11599_v0 = vld [vmem:[#allocation5 + $0x1e4] ss:$16 sps:$4 sm:$0xff]  }
  0xcb   : > { %2729 = vmatprep.mubr.bf16.mxu0 %v884_v52  ;;  %4141 = vmatprep.mubr.bf16.mxu1 %v884_v52  ;;  %v11598_v63 = vld [vmem:[#allocation5 + $0x1c8] ss:$16 sps:$4 sm:$0xff]   ;;  %v11601_v1 = vld [vmem:[#allocation5 + $0x1ec] ss:$16 sps:$4 sm:$0xff]   ;;  %v11603_v2 = vld [vmem:[#allocation5 + $0x1e0] ss:$16 sps:$4 sm:$0xff]  }
  0xcc   : > { %2708 = vmatpush1.bf16.msra.mxu0 %v11543_v23  ;;  %4120 = vmatpush1.bf16.msra.mxu1 %v11544_v24  ;;  %v11604_v3 = vld [vmem:[#allocation5 + $0x1e8] ss:$16 sps:$4 sm:$0xff]   ;;  %v371_v4 = vld [vmem:[%s12581_s22] sm:$0xff]  ;;  %v11610_v7 = vld [vmem:[#allocation5 + $0x20c] ss:$16 sps:$4 sm:$0xff]   ;;  %s19367_s9 = smov (!%p366_p4, %s16638_s9), 255 }
  0xcd   : > { %2709 = vmatprep.subr.bf16.mxu0 %v11545_v25  ;;  %4121 = vmatprep.subr.bf16.mxu1 %v11547_v26  ;;  %v379_v5 = vld [vmem:[%s12581_s22 + $0x40] sm:$0xff]  ;;  %v388_v8 = vld [vmem:[%s12581_s22 + $0x88] sm:$0xff]  ;;  %s9489_s29 = sshll.u32 %s19367_s9, 3  ;;  %vm9288_vm0 = vcmask 7168  }
  0xce   : > { %v11607_v6 = vld [vmem:[#allocation5 + $0x204] ss:$16 sps:$4 sm:$0xff]   ;;  %v396_v9 = vld [vmem:[%s12581_s22 + $0xc8] sm:$0xff]  ;;  %v883_v10 = vpack.c.bf16 %v379_v5, %v371_v4  ;;  %v11605_v11 = vld [vmem:[#allocation5 + $0x200] ss:$16 sps:$4 sm:$0xff]   ;;  %s16765_s12 = scalar_lea.vmem %s17854_s7, %s9489_s29 }
  0xcf   : > { %v11608_v12 = vld [vmem:[#allocation5 + $0x208] ss:$16 sps:$4 sm:$0xff]   ;;  %v892_v13 = vpack.c.bf16 %v396_v9, %v388_v8  ;;  %v11613_v14 = vld [vmem:[#allocation5 + $0x224] ss:$16 sps:$4 sm:$0xff]   ;;  %v11616_v15 = vld [vmem:[#allocation5 + $0x22c] ss:$16 sps:$4 sm:$0xff]  }
  0xd0   : > { %2710 = vmatpush1.bf16.msra.mxu0 %v11549_v27  ;;  %4122 = vmatpush1.bf16.msra.mxu1 %v11550_v28  ;;  %v387_v16 = vld [vmem:[%s12581_s22 + $0x80] sm:$0xff]  ;;  %v404_v18 = vld [vmem:[%s12581_s22 + $0x108] sm:$0xff] }
  0xd1   : > { %2711 = vmatprep.subr.bf16.mxu0 %v11551_v29  ;;  %4123 = vmatprep.subr.bf16.mxu1 %v11553_v30  ;;  %v395_v17 = vld [vmem:[%s12581_s22 + $0xc0] sm:$0xff]  ;;  %v11614_v20 = vld [vmem:[#allocation5 + $0x228] ss:$16 sps:$4 sm:$0xff]   ;;  %v11622_v23 = vld [vmem:[#allocation5 + $0x24c] ss:$16 sps:$4 sm:$0xff]  }
  0xd2   : > { %v11611_v19 = vld [vmem:[#allocation5 + $0x220] ss:$16 sps:$4 sm:$0xff]   ;;  %v412_v21 = vld [vmem:[%s12581_s22 + $0x148] sm:$0xff]  ;;  %v11619_v22 = vld [vmem:[#allocation5 + $0x244] ss:$16 sps:$4 sm:$0xff]   ;;  %v891_v24 = vpack.c.bf16 %v395_v17, %v387_v16 }
  0xd3   : > { %v900_v25 = vpack.c.bf16 %v412_v21, %v404_v18  ;;  %v11617_v26 = vld [vmem:[#allocation5 + $0x240] ss:$16 sps:$4 sm:$0xff]   ;;  %v11620_v27 = vld [vmem:[#allocation5 + $0x248] ss:$16 sps:$4 sm:$0xff]   ;;  %v11625_v29 = vld [vmem:[#allocation5 + $0x264] ss:$16 sps:$4 sm:$0xff]  }
  0xd4   : > { %2712 = vmatpush1.bf16.msra.mxu0 %v11555_v31  ;;  %4124 = vmatpush1.bf16.msra.mxu1 %v11556_v32  ;;  %v403_v28 = vld [vmem:[%s12581_s22 + $0x100] sm:$0xff]  ;;  %v11628_v30 = vld [vmem:[#allocation5 + $0x26c] ss:$16 sps:$4 sm:$0xff]   ;;  %v11656_v5 = vld [vmem:[#allocation5 + $0x308] ss:$16 sps:$4 sm:$0xff]  }
  0xd5   : > { %2713 = vmatprep.subr.bf16.mxu0 %v11557_v33  ;;  %4125 = vmatprep.subr.bf16.mxu1 %v11559_v34  ;;  %v411_v31 = vld [vmem:[%s12581_s22 + $0x140] sm:$0xff]  ;;  %v420_v32 = vld [vmem:[%s12581_s22 + $0x188] sm:$0xff] }
  0xd6   : > { %v428_v33 = vld [vmem:[%s12581_s22 + $0x1c8] sm:$0xff]  ;;  %v11623_v34 = vld [vmem:[#allocation5 + $0x260] ss:$16 sps:$4 sm:$0xff]   ;;  %v11643_v50 = vld [vmem:[#allocation5 + $0x2c4] ss:$16 sps:$4 sm:$0xff]  }
  0xd7   : > { %v444_v47 = vld [vmem:[%s12581_s22 + $0x248] sm:$0xff]  ;;  %v11653_v4 = vld [vmem:[#allocation5 + $0x300] ss:$16 sps:$4 sm:$0xff]  }
  0xd8   : > { %2714 = vmatpush1.bf16.msra.mxu0 %v11561_v35  ;;  %4126 = vmatpush1.bf16.msra.mxu1 %v11562_v36  ;;  %v11626_v35 = vld [vmem:[#allocation5 + $0x268] ss:$16 sps:$4 sm:$0xff]   ;;  %v11631_v36 = vld [vmem:[#allocation5 + $0x284] ss:$16 sps:$4 sm:$0xff]   ;;  %v11665_v17 = vld [vmem:[#allocation5 + $0x340] ss:$16 sps:$4 sm:$0xff]  }
  0xd9   : > { %2715 = vmatprep.subr.bf16.mxu0 %v11563_v37  ;;  %4127 = vmatprep.subr.bf16.mxu1 %v11565_v38  ;;  %v11634_v37 = vld [vmem:[#allocation5 + $0x28c] ss:$16 sps:$4 sm:$0xff]   ;;  %v899_v38 = vpack.c.bf16 %v411_v31, %v403_v28  ;;  %v451_v8 = vld [vmem:[%s12581_s22 + $0x280] sm:$0xff]  ;;  %v11668_v18 = vld [vmem:[#allocation5 + $0x348] ss:$16 sps:$4 sm:$0xff]  }
  0xda   : > { %v459_v9 = vld [vmem:[%s12581_s22 + $0x2c0] sm:$0xff]  ;;  %v11674_v28 = vld [vmem:[#allocation5 + $0x368] ss:$16 sps:$4 sm:$0xff]   ;;  %v11676_v31 = vld [vmem:[#allocation5 + $0x36c] ss:$16 sps:$4 sm:$0xff]  }
  0xdb   : > { %v923_v16 = vpack.c.bf16 %v459_v9, %v451_v8  ;;  %v475_v21 = vld [vmem:[%s12581_s22 + $0x340] sm:$0xff] }
  0xdc   : > { %2716 = vmatpush1.bf16.msra.mxu0 %v11567_v39  ;;  %4128 = vmatpush1.bf16.msra.mxu1 %v11568_v40  ;;  %v908_v39 = vpack.c.bf16 %v428_v33, %v420_v32  ;;  %v11629_v40 = vld [vmem:[#allocation5 + $0x280] ss:$16 sps:$4 sm:$0xff]   ;;  %v500_v32 = vld [vmem:[%s12581_s22 + $0x408] sm:$0xff] }
  0xdd   : > { %2717 = vmatprep.subr.bf16.mxu0 %v11569_v41  ;;  %4129 = vmatprep.subr.bf16.mxu1 %v11571_v42  ;;  %v11632_v41 = vld [vmem:[#allocation5 + $0x288] ss:$16 sps:$4 sm:$0xff]   ;;  %v11637_v42 = vld [vmem:[#allocation5 + $0x2a4] ss:$16 sps:$4 sm:$0xff]  }
  0xde   : > { %v508_v33 = vld [vmem:[%s12581_s22 + $0x448] sm:$0xff] }
  0xe0   : > { %2718 = vmatpush1.bf16.msra.mxu0 %v11573_v43  ;;  %4130 = vmatpush1.bf16.msra.mxu1 %v11574_v44  ;;  %v11640_v43 = vld [vmem:[#allocation5 + $0x2ac] ss:$16 sps:$4 sm:$0xff]   ;;  %v419_v44 = vld [vmem:[%s12581_s22 + $0x180] sm:$0xff] }
  0xe1   : > { %2719 = vmatprep.subr.bf16.mxu0 %v11575_v45  ;;  %4131 = vmatprep.subr.bf16.mxu1 %v11577_v46  ;;  %v427_v45 = vld [vmem:[%s12581_s22 + $0x1c0] sm:$0xff]  ;;  %v436_v46 = vld [vmem:[%s12581_s22 + $0x208] sm:$0xff] }
  0xe2   : > { %v907_v52 = vpack.c.bf16 %v427_v45, %v419_v44  ;;  %v11680_v44 = vld [vmem:[#allocation5 + $0x388] ss:$16 sps:$4 sm:$0xff]   ;;  %v515_v45 = vld [vmem:[%s12581_s22 + $0x480] sm:$0xff] }
  0xe4   : > { %2720 = vmatpush1.bf16.msra.mxu0 %v11579_v48  ;;  %4132 = vmatpush1.bf16.msra.mxu1 %v11580_v49  ;;  %v11635_v48 = vld [vmem:[#allocation5 + $0x2a0] ss:$16 sps:$4 sm:$0xff]   ;;  %v11638_v49 = vld [vmem:[#allocation5 + $0x2a8] ss:$16 sps:$4 sm:$0xff]  }
  0xe5   : > { %2721 = vmatprep.subr.bf16.mxu0 %v11581_v51  ;;  %4133 = vmatprep.subr.bf16.mxu1 %v11583_v53  ;;  %v11646_v51 = vld [vmem:[#allocation5 + $0x2cc] ss:$16 sps:$4 sm:$0xff]   ;;  %v916_v53 = vpack.c.bf16 %v444_v47, %v436_v46  ;;  %v523_v46 = vld [vmem:[%s12581_s22 + $0x4c0] sm:$0xff] }
  0xe6   : > { %v11682_v47 = vld [vmem:[#allocation5 + $0x38c] ss:$16 sps:$4 sm:$0xff]  }
  0xe8   : > { %2722 = vmatpush1.bf16.msra.mxu0 %v11585_v54  ;;  %4134 = vmatpush1.bf16.msra.mxu1 %v11586_v55  ;;  %v11641_v54 = vld [vmem:[#allocation5 + $0x2c0] ss:$16 sps:$4 sm:$0xff]   ;;  %v11644_v55 = vld [vmem:[#allocation5 + $0x2c8] ss:$16 sps:$4 sm:$0xff]  }
  0xe9   : > { %2723 = vmatprep.subr.bf16.mxu0 %v11587_v56  ;;  %4135 = vmatprep.subr.bf16.mxu1 %v11589_v57  ;;  %v435_v56 = vld [vmem:[%s12581_s22 + $0x200] sm:$0xff] }
  0xea   : > { %v11649_v57 = vld [vmem:[#allocation5 + $0x2e4] ss:$16 sps:$4 sm:$0xff]  }
  0xec   : > { %2724 = vmatpush1.bf16.msra.mxu0 %v11591_v58  ;;  %4136 = vmatpush1.bf16.msra.mxu1 %v11592_v59  ;;  %v11652_v58 = vld [vmem:[#allocation5 + $0x2ec] ss:$16 sps:$4 sm:$0xff]   ;;  %v443_v59 = vld [vmem:[%s12581_s22 + $0x240] sm:$0xff] }
  0xed   : > { %2725 = vmatprep.subr.bf16.mxu0 %v11593_v60  ;;  %4137 = vmatprep.subr.bf16.mxu1 %v11595_v61  ;;  %v452_v60 = vld [vmem:[%s12581_s22 + $0x288] sm:$0xff] }
  0xee   : > { %v460_v61 = vld [vmem:[%s12581_s22 + $0x2c8] sm:$0xff] }
  0xf0   : > { %2726 = vmatpush1.bf16.msra.mxu0 %v11597_v62  ;;  %4138 = vmatpush1.bf16.msra.mxu1 %v11598_v63  ;;  %v11647_v62 = vld [vmem:[#allocation5 + $0x2e0] ss:$16 sps:$4 sm:$0xff]   ;;  %v11650_v63 = vld [vmem:[#allocation5 + $0x2e8] ss:$16 sps:$4 sm:$0xff]  }
  0xf1   : > { %2727 = vmatprep.subr.bf16.mxu0 %v11599_v0  ;;  %4139 = vmatprep.subr.bf16.mxu1 %v11601_v1  ;;  %v11655_v0 = vld [vmem:[#allocation5 + $0x304] ss:$16 sps:$4 sm:$0xff]   ;;  %v11658_v1 = vld [vmem:[#allocation5 + $0x30c] ss:$16 sps:$4 sm:$0xff]  }
  0xf4   : > { %2728 = vmatpush1.bf16.msra.mxu0 %v11603_v2  ;;  %4140 = vmatpush1.bf16.msra.mxu1 %v11604_v3  ;;  %v915_v2 = vpack.c.bf16 %v443_v59, %v435_v56  ;;  %v924_v3 = vpack.c.bf16 %v460_v61, %v452_v60  ;;  %v11685_v59 = vld [vmem:[#allocation5 + $0x3a4] ss:$16 sps:$4 sm:$0xff]   ;;  %v11686_v60 = vld [vmem:[#allocation5 + $0x3a8] ss:$16 sps:$4 sm:$0xff]  }
  0xf5   : > { %3050 = vmatprep.subr.bf16.mxu0 %v11607_v6  ;;  %4462 = vmatprep.subr.bf16.mxu1 %v11610_v7  ;;  %v11661_v6 = vld [vmem:[#allocation5 + $0x324] ss:$16 sps:$4 sm:$0xff]   ;;  %v11664_v7 = vld [vmem:[#allocation5 + $0x32c] ss:$16 sps:$4 sm:$0xff]  }
  0xf6   : > { %v547_v61 = vld [vmem:[%s12581_s22 + $0x580] sm:$0xff] }
  0xf7   : > { %2730 = vmatmul.mubr.bf16.vlgmr.msra.gmra.mrb[0].mxu0 %v883_v10  ;;  %4142 = vmatmul.mubr.bf16.vlgmr.msra.gmra.mrb[0].mxu1 %v883_v10  ;;  %v468_v10 = vld [vmem:[%s12581_s22 + $0x308] sm:$0xff] }
  0xf8   : > { %3051 = vmatpush1.bf16.msra.mxu0 %v11605_v11  ;;  %4463 = vmatpush1.bf16.msra.mxu1 %v11608_v12  ;;  %v476_v11 = vld [vmem:[%s12581_s22 + $0x348] sm:$0xff]  ;;  %v11659_v12 = vld [vmem:[#allocation5 + $0x320] ss:$16 sps:$4 sm:$0xff]  }
  0xf9   : > { %2739 = vmatprep.mubr.bf16.mxu0 %v892_v13  ;;  %4151 = vmatprep.mubr.bf16.mxu1 %v892_v13  ;;  %v11662_v13 = vld [vmem:[#allocation5 + $0x328] ss:$16 sps:$4 sm:$0xff]  }
  0xfa   : > { %3052 = vmatprep.subr.bf16.mxu0 %v11613_v14  ;;  %4464 = vmatprep.subr.bf16.mxu1 %v11616_v15  ;;  %v11667_v14 = vld [vmem:[#allocation5 + $0x344] ss:$16 sps:$4 sm:$0xff]   ;;  %v11670_v15 = vld [vmem:[#allocation5 + $0x34c] ss:$16 sps:$4 sm:$0xff]  }
  0xfc   : > { %3053 = vmatpush1.bf16.msra.mxu0 %v11611_v19  ;;  %4465 = vmatpush1.bf16.msra.mxu1 %v11614_v20  ;;  %v932_v19 = vpack.c.bf16 %v476_v11, %v468_v10  ;;  %v467_v20 = vld [vmem:[%s12581_s22 + $0x300] sm:$0xff] }
  0xfd   : > { %3054 = vmatprep.subr.bf16.mxu0 %v11619_v22  ;;  %4466 = vmatprep.subr.bf16.mxu1 %v11622_v23  ;;  %v484_v22 = vld [vmem:[%s12581_s22 + $0x388] sm:$0xff]  ;;  %v11689_v10 = vld [vmem:[#allocation5 + $0x3c0] ss:$16 sps:$4 sm:$0xff]   ;;  %v11691_v11 = vld [vmem:[#allocation5 + $0x3c4] ss:$16 sps:$4 sm:$0xff]  }
  0xfe   : > { %v492_v23 = vld [vmem:[%s12581_s22 + $0x3c8] sm:$0xff] }
  0xff   : > { %2740 = vmatmul.mubr.bf16.gmra.mrb[4].mxu0 %v891_v24  ;;  %4152 = vmatmul.mubr.bf16.gmra.mrb[4].mxu1 %v891_v24  ;;  %v931_v24 = vpack.c.bf16 %v475_v21, %v467_v20  ;;  %v595_v20 = vld [vmem:[%s12581_s22 + $0x700] sm:$0xff] }
 0x100   : > { %2749 = vmatprep.mubr.bf16.mxu0 %v900_v25  ;;  %4161 = vmatprep.mubr.bf16.mxu1 %v900_v25  ;;  %v940_v25 = vpack.c.bf16 %v492_v23, %v484_v22  ;;  %v603_v21 = vld [vmem:[%s12581_s22 + $0x740] sm:$0xff]  ;;  %v612_v22 = vld [vmem:[%s12581_s22 + $0x788] sm:$0xff] }
 0x101   : > { %3055 = vmatpush1.bf16.msra.mxu0 %v11617_v26  ;;  %4467 = vmatpush1.bf16.msra.mxu1 %v11620_v27  ;;  %v11671_v26 = vld [vmem:[#allocation5 + $0x360] ss:$16 sps:$4 sm:$0xff]   ;;  %v11673_v27 = vld [vmem:[#allocation5 + $0x364] ss:$16 sps:$4 sm:$0xff]   ;;  %v620_v23 = vld [vmem:[%s12581_s22 + $0x7c8] sm:$0xff] }
 0x102   : > { %3056 = vmatprep.subr.bf16.mxu0 %v11625_v29  ;;  %4468 = vmatprep.subr.bf16.mxu1 %v11628_v30  ;;  %v483_v29 = vld [vmem:[%s12581_s22 + $0x380] sm:$0xff] }
 0x103   : > { %v491_v30 = vld [vmem:[%s12581_s22 + $0x3c0] sm:$0xff] }
 0x105   : > { %3057 = vmatpush1.bf16.msra.mxu0 %v11623_v34  ;;  %4469 = vmatpush1.bf16.msra.mxu1 %v11626_v35  ;;  %v939_v34 = vpack.c.bf16 %v491_v30, %v483_v29  ;;  %v948_v35 = vpack.c.bf16 %v508_v33, %v500_v32  ;;  %v611_v29 = vld [vmem:[%s12581_s22 + $0x780] sm:$0xff]  ;;  %v628_v32 = vld [vmem:[%s12581_s22 + $0x808] sm:$0xff] }
 0x106   : > { %3058 = vmatprep.subr.bf16.mxu0 %v11631_v36  ;;  %4470 = vmatprep.subr.bf16.mxu1 %v11634_v37  ;;  %v499_v36 = vld [vmem:[%s12581_s22 + $0x400] sm:$0xff]  ;;  %v636_v33 = vld [vmem:[%s12581_s22 + $0x848] sm:$0xff] }
 0x107   : > { %2750 = vmatmul.mubr.bf16.gmra.mrb[8].mxu0 %v899_v38  ;;  %4162 = vmatmul.mubr.bf16.gmra.mrb[8].mxu1 %v899_v38  ;;  %v507_v37 = vld [vmem:[%s12581_s22 + $0x440] sm:$0xff]  ;;  %v516_v38 = vld [vmem:[%s12581_s22 + $0x488] sm:$0xff] }
 0x108   : > { %2759 = vmatprep.mubr.bf16.mxu0 %v908_v39  ;;  %4171 = vmatprep.mubr.bf16.mxu1 %v908_v39  ;;  %v524_v39 = vld [vmem:[%s12581_s22 + $0x4c8] sm:$0xff]  ;;  %v619_v30 = vld [vmem:[%s12581_s22 + $0x7c0] sm:$0xff] }
 0x109   : > { %3059 = vmatpush1.bf16.msra.mxu0 %v11629_v40  ;;  %4471 = vmatpush1.bf16.msra.mxu1 %v11632_v41  ;;  %v947_v40 = vpack.c.bf16 %v507_v37, %v499_v36  ;;  %v956_v41 = vpack.c.bf16 %v524_v39, %v516_v38  ;;  %v627_v36 = vld [vmem:[%s12581_s22 + $0x800] sm:$0xff]  ;;  %v644_v38 = vld [vmem:[%s12581_s22 + $0x888] sm:$0xff] }
 0x10a   : > { %3060 = vmatprep.subr.bf16.mxu0 %v11637_v42  ;;  %4472 = vmatprep.subr.bf16.mxu1 %v11640_v43  ;;  %v11677_v42 = vld [vmem:[#allocation5 + $0x380] ss:$16 sps:$4 sm:$0xff]   ;;  %v11679_v43 = vld [vmem:[#allocation5 + $0x384] ss:$16 sps:$4 sm:$0xff]   ;;  %v652_v39 = vld [vmem:[%s12581_s22 + $0x8c8] sm:$0xff] }
 0x10b   : > { %v635_v37 = vld [vmem:[%s12581_s22 + $0x840] sm:$0xff] }
 0x10d   : > { %3061 = vmatpush1.bf16.msra.mxu0 %v11635_v48  ;;  %4473 = vmatpush1.bf16.msra.mxu1 %v11638_v49  ;;  %v532_v48 = vld [vmem:[%s12581_s22 + $0x508] sm:$0xff] }
 0x10e   : > { %3062 = vmatprep.subr.bf16.mxu0 %v11643_v50  ;;  %4474 = vmatprep.subr.bf16.mxu1 %v11646_v51  ;;  %v540_v49 = vld [vmem:[%s12581_s22 + $0x548] sm:$0xff]  ;;  %v955_v50 = vpack.c.bf16 %v523_v46, %v515_v45 }
 0x10f   : > { %2760 = vmatmul.mubr.bf16.gmra.mrb[12].mxu0 %v907_v52  ;;  %4172 = vmatmul.mubr.bf16.gmra.mrb[12].mxu1 %v907_v52  ;;  %v964_v51 = vpack.c.bf16 %v540_v49, %v532_v48  ;;  %v531_v52 = vld [vmem:[%s12581_s22 + $0x500] sm:$0xff]  ;;  %v11706_v45 = vld [vmem:[#allocation5 + $0x40c] ss:$16 sps:$4 sm:$0xff]  }
 0x110   : > { %2769 = vmatprep.mubr.bf16.mxu0 %v916_v53  ;;  %4181 = vmatprep.mubr.bf16.mxu1 %v916_v53  ;;  %v539_v53 = vld [vmem:[%s12581_s22 + $0x540] sm:$0xff]  ;;  %v660_v46 = vld [vmem:[%s12581_s22 + $0x908] sm:$0xff] }
 0x111   : > { %3063 = vmatpush1.bf16.msra.mxu0 %v11641_v54  ;;  %4475 = vmatpush1.bf16.msra.mxu1 %v11644_v55  ;;  %v548_v54 = vld [vmem:[%s12581_s22 + $0x588] sm:$0xff]  ;;  %v963_v56 = vpack.c.bf16 %v539_v53, %v531_v52 }
 0x112   : > { %3064 = vmatprep.subr.bf16.mxu0 %v11649_v57  ;;  %4476 = vmatprep.subr.bf16.mxu1 %v11652_v58  ;;  %v556_v55 = vld [vmem:[%s12581_s22 + $0x5c8] sm:$0xff]  ;;  %v11683_v58 = vld [vmem:[#allocation5 + $0x3a0] ss:$16 sps:$4 sm:$0xff]  }
 0x113   : > { %v972_v57 = vpack.c.bf16 %v556_v55, %v548_v54  ;;  %v676_v52 = vld [vmem:[%s12581_s22 + $0x988] sm:$0xff] }
 0x114   : > { %v684_v53 = vld [vmem:[%s12581_s22 + $0x9c8] sm:$0xff] }
 0x115   : > { %3065 = vmatpush1.bf16.msra.mxu0 %v11647_v62  ;;  %4477 = vmatpush1.bf16.msra.mxu1 %v11650_v63  ;;  %v555_v62 = vld [vmem:[%s12581_s22 + $0x5c0] sm:$0xff]  ;;  %v11688_v63 = vld [vmem:[#allocation5 + $0x3ac] ss:$16 sps:$4 sm:$0xff]   ;;  %v1036_v55 = vpack.c.bf16 %v684_v53, %v676_v52 }
 0x116   : > { %3066 = vmatprep.subr.bf16.mxu0 %v11655_v0  ;;  %4478 = vmatprep.subr.bf16.mxu1 %v11658_v1  ;;  %v564_v0 = vld [vmem:[%s12581_s22 + $0x608] sm:$0xff]  ;;  %v835_v52 = vld [vmem:[%s12581_s22 + $0xe80] sm:$0xff] }
 0x117   : > { %2770 = vmatmul.mubr.bf16.gmra.mrb[16].mxu0 %v915_v2  ;;  %4182 = vmatmul.mubr.bf16.gmra.mrb[16].mxu1 %v915_v2  ;;  %v572_v1 = vld [vmem:[%s12581_s22 + $0x648] sm:$0xff]  ;;  %v971_v2 = vpack.c.bf16 %v555_v62, %v547_v61  ;;  %v691_v62 = vld [vmem:[%s12581_s22 + $0xa00] sm:$0xff] }
 0x118   : > { %2779 = vmatprep.mubr.bf16.mxu0 %v924_v3  ;;  %4191 = vmatprep.mubr.bf16.mxu1 %v924_v3  ;;  %v980_v3 = vpack.c.bf16 %v572_v1, %v564_v0  ;;  %v708_v0 = vld [vmem:[%s12581_s22 + $0xa88] sm:$0xff]  ;;  %v843_v53 = vld [vmem:[%s12581_s22 + $0xec0] sm:$0xff] }
 0x119   : > { %3067 = vmatpush1.bf16.msra.mxu0 %v11653_v4  ;;  %4479 = vmatpush1.bf16.msra.mxu1 %v11656_v5  ;;  %v563_v4 = vld [vmem:[%s12581_s22 + $0x600] sm:$0xff]  ;;  %v716_v1 = vld [vmem:[%s12581_s22 + $0xac8] sm:$0xff] }
 0x11a   : > { %3068 = vmatprep.subr.bf16.mxu0 %v11661_v6  ;;  %4480 = vmatprep.subr.bf16.mxu1 %v11664_v7  ;;  %v571_v5 = vld [vmem:[%s12581_s22 + $0x640] sm:$0xff]  ;;  %v580_v6 = vld [vmem:[%s12581_s22 + $0x688] sm:$0xff] }
 0x11b   : > { %v588_v7 = vld [vmem:[%s12581_s22 + $0x6c8] sm:$0xff]  ;;  %v979_v8 = vpack.c.bf16 %v571_v5, %v563_v4  ;;  %v707_v4 = vld [vmem:[%s12581_s22 + $0xa80] sm:$0xff] }
 0x11c   : > { %v988_v9 = vpack.c.bf16 %v588_v7, %v580_v6  ;;  %v715_v5 = vld [vmem:[%s12581_s22 + $0xac0] sm:$0xff]  ;;  %v724_v6 = vld [vmem:[%s12581_s22 + $0xb08] sm:$0xff] }
 0x11d   : > { %3069 = vmatpush1.bf16.msra.mxu0 %v11659_v12  ;;  %4481 = vmatpush1.bf16.msra.mxu1 %v11662_v13  ;;  %v11692_v12 = vld [vmem:[#allocation5 + $0x3c8] ss:$16 sps:$4 sm:$0xff]   ;;  %v579_v13 = vld [vmem:[%s12581_s22 + $0x680] sm:$0xff] }
 0x11e   : > { %3070 = vmatprep.subr.bf16.mxu0 %v11667_v14  ;;  %4482 = vmatprep.subr.bf16.mxu1 %v11670_v15  ;;  %v587_v14 = vld [vmem:[%s12581_s22 + $0x6c0] sm:$0xff]  ;;  %v11694_v15 = vld [vmem:[#allocation5 + $0x3cc] ss:$16 sps:$4 sm:$0xff]  }
 0x11f   : > { %2780 = vmatmul.mubr.bf16.gmra.mrb[20].mxu0 %v923_v16  ;;  %4192 = vmatmul.mubr.bf16.gmra.mrb[20].mxu1 %v923_v16  ;;  %v596_v16 = vld [vmem:[%s12581_s22 + $0x708] sm:$0xff] }
 0x120   : > { %2789 = vmatprep.mubr.bf16.mxu0 %v932_v19  ;;  %4201 = vmatprep.mubr.bf16.mxu1 %v932_v19  ;;  %v732_v7 = vld [vmem:[%s12581_s22 + $0xb48] sm:$0xff] }
 0x121   : > { %3071 = vmatpush1.bf16.msra.mxu0 %v11665_v17  ;;  %4483 = vmatpush1.bf16.msra.mxu1 %v11668_v18  ;;  %v604_v17 = vld [vmem:[%s12581_s22 + $0x748] sm:$0xff]  ;;  %v987_v18 = vpack.c.bf16 %v587_v14, %v579_v13 }
 0x122   : > { %3072 = vmatprep.subr.bf16.mxu0 %v11673_v27  ;;  %4484 = vmatprep.subr.bf16.mxu1 %v11676_v31  ;;  %v996_v19 = vpack.c.bf16 %v604_v17, %v596_v16  ;;  %v11697_v27 = vld [vmem:[#allocation5 + $0x3e4] ss:$16 sps:$4 sm:$0xff]   ;;  %v11700_v31 = vld [vmem:[#allocation5 + $0x3ec] ss:$16 sps:$4 sm:$0xff]  }
 0x123   : > { %v748_v13 = vld [vmem:[%s12581_s22 + $0xbc8] sm:$0xff]  ;;  %v739_v16 = vld [vmem:[%s12581_s22 + $0xb80] sm:$0xff] }
 0x124   : > { %v747_v17 = vld [vmem:[%s12581_s22 + $0xbc0] sm:$0xff] }
 0x125   : > { %3073 = vmatpush1.bf16.msra.mxu0 %v11671_v26  ;;  %4485 = vmatpush1.bf16.msra.mxu1 %v11674_v28  ;;  %v11695_v26 = vld [vmem:[#allocation5 + $0x3e0] ss:$16 sps:$4 sm:$0xff]   ;;  %v11698_v28 = vld [vmem:[#allocation5 + $0x3e8] ss:$16 sps:$4 sm:$0xff]  }
 0x126   : > { %3074 = vmatprep.subr.bf16.mxu0 %v11679_v43  ;;  %4486 = vmatprep.subr.bf16.mxu1 %v11682_v47  ;;  %v643_v43 = vld [vmem:[%s12581_s22 + $0x880] sm:$0xff]  ;;  %v668_v47 = vld [vmem:[%s12581_s22 + $0x948] sm:$0xff] }
 0x127   : > { %2790 = vmatmul.mubr.bf16.gmra.mrb[24].mxu0 %v931_v24  ;;  %4202 = vmatmul.mubr.bf16.gmra.mrb[24].mxu1 %v931_v24  ;;  %v995_v24 = vpack.c.bf16 %v603_v21, %v595_v20  ;;  %v1028_v49 = vpack.c.bf16 %v668_v47, %v660_v46  ;;  %v1067_v20 = vpack.c.bf16 %v747_v17, %v739_v16  ;;  %v819_v46 = vld [vmem:[%s12581_s22 + $0xe00] sm:$0xff]  ;;  %v389_v16 = vld [vmem:[%s12581_s22 + $0x90] sm:$0xff] }
 0x128   : > { %2799 = vmatprep.mubr.bf16.mxu0 %v940_v25  ;;  %4211 = vmatprep.mubr.bf16.mxu1 %v940_v25  ;;  %v1004_v25 = vpack.c.bf16 %v620_v23, %v612_v22  ;;  %v755_v22 = vld [vmem:[%s12581_s22 + $0xc00] sm:$0xff]  ;;  %v397_v17 = vld [vmem:[%s12581_s22 + $0xd0] sm:$0xff] }
 0x129   : > { %3075 = vmatpush1.bf16.msra.mxu0 %v11677_v42  ;;  %4487 = vmatpush1.bf16.msra.mxu1 %v11680_v44  ;;  %v11703_v42 = vld [vmem:[#allocation5 + $0x404] ss:$16 sps:$4 sm:$0xff]  }
 0x12a   : > { %3076 = vmatprep.subr.bf16.mxu0 %v11685_v59  ;;  %4488 = vmatprep.subr.bf16.mxu1 %v11688_v63  ;;  %v651_v44 = vld [vmem:[%s12581_s22 + $0x8c0] sm:$0xff]  ;;  %v700_v59 = vld [vmem:[%s12581_s22 + $0xa48] sm:$0xff] }
 0x12b   : > { %v1019_v48 = vpack.c.bf16 %v651_v44, %v643_v43  ;;  %v699_v63 = vld [vmem:[%s12581_s22 + $0xa40] sm:$0xff]  ;;  %v828_v43 = vld [vmem:[%s12581_s22 + $0xe48] sm:$0xff] }
 0x12c   : > { %v763_v23 = vld [vmem:[%s12581_s22 + $0xc40] sm:$0xff] }
 0x12d   : > { %3077 = vmatpush1.bf16.msra.mxu0 %v11683_v58  ;;  %4489 = vmatpush1.bf16.msra.mxu1 %v11686_v60  ;;  %v692_v58 = vld [vmem:[%s12581_s22 + $0xa08] sm:$0xff]  ;;  %v827_v47 = vld [vmem:[%s12581_s22 + $0xe40] sm:$0xff] }
 0x12e   : > { %3078 = vmatprep.subr.bf16.mxu0 %v11691_v11  ;;  %4490 = vmatprep.subr.bf16.mxu1 %v11694_v15  ;;  %v1044_v61 = vpack.c.bf16 %v700_v59, %v692_v58  ;;  %v731_v11 = vld [vmem:[%s12581_s22 + $0xb40] sm:$0xff] }
 0x12f   : > { %2800 = vmatmul.mubr.bf16.gmra.mrb[28].mxu0 %v939_v34  ;;  %4212 = vmatmul.mubr.bf16.gmra.mrb[28].mxu1 %v939_v34  ;;  %v1003_v34 = vpack.c.bf16 %v619_v30, %v611_v29  ;;  %v779_v29 = vld [vmem:[%s12581_s22 + $0xcc0] sm:$0xff]  ;;  %v788_v30 = vld [vmem:[%s12581_s22 + $0xd08] sm:$0xff] }
 0x130   : > { %2809 = vmatprep.mubr.bf16.mxu0 %v948_v35  ;;  %4221 = vmatprep.mubr.bf16.mxu1 %v948_v35  ;;  %v1012_v35 = vpack.c.bf16 %v636_v33, %v628_v32  ;;  %v851_v58 = vld [vmem:[%s12581_s22 + $0xf00] sm:$0xff] }
 0x131   : > { %3079 = vmatpush1.bf16.msra.mxu0 %v11689_v10  ;;  %4491 = vmatpush1.bf16.msra.mxu1 %v11692_v12  ;;  %v723_v10 = vld [vmem:[%s12581_s22 + $0xb00] sm:$0xff]  ;;  %v740_v12 = vld [vmem:[%s12581_s22 + $0xb88] sm:$0xff] }
 0x132   : > { %3080 = vmatprep.subr.bf16.mxu0 %v11697_v27  ;;  %4492 = vmatprep.subr.bf16.mxu1 %v11700_v31  ;;  %v1059_v14 = vpack.c.bf16 %v731_v11, %v723_v10  ;;  %v1068_v15 = vpack.c.bf16 %v748_v13, %v740_v12  ;;  %v796_v31 = vld [vmem:[%s12581_s22 + $0xd48] sm:$0xff]  ;;  %v859_v59 = vld [vmem:[%s12581_s22 + $0xf40] sm:$0xff] }
 0x133   : > { %v1092_v33 = vpack.c.bf16 %v796_v31, %v788_v30  ;;  %v11701_v11 = vld [vmem:[#allocation5 + $0x400] ss:$16 sps:$4 sm:$0xff]   ;;  %v11704_v12 = vld [vmem:[#allocation5 + $0x408] ss:$16 sps:$4 sm:$0xff]  }
 0x134   : > { %v405_v30 = vld [vmem:[%s12581_s22 + $0x110] sm:$0xff] }
 0x135   : > { %3081 = vmatpush1.bf16.msra.mxu0 %v11695_v26  ;;  %4493 = vmatpush1.bf16.msra.mxu1 %v11698_v28  ;;  %v1075_v26 = vpack.c.bf16 %v763_v23, %v755_v22  ;;  %v771_v28 = vld [vmem:[%s12581_s22 + $0xc80] sm:$0xff]  ;;  %v11718_v23 = vld [vmem:[#allocation5 + $0x44c] ss:$16 sps:$4 sm:$0xff]   ;;  %v413_v31 = vld [vmem:[%s12581_s22 + $0x150] sm:$0xff] }
 0x136   : > { %3403 = vmatprep.subr.bf16.mxu0 %v11703_v42  ;;  %4815 = vmatprep.subr.bf16.mxu1 %v11706_v45  ;;  %v1083_v32 = vpack.c.bf16 %v779_v29, %v771_v28  ;;  %v820_v42 = vld [vmem:[%s12581_s22 + $0xe08] sm:$0xff]  ;;  %v11715_v22 = vld [vmem:[#allocation5 + $0x444] ss:$16 sps:$4 sm:$0xff]  }
 0x137   : > { %2810 = vmatmul.mubr.bf16.gmra.mrb[32].mxu0 %v947_v40  ;;  %4222 = vmatmul.mubr.bf16.gmra.mrb[32].mxu1 %v947_v40  ;;  %v1011_v40 = vpack.c.bf16 %v635_v37, %v627_v36  ;;  %v804_v36 = vld [vmem:[%s12581_s22 + $0xd88] sm:$0xff]  ;;  %v1108_v45 = vpack.c.bf16 %v828_v43, %v820_v42  ;;  %v11721_v28 = vld [vmem:[#allocation5 + $0x464] ss:$16 sps:$4 sm:$0xff]  }
 0x138   : > { %2819 = vmatprep.mubr.bf16.mxu0 %v956_v41  ;;  %4231 = vmatprep.mubr.bf16.mxu1 %v956_v41  ;;  %v1020_v41 = vpack.c.bf16 %v652_v39, %v644_v38  ;;  %v812_v37 = vld [vmem:[%s12581_s22 + $0xdc8] sm:$0xff]  ;;  %v11733_v42 = vld [vmem:[#allocation5 + $0x4a4] ss:$16 sps:$4 sm:$0xff]  }
 0x139   : > { %v1100_v39 = vpack.c.bf16 %v812_v37, %v804_v36  ;;  %v11724_v29 = vld [vmem:[#allocation5 + $0x46c] ss:$16 sps:$4 sm:$0xff]   ;;  %v11727_v36 = vld [vmem:[#allocation5 + $0x484] ss:$16 sps:$4 sm:$0xff]  }
 0x13a   : > { %v11730_v37 = vld [vmem:[#allocation5 + $0x48c] ss:$16 sps:$4 sm:$0xff]  }
 0x13b   : > { %v11736_v43 = vld [vmem:[#allocation5 + $0x4ac] ss:$16 sps:$4 sm:$0xff]  }
 0x13f   : > { %2820 = vmatmul.mubr.bf16.gmra.mrb[36].mxu0 %v955_v50  ;;  %4232 = vmatmul.mubr.bf16.gmra.mrb[36].mxu1 %v955_v50  ;;  %v659_v50 = vld [vmem:[%s12581_s22 + $0x900] sm:$0xff] }
 0x140   : > { %2829 = vmatprep.mubr.bf16.mxu0 %v964_v51  ;;  %4241 = vmatprep.mubr.bf16.mxu1 %v964_v51  ;;  %v667_v51 = vld [vmem:[%s12581_s22 + $0x940] sm:$0xff] }
 0x141   : > { %v1027_v54 = vpack.c.bf16 %v667_v51, %v659_v50  ;;  %v1107_v50 = vpack.c.bf16 %v827_v47, %v819_v46  ;;  %v438_v46 = vld [vmem:[%s12581_s22 + $0x218] sm:$0xff] }
 0x142   : > { %v446_v47 = vld [vmem:[%s12581_s22 + $0x258] sm:$0xff] }
 0x147   : > { %2830 = vmatmul.mubr.bf16.gmra.mrb[40].mxu0 %v963_v56  ;;  %4242 = vmatmul.mubr.bf16.gmra.mrb[40].mxu1 %v963_v56  ;;  %v675_v56 = vld [vmem:[%s12581_s22 + $0x980] sm:$0xff] }
 0x148   : > { %2839 = vmatprep.mubr.bf16.mxu0 %v972_v57  ;;  %4251 = vmatprep.mubr.bf16.mxu1 %v972_v57  ;;  %v683_v57 = vld [vmem:[%s12581_s22 + $0x9c0] sm:$0xff] }
 0x149   : > { %v1035_v60 = vpack.c.bf16 %v683_v57, %v675_v56  ;;  %v1115_v56 = vpack.c.bf16 %v843_v53, %v835_v52  ;;  %v918_v53 = vpack.c.bf16 %v446_v47, %v438_v46  ;;  %v525_v46 = vld [vmem:[%s12581_s22 + $0x4d0] sm:$0xff]  ;;  %v11778_v47 = vld [vmem:[#allocation5 + $0x58c] ss:$16 sps:$4 sm:$0xff]  }
 0x14f   : > { %2840 = vmatmul.mubr.bf16.gmra.mrb[44].mxu0 %v971_v2  ;;  %4252 = vmatmul.mubr.bf16.gmra.mrb[44].mxu1 %v971_v2  ;;  %v1043_v2 = vpack.c.bf16 %v699_v63, %v691_v62  ;;  %v1123_v62 = vpack.c.bf16 %v859_v59, %v851_v58  ;;  %v437_v58 = vld [vmem:[%s12581_s22 + $0x210] sm:$0xff] }
 0x150   : > { %2849 = vmatprep.mubr.bf16.mxu0 %v980_v3  ;;  %4261 = vmatprep.mubr.bf16.mxu1 %v980_v3  ;;  %v1052_v3 = vpack.c.bf16 %v716_v1, %v708_v0  ;;  %v867_v0 = vld [vmem:[%s12581_s22 + $0xf80] sm:$0xff]  ;;  %v445_v59 = vld [vmem:[%s12581_s22 + $0x250] sm:$0xff] }
 0x151   : > { %v875_v1 = vld [vmem:[%s12581_s22 + $0xfc0] sm:$0xff] }
 0x157   : > { %2850 = vmatmul.mubr.bf16.gmra.mrb[48].mxu0 %v979_v8  ;;  %4262 = vmatmul.mubr.bf16.gmra.mrb[48].mxu1 %v979_v8  ;;  %v1051_v8 = vpack.c.bf16 %v715_v5, %v707_v4  ;;  %v1131_v4 = vpack.c.bf16 %v875_v1, %v867_v0  ;;  %v11751_v0 = vld [vmem:[#allocation5 + $0x504] ss:$16 sps:$4 sm:$0xff]   ;;  %v11754_v1 = vld [vmem:[#allocation5 + $0x50c] ss:$16 sps:$4 sm:$0xff]  }
 0x158   : > { %2859 = vmatprep.mubr.bf16.mxu0 %v988_v9  ;;  %4271 = vmatprep.mubr.bf16.mxu1 %v988_v9  ;;  %v1060_v9 = vpack.c.bf16 %v732_v7, %v724_v6  ;;  %v373_v6 = vld [vmem:[%s12581_s22 + $0x10] sm:$0xff] }
 0x159   : > { %v381_v7 = vld [vmem:[%s12581_s22 + $0x50] sm:$0xff] }
 0x15a   : > { %v885_v10 = vpack.c.bf16 %v381_v7, %v373_v6  ;;  %v11757_v6 = vld [vmem:[#allocation5 + $0x524] ss:$16 sps:$4 sm:$0xff]   ;;  %v11760_v7 = vld [vmem:[#allocation5 + $0x52c] ss:$16 sps:$4 sm:$0xff]  }
 0x15f   : > { %2860 = vmatmul.mubr.bf16.gmra.mrb[52].mxu0 %v987_v18  ;;  %4272 = vmatmul.mubr.bf16.gmra.mrb[52].mxu1 %v987_v18  ;;  %v756_v18 = vld [vmem:[%s12581_s22 + $0xc08] sm:$0xff] }
 0x160   : > { %2869 = vmatprep.mubr.bf16.mxu0 %v996_v19  ;;  %4281 = vmatprep.mubr.bf16.mxu1 %v996_v19  ;;  %v764_v19 = vld [vmem:[%s12581_s22 + $0xc48] sm:$0xff] }
 0x161   : > { %v1076_v21 = vpack.c.bf16 %v764_v19, %v756_v18  ;;  %v406_v18 = vld [vmem:[%s12581_s22 + $0x118] sm:$0xff]  ;;  %v11707_v19 = vld [vmem:[#allocation5 + $0x420] ss:$16 sps:$4 sm:$0xff]  }
 0x167   : > { %2870 = vmatmul.mubr.bf16.gmra.mrb[56].mxu0 %v995_v24  ;;  %4282 = vmatmul.mubr.bf16.gmra.mrb[56].mxu1 %v995_v24  ;;  %v772_v24 = vld [vmem:[%s12581_s22 + $0xc88] sm:$0xff] }
 0x168   : > { %2879 = vmatprep.mubr.bf16.mxu0 %v1004_v25  ;;  %4291 = vmatprep.mubr.bf16.mxu1 %v1004_v25  ;;  %v780_v25 = vld [vmem:[%s12581_s22 + $0xcc8] sm:$0xff] }
 0x169   : > { %v1084_v27 = vpack.c.bf16 %v780_v25, %v772_v24  ;;  %v893_v24 = vpack.c.bf16 %v397_v17, %v389_v16 }
 0x16f   : > { %2880 = vmatmul.mubr.bf16.gmra.mrb[60].mxu0 %v1003_v34  ;;  %4292 = vmatmul.mubr.bf16.gmra.mrb[60].mxu1 %v1003_v34  ;;  %v787_v34 = vld [vmem:[%s12581_s22 + $0xd00] sm:$0xff] }
 0x170   : > { %2889 = vmatprep.mubr.bf16.mxu0 %v1012_v35  ;;  %4301 = vmatprep.mubr.bf16.mxu1 %v1012_v35  ;;  %v795_v35 = vld [vmem:[%s12581_s22 + $0xd40] sm:$0xff] }
 0x171   : > { %v1091_v38 = vpack.c.bf16 %v795_v35, %v787_v34  ;;  %v11719_v34 = vld [vmem:[#allocation5 + $0x460] ss:$16 sps:$4 sm:$0xff]   ;;  %v11722_v35 = vld [vmem:[#allocation5 + $0x468] ss:$16 sps:$4 sm:$0xff]  }
 0x177   : > { %2890 = vmatmul.mubr.bf16.gmra.mrb[64].mxu0 %v1011_v40  ;;  %4302 = vmatmul.mubr.bf16.gmra.mrb[64].mxu1 %v1011_v40  ;;  %v803_v40 = vld [vmem:[%s12581_s22 + $0xd80] sm:$0xff] }
 0x178   : > { %2899 = vmatprep.mubr.bf16.mxu0 %v1020_v41  ;;  %4311 = vmatprep.mubr.bf16.mxu1 %v1020_v41  ;;  %v811_v41 = vld [vmem:[%s12581_s22 + $0xdc0] sm:$0xff] }
 0x179   : > { %v1099_v44 = vpack.c.bf16 %v811_v41, %v803_v40  ;;  %v11725_v40 = vld [vmem:[#allocation5 + $0x480] ss:$16 sps:$4 sm:$0xff]   ;;  %v11728_v41 = vld [vmem:[#allocation5 + $0x488] ss:$16 sps:$4 sm:$0xff]  }
 0x17f   : > { %2900 = vmatmul.mubr.bf16.gmra.mrb[68].mxu0 %v1019_v48  ;;  %4312 = vmatmul.mubr.bf16.gmra.mrb[68].mxu1 %v1019_v48  ;;  %v836_v48 = vld [vmem:[%s12581_s22 + $0xe88] sm:$0xff] }
 0x180   : > { %2909 = vmatprep.mubr.bf16.mxu0 %v1028_v49  ;;  %4321 = vmatprep.mubr.bf16.mxu1 %v1028_v49  ;;  %v844_v49 = vld [vmem:[%s12581_s22 + $0xec8] sm:$0xff] }
 0x181   : > { %v1116_v51 = vpack.c.bf16 %v844_v49, %v836_v48  ;;  %v11731_v48 = vld [vmem:[#allocation5 + $0x4a0] ss:$16 sps:$4 sm:$0xff]   ;;  %v11734_v49 = vld [vmem:[#allocation5 + $0x4a8] ss:$16 sps:$4 sm:$0xff]  }
 0x187   : > { %2910 = vmatmul.mubr.bf16.gmra.mrb[72].mxu0 %v1027_v54  ;;  %4322 = vmatmul.mubr.bf16.gmra.mrb[72].mxu1 %v1027_v54  ;;  %v852_v54 = vld [vmem:[%s12581_s22 + $0xf08] sm:$0xff] }
 0x188   : > { %2919 = vmatprep.mubr.bf16.mxu0 %v1036_v55  ;;  %4331 = vmatprep.mubr.bf16.mxu1 %v1036_v55  ;;  %v860_v55 = vld [vmem:[%s12581_s22 + $0xf48] sm:$0xff] }
 0x189   : > { %v1124_v57 = vpack.c.bf16 %v860_v55, %v852_v54  ;;  %v11737_v54 = vld [vmem:[#allocation5 + $0x4c0] ss:$16 sps:$4 sm:$0xff]   ;;  %v11740_v55 = vld [vmem:[#allocation5 + $0x4c8] ss:$16 sps:$4 sm:$0xff]  }
 0x18f   : > { %2920 = vmatmul.mubr.bf16.gmra.mrb[76].mxu0 %v1035_v60  ;;  %4332 = vmatmul.mubr.bf16.gmra.mrb[76].mxu1 %v1035_v60  ;;  %v868_v60 = vld [vmem:[%s12581_s22 + $0xf88] sm:$0xff] }
 0x190   : > { %2929 = vmatprep.mubr.bf16.mxu0 %v1044_v61  ;;  %4341 = vmatprep.mubr.bf16.mxu1 %v1044_v61  ;;  %v876_v61 = vld [vmem:[%s12581_s22 + $0xfc8] sm:$0xff] }
 0x191   : > { %v1132_v63 = vpack.c.bf16 %v876_v61, %v868_v60  ;;  %v454_v60 = vld [vmem:[%s12581_s22 + $0x298] sm:$0xff] }
 0x192   : > { %v462_v61 = vld [vmem:[%s12581_s22 + $0x2d8] sm:$0xff] }
 0x197   : > { %2930 = vmatmul.mubr.bf16.gmra.mrb[80].mxu0 %v1043_v2  ;;  %4342 = vmatmul.mubr.bf16.gmra.mrb[80].mxu1 %v1043_v2  ;;  %v374_v2 = vld [vmem:[%s12581_s22 + $0x18] sm:$0xff] }
 0x198   : > { %2939 = vmatprep.mubr.bf16.mxu0 %v1052_v3  ;;  %4351 = vmatprep.mubr.bf16.mxu1 %v1052_v3  ;;  %v382_v3 = vld [vmem:[%s12581_s22 + $0x58] sm:$0xff] }
 0x199   : > { %v886_v5 = vpack.c.bf16 %v382_v3, %v374_v2  ;;  %v917_v2 = vpack.c.bf16 %v445_v59, %v437_v58  ;;  %v926_v3 = vpack.c.bf16 %v462_v61, %v454_v60  ;;  %v11779_v58 = vld [vmem:[#allocation5 + $0x5a0] ss:$16 sps:$4 sm:$0xff]   ;;  %v11781_v59 = vld [vmem:[#allocation5 + $0x5a4] ss:$16 sps:$4 sm:$0xff]   ;;  %v11782_v60 = vld [vmem:[#allocation5 + $0x5a8] ss:$16 sps:$4 sm:$0xff]  }
 0x19a   : > { %v549_v61 = vld [vmem:[%s12581_s22 + $0x590] sm:$0xff] }
 0x19f   : > { %2940 = vmatmul.mubr.bf16.gmra.mrb[84].mxu0 %v1051_v8  ;;  %4352 = vmatmul.mubr.bf16.gmra.mrb[84].mxu1 %v1051_v8  ;;  %v390_v8 = vld [vmem:[%s12581_s22 + $0x98] sm:$0xff] }
 0x1a0   : > { %2949 = vmatprep.mubr.bf16.mxu0 %v1060_v9  ;;  %4361 = vmatprep.mubr.bf16.mxu1 %v1060_v9  ;;  %v398_v9 = vld [vmem:[%s12581_s22 + $0xd8] sm:$0xff] }
 0x1a1   : > { %v894_v13 = vpack.c.bf16 %v398_v9, %v390_v8  ;;  %v453_v8 = vld [vmem:[%s12581_s22 + $0x290] sm:$0xff] }
 0x1a2   : > { %v461_v9 = vld [vmem:[%s12581_s22 + $0x2d0] sm:$0xff] }
 0x1a3   : > { %v925_v16 = vpack.c.bf16 %v461_v9, %v453_v8 }
 0x1a7   : > { %2950 = vmatmul.mubr.bf16.gmra.mrb[88].mxu0 %v1059_v14  ;;  %4362 = vmatmul.mubr.bf16.gmra.mrb[88].mxu1 %v1059_v14  ;;  %v11709_v14 = vld [vmem:[#allocation5 + $0x424] ss:$16 sps:$4 sm:$0xff]  }
 0x1a8   : > { %2959 = vmatprep.mubr.bf16.mxu0 %v1068_v15  ;;  %4371 = vmatprep.mubr.bf16.mxu1 %v1068_v15  ;;  %v11712_v15 = vld [vmem:[#allocation5 + $0x42c] ss:$16 sps:$4 sm:$0xff]  }
 0x1af   : > { %2960 = vmatmul.mubr.bf16.gmra.mrb[92].mxu0 %v1067_v20  ;;  %4372 = vmatmul.mubr.bf16.gmra.mrb[92].mxu1 %v1067_v20  ;;  %v11710_v20 = vld [vmem:[#allocation5 + $0x428] ss:$16 sps:$4 sm:$0xff]  }
 0x1b0   : > { %2969 = vmatprep.mubr.bf16.mxu0 %v1076_v21  ;;  %4381 = vmatprep.mubr.bf16.mxu1 %v1076_v21  ;;  %v414_v21 = vld [vmem:[%s12581_s22 + $0x158] sm:$0xff] }
 0x1b1   : > { %v902_v25 = vpack.c.bf16 %v414_v21, %v406_v18  ;;  %v11761_v18 = vld [vmem:[#allocation5 + $0x540] ss:$16 sps:$4 sm:$0xff]  }
 0x1b2   : > { %v477_v21 = vld [vmem:[%s12581_s22 + $0x350] sm:$0xff] }
 0x1b7   : > { %2970 = vmatmul.mubr.bf16.gmra.mrb[96].mxu0 %v1075_v26  ;;  %4382 = vmatmul.mubr.bf16.gmra.mrb[96].mxu1 %v1075_v26  ;;  %v11713_v26 = vld [vmem:[#allocation5 + $0x440] ss:$16 sps:$4 sm:$0xff]  }
 0x1b8   : > { %2979 = vmatprep.mubr.bf16.mxu0 %v1084_v27  ;;  %4391 = vmatprep.mubr.bf16.mxu1 %v1084_v27  ;;  %v11716_v27 = vld [vmem:[#allocation5 + $0x448] ss:$16 sps:$4 sm:$0xff]  }
 0x1bf   : > { %2980 = vmatmul.mubr.bf16.gmra.mrb[100].mxu0 %v1083_v32  ;;  %4392 = vmatmul.mubr.bf16.gmra.mrb[100].mxu1 %v1083_v32  ;;  %v422_v32 = vld [vmem:[%s12581_s22 + $0x198] sm:$0xff] }
 0x1c0   : > { %2989 = vmatprep.mubr.bf16.mxu0 %v1092_v33  ;;  %4401 = vmatprep.mubr.bf16.mxu1 %v1092_v33  ;;  %v430_v33 = vld [vmem:[%s12581_s22 + $0x1d8] sm:$0xff] }
 0x1c7   : > { %2990 = vmatmul.mubr.bf16.gmra.mrb[104].mxu0 %v1091_v38  ;;  %4402 = vmatmul.mubr.bf16.gmra.mrb[104].mxu1 %v1091_v38  ;;  %v901_v38 = vpack.c.bf16 %v413_v31, %v405_v30  ;;  %v493_v30 = vld [vmem:[%s12581_s22 + $0x3d0] sm:$0xff]  ;;  %v11772_v31 = vld [vmem:[#allocation5 + $0x56c] ss:$16 sps:$4 sm:$0xff]  }
 0x1c8   : > { %2999 = vmatprep.mubr.bf16.mxu0 %v1100_v39  ;;  %4411 = vmatprep.mubr.bf16.mxu1 %v1100_v39  ;;  %v910_v39 = vpack.c.bf16 %v430_v33, %v422_v32  ;;  %v502_v32 = vld [vmem:[%s12581_s22 + $0x418] sm:$0xff] }
 0x1c9   : > { %v510_v33 = vld [vmem:[%s12581_s22 + $0x458] sm:$0xff] }
 0x1cf   : > { %3000 = vmatmul.mubr.bf16.gmra.mrb[108].mxu0 %v1099_v44  ;;  %4412 = vmatmul.mubr.bf16.gmra.mrb[108].mxu1 %v1099_v44  ;;  %v421_v44 = vld [vmem:[%s12581_s22 + $0x190] sm:$0xff] }
 0x1d0   : > { %3009 = vmatprep.mubr.bf16.mxu0 %v1108_v45  ;;  %4421 = vmatprep.mubr.bf16.mxu1 %v1108_v45  ;;  %v429_v45 = vld [vmem:[%s12581_s22 + $0x1d0] sm:$0xff] }
 0x1d1   : > { %v909_v52 = vpack.c.bf16 %v429_v45, %v421_v44  ;;  %v11776_v44 = vld [vmem:[#allocation5 + $0x588] ss:$16 sps:$4 sm:$0xff]   ;;  %v517_v45 = vld [vmem:[%s12581_s22 + $0x490] sm:$0xff] }
 0x1d7   : > { %3010 = vmatmul.mubr.bf16.gmra.mrb[112].mxu0 %v1107_v50  ;;  %4422 = vmatmul.mubr.bf16.gmra.mrb[112].mxu1 %v1107_v50  ;;  %v11739_v50 = vld [vmem:[#allocation5 + $0x4c4] ss:$16 sps:$4 sm:$0xff]  }
 0x1d8   : > { %3019 = vmatprep.mubr.bf16.mxu0 %v1116_v51  ;;  %4431 = vmatprep.mubr.bf16.mxu1 %v1116_v51  ;;  %v11742_v51 = vld [vmem:[#allocation5 + $0x4cc] ss:$16 sps:$4 sm:$0xff]  }
 0x1df   : > { %3020 = vmatmul.mubr.bf16.gmra.mrb[116].mxu0 %v1115_v56  ;;  %4432 = vmatmul.mubr.bf16.gmra.mrb[116].mxu1 %v1115_v56  ;;  %v11745_v56 = vld [vmem:[#allocation5 + $0x4e4] ss:$16 sps:$4 sm:$0xff]  }
 0x1e0   : > { %3029 = vmatprep.mubr.bf16.mxu0 %v1124_v57  ;;  %4441 = vmatprep.mubr.bf16.mxu1 %v1124_v57  ;;  %v11748_v57 = vld [vmem:[#allocation5 + $0x4ec] ss:$16 sps:$4 sm:$0xff]  }
 0x1e7   : > { %3030 = vmatmul.mubr.bf16.gmra.mrb[120].mxu0 %v1123_v62  ;;  %4442 = vmatmul.mubr.bf16.gmra.mrb[120].mxu1 %v1123_v62  ;;  %v11743_v62 = vld [vmem:[#allocation5 + $0x4e0] ss:$16 sps:$4 sm:$0xff]  }
 0x1e8   : > { %3039 = vmatprep.mubr.bf16.mxu0 %v1132_v63  ;;  %4451 = vmatprep.mubr.bf16.mxu1 %v1132_v63  ;;  %v11746_v63 = vld [vmem:[#allocation5 + $0x4e8] ss:$16 sps:$4 sm:$0xff]  }
 0x1ef   : > { %3040 = vmatmul.mubr.bf16.gmra.mrb[124].mxu0 %v1131_v4  ;;  %4452 = vmatmul.mubr.bf16.gmra.mrb[124].mxu1 %v1131_v4  ;;  %v11749_v4 = vld [vmem:[#allocation5 + $0x500] ss:$16 sps:$4 sm:$0xff]  }
 0x1f0   : > { %3082 = vmatprep.mubr.bf16.mxu0 %v886_v5  ;;  %4494 = vmatprep.mubr.bf16.mxu1 %v886_v5  ;;  %v11752_v5 = vld [vmem:[#allocation5 + $0x508] ss:$16 sps:$4 sm:$0xff]  }
 0x1f7   : > { %3083 = vmatmul.mubr.bf16.vlgmr.msra.gmra.mrb[0].mxu0 %v885_v10  ;;  %4495 = vmatmul.mubr.bf16.vlgmr.msra.gmra.mrb[0].mxu1 %v885_v10  ;;  %v470_v10 = vld [vmem:[%s12581_s22 + $0x318] sm:$0xff] }
 0x1f8   : > { %3404 = vmatpush1.bf16.msra.mxu0 %v11701_v11  ;;  %4816 = vmatpush1.bf16.msra.mxu1 %v11704_v12  ;;  %v478_v11 = vld [vmem:[%s12581_s22 + $0x358] sm:$0xff]  ;;  %v11755_v12 = vld [vmem:[#allocation5 + $0x520] ss:$16 sps:$4 sm:$0xff]  }
 0x1f9   : > { %3092 = vmatprep.mubr.bf16.mxu0 %v894_v13  ;;  %4504 = vmatprep.mubr.bf16.mxu1 %v894_v13  ;;  %v11758_v13 = vld [vmem:[#allocation5 + $0x528] ss:$16 sps:$4 sm:$0xff]   ;;  %v934_v17 = vpack.c.bf16 %v478_v11, %v470_v10  ;;  %v11785_v10 = vld [vmem:[#allocation5 + $0x5c0] ss:$16 sps:$4 sm:$0xff]   ;;  %v11787_v11 = vld [vmem:[#allocation5 + $0x5c4] ss:$16 sps:$4 sm:$0xff]  }
 0x1fa   : > { %3405 = vmatprep.subr.bf16.mxu0 %v11709_v14  ;;  %4817 = vmatprep.subr.bf16.mxu1 %v11712_v15  ;;  %v11763_v14 = vld [vmem:[#allocation5 + $0x544] ss:$16 sps:$4 sm:$0xff]   ;;  %v11766_v15 = vld [vmem:[#allocation5 + $0x54c] ss:$16 sps:$4 sm:$0xff]  }
 0x1fc   : > { %3406 = vmatpush1.bf16.msra.mxu0 %v11707_v19  ;;  %4818 = vmatpush1.bf16.msra.mxu1 %v11710_v20  ;;  %v11764_v19 = vld [vmem:[#allocation5 + $0x548] ss:$16 sps:$4 sm:$0xff]   ;;  %v469_v20 = vld [vmem:[%s12581_s22 + $0x310] sm:$0xff] }
 0x1fd   : > { %3407 = vmatprep.subr.bf16.mxu0 %v11715_v22  ;;  %4819 = vmatprep.subr.bf16.mxu1 %v11718_v23  ;;  %v486_v22 = vld [vmem:[%s12581_s22 + $0x398] sm:$0xff] }
 0x1fe   : > { %v494_v23 = vld [vmem:[%s12581_s22 + $0x3d8] sm:$0xff] }
 0x1ff   : > { %3093 = vmatmul.mubr.bf16.gmra.mrb[4].mxu0 %v893_v24  ;;  %4505 = vmatmul.mubr.bf16.gmra.mrb[4].mxu1 %v893_v24  ;;  %v933_v24 = vpack.c.bf16 %v477_v21, %v469_v20  ;;  %v597_v20 = vld [vmem:[%s12581_s22 + $0x710] sm:$0xff] }
 0x200   : > { %3102 = vmatprep.mubr.bf16.mxu0 %v902_v25  ;;  %4514 = vmatprep.mubr.bf16.mxu1 %v902_v25  ;;  %v942_v25 = vpack.c.bf16 %v494_v23, %v486_v22  ;;  %v605_v21 = vld [vmem:[%s12581_s22 + $0x750] sm:$0xff]  ;;  %v614_v22 = vld [vmem:[%s12581_s22 + $0x798] sm:$0xff] }
 0x201   : > { %3408 = vmatpush1.bf16.msra.mxu0 %v11713_v26  ;;  %4820 = vmatpush1.bf16.msra.mxu1 %v11716_v27  ;;  %v11767_v26 = vld [vmem:[#allocation5 + $0x560] ss:$16 sps:$4 sm:$0xff]   ;;  %v11769_v27 = vld [vmem:[#allocation5 + $0x564] ss:$16 sps:$4 sm:$0xff]   ;;  %v622_v23 = vld [vmem:[%s12581_s22 + $0x7d8] sm:$0xff] }
 0x202   : > { %3409 = vmatprep.subr.bf16.mxu0 %v11721_v28  ;;  %4821 = vmatprep.subr.bf16.mxu1 %v11724_v29  ;;  %v11770_v28 = vld [vmem:[#allocation5 + $0x568] ss:$16 sps:$4 sm:$0xff]   ;;  %v485_v29 = vld [vmem:[%s12581_s22 + $0x390] sm:$0xff] }
 0x205   : > { %3410 = vmatpush1.bf16.msra.mxu0 %v11719_v34  ;;  %4822 = vmatpush1.bf16.msra.mxu1 %v11722_v35  ;;  %v941_v34 = vpack.c.bf16 %v493_v30, %v485_v29  ;;  %v950_v35 = vpack.c.bf16 %v510_v33, %v502_v32  ;;  %v613_v29 = vld [vmem:[%s12581_s22 + $0x790] sm:$0xff]  ;;  %v630_v32 = vld [vmem:[%s12581_s22 + $0x818] sm:$0xff] }
 0x206   : > { %3411 = vmatprep.subr.bf16.mxu0 %v11727_v36  ;;  %4823 = vmatprep.subr.bf16.mxu1 %v11730_v37  ;;  %v501_v36 = vld [vmem:[%s12581_s22 + $0x410] sm:$0xff]  ;;  %v638_v33 = vld [vmem:[%s12581_s22 + $0x858] sm:$0xff] }
 0x207   : > { %3103 = vmatmul.mubr.bf16.gmra.mrb[8].mxu0 %v901_v38  ;;  %4515 = vmatmul.mubr.bf16.gmra.mrb[8].mxu1 %v901_v38  ;;  %v509_v37 = vld [vmem:[%s12581_s22 + $0x450] sm:$0xff]  ;;  %v518_v38 = vld [vmem:[%s12581_s22 + $0x498] sm:$0xff] }
 0x208   : > { %3112 = vmatprep.mubr.bf16.mxu0 %v910_v39  ;;  %4524 = vmatprep.mubr.bf16.mxu1 %v910_v39  ;;  %v526_v39 = vld [vmem:[%s12581_s22 + $0x4d8] sm:$0xff]  ;;  %v621_v30 = vld [vmem:[%s12581_s22 + $0x7d0] sm:$0xff] }
 0x209   : > { %3412 = vmatpush1.bf16.msra.mxu0 %v11725_v40  ;;  %4824 = vmatpush1.bf16.msra.mxu1 %v11728_v41  ;;  %v949_v40 = vpack.c.bf16 %v509_v37, %v501_v36  ;;  %v958_v41 = vpack.c.bf16 %v526_v39, %v518_v38  ;;  %v629_v36 = vld [vmem:[%s12581_s22 + $0x810] sm:$0xff]  ;;  %v646_v38 = vld [vmem:[%s12581_s22 + $0x898] sm:$0xff] }
 0x20a   : > { %3413 = vmatprep.subr.bf16.mxu0 %v11733_v42  ;;  %4825 = vmatprep.subr.bf16.mxu1 %v11736_v43  ;;  %v11773_v42 = vld [vmem:[#allocation5 + $0x580] ss:$16 sps:$4 sm:$0xff]   ;;  %v11775_v43 = vld [vmem:[#allocation5 + $0x584] ss:$16 sps:$4 sm:$0xff]   ;;  %v654_v39 = vld [vmem:[%s12581_s22 + $0x8d8] sm:$0xff] }
 0x20b   : > { %v637_v37 = vld [vmem:[%s12581_s22 + $0x850] sm:$0xff] }
 0x20d   : > { %3414 = vmatpush1.bf16.msra.mxu0 %v11731_v48  ;;  %4826 = vmatpush1.bf16.msra.mxu1 %v11734_v49  ;;  %v534_v48 = vld [vmem:[%s12581_s22 + $0x518] sm:$0xff] }
 0x20e   : > { %3415 = vmatprep.subr.bf16.mxu0 %v11739_v50  ;;  %4827 = vmatprep.subr.bf16.mxu1 %v11742_v51  ;;  %v542_v49 = vld [vmem:[%s12581_s22 + $0x558] sm:$0xff]  ;;  %v957_v50 = vpack.c.bf16 %v525_v46, %v517_v45 }
 0x20f   : > { %3113 = vmatmul.mubr.bf16.gmra.mrb[12].mxu0 %v909_v52  ;;  %4525 = vmatmul.mubr.bf16.gmra.mrb[12].mxu1 %v909_v52  ;;  %v966_v51 = vpack.c.bf16 %v542_v49, %v534_v48  ;;  %v533_v52 = vld [vmem:[%s12581_s22 + $0x510] sm:$0xff]  ;;  %v11802_v45 = vld [vmem:[#allocation5 + $0x60c] ss:$16 sps:$4 sm:$0xff]  }
 0x210   : > { %3122 = vmatprep.mubr.bf16.mxu0 %v918_v53  ;;  %4534 = vmatprep.mubr.bf16.mxu1 %v918_v53  ;;  %v541_v53 = vld [vmem:[%s12581_s22 + $0x550] sm:$0xff]  ;;  %v662_v46 = vld [vmem:[%s12581_s22 + $0x918] sm:$0xff] }
 0x211   : > { %3416 = vmatpush1.bf16.msra.mxu0 %v11737_v54  ;;  %4828 = vmatpush1.bf16.msra.mxu1 %v11740_v55  ;;  %v550_v54 = vld [vmem:[%s12581_s22 + $0x598] sm:$0xff] }
 0x212   : > { %3417 = vmatprep.subr.bf16.mxu0 %v11745_v56  ;;  %4829 = vmatprep.subr.bf16.mxu1 %v11748_v57  ;;  %v558_v55 = vld [vmem:[%s12581_s22 + $0x5d8] sm:$0xff]  ;;  %v965_v56 = vpack.c.bf16 %v541_v53, %v533_v52 }
 0x213   : > { %v974_v57 = vpack.c.bf16 %v558_v55, %v550_v54  ;;  %v678_v52 = vld [vmem:[%s12581_s22 + $0x998] sm:$0xff] }
 0x214   : > { %v686_v53 = vld [vmem:[%s12581_s22 + $0x9d8] sm:$0xff] }
 0x215   : > { %3418 = vmatpush1.bf16.msra.mxu0 %v11743_v62  ;;  %4830 = vmatpush1.bf16.msra.mxu1 %v11746_v63  ;;  %v557_v62 = vld [vmem:[%s12581_s22 + $0x5d0] sm:$0xff]  ;;  %v11784_v63 = vld [vmem:[#allocation5 + $0x5ac] ss:$16 sps:$4 sm:$0xff]   ;;  %v1038_v55 = vpack.c.bf16 %v686_v53, %v678_v52 }
 0x216   : > { %3419 = vmatprep.subr.bf16.mxu0 %v11751_v0  ;;  %4831 = vmatprep.subr.bf16.mxu1 %v11754_v1  ;;  %v566_v0 = vld [vmem:[%s12581_s22 + $0x618] sm:$0xff]  ;;  %v837_v52 = vld [vmem:[%s12581_s22 + $0xe90] sm:$0xff] }
 0x217   : > { %3123 = vmatmul.mubr.bf16.gmra.mrb[16].mxu0 %v917_v2  ;;  %4535 = vmatmul.mubr.bf16.gmra.mrb[16].mxu1 %v917_v2  ;;  %v574_v1 = vld [vmem:[%s12581_s22 + $0x658] sm:$0xff]  ;;  %v973_v2 = vpack.c.bf16 %v557_v62, %v549_v61  ;;  %v693_v62 = vld [vmem:[%s12581_s22 + $0xa10] sm:$0xff] }
 0x218   : > { %3132 = vmatprep.mubr.bf16.mxu0 %v926_v3  ;;  %4544 = vmatprep.mubr.bf16.mxu1 %v926_v3  ;;  %v982_v3 = vpack.c.bf16 %v574_v1, %v566_v0  ;;  %v710_v0 = vld [vmem:[%s12581_s22 + $0xa98] sm:$0xff]  ;;  %v845_v53 = vld [vmem:[%s12581_s22 + $0xed0] sm:$0xff] }
 0x219   : > { %3420 = vmatpush1.bf16.msra.mxu0 %v11749_v4  ;;  %4832 = vmatpush1.bf16.msra.mxu1 %v11752_v5  ;;  %v565_v4 = vld [vmem:[%s12581_s22 + $0x610] sm:$0xff]  ;;  %v718_v1 = vld [vmem:[%s12581_s22 + $0xad8] sm:$0xff] }
 0x21a   : > { %3421 = vmatprep.subr.bf16.mxu0 %v11757_v6  ;;  %4833 = vmatprep.subr.bf16.mxu1 %v11760_v7  ;;  %v573_v5 = vld [vmem:[%s12581_s22 + $0x650] sm:$0xff]  ;;  %v582_v6 = vld [vmem:[%s12581_s22 + $0x698] sm:$0xff] }
 0x21b   : > { %v590_v7 = vld [vmem:[%s12581_s22 + $0x6d8] sm:$0xff]  ;;  %v981_v8 = vpack.c.bf16 %v573_v5, %v565_v4  ;;  %v709_v4 = vld [vmem:[%s12581_s22 + $0xa90] sm:$0xff] }
 0x21c   : > { %v990_v9 = vpack.c.bf16 %v590_v7, %v582_v6  ;;  %v717_v5 = vld [vmem:[%s12581_s22 + $0xad0] sm:$0xff]  ;;  %v726_v6 = vld [vmem:[%s12581_s22 + $0xb18] sm:$0xff] }
 0x21d   : > { %3422 = vmatpush1.bf16.msra.mxu0 %v11755_v12  ;;  %4834 = vmatpush1.bf16.msra.mxu1 %v11758_v13  ;;  %v11788_v12 = vld [vmem:[#allocation5 + $0x5c8] ss:$16 sps:$4 sm:$0xff]   ;;  %v581_v13 = vld [vmem:[%s12581_s22 + $0x690] sm:$0xff] }
 0x21e   : > { %3423 = vmatprep.subr.bf16.mxu0 %v11763_v14  ;;  %4835 = vmatprep.subr.bf16.mxu1 %v11766_v15  ;;  %v589_v14 = vld [vmem:[%s12581_s22 + $0x6d0] sm:$0xff]  ;;  %v11790_v15 = vld [vmem:[#allocation5 + $0x5cc] ss:$16 sps:$4 sm:$0xff]  }
 0x21f   : > { %3133 = vmatmul.mubr.bf16.gmra.mrb[20].mxu0 %v925_v16  ;;  %4545 = vmatmul.mubr.bf16.gmra.mrb[20].mxu1 %v925_v16  ;;  %v598_v16 = vld [vmem:[%s12581_s22 + $0x718] sm:$0xff] }
 0x220   : > { %3142 = vmatprep.mubr.bf16.mxu0 %v934_v17  ;;  %4554 = vmatprep.mubr.bf16.mxu1 %v934_v17  ;;  %v606_v17 = vld [vmem:[%s12581_s22 + $0x758] sm:$0xff] }
 0x221   : > { %3424 = vmatpush1.bf16.msra.mxu0 %v11761_v18  ;;  %4836 = vmatpush1.bf16.msra.mxu1 %v11764_v19  ;;  %v989_v18 = vpack.c.bf16 %v589_v14, %v581_v13  ;;  %v998_v19 = vpack.c.bf16 %v606_v17, %v598_v16  ;;  %v734_v7 = vld [vmem:[%s12581_s22 + $0xb58] sm:$0xff]  ;;  %v741_v16 = vld [vmem:[%s12581_s22 + $0xb90] sm:$0xff] }
 0x222   : > { %3425 = vmatprep.subr.bf16.mxu0 %v11769_v27  ;;  %4837 = vmatprep.subr.bf16.mxu1 %v11772_v31  ;;  %v11793_v27 = vld [vmem:[#allocation5 + $0x5e4] ss:$16 sps:$4 sm:$0xff]   ;;  %v11796_v31 = vld [vmem:[#allocation5 + $0x5ec] ss:$16 sps:$4 sm:$0xff]  }
 0x223   : > { %v750_v13 = vld [vmem:[%s12581_s22 + $0xbd8] sm:$0xff]  ;;  %v749_v17 = vld [vmem:[%s12581_s22 + $0xbd0] sm:$0xff] }
 0x225   : > { %3426 = vmatpush1.bf16.msra.mxu0 %v11767_v26  ;;  %4838 = vmatpush1.bf16.msra.mxu1 %v11770_v28  ;;  %v11791_v26 = vld [vmem:[#allocation5 + $0x5e0] ss:$16 sps:$4 sm:$0xff]   ;;  %v11794_v28 = vld [vmem:[#allocation5 + $0x5e8] ss:$16 sps:$4 sm:$0xff]  }
 0x226   : > { %3427 = vmatprep.subr.bf16.mxu0 %v11775_v43  ;;  %4839 = vmatprep.subr.bf16.mxu1 %v11778_v47  ;;  %v645_v43 = vld [vmem:[%s12581_s22 + $0x890] sm:$0xff]  ;;  %v670_v47 = vld [vmem:[%s12581_s22 + $0x958] sm:$0xff] }
 0x227   : > { %3143 = vmatmul.mubr.bf16.gmra.mrb[24].mxu0 %v933_v24  ;;  %4555 = vmatmul.mubr.bf16.gmra.mrb[24].mxu1 %v933_v24  ;;  %v997_v24 = vpack.c.bf16 %v605_v21, %v597_v20  ;;  %v1030_v49 = vpack.c.bf16 %v670_v47, %v662_v46  ;;  %v1069_v20 = vpack.c.bf16 %v749_v17, %v741_v16  ;;  %v821_v46 = vld [vmem:[%s12581_s22 + $0xe10] sm:$0xff]  ;;  %v391_v16 = vld [vmem:[%s12581_s22 + $0xa0] sm:$0xff] }
 0x228   : > { %3152 = vmatprep.mubr.bf16.mxu0 %v942_v25  ;;  %4564 = vmatprep.mubr.bf16.mxu1 %v942_v25  ;;  %v1006_v25 = vpack.c.bf16 %v622_v23, %v614_v22  ;;  %v757_v22 = vld [vmem:[%s12581_s22 + $0xc10] sm:$0xff]  ;;  %v399_v17 = vld [vmem:[%s12581_s22 + $0xe0] sm:$0xff] }
 0x229   : > { %3428 = vmatpush1.bf16.msra.mxu0 %v11773_v42  ;;  %4840 = vmatpush1.bf16.msra.mxu1 %v11776_v44  ;;  %v11799_v42 = vld [vmem:[#allocation5 + $0x604] ss:$16 sps:$4 sm:$0xff]  }
 0x22a   : > { %3429 = vmatprep.subr.bf16.mxu0 %v11781_v59  ;;  %4841 = vmatprep.subr.bf16.mxu1 %v11784_v63  ;;  %v653_v44 = vld [vmem:[%s12581_s22 + $0x8d0] sm:$0xff]  ;;  %v702_v59 = vld [vmem:[%s12581_s22 + $0xa58] sm:$0xff] }
 0x22b   : > { %v1021_v48 = vpack.c.bf16 %v653_v44, %v645_v43  ;;  %v701_v63 = vld [vmem:[%s12581_s22 + $0xa50] sm:$0xff]  ;;  %v830_v43 = vld [vmem:[%s12581_s22 + $0xe58] sm:$0xff] }
 0x22c   : > { %v765_v23 = vld [vmem:[%s12581_s22 + $0xc50] sm:$0xff] }
 0x22d   : > { %3430 = vmatpush1.bf16.msra.mxu0 %v11779_v58  ;;  %4842 = vmatpush1.bf16.msra.mxu1 %v11782_v60  ;;  %v694_v58 = vld [vmem:[%s12581_s22 + $0xa18] sm:$0xff]  ;;  %v829_v47 = vld [vmem:[%s12581_s22 + $0xe50] sm:$0xff] }
 0x22e   : > { %3431 = vmatprep.subr.bf16.mxu0 %v11787_v11  ;;  %4843 = vmatprep.subr.bf16.mxu1 %v11790_v15  ;;  %v1046_v61 = vpack.c.bf16 %v702_v59, %v694_v58  ;;  %v733_v11 = vld [vmem:[%s12581_s22 + $0xb50] sm:$0xff] }
 0x22f   : > { %3153 = vmatmul.mubr.bf16.gmra.mrb[28].mxu0 %v941_v34  ;;  %4565 = vmatmul.mubr.bf16.gmra.mrb[28].mxu1 %v941_v34  ;;  %v1005_v34 = vpack.c.bf16 %v621_v30, %v613_v29  ;;  %v781_v29 = vld [vmem:[%s12581_s22 + $0xcd0] sm:$0xff]  ;;  %v790_v30 = vld [vmem:[%s12581_s22 + $0xd18] sm:$0xff] }
 0x230   : > { %3162 = vmatprep.mubr.bf16.mxu0 %v950_v35  ;;  %4574 = vmatprep.mubr.bf16.mxu1 %v950_v35  ;;  %v1014_v35 = vpack.c.bf16 %v638_v33, %v630_v32  ;;  %v853_v58 = vld [vmem:[%s12581_s22 + $0xf10] sm:$0xff] }
 0x231   : > { %3432 = vmatpush1.bf16.msra.mxu0 %v11785_v10  ;;  %4844 = vmatpush1.bf16.msra.mxu1 %v11788_v12  ;;  %v725_v10 = vld [vmem:[%s12581_s22 + $0xb10] sm:$0xff]  ;;  %v742_v12 = vld [vmem:[%s12581_s22 + $0xb98] sm:$0xff] }
 0x232   : > { %3433 = vmatprep.subr.bf16.mxu0 %v11793_v27  ;;  %4845 = vmatprep.subr.bf16.mxu1 %v11796_v31  ;;  %v1061_v14 = vpack.c.bf16 %v733_v11, %v725_v10  ;;  %v1070_v15 = vpack.c.bf16 %v750_v13, %v742_v12  ;;  %v798_v31 = vld [vmem:[%s12581_s22 + $0xd58] sm:$0xff]  ;;  %v861_v59 = vld [vmem:[%s12581_s22 + $0xf50] sm:$0xff] }
 0x233   : > { %v1094_v33 = vpack.c.bf16 %v798_v31, %v790_v30  ;;  %v11797_v11 = vld [vmem:[#allocation5 + $0x600] ss:$16 sps:$4 sm:$0xff]   ;;  %v11800_v12 = vld [vmem:[#allocation5 + $0x608] ss:$16 sps:$4 sm:$0xff]  }
 0x234   : > { %v407_v30 = vld [vmem:[%s12581_s22 + $0x120] sm:$0xff] }
 0x235   : > { %3434 = vmatpush1.bf16.msra.mxu0 %v11791_v26  ;;  %4846 = vmatpush1.bf16.msra.mxu1 %v11794_v28  ;;  %v1077_v26 = vpack.c.bf16 %v765_v23, %v757_v22  ;;  %v773_v28 = vld [vmem:[%s12581_s22 + $0xc90] sm:$0xff]  ;;  %v11814_v23 = vld [vmem:[#allocation5 + $0x64c] ss:$16 sps:$4 sm:$0xff]   ;;  %v415_v31 = vld [vmem:[%s12581_s22 + $0x160] sm:$0xff] }
 0x236   : > { %3756 = vmatprep.subr.bf16.mxu0 %v11799_v42  ;;  %5168 = vmatprep.subr.bf16.mxu1 %v11802_v45  ;;  %v1085_v32 = vpack.c.bf16 %v781_v29, %v773_v28  ;;  %v822_v42 = vld [vmem:[%s12581_s22 + $0xe18] sm:$0xff]  ;;  %v11811_v22 = vld [vmem:[#allocation5 + $0x644] ss:$16 sps:$4 sm:$0xff]  }
 0x237   : > { %3163 = vmatmul.mubr.bf16.gmra.mrb[32].mxu0 %v949_v40  ;;  %4575 = vmatmul.mubr.bf16.gmra.mrb[32].mxu1 %v949_v40  ;;  %v1013_v40 = vpack.c.bf16 %v637_v37, %v629_v36  ;;  %v806_v36 = vld [vmem:[%s12581_s22 + $0xd98] sm:$0xff]  ;;  %v1110_v45 = vpack.c.bf16 %v830_v43, %v822_v42  ;;  %v11817_v28 = vld [vmem:[#allocation5 + $0x664] ss:$16 sps:$4 sm:$0xff]  }
 0x238   : > { %3172 = vmatprep.mubr.bf16.mxu0 %v958_v41  ;;  %4584 = vmatprep.mubr.bf16.mxu1 %v958_v41  ;;  %v1022_v41 = vpack.c.bf16 %v654_v39, %v646_v38  ;;  %v814_v37 = vld [vmem:[%s12581_s22 + $0xdd8] sm:$0xff]  ;;  %v11829_v42 = vld [vmem:[#allocation5 + $0x6a4] ss:$16 sps:$4 sm:$0xff]  }
 0x239   : > { %v1102_v39 = vpack.c.bf16 %v814_v37, %v806_v36  ;;  %v11820_v29 = vld [vmem:[#allocation5 + $0x66c] ss:$16 sps:$4 sm:$0xff]   ;;  %v11823_v36 = vld [vmem:[#allocation5 + $0x684] ss:$16 sps:$4 sm:$0xff]  }
 0x23a   : > { %v11826_v37 = vld [vmem:[#allocation5 + $0x68c] ss:$16 sps:$4 sm:$0xff]  }
 0x23b   : > { %v11832_v43 = vld [vmem:[#allocation5 + $0x6ac] ss:$16 sps:$4 sm:$0xff]  }
 0x23f   : > { %3173 = vmatmul.mubr.bf16.gmra.mrb[36].mxu0 %v957_v50  ;;  %4585 = vmatmul.mubr.bf16.gmra.mrb[36].mxu1 %v957_v50  ;;  %v661_v50 = vld [vmem:[%s12581_s22 + $0x910] sm:$0xff] }
 0x240   : > { %3182 = vmatprep.mubr.bf16.mxu0 %v966_v51  ;;  %4594 = vmatprep.mubr.bf16.mxu1 %v966_v51  ;;  %v669_v51 = vld [vmem:[%s12581_s22 + $0x950] sm:$0xff] }
 0x241   : > { %v1029_v54 = vpack.c.bf16 %v669_v51, %v661_v50  ;;  %v1109_v50 = vpack.c.bf16 %v829_v47, %v821_v46  ;;  %v440_v46 = vld [vmem:[%s12581_s22 + $0x228] sm:$0xff] }
 0x242   : > { %v448_v47 = vld [vmem:[%s12581_s22 + $0x268] sm:$0xff] }
 0x247   : > { %3183 = vmatmul.mubr.bf16.gmra.mrb[40].mxu0 %v965_v56  ;;  %4595 = vmatmul.mubr.bf16.gmra.mrb[40].mxu1 %v965_v56  ;;  %v677_v56 = vld [vmem:[%s12581_s22 + $0x990] sm:$0xff] }
 0x248   : > { %3192 = vmatprep.mubr.bf16.mxu0 %v974_v57  ;;  %4604 = vmatprep.mubr.bf16.mxu1 %v974_v57  ;;  %v685_v57 = vld [vmem:[%s12581_s22 + $0x9d0] sm:$0xff] }
 0x249   : > { %v1037_v60 = vpack.c.bf16 %v685_v57, %v677_v56  ;;  %v1117_v56 = vpack.c.bf16 %v845_v53, %v837_v52  ;;  %v920_v53 = vpack.c.bf16 %v448_v47, %v440_v46  ;;  %v527_v46 = vld [vmem:[%s12581_s22 + $0x4e0] sm:$0xff]  ;;  %v11874_v47 = vld [vmem:[#allocation5 + $0x78c] ss:$16 sps:$4 sm:$0xff]  }
 0x24f   : > { %3193 = vmatmul.mubr.bf16.gmra.mrb[44].mxu0 %v973_v2  ;;  %4605 = vmatmul.mubr.bf16.gmra.mrb[44].mxu1 %v973_v2  ;;  %v1045_v2 = vpack.c.bf16 %v701_v63, %v693_v62  ;;  %v1125_v62 = vpack.c.bf16 %v861_v59, %v853_v58  ;;  %v439_v58 = vld [vmem:[%s12581_s22 + $0x220] sm:$0xff] }
 0x250   : > { %3202 = vmatprep.mubr.bf16.mxu0 %v982_v3  ;;  %4614 = vmatprep.mubr.bf16.mxu1 %v982_v3  ;;  %v1054_v3 = vpack.c.bf16 %v718_v1, %v710_v0  ;;  %v869_v0 = vld [vmem:[%s12581_s22 + $0xf90] sm:$0xff]  ;;  %v447_v59 = vld [vmem:[%s12581_s22 + $0x260] sm:$0xff] }
 0x251   : > { %v877_v1 = vld [vmem:[%s12581_s22 + $0xfd0] sm:$0xff] }
 0x257   : > { %3203 = vmatmul.mubr.bf16.gmra.mrb[48].mxu0 %v981_v8  ;;  %4615 = vmatmul.mubr.bf16.gmra.mrb[48].mxu1 %v981_v8  ;;  %v1053_v8 = vpack.c.bf16 %v717_v5, %v709_v4  ;;  %v1133_v4 = vpack.c.bf16 %v877_v1, %v869_v0  ;;  %v11847_v0 = vld [vmem:[#allocation5 + $0x704] ss:$16 sps:$4 sm:$0xff]   ;;  %v11850_v1 = vld [vmem:[#allocation5 + $0x70c] ss:$16 sps:$4 sm:$0xff]  }
 0x258   : > { %3212 = vmatprep.mubr.bf16.mxu0 %v990_v9  ;;  %4624 = vmatprep.mubr.bf16.mxu1 %v990_v9  ;;  %v1062_v9 = vpack.c.bf16 %v734_v7, %v726_v6  ;;  %v375_v6 = vld [vmem:[%s12581_s22 + $0x20] sm:$0xff] }
 0x259   : > { %v383_v7 = vld [vmem:[%s12581_s22 + $0x60] sm:$0xff] }
 0x25a   : > { %v887_v10 = vpack.c.bf16 %v383_v7, %v375_v6  ;;  %v11853_v6 = vld [vmem:[#allocation5 + $0x724] ss:$16 sps:$4 sm:$0xff]   ;;  %v11856_v7 = vld [vmem:[#allocation5 + $0x72c] ss:$16 sps:$4 sm:$0xff]  }
 0x25f   : > { %3213 = vmatmul.mubr.bf16.gmra.mrb[52].mxu0 %v989_v18  ;;  %4625 = vmatmul.mubr.bf16.gmra.mrb[52].mxu1 %v989_v18  ;;  %v758_v18 = vld [vmem:[%s12581_s22 + $0xc18] sm:$0xff] }
 0x260   : > { %3222 = vmatprep.mubr.bf16.mxu0 %v998_v19  ;;  %4634 = vmatprep.mubr.bf16.mxu1 %v998_v19  ;;  %v766_v19 = vld [vmem:[%s12581_s22 + $0xc58] sm:$0xff] }
 0x261   : > { %v1078_v21 = vpack.c.bf16 %v766_v19, %v758_v18  ;;  %v408_v18 = vld [vmem:[%s12581_s22 + $0x128] sm:$0xff]  ;;  %v11803_v19 = vld [vmem:[#allocation5 + $0x620] ss:$16 sps:$4 sm:$0xff]  }
 0x267   : > { %3223 = vmatmul.mubr.bf16.gmra.mrb[56].mxu0 %v997_v24  ;;  %4635 = vmatmul.mubr.bf16.gmra.mrb[56].mxu1 %v997_v24  ;;  %v774_v24 = vld [vmem:[%s12581_s22 + $0xc98] sm:$0xff] }
 0x268   : > { %3232 = vmatprep.mubr.bf16.mxu0 %v1006_v25  ;;  %4644 = vmatprep.mubr.bf16.mxu1 %v1006_v25  ;;  %v782_v25 = vld [vmem:[%s12581_s22 + $0xcd8] sm:$0xff] }
 0x269   : > { %v1086_v27 = vpack.c.bf16 %v782_v25, %v774_v24  ;;  %v895_v24 = vpack.c.bf16 %v399_v17, %v391_v16 }
 0x26f   : > { %3233 = vmatmul.mubr.bf16.gmra.mrb[60].mxu0 %v1005_v34  ;;  %4645 = vmatmul.mubr.bf16.gmra.mrb[60].mxu1 %v1005_v34  ;;  %v789_v34 = vld [vmem:[%s12581_s22 + $0xd10] sm:$0xff] }
 0x270   : > { %3242 = vmatprep.mubr.bf16.mxu0 %v1014_v35  ;;  %4654 = vmatprep.mubr.bf16.mxu1 %v1014_v35  ;;  %v797_v35 = vld [vmem:[%s12581_s22 + $0xd50] sm:$0xff] }
 0x271   : > { %v1093_v38 = vpack.c.bf16 %v797_v35, %v789_v34  ;;  %v11815_v34 = vld [vmem:[#allocation5 + $0x660] ss:$16 sps:$4 sm:$0xff]   ;;  %v11818_v35 = vld [vmem:[#allocation5 + $0x668] ss:$16 sps:$4 sm:$0xff]  }
 0x277   : > { %3243 = vmatmul.mubr.bf16.gmra.mrb[64].mxu0 %v1013_v40  ;;  %4655 = vmatmul.mubr.bf16.gmra.mrb[64].mxu1 %v1013_v40  ;;  %v805_v40 = vld [vmem:[%s12581_s22 + $0xd90] sm:$0xff] }
 0x278   : > { %3252 = vmatprep.mubr.bf16.mxu0 %v1022_v41  ;;  %4664 = vmatprep.mubr.bf16.mxu1 %v1022_v41  ;;  %v813_v41 = vld [vmem:[%s12581_s22 + $0xdd0] sm:$0xff] }
 0x279   : > { %v1101_v44 = vpack.c.bf16 %v813_v41, %v805_v40  ;;  %v11821_v40 = vld [vmem:[#allocation5 + $0x680] ss:$16 sps:$4 sm:$0xff]   ;;  %v11824_v41 = vld [vmem:[#allocation5 + $0x688] ss:$16 sps:$4 sm:$0xff]  }
 0x27f   : > { %3253 = vmatmul.mubr.bf16.gmra.mrb[68].mxu0 %v1021_v48  ;;  %4665 = vmatmul.mubr.bf16.gmra.mrb[68].mxu1 %v1021_v48  ;;  %v838_v48 = vld [vmem:[%s12581_s22 + $0xe98] sm:$0xff] }
 0x280   : > { %3262 = vmatprep.mubr.bf16.mxu0 %v1030_v49  ;;  %4674 = vmatprep.mubr.bf16.mxu1 %v1030_v49  ;;  %v846_v49 = vld [vmem:[%s12581_s22 + $0xed8] sm:$0xff] }
 0x281   : > { %v1118_v51 = vpack.c.bf16 %v846_v49, %v838_v48  ;;  %v11827_v48 = vld [vmem:[#allocation5 + $0x6a0] ss:$16 sps:$4 sm:$0xff]   ;;  %v11830_v49 = vld [vmem:[#allocation5 + $0x6a8] ss:$16 sps:$4 sm:$0xff]  }
 0x287   : > { %3263 = vmatmul.mubr.bf16.gmra.mrb[72].mxu0 %v1029_v54  ;;  %4675 = vmatmul.mubr.bf16.gmra.mrb[72].mxu1 %v1029_v54  ;;  %v854_v54 = vld [vmem:[%s12581_s22 + $0xf18] sm:$0xff] }
 0x288   : > { %3272 = vmatprep.mubr.bf16.mxu0 %v1038_v55  ;;  %4684 = vmatprep.mubr.bf16.mxu1 %v1038_v55  ;;  %v862_v55 = vld [vmem:[%s12581_s22 + $0xf58] sm:$0xff] }
 0x289   : > { %v1126_v57 = vpack.c.bf16 %v862_v55, %v854_v54  ;;  %v11833_v54 = vld [vmem:[#allocation5 + $0x6c0] ss:$16 sps:$4 sm:$0xff]   ;;  %v11836_v55 = vld [vmem:[#allocation5 + $0x6c8] ss:$16 sps:$4 sm:$0xff]  }
 0x28f   : > { %3273 = vmatmul.mubr.bf16.gmra.mrb[76].mxu0 %v1037_v60  ;;  %4685 = vmatmul.mubr.bf16.gmra.mrb[76].mxu1 %v1037_v60  ;;  %v870_v60 = vld [vmem:[%s12581_s22 + $0xf98] sm:$0xff] }
 0x290   : > { %3282 = vmatprep.mubr.bf16.mxu0 %v1046_v61  ;;  %4694 = vmatprep.mubr.bf16.mxu1 %v1046_v61  ;;  %v878_v61 = vld [vmem:[%s12581_s22 + $0xfd8] sm:$0xff] }
 0x291   : > { %v1134_v63 = vpack.c.bf16 %v878_v61, %v870_v60  ;;  %v456_v60 = vld [vmem:[%s12581_s22 + $0x2a8] sm:$0xff] }
 0x292   : > { %v464_v61 = vld [vmem:[%s12581_s22 + $0x2e8] sm:$0xff] }
 0x297   : > { %3283 = vmatmul.mubr.bf16.gmra.mrb[80].mxu0 %v1045_v2  ;;  %4695 = vmatmul.mubr.bf16.gmra.mrb[80].mxu1 %v1045_v2  ;;  %v376_v2 = vld [vmem:[%s12581_s22 + $0x28] sm:$0xff] }
 0x298   : > { %3292 = vmatprep.mubr.bf16.mxu0 %v1054_v3  ;;  %4704 = vmatprep.mubr.bf16.mxu1 %v1054_v3  ;;  %v384_v3 = vld [vmem:[%s12581_s22 + $0x68] sm:$0xff] }
 0x299   : > { %v888_v5 = vpack.c.bf16 %v384_v3, %v376_v2  ;;  %v919_v2 = vpack.c.bf16 %v447_v59, %v439_v58  ;;  %v928_v3 = vpack.c.bf16 %v464_v61, %v456_v60  ;;  %v11875_v58 = vld [vmem:[#allocation5 + $0x7a0] ss:$16 sps:$4 sm:$0xff]   ;;  %v11877_v59 = vld [vmem:[#allocation5 + $0x7a4] ss:$16 sps:$4 sm:$0xff]   ;;  %v11878_v60 = vld [vmem:[#allocation5 + $0x7a8] ss:$16 sps:$4 sm:$0xff]  }
 0x29a   : > { %v551_v61 = vld [vmem:[%s12581_s22 + $0x5a0] sm:$0xff] }
 0x29f   : > { %3293 = vmatmul.mubr.bf16.gmra.mrb[84].mxu0 %v1053_v8  ;;  %4705 = vmatmul.mubr.bf16.gmra.mrb[84].mxu1 %v1053_v8  ;;  %v392_v8 = vld [vmem:[%s12581_s22 + $0xa8] sm:$0xff] }
 0x2a0   : > { %3302 = vmatprep.mubr.bf16.mxu0 %v1062_v9  ;;  %4714 = vmatprep.mubr.bf16.mxu1 %v1062_v9  ;;  %v400_v9 = vld [vmem:[%s12581_s22 + $0xe8] sm:$0xff] }
 0x2a1   : > { %v896_v13 = vpack.c.bf16 %v400_v9, %v392_v8  ;;  %v455_v8 = vld [vmem:[%s12581_s22 + $0x2a0] sm:$0xff] }
 0x2a2   : > { %v463_v9 = vld [vmem:[%s12581_s22 + $0x2e0] sm:$0xff] }
 0x2a3   : > { %v927_v16 = vpack.c.bf16 %v463_v9, %v455_v8 }
 0x2a7   : > { %3303 = vmatmul.mubr.bf16.gmra.mrb[88].mxu0 %v1061_v14  ;;  %4715 = vmatmul.mubr.bf16.gmra.mrb[88].mxu1 %v1061_v14  ;;  %v11805_v14 = vld [vmem:[#allocation5 + $0x624] ss:$16 sps:$4 sm:$0xff]  }
 0x2a8   : > { %3312 = vmatprep.mubr.bf16.mxu0 %v1070_v15  ;;  %4724 = vmatprep.mubr.bf16.mxu1 %v1070_v15  ;;  %v11808_v15 = vld [vmem:[#allocation5 + $0x62c] ss:$16 sps:$4 sm:$0xff]  }
 0x2af   : > { %3313 = vmatmul.mubr.bf16.gmra.mrb[92].mxu0 %v1069_v20  ;;  %4725 = vmatmul.mubr.bf16.gmra.mrb[92].mxu1 %v1069_v20  ;;  %v11806_v20 = vld [vmem:[#allocation5 + $0x628] ss:$16 sps:$4 sm:$0xff]  }
 0x2b0   : > { %3322 = vmatprep.mubr.bf16.mxu0 %v1078_v21  ;;  %4734 = vmatprep.mubr.bf16.mxu1 %v1078_v21  ;;  %v416_v21 = vld [vmem:[%s12581_s22 + $0x168] sm:$0xff] }
 0x2b1   : > { %v904_v25 = vpack.c.bf16 %v416_v21, %v408_v18  ;;  %v11857_v18 = vld [vmem:[#allocation5 + $0x740] ss:$16 sps:$4 sm:$0xff]  }
 0x2b2   : > { %v479_v21 = vld [vmem:[%s12581_s22 + $0x360] sm:$0xff] }
 0x2b7   : > { %3323 = vmatmul.mubr.bf16.gmra.mrb[96].mxu0 %v1077_v26  ;;  %4735 = vmatmul.mubr.bf16.gmra.mrb[96].mxu1 %v1077_v26  ;;  %v11809_v26 = vld [vmem:[#allocation5 + $0x640] ss:$16 sps:$4 sm:$0xff]  }
 0x2b8   : > { %3332 = vmatprep.mubr.bf16.mxu0 %v1086_v27  ;;  %4744 = vmatprep.mubr.bf16.mxu1 %v1086_v27  ;;  %v11812_v27 = vld [vmem:[#allocation5 + $0x648] ss:$16 sps:$4 sm:$0xff]  }
 0x2bf   : > { %3333 = vmatmul.mubr.bf16.gmra.mrb[100].mxu0 %v1085_v32  ;;  %4745 = vmatmul.mubr.bf16.gmra.mrb[100].mxu1 %v1085_v32  ;;  %v424_v32 = vld [vmem:[%s12581_s22 + $0x1a8] sm:$0xff] }
 0x2c0   : > { %3342 = vmatprep.mubr.bf16.mxu0 %v1094_v33  ;;  %4754 = vmatprep.mubr.bf16.mxu1 %v1094_v33  ;;  %v432_v33 = vld [vmem:[%s12581_s22 + $0x1e8] sm:$0xff] }
 0x2c7   : > { %3343 = vmatmul.mubr.bf16.gmra.mrb[104].mxu0 %v1093_v38  ;;  %4755 = vmatmul.mubr.bf16.gmra.mrb[104].mxu1 %v1093_v38  ;;  %v903_v38 = vpack.c.bf16 %v415_v31, %v407_v30  ;;  %v495_v30 = vld [vmem:[%s12581_s22 + $0x3e0] sm:$0xff]  ;;  %v11868_v31 = vld [vmem:[#allocation5 + $0x76c] ss:$16 sps:$4 sm:$0xff]  }
 0x2c8   : > { %3352 = vmatprep.mubr.bf16.mxu0 %v1102_v39  ;;  %4764 = vmatprep.mubr.bf16.mxu1 %v1102_v39  ;;  %v912_v39 = vpack.c.bf16 %v432_v33, %v424_v32  ;;  %v504_v32 = vld [vmem:[%s12581_s22 + $0x428] sm:$0xff] }
 0x2c9   : > { %v512_v33 = vld [vmem:[%s12581_s22 + $0x468] sm:$0xff] }
 0x2cf   : > { %3353 = vmatmul.mubr.bf16.gmra.mrb[108].mxu0 %v1101_v44  ;;  %4765 = vmatmul.mubr.bf16.gmra.mrb[108].mxu1 %v1101_v44  ;;  %v423_v44 = vld [vmem:[%s12581_s22 + $0x1a0] sm:$0xff] }
 0x2d0   : > { %3362 = vmatprep.mubr.bf16.mxu0 %v1110_v45  ;;  %4774 = vmatprep.mubr.bf16.mxu1 %v1110_v45  ;;  %v431_v45 = vld [vmem:[%s12581_s22 + $0x1e0] sm:$0xff] }
 0x2d1   : > { %v911_v52 = vpack.c.bf16 %v431_v45, %v423_v44  ;;  %v11872_v44 = vld [vmem:[#allocation5 + $0x788] ss:$16 sps:$4 sm:$0xff]   ;;  %v519_v45 = vld [vmem:[%s12581_s22 + $0x4a0] sm:$0xff] }
 0x2d7   : > { %3363 = vmatmul.mubr.bf16.gmra.mrb[112].mxu0 %v1109_v50  ;;  %4775 = vmatmul.mubr.bf16.gmra.mrb[112].mxu1 %v1109_v50  ;;  %v11835_v50 = vld [vmem:[#allocation5 + $0x6c4] ss:$16 sps:$4 sm:$0xff]  }
 0x2d8   : > { %3372 = vmatprep.mubr.bf16.mxu0 %v1118_v51  ;;  %4784 = vmatprep.mubr.bf16.mxu1 %v1118_v51  ;;  %v11838_v51 = vld [vmem:[#allocation5 + $0x6cc] ss:$16 sps:$4 sm:$0xff]  }
 0x2df   : > { %3373 = vmatmul.mubr.bf16.gmra.mrb[116].mxu0 %v1117_v56  ;;  %4785 = vmatmul.mubr.bf16.gmra.mrb[116].mxu1 %v1117_v56  ;;  %v11841_v56 = vld [vmem:[#allocation5 + $0x6e4] ss:$16 sps:$4 sm:$0xff]  }
 0x2e0   : > { %3382 = vmatprep.mubr.bf16.mxu0 %v1126_v57  ;;  %4794 = vmatprep.mubr.bf16.mxu1 %v1126_v57  ;;  %v11844_v57 = vld [vmem:[#allocation5 + $0x6ec] ss:$16 sps:$4 sm:$0xff]  }
 0x2e7   : > { %3383 = vmatmul.mubr.bf16.gmra.mrb[120].mxu0 %v1125_v62  ;;  %4795 = vmatmul.mubr.bf16.gmra.mrb[120].mxu1 %v1125_v62  ;;  %v11839_v62 = vld [vmem:[#allocation5 + $0x6e0] ss:$16 sps:$4 sm:$0xff]  }
 0x2e8   : > { %3392 = vmatprep.mubr.bf16.mxu0 %v1134_v63  ;;  %4804 = vmatprep.mubr.bf16.mxu1 %v1134_v63  ;;  %v11842_v63 = vld [vmem:[#allocation5 + $0x6e8] ss:$16 sps:$4 sm:$0xff]  }
 0x2ef   : > { %3393 = vmatmul.mubr.bf16.gmra.mrb[124].mxu0 %v1133_v4  ;;  %4805 = vmatmul.mubr.bf16.gmra.mrb[124].mxu1 %v1133_v4  ;;  %v11845_v4 = vld [vmem:[#allocation5 + $0x700] ss:$16 sps:$4 sm:$0xff]  }
 0x2f0   : > { %3435 = vmatprep.mubr.bf16.mxu0 %v888_v5  ;;  %4847 = vmatprep.mubr.bf16.mxu1 %v888_v5  ;;  %v11848_v5 = vld [vmem:[#allocation5 + $0x708] ss:$16 sps:$4 sm:$0xff]  }
 0x2f7   : > { %3436 = vmatmul.mubr.bf16.vlgmr.msra.gmra.mrb[0].mxu0 %v887_v10  ;;  %4848 = vmatmul.mubr.bf16.vlgmr.msra.gmra.mrb[0].mxu1 %v887_v10  ;;  %v472_v10 = vld [vmem:[%s12581_s22 + $0x328] sm:$0xff] }
 0x2f8   : > { %3757 = vmatpush1.bf16.msra.mxu0 %v11797_v11  ;;  %5169 = vmatpush1.bf16.msra.mxu1 %v11800_v12  ;;  %v480_v11 = vld [vmem:[%s12581_s22 + $0x368] sm:$0xff]  ;;  %v11851_v12 = vld [vmem:[#allocation5 + $0x720] ss:$16 sps:$4 sm:$0xff]  }
 0x2f9   : > { %3445 = vmatprep.mubr.bf16.mxu0 %v896_v13  ;;  %4857 = vmatprep.mubr.bf16.mxu1 %v896_v13  ;;  %v11854_v13 = vld [vmem:[#allocation5 + $0x728] ss:$16 sps:$4 sm:$0xff]   ;;  %v936_v17 = vpack.c.bf16 %v480_v11, %v472_v10  ;;  %v11881_v10 = vld [vmem:[#allocation5 + $0x7c0] ss:$16 sps:$4 sm:$0xff]   ;;  %v11883_v11 = vld [vmem:[#allocation5 + $0x7c4] ss:$16 sps:$4 sm:$0xff]  }
 0x2fa   : > { %3758 = vmatprep.subr.bf16.mxu0 %v11805_v14  ;;  %5170 = vmatprep.subr.bf16.mxu1 %v11808_v15  ;;  %v11859_v14 = vld [vmem:[#allocation5 + $0x744] ss:$16 sps:$4 sm:$0xff]   ;;  %v11862_v15 = vld [vmem:[#allocation5 + $0x74c] ss:$16 sps:$4 sm:$0xff]  }
 0x2fc   : > { %3759 = vmatpush1.bf16.msra.mxu0 %v11803_v19  ;;  %5171 = vmatpush1.bf16.msra.mxu1 %v11806_v20  ;;  %v11860_v19 = vld [vmem:[#allocation5 + $0x748] ss:$16 sps:$4 sm:$0xff]   ;;  %v471_v20 = vld [vmem:[%s12581_s22 + $0x320] sm:$0xff] }
 0x2fd   : > { %3760 = vmatprep.subr.bf16.mxu0 %v11811_v22  ;;  %5172 = vmatprep.subr.bf16.mxu1 %v11814_v23  ;;  %v488_v22 = vld [vmem:[%s12581_s22 + $0x3a8] sm:$0xff] }
 0x2fe   : > { %v496_v23 = vld [vmem:[%s12581_s22 + $0x3e8] sm:$0xff] }
 0x2ff   : > { %3446 = vmatmul.mubr.bf16.gmra.mrb[4].mxu0 %v895_v24  ;;  %4858 = vmatmul.mubr.bf16.gmra.mrb[4].mxu1 %v895_v24  ;;  %v935_v24 = vpack.c.bf16 %v479_v21, %v471_v20  ;;  %v599_v20 = vld [vmem:[%s12581_s22 + $0x720] sm:$0xff] }
 0x300   : > { %3455 = vmatprep.mubr.bf16.mxu0 %v904_v25  ;;  %4867 = vmatprep.mubr.bf16.mxu1 %v904_v25  ;;  %v944_v25 = vpack.c.bf16 %v496_v23, %v488_v22  ;;  %v607_v21 = vld [vmem:[%s12581_s22 + $0x760] sm:$0xff]  ;;  %v616_v22 = vld [vmem:[%s12581_s22 + $0x7a8] sm:$0xff] }
 0x301   : > { %3761 = vmatpush1.bf16.msra.mxu0 %v11809_v26  ;;  %5173 = vmatpush1.bf16.msra.mxu1 %v11812_v27  ;;  %v11863_v26 = vld [vmem:[#allocation5 + $0x760] ss:$16 sps:$4 sm:$0xff]   ;;  %v11865_v27 = vld [vmem:[#allocation5 + $0x764] ss:$16 sps:$4 sm:$0xff]   ;;  %v624_v23 = vld [vmem:[%s12581_s22 + $0x7e8] sm:$0xff] }
 0x302   : > { %3762 = vmatprep.subr.bf16.mxu0 %v11817_v28  ;;  %5174 = vmatprep.subr.bf16.mxu1 %v11820_v29  ;;  %v11866_v28 = vld [vmem:[#allocation5 + $0x768] ss:$16 sps:$4 sm:$0xff]   ;;  %v487_v29 = vld [vmem:[%s12581_s22 + $0x3a0] sm:$0xff] }
 0x305   : > { %3763 = vmatpush1.bf16.msra.mxu0 %v11815_v34  ;;  %5175 = vmatpush1.bf16.msra.mxu1 %v11818_v35  ;;  %v943_v34 = vpack.c.bf16 %v495_v30, %v487_v29  ;;  %v952_v35 = vpack.c.bf16 %v512_v33, %v504_v32  ;;  %v615_v29 = vld [vmem:[%s12581_s22 + $0x7a0] sm:$0xff]  ;;  %v632_v32 = vld [vmem:[%s12581_s22 + $0x828] sm:$0xff] }
 0x306   : > { %3764 = vmatprep.subr.bf16.mxu0 %v11823_v36  ;;  %5176 = vmatprep.subr.bf16.mxu1 %v11826_v37  ;;  %v503_v36 = vld [vmem:[%s12581_s22 + $0x420] sm:$0xff]  ;;  %v640_v33 = vld [vmem:[%s12581_s22 + $0x868] sm:$0xff] }
 0x307   : > { %3456 = vmatmul.mubr.bf16.gmra.mrb[8].mxu0 %v903_v38  ;;  %4868 = vmatmul.mubr.bf16.gmra.mrb[8].mxu1 %v903_v38  ;;  %v511_v37 = vld [vmem:[%s12581_s22 + $0x460] sm:$0xff]  ;;  %v520_v38 = vld [vmem:[%s12581_s22 + $0x4a8] sm:$0xff] }
 0x308   : > { %3465 = vmatprep.mubr.bf16.mxu0 %v912_v39  ;;  %4877 = vmatprep.mubr.bf16.mxu1 %v912_v39  ;;  %v528_v39 = vld [vmem:[%s12581_s22 + $0x4e8] sm:$0xff]  ;;  %v623_v30 = vld [vmem:[%s12581_s22 + $0x7e0] sm:$0xff] }
 0x309   : > { %3765 = vmatpush1.bf16.msra.mxu0 %v11821_v40  ;;  %5177 = vmatpush1.bf16.msra.mxu1 %v11824_v41  ;;  %v951_v40 = vpack.c.bf16 %v511_v37, %v503_v36  ;;  %v960_v41 = vpack.c.bf16 %v528_v39, %v520_v38  ;;  %v631_v36 = vld [vmem:[%s12581_s22 + $0x820] sm:$0xff]  ;;  %v648_v38 = vld [vmem:[%s12581_s22 + $0x8a8] sm:$0xff] }
 0x30a   : > { %3766 = vmatprep.subr.bf16.mxu0 %v11829_v42  ;;  %5178 = vmatprep.subr.bf16.mxu1 %v11832_v43  ;;  %v11869_v42 = vld [vmem:[#allocation5 + $0x780] ss:$16 sps:$4 sm:$0xff]   ;;  %v11871_v43 = vld [vmem:[#allocation5 + $0x784] ss:$16 sps:$4 sm:$0xff]   ;;  %v656_v39 = vld [vmem:[%s12581_s22 + $0x8e8] sm:$0xff] }
 0x30b   : > { %v639_v37 = vld [vmem:[%s12581_s22 + $0x860] sm:$0xff] }
 0x30d   : > { %3767 = vmatpush1.bf16.msra.mxu0 %v11827_v48  ;;  %5179 = vmatpush1.bf16.msra.mxu1 %v11830_v49  ;;  %v536_v48 = vld [vmem:[%s12581_s22 + $0x528] sm:$0xff] }
 0x30e   : > { %3768 = vmatprep.subr.bf16.mxu0 %v11835_v50  ;;  %5180 = vmatprep.subr.bf16.mxu1 %v11838_v51  ;;  %v544_v49 = vld [vmem:[%s12581_s22 + $0x568] sm:$0xff]  ;;  %v959_v50 = vpack.c.bf16 %v527_v46, %v519_v45  ;;  %v11898_v45 = vld [vmem:[#allocation8 + $0xc] ss:$16 sps:$4 sm:$0xff]  }
 0x30f   : > { %3466 = vmatmul.mubr.bf16.gmra.mrb[12].mxu0 %v911_v52  ;;  %4878 = vmatmul.mubr.bf16.gmra.mrb[12].mxu1 %v911_v52  ;;  %v968_v51 = vpack.c.bf16 %v544_v49, %v536_v48  ;;  %v535_v52 = vld [vmem:[%s12581_s22 + $0x520] sm:$0xff]  ;;  %v664_v46 = vld [vmem:[%s12581_s22 + $0x928] sm:$0xff] }
 0x310   : > { %3475 = vmatprep.mubr.bf16.mxu0 %v920_v53  ;;  %4887 = vmatprep.mubr.bf16.mxu1 %v920_v53  ;;  %v543_v53 = vld [vmem:[%s12581_s22 + $0x560] sm:$0xff] }
 0x311   : > { %3769 = vmatpush1.bf16.msra.mxu0 %v11833_v54  ;;  %5181 = vmatpush1.bf16.msra.mxu1 %v11836_v55  ;;  %v552_v54 = vld [vmem:[%s12581_s22 + $0x5a8] sm:$0xff] }
 0x312   : > { %3770 = vmatprep.subr.bf16.mxu0 %v11841_v56  ;;  %5182 = vmatprep.subr.bf16.mxu1 %v11844_v57  ;;  %v560_v55 = vld [vmem:[%s12581_s22 + $0x5e8] sm:$0xff]  ;;  %v967_v56 = vpack.c.bf16 %v543_v53, %v535_v52 }
 0x313   : > { %v976_v57 = vpack.c.bf16 %v560_v55, %v552_v54  ;;  %v680_v52 = vld [vmem:[%s12581_s22 + $0x9a8] sm:$0xff] }
 0x314   : > { %v688_v53 = vld [vmem:[%s12581_s22 + $0x9e8] sm:$0xff] }
 0x315   : > { %3771 = vmatpush1.bf16.msra.mxu0 %v11839_v62  ;;  %5183 = vmatpush1.bf16.msra.mxu1 %v11842_v63  ;;  %v559_v62 = vld [vmem:[%s12581_s22 + $0x5e0] sm:$0xff]  ;;  %v11880_v63 = vld [vmem:[#allocation5 + $0x7ac] ss:$16 sps:$4 sm:$0xff]   ;;  %v1040_v55 = vpack.c.bf16 %v688_v53, %v680_v52 }
 0x316   : > { %3772 = vmatprep.subr.bf16.mxu0 %v11847_v0  ;;  %5184 = vmatprep.subr.bf16.mxu1 %v11850_v1  ;;  %v568_v0 = vld [vmem:[%s12581_s22 + $0x628] sm:$0xff]  ;;  %v839_v52 = vld [vmem:[%s12581_s22 + $0xea0] sm:$0xff] }
 0x317   : > { %3476 = vmatmul.mubr.bf16.gmra.mrb[16].mxu0 %v919_v2  ;;  %4888 = vmatmul.mubr.bf16.gmra.mrb[16].mxu1 %v919_v2  ;;  %v576_v1 = vld [vmem:[%s12581_s22 + $0x668] sm:$0xff]  ;;  %v975_v2 = vpack.c.bf16 %v559_v62, %v551_v61  ;;  %v695_v62 = vld [vmem:[%s12581_s22 + $0xa20] sm:$0xff] }
 0x318   : > { %3485 = vmatprep.mubr.bf16.mxu0 %v928_v3  ;;  %4897 = vmatprep.mubr.bf16.mxu1 %v928_v3  ;;  %v984_v3 = vpack.c.bf16 %v576_v1, %v568_v0  ;;  %v712_v0 = vld [vmem:[%s12581_s22 + $0xaa8] sm:$0xff]  ;;  %v847_v53 = vld [vmem:[%s12581_s22 + $0xee0] sm:$0xff] }
 0x319   : > { %3773 = vmatpush1.bf16.msra.mxu0 %v11845_v4  ;;  %5185 = vmatpush1.bf16.msra.mxu1 %v11848_v5  ;;  %v567_v4 = vld [vmem:[%s12581_s22 + $0x620] sm:$0xff]  ;;  %v720_v1 = vld [vmem:[%s12581_s22 + $0xae8] sm:$0xff] }
 0x31a   : > { %3774 = vmatprep.subr.bf16.mxu0 %v11853_v6  ;;  %5186 = vmatprep.subr.bf16.mxu1 %v11856_v7  ;;  %v575_v5 = vld [vmem:[%s12581_s22 + $0x660] sm:$0xff]  ;;  %v584_v6 = vld [vmem:[%s12581_s22 + $0x6a8] sm:$0xff] }
 0x31b   : > { %v592_v7 = vld [vmem:[%s12581_s22 + $0x6e8] sm:$0xff]  ;;  %v983_v8 = vpack.c.bf16 %v575_v5, %v567_v4  ;;  %v711_v4 = vld [vmem:[%s12581_s22 + $0xaa0] sm:$0xff] }
 0x31c   : > { %v992_v9 = vpack.c.bf16 %v592_v7, %v584_v6  ;;  %v719_v5 = vld [vmem:[%s12581_s22 + $0xae0] sm:$0xff]  ;;  %v728_v6 = vld [vmem:[%s12581_s22 + $0xb28] sm:$0xff] }
 0x31d   : > { %3775 = vmatpush1.bf16.msra.mxu0 %v11851_v12  ;;  %5187 = vmatpush1.bf16.msra.mxu1 %v11854_v13  ;;  %v11884_v12 = vld [vmem:[#allocation5 + $0x7c8] ss:$16 sps:$4 sm:$0xff]   ;;  %v583_v13 = vld [vmem:[%s12581_s22 + $0x6a0] sm:$0xff] }
 0x31e   : > { %3776 = vmatprep.subr.bf16.mxu0 %v11859_v14  ;;  %5188 = vmatprep.subr.bf16.mxu1 %v11862_v15  ;;  %v591_v14 = vld [vmem:[%s12581_s22 + $0x6e0] sm:$0xff]  ;;  %v11886_v15 = vld [vmem:[#allocation5 + $0x7cc] ss:$16 sps:$4 sm:$0xff]  }
 0x31f   : > { %3486 = vmatmul.mubr.bf16.gmra.mrb[20].mxu0 %v927_v16  ;;  %4898 = vmatmul.mubr.bf16.gmra.mrb[20].mxu1 %v927_v16  ;;  %v600_v16 = vld [vmem:[%s12581_s22 + $0x728] sm:$0xff] }
 0x320   : > { %3495 = vmatprep.mubr.bf16.mxu0 %v936_v17  ;;  %4907 = vmatprep.mubr.bf16.mxu1 %v936_v17  ;;  %v608_v17 = vld [vmem:[%s12581_s22 + $0x768] sm:$0xff] }
 0x321   : > { %3777 = vmatpush1.bf16.msra.mxu0 %v11857_v18  ;;  %5189 = vmatpush1.bf16.msra.mxu1 %v11860_v19  ;;  %v991_v18 = vpack.c.bf16 %v591_v14, %v583_v13  ;;  %v1000_v19 = vpack.c.bf16 %v608_v17, %v600_v16  ;;  %v736_v7 = vld [vmem:[%s12581_s22 + $0xb68] sm:$0xff]  ;;  %v743_v16 = vld [vmem:[%s12581_s22 + $0xba0] sm:$0xff] }
 0x322   : > { %3778 = vmatprep.subr.bf16.mxu0 %v11865_v27  ;;  %5190 = vmatprep.subr.bf16.mxu1 %v11868_v31  ;;  %v11889_v27 = vld [vmem:[#allocation5 + $0x7e4] ss:$16 sps:$4 sm:$0xff]   ;;  %v11892_v31 = vld [vmem:[#allocation5 + $0x7ec] ss:$16 sps:$4 sm:$0xff]  }
 0x323   : > { %v752_v13 = vld [vmem:[%s12581_s22 + $0xbe8] sm:$0xff]  ;;  %v751_v17 = vld [vmem:[%s12581_s22 + $0xbe0] sm:$0xff] }
 0x325   : > { %3779 = vmatpush1.bf16.msra.mxu0 %v11863_v26  ;;  %5191 = vmatpush1.bf16.msra.mxu1 %v11866_v28  ;;  %v11887_v26 = vld [vmem:[#allocation5 + $0x7e0] ss:$16 sps:$4 sm:$0xff]   ;;  %v11890_v28 = vld [vmem:[#allocation5 + $0x7e8] ss:$16 sps:$4 sm:$0xff]  }
 0x326   : > { %3780 = vmatprep.subr.bf16.mxu0 %v11871_v43  ;;  %5192 = vmatprep.subr.bf16.mxu1 %v11874_v47  ;;  %v647_v43 = vld [vmem:[%s12581_s22 + $0x8a0] sm:$0xff]  ;;  %v672_v47 = vld [vmem:[%s12581_s22 + $0x968] sm:$0xff] }
 0x327   : > { %3496 = vmatmul.mubr.bf16.gmra.mrb[24].mxu0 %v935_v24  ;;  %4908 = vmatmul.mubr.bf16.gmra.mrb[24].mxu1 %v935_v24  ;;  %v999_v24 = vpack.c.bf16 %v607_v21, %v599_v20  ;;  %v1032_v49 = vpack.c.bf16 %v672_v47, %v664_v46  ;;  %v1071_v20 = vpack.c.bf16 %v751_v17, %v743_v16  ;;  %v823_v46 = vld [vmem:[%s12581_s22 + $0xe20] sm:$0xff]  ;;  %v393_v16 = vld [vmem:[%s12581_s22 + $0xb0] sm:$0xff] }
 0x328   : > { %3505 = vmatprep.mubr.bf16.mxu0 %v944_v25  ;;  %4917 = vmatprep.mubr.bf16.mxu1 %v944_v25  ;;  %v1008_v25 = vpack.c.bf16 %v624_v23, %v616_v22  ;;  %v759_v22 = vld [vmem:[%s12581_s22 + $0xc20] sm:$0xff]  ;;  %v401_v17 = vld [vmem:[%s12581_s22 + $0xf0] sm:$0xff] }
 0x329   : > { %3781 = vmatpush1.bf16.msra.mxu0 %v11869_v42  ;;  %5193 = vmatpush1.bf16.msra.mxu1 %v11872_v44  ;;  %v11895_v42 = vld [vmem:[#allocation8 + $0x4] ss:$16 sps:$4 sm:$0xff]   ;;  %v655_v44 = vld [vmem:[%s12581_s22 + $0x8e0] sm:$0xff] }
 0x32a   : > { %3782 = vmatprep.subr.bf16.mxu0 %v11877_v59  ;;  %5194 = vmatprep.subr.bf16.mxu1 %v11880_v63  ;;  %v1023_v48 = vpack.c.bf16 %v655_v44, %v647_v43  ;;  %v704_v59 = vld [vmem:[%s12581_s22 + $0xa68] sm:$0xff]  ;;  %v703_v63 = vld [vmem:[%s12581_s22 + $0xa60] sm:$0xff] }
 0x32b   : > { %v767_v23 = vld [vmem:[%s12581_s22 + $0xc60] sm:$0xff]  ;;  %v832_v43 = vld [vmem:[%s12581_s22 + $0xe68] sm:$0xff] }
 0x32c   : > { %v831_v47 = vld [vmem:[%s12581_s22 + $0xe60] sm:$0xff] }
 0x32d   : > { %3783 = vmatpush1.bf16.msra.mxu0 %v11875_v58  ;;  %5195 = vmatpush1.bf16.msra.mxu1 %v11878_v60  ;;  %v696_v58 = vld [vmem:[%s12581_s22 + $0xa28] sm:$0xff] }
 0x32e   : > { %3784 = vmatprep.subr.bf16.mxu0 %v11883_v11  ;;  %5196 = vmatprep.subr.bf16.mxu1 %v11886_v15  ;;  %v1048_v61 = vpack.c.bf16 %v704_v59, %v696_v58  ;;  %v735_v11 = vld [vmem:[%s12581_s22 + $0xb60] sm:$0xff] }
 0x32f   : > { %3506 = vmatmul.mubr.bf16.gmra.mrb[28].mxu0 %v943_v34  ;;  %4918 = vmatmul.mubr.bf16.gmra.mrb[28].mxu1 %v943_v34  ;;  %v1007_v34 = vpack.c.bf16 %v623_v30, %v615_v29  ;;  %v783_v29 = vld [vmem:[%s12581_s22 + $0xce0] sm:$0xff]  ;;  %v792_v30 = vld [vmem:[%s12581_s22 + $0xd28] sm:$0xff] }
 0x330   : > { %3515 = vmatprep.mubr.bf16.mxu0 %v952_v35  ;;  %4927 = vmatprep.mubr.bf16.mxu1 %v952_v35  ;;  %v1016_v35 = vpack.c.bf16 %v640_v33, %v632_v32  ;;  %v855_v58 = vld [vmem:[%s12581_s22 + $0xf20] sm:$0xff] }
 0x331   : > { %3785 = vmatpush1.bf16.msra.mxu0 %v11881_v10  ;;  %5197 = vmatpush1.bf16.msra.mxu1 %v11884_v12  ;;  %v727_v10 = vld [vmem:[%s12581_s22 + $0xb20] sm:$0xff]  ;;  %v744_v12 = vld [vmem:[%s12581_s22 + $0xba8] sm:$0xff] }
 0x332   : > { %3786 = vmatprep.subr.bf16.mxu0 %v11889_v27  ;;  %5198 = vmatprep.subr.bf16.mxu1 %v11892_v31  ;;  %v1063_v14 = vpack.c.bf16 %v735_v11, %v727_v10  ;;  %v1072_v15 = vpack.c.bf16 %v752_v13, %v744_v12  ;;  %v800_v31 = vld [vmem:[%s12581_s22 + $0xd68] sm:$0xff]  ;;  %v863_v59 = vld [vmem:[%s12581_s22 + $0xf60] sm:$0xff] }
 0x333   : > { %v1096_v33 = vpack.c.bf16 %v800_v31, %v792_v30  ;;  %v11893_v11 = vld [vmem:[#allocation8] ss:$16 sps:$4 sm:$0xff]   ;;  %v11896_v12 = vld [vmem:[#allocation8 + $0x8] ss:$16 sps:$4 sm:$0xff]  }
 0x334   : > { %v409_v30 = vld [vmem:[%s12581_s22 + $0x130] sm:$0xff] }
 0x335   : > { %3787 = vmatpush1.bf16.msra.mxu0 %v11887_v26  ;;  %5199 = vmatpush1.bf16.msra.mxu1 %v11890_v28  ;;  %v1079_v26 = vpack.c.bf16 %v767_v23, %v759_v22  ;;  %v775_v28 = vld [vmem:[%s12581_s22 + $0xca0] sm:$0xff]  ;;  %v11907_v22 = vld [vmem:[#allocation8 + $0x44] ss:$16 sps:$4 sm:$0xff]   ;;  %v417_v31 = vld [vmem:[%s12581_s22 + $0x170] sm:$0xff] }
 0x336   : > { %6695 = vmatprep.subr.bf16.mxu0 %v11895_v42  ;;  %7401 = vmatprep.subr.bf16.mxu1 %v11898_v45  ;;  %v1087_v32 = vpack.c.bf16 %v783_v29, %v775_v28  ;;  %v824_v42 = vld [vmem:[%s12581_s22 + $0xe28] sm:$0xff]  ;;  %v11910_v23 = vld [vmem:[#allocation8 + $0x4c] ss:$16 sps:$4 sm:$0xff]  }
 0x337   : > { %3516 = vmatmul.mubr.bf16.gmra.mrb[32].mxu0 %v951_v40  ;;  %4928 = vmatmul.mubr.bf16.gmra.mrb[32].mxu1 %v951_v40  ;;  %v1015_v40 = vpack.c.bf16 %v639_v37, %v631_v36  ;;  %v808_v36 = vld [vmem:[%s12581_s22 + $0xda8] sm:$0xff]  ;;  %v1112_v45 = vpack.c.bf16 %v832_v43, %v824_v42  ;;  %v11916_v29 = vld [vmem:[#allocation8 + $0x6c] ss:$16 sps:$4 sm:$0xff]  }
 0x338   : > { %3525 = vmatprep.mubr.bf16.mxu0 %v960_v41  ;;  %4937 = vmatprep.mubr.bf16.mxu1 %v960_v41  ;;  %v1024_v41 = vpack.c.bf16 %v656_v39, %v648_v38  ;;  %v816_v37 = vld [vmem:[%s12581_s22 + $0xde8] sm:$0xff]  ;;  %v11928_v43 = vld [vmem:[#allocation8 + $0xac] ss:$16 sps:$4 sm:$0xff]  }
 0x339   : > { %v1104_v39 = vpack.c.bf16 %v816_v37, %v808_v36  ;;  %v11913_v28 = vld [vmem:[#allocation8 + $0x64] ss:$16 sps:$4 sm:$0xff]   ;;  %v11922_v37 = vld [vmem:[#allocation8 + $0x8c] ss:$16 sps:$4 sm:$0xff]  }
 0x33a   : > { %v11919_v36 = vld [vmem:[#allocation8 + $0x84] ss:$16 sps:$4 sm:$0xff]  }
 0x33b   : > { %v11925_v42 = vld [vmem:[#allocation8 + $0xa4] ss:$16 sps:$4 sm:$0xff]  }
 0x33f   : > { %3526 = vmatmul.mubr.bf16.gmra.mrb[36].mxu0 %v959_v50  ;;  %4938 = vmatmul.mubr.bf16.gmra.mrb[36].mxu1 %v959_v50  ;;  %v663_v50 = vld [vmem:[%s12581_s22 + $0x920] sm:$0xff] }
 0x340   : > { %3535 = vmatprep.mubr.bf16.mxu0 %v968_v51  ;;  %4947 = vmatprep.mubr.bf16.mxu1 %v968_v51  ;;  %v671_v51 = vld [vmem:[%s12581_s22 + $0x960] sm:$0xff] }
 0x341   : > { %v1031_v54 = vpack.c.bf16 %v671_v51, %v663_v50  ;;  %v1111_v50 = vpack.c.bf16 %v831_v47, %v823_v46  ;;  %v442_v46 = vld [vmem:[%s12581_s22 + $0x238] sm:$0xff] }
 0x342   : > { %v450_v47 = vld [vmem:[%s12581_s22 + $0x278] sm:$0xff] }
 0x347   : > { %3536 = vmatmul.mubr.bf16.gmra.mrb[40].mxu0 %v967_v56  ;;  %4948 = vmatmul.mubr.bf16.gmra.mrb[40].mxu1 %v967_v56  ;;  %v679_v56 = vld [vmem:[%s12581_s22 + $0x9a0] sm:$0xff] }
 0x348   : > { %3545 = vmatprep.mubr.bf16.mxu0 %v976_v57  ;;  %4957 = vmatprep.mubr.bf16.mxu1 %v976_v57  ;;  %v687_v57 = vld [vmem:[%s12581_s22 + $0x9e0] sm:$0xff] }
 0x349   : > { %v1039_v60 = vpack.c.bf16 %v687_v57, %v679_v56  ;;  %v1119_v56 = vpack.c.bf16 %v847_v53, %v839_v52  ;;  %v922_v53 = vpack.c.bf16 %v450_v47, %v442_v46  ;;  %v529_v46 = vld [vmem:[%s12581_s22 + $0x4f0] sm:$0xff] }
 0x34a   : > { %v11970_v47 = vld [vmem:[#allocation8 + $0x18c] ss:$16 sps:$4 sm:$0xff]  }
 0x34f   : > { %3546 = vmatmul.mubr.bf16.gmra.mrb[44].mxu0 %v975_v2  ;;  %4958 = vmatmul.mubr.bf16.gmra.mrb[44].mxu1 %v975_v2  ;;  %v1047_v2 = vpack.c.bf16 %v703_v63, %v695_v62  ;;  %v1127_v62 = vpack.c.bf16 %v863_v59, %v855_v58  ;;  %v441_v58 = vld [vmem:[%s12581_s22 + $0x230] sm:$0xff] }
 0x350   : > { %3555 = vmatprep.mubr.bf16.mxu0 %v984_v3  ;;  %4967 = vmatprep.mubr.bf16.mxu1 %v984_v3  ;;  %v1056_v3 = vpack.c.bf16 %v720_v1, %v712_v0  ;;  %v871_v0 = vld [vmem:[%s12581_s22 + $0xfa0] sm:$0xff]  ;;  %v449_v59 = vld [vmem:[%s12581_s22 + $0x270] sm:$0xff] }
 0x351   : > { %v879_v1 = vld [vmem:[%s12581_s22 + $0xfe0] sm:$0xff] }
 0x357   : > { %3556 = vmatmul.mubr.bf16.gmra.mrb[48].mxu0 %v983_v8  ;;  %4968 = vmatmul.mubr.bf16.gmra.mrb[48].mxu1 %v983_v8  ;;  %v1055_v8 = vpack.c.bf16 %v719_v5, %v711_v4  ;;  %v1135_v4 = vpack.c.bf16 %v879_v1, %v871_v0  ;;  %v11943_v0 = vld [vmem:[#allocation8 + $0x104] ss:$16 sps:$4 sm:$0xff]   ;;  %v11946_v1 = vld [vmem:[#allocation8 + $0x10c] ss:$16 sps:$4 sm:$0xff]  }
 0x358   : > { %3565 = vmatprep.mubr.bf16.mxu0 %v992_v9  ;;  %4977 = vmatprep.mubr.bf16.mxu1 %v992_v9  ;;  %v1064_v9 = vpack.c.bf16 %v736_v7, %v728_v6  ;;  %v377_v6 = vld [vmem:[%s12581_s22 + $0x30] sm:$0xff] }
 0x359   : > { %v385_v7 = vld [vmem:[%s12581_s22 + $0x70] sm:$0xff] }
 0x35a   : > { %v889_v10 = vpack.c.bf16 %v385_v7, %v377_v6  ;;  %v11949_v6 = vld [vmem:[#allocation8 + $0x124] ss:$16 sps:$4 sm:$0xff]   ;;  %v11952_v7 = vld [vmem:[#allocation8 + $0x12c] ss:$16 sps:$4 sm:$0xff]  }
 0x35f   : > { %3566 = vmatmul.mubr.bf16.gmra.mrb[52].mxu0 %v991_v18  ;;  %4978 = vmatmul.mubr.bf16.gmra.mrb[52].mxu1 %v991_v18  ;;  %v760_v18 = vld [vmem:[%s12581_s22 + $0xc28] sm:$0xff] }
 0x360   : > { %3575 = vmatprep.mubr.bf16.mxu0 %v1000_v19  ;;  %4987 = vmatprep.mubr.bf16.mxu1 %v1000_v19  ;;  %v768_v19 = vld [vmem:[%s12581_s22 + $0xc68] sm:$0xff] }
 0x361   : > { %v1080_v21 = vpack.c.bf16 %v768_v19, %v760_v18  ;;  %v410_v18 = vld [vmem:[%s12581_s22 + $0x138] sm:$0xff]  ;;  %v11899_v19 = vld [vmem:[#allocation8 + $0x20] ss:$16 sps:$4 sm:$0xff]  }
 0x367   : > { %3576 = vmatmul.mubr.bf16.gmra.mrb[56].mxu0 %v999_v24  ;;  %4988 = vmatmul.mubr.bf16.gmra.mrb[56].mxu1 %v999_v24  ;;  %v776_v24 = vld [vmem:[%s12581_s22 + $0xca8] sm:$0xff] }
 0x368   : > { %3585 = vmatprep.mubr.bf16.mxu0 %v1008_v25  ;;  %4997 = vmatprep.mubr.bf16.mxu1 %v1008_v25  ;;  %v784_v25 = vld [vmem:[%s12581_s22 + $0xce8] sm:$0xff] }
 0x369   : > { %v1088_v27 = vpack.c.bf16 %v784_v25, %v776_v24  ;;  %v897_v24 = vpack.c.bf16 %v401_v17, %v393_v16 }
 0x36f   : > { %3586 = vmatmul.mubr.bf16.gmra.mrb[60].mxu0 %v1007_v34  ;;  %4998 = vmatmul.mubr.bf16.gmra.mrb[60].mxu1 %v1007_v34  ;;  %v791_v34 = vld [vmem:[%s12581_s22 + $0xd20] sm:$0xff] }
 0x370   : > { %3595 = vmatprep.mubr.bf16.mxu0 %v1016_v35  ;;  %5007 = vmatprep.mubr.bf16.mxu1 %v1016_v35  ;;  %v799_v35 = vld [vmem:[%s12581_s22 + $0xd60] sm:$0xff] }
 0x371   : > { %v1095_v38 = vpack.c.bf16 %v799_v35, %v791_v34  ;;  %v11911_v34 = vld [vmem:[#allocation8 + $0x60] ss:$16 sps:$4 sm:$0xff]   ;;  %v11914_v35 = vld [vmem:[#allocation8 + $0x68] ss:$16 sps:$4 sm:$0xff]  }
 0x377   : > { %3596 = vmatmul.mubr.bf16.gmra.mrb[64].mxu0 %v1015_v40  ;;  %5008 = vmatmul.mubr.bf16.gmra.mrb[64].mxu1 %v1015_v40  ;;  %v807_v40 = vld [vmem:[%s12581_s22 + $0xda0] sm:$0xff] }
 0x378   : > { %3605 = vmatprep.mubr.bf16.mxu0 %v1024_v41  ;;  %5017 = vmatprep.mubr.bf16.mxu1 %v1024_v41  ;;  %v815_v41 = vld [vmem:[%s12581_s22 + $0xde0] sm:$0xff] }
 0x379   : > { %v1103_v44 = vpack.c.bf16 %v815_v41, %v807_v40  ;;  %v11917_v40 = vld [vmem:[#allocation8 + $0x80] ss:$16 sps:$4 sm:$0xff]   ;;  %v11920_v41 = vld [vmem:[#allocation8 + $0x88] ss:$16 sps:$4 sm:$0xff]  }
 0x37f   : > { %3606 = vmatmul.mubr.bf16.gmra.mrb[68].mxu0 %v1023_v48  ;;  %5018 = vmatmul.mubr.bf16.gmra.mrb[68].mxu1 %v1023_v48  ;;  %v840_v48 = vld [vmem:[%s12581_s22 + $0xea8] sm:$0xff] }
 0x380   : > { %3615 = vmatprep.mubr.bf16.mxu0 %v1032_v49  ;;  %5027 = vmatprep.mubr.bf16.mxu1 %v1032_v49  ;;  %v848_v49 = vld [vmem:[%s12581_s22 + $0xee8] sm:$0xff] }
 0x381   : > { %v1120_v51 = vpack.c.bf16 %v848_v49, %v840_v48  ;;  %v11923_v48 = vld [vmem:[#allocation8 + $0xa0] ss:$16 sps:$4 sm:$0xff]   ;;  %v11926_v49 = vld [vmem:[#allocation8 + $0xa8] ss:$16 sps:$4 sm:$0xff]  }
 0x387   : > { %3616 = vmatmul.mubr.bf16.gmra.mrb[72].mxu0 %v1031_v54  ;;  %5028 = vmatmul.mubr.bf16.gmra.mrb[72].mxu1 %v1031_v54  ;;  %v856_v54 = vld [vmem:[%s12581_s22 + $0xf28] sm:$0xff] }
 0x388   : > { %3625 = vmatprep.mubr.bf16.mxu0 %v1040_v55  ;;  %5037 = vmatprep.mubr.bf16.mxu1 %v1040_v55  ;;  %v864_v55 = vld [vmem:[%s12581_s22 + $0xf68] sm:$0xff] }
 0x389   : > { %v1128_v57 = vpack.c.bf16 %v864_v55, %v856_v54  ;;  %v11929_v54 = vld [vmem:[#allocation8 + $0xc0] ss:$16 sps:$4 sm:$0xff]   ;;  %v11932_v55 = vld [vmem:[#allocation8 + $0xc8] ss:$16 sps:$4 sm:$0xff]  }
 0x38f   : > { %3626 = vmatmul.mubr.bf16.gmra.mrb[76].mxu0 %v1039_v60  ;;  %5038 = vmatmul.mubr.bf16.gmra.mrb[76].mxu1 %v1039_v60  ;;  %v872_v60 = vld [vmem:[%s12581_s22 + $0xfa8] sm:$0xff] }
 0x390   : > { %3635 = vmatprep.mubr.bf16.mxu0 %v1048_v61  ;;  %5047 = vmatprep.mubr.bf16.mxu1 %v1048_v61  ;;  %v880_v61 = vld [vmem:[%s12581_s22 + $0xfe8] sm:$0xff] }
 0x391   : > { %v1136_v63 = vpack.c.bf16 %v880_v61, %v872_v60  ;;  %v458_v60 = vld [vmem:[%s12581_s22 + $0x2b8] sm:$0xff] }
 0x392   : > { %v466_v61 = vld [vmem:[%s12581_s22 + $0x2f8] sm:$0xff] }
 0x397   : > { %3636 = vmatmul.mubr.bf16.gmra.mrb[80].mxu0 %v1047_v2  ;;  %5048 = vmatmul.mubr.bf16.gmra.mrb[80].mxu1 %v1047_v2  ;;  %v378_v2 = vld [vmem:[%s12581_s22 + $0x38] sm:$0xff] }
 0x398   : > { %3645 = vmatprep.mubr.bf16.mxu0 %v1056_v3  ;;  %5057 = vmatprep.mubr.bf16.mxu1 %v1056_v3  ;;  %v386_v3 = vld [vmem:[%s12581_s22 + $0x78] sm:$0xff] }
 0x399   : > { %v890_v5 = vpack.c.bf16 %v386_v3, %v378_v2  ;;  %v921_v2 = vpack.c.bf16 %v449_v59, %v441_v58  ;;  %v930_v3 = vpack.c.bf16 %v466_v61, %v458_v60  ;;  %v11971_v58 = vld [vmem:[#allocation8 + $0x1a0] ss:$16 sps:$4 sm:$0xff]   ;;  %v11973_v59 = vld [vmem:[#allocation8 + $0x1a4] ss:$16 sps:$4 sm:$0xff]  }
 0x39a   : > { %v553_v60 = vld [vmem:[%s12581_s22 + $0x5b0] sm:$0xff] }
 0x39b   : > { %v561_v61 = vld [vmem:[%s12581_s22 + $0x5f0] sm:$0xff] }
 0x39f   : > { %3646 = vmatmul.mubr.bf16.gmra.mrb[84].mxu0 %v1055_v8  ;;  %5058 = vmatmul.mubr.bf16.gmra.mrb[84].mxu1 %v1055_v8  ;;  %v394_v8 = vld [vmem:[%s12581_s22 + $0xb8] sm:$0xff] }
 0x3a0   : > { %3655 = vmatprep.mubr.bf16.mxu0 %v1064_v9  ;;  %5067 = vmatprep.mubr.bf16.mxu1 %v1064_v9  ;;  %v402_v9 = vld [vmem:[%s12581_s22 + $0xf8] sm:$0xff] }
 0x3a1   : > { %v898_v13 = vpack.c.bf16 %v402_v9, %v394_v8  ;;  %v457_v8 = vld [vmem:[%s12581_s22 + $0x2b0] sm:$0xff] }
 0x3a2   : > { %v465_v9 = vld [vmem:[%s12581_s22 + $0x2f0] sm:$0xff] }
 0x3a3   : > { %v929_v16 = vpack.c.bf16 %v465_v9, %v457_v8 }
 0x3a7   : > { %3656 = vmatmul.mubr.bf16.gmra.mrb[88].mxu0 %v1063_v14  ;;  %5068 = vmatmul.mubr.bf16.gmra.mrb[88].mxu1 %v1063_v14  ;;  %v11901_v14 = vld [vmem:[#allocation8 + $0x24] ss:$16 sps:$4 sm:$0xff]  }
 0x3a8   : > { %3665 = vmatprep.mubr.bf16.mxu0 %v1072_v15  ;;  %5077 = vmatprep.mubr.bf16.mxu1 %v1072_v15  ;;  %v11904_v15 = vld [vmem:[#allocation8 + $0x2c] ss:$16 sps:$4 sm:$0xff]  }
 0x3af   : > { %3666 = vmatmul.mubr.bf16.gmra.mrb[92].mxu0 %v1071_v20  ;;  %5078 = vmatmul.mubr.bf16.gmra.mrb[92].mxu1 %v1071_v20  ;;  %v11902_v20 = vld [vmem:[#allocation8 + $0x28] ss:$16 sps:$4 sm:$0xff]  }
 0x3b0   : > { %3675 = vmatprep.mubr.bf16.mxu0 %v1080_v21  ;;  %5087 = vmatprep.mubr.bf16.mxu1 %v1080_v21  ;;  %v418_v21 = vld [vmem:[%s12581_s22 + $0x178] sm:$0xff] }
 0x3b1   : > { %v906_v25 = vpack.c.bf16 %v418_v21, %v410_v18  ;;  %v11953_v18 = vld [vmem:[#allocation8 + $0x140] ss:$16 sps:$4 sm:$0xff]  }
 0x3b2   : > { %v481_v21 = vld [vmem:[%s12581_s22 + $0x370] sm:$0xff] }
 0x3b7   : > { %3676 = vmatmul.mubr.bf16.gmra.mrb[96].mxu0 %v1079_v26  ;;  %5088 = vmatmul.mubr.bf16.gmra.mrb[96].mxu1 %v1079_v26  ;;  %v11905_v26 = vld [vmem:[#allocation8 + $0x40] ss:$16 sps:$4 sm:$0xff]  }
 0x3b8   : > { %3685 = vmatprep.mubr.bf16.mxu0 %v1088_v27  ;;  %5097 = vmatprep.mubr.bf16.mxu1 %v1088_v27  ;;  %v11908_v27 = vld [vmem:[#allocation8 + $0x48] ss:$16 sps:$4 sm:$0xff]  }
 0x3bf   : > { %3686 = vmatmul.mubr.bf16.gmra.mrb[100].mxu0 %v1087_v32  ;;  %5098 = vmatmul.mubr.bf16.gmra.mrb[100].mxu1 %v1087_v32  ;;  %v426_v32 = vld [vmem:[%s12581_s22 + $0x1b8] sm:$0xff] }
 0x3c0   : > { %3695 = vmatprep.mubr.bf16.mxu0 %v1096_v33  ;;  %5107 = vmatprep.mubr.bf16.mxu1 %v1096_v33  ;;  %v434_v33 = vld [vmem:[%s12581_s22 + $0x1f8] sm:$0xff] }
 0x3c7   : > { %3696 = vmatmul.mubr.bf16.gmra.mrb[104].mxu0 %v1095_v38  ;;  %5108 = vmatmul.mubr.bf16.gmra.mrb[104].mxu1 %v1095_v38  ;;  %v905_v38 = vpack.c.bf16 %v417_v31, %v409_v30  ;;  %v497_v30 = vld [vmem:[%s12581_s22 + $0x3f0] sm:$0xff] }
 0x3c8   : > { %3705 = vmatprep.mubr.bf16.mxu0 %v1104_v39  ;;  %5117 = vmatprep.mubr.bf16.mxu1 %v1104_v39  ;;  %v914_v39 = vpack.c.bf16 %v434_v33, %v426_v32  ;;  %v11964_v31 = vld [vmem:[#allocation8 + $0x16c] ss:$16 sps:$4 sm:$0xff]   ;;  %v506_v32 = vld [vmem:[%s12581_s22 + $0x438] sm:$0xff] }
 0x3c9   : > { %v514_v33 = vld [vmem:[%s12581_s22 + $0x478] sm:$0xff] }
 0x3cf   : > { %3706 = vmatmul.mubr.bf16.gmra.mrb[108].mxu0 %v1103_v44  ;;  %5118 = vmatmul.mubr.bf16.gmra.mrb[108].mxu1 %v1103_v44  ;;  %v425_v44 = vld [vmem:[%s12581_s22 + $0x1b0] sm:$0xff] }
 0x3d0   : > { %3715 = vmatprep.mubr.bf16.mxu0 %v1112_v45  ;;  %5127 = vmatprep.mubr.bf16.mxu1 %v1112_v45  ;;  %v433_v45 = vld [vmem:[%s12581_s22 + $0x1f0] sm:$0xff] }
 0x3d1   : > { %v913_v52 = vpack.c.bf16 %v433_v45, %v425_v44  ;;  %v11968_v44 = vld [vmem:[#allocation8 + $0x188] ss:$16 sps:$4 sm:$0xff]   ;;  %v521_v45 = vld [vmem:[%s12581_s22 + $0x4b0] sm:$0xff] }
 0x3d7   : > { %3716 = vmatmul.mubr.bf16.gmra.mrb[112].mxu0 %v1111_v50  ;;  %5128 = vmatmul.mubr.bf16.gmra.mrb[112].mxu1 %v1111_v50  ;;  %v11931_v50 = vld [vmem:[#allocation8 + $0xc4] ss:$16 sps:$4 sm:$0xff]  }
 0x3d8   : > { %3725 = vmatprep.mubr.bf16.mxu0 %v1120_v51  ;;  %5137 = vmatprep.mubr.bf16.mxu1 %v1120_v51  ;;  %v11934_v51 = vld [vmem:[#allocation8 + $0xcc] ss:$16 sps:$4 sm:$0xff]  }
 0x3df   : > { %3726 = vmatmul.mubr.bf16.gmra.mrb[116].mxu0 %v1119_v56  ;;  %5138 = vmatmul.mubr.bf16.gmra.mrb[116].mxu1 %v1119_v56  ;;  %v11937_v56 = vld [vmem:[#allocation8 + $0xe4] ss:$16 sps:$4 sm:$0xff]  }
 0x3e0   : > { %3735 = vmatprep.mubr.bf16.mxu0 %v1128_v57  ;;  %5147 = vmatprep.mubr.bf16.mxu1 %v1128_v57  ;;  %v11940_v57 = vld [vmem:[#allocation8 + $0xec] ss:$16 sps:$4 sm:$0xff]  }
 0x3e7   : > { %3736 = vmatmul.mubr.bf16.gmra.mrb[120].mxu0 %v1127_v62  ;;  %5148 = vmatmul.mubr.bf16.gmra.mrb[120].mxu1 %v1127_v62  ;;  %v11935_v62 = vld [vmem:[#allocation8 + $0xe0] ss:$16 sps:$4 sm:$0xff]  }
 0x3e8   : > { %3745 = vmatprep.mubr.bf16.mxu0 %v1136_v63  ;;  %5157 = vmatprep.mubr.bf16.mxu1 %v1136_v63  ;;  %v11938_v63 = vld [vmem:[#allocation8 + $0xe8] ss:$16 sps:$4 sm:$0xff]  }
 0x3ef   : > { %3746 = vmatmul.mubr.bf16.gmra.mrb[124].mxu0 %v1135_v4  ;;  %5158 = vmatmul.mubr.bf16.gmra.mrb[124].mxu1 %v1135_v4  ;;  %v11941_v4 = vld [vmem:[#allocation8 + $0x100] ss:$16 sps:$4 sm:$0xff]  }
 0x3f0   : > { %3788 = vmatprep.mubr.bf16.mxu0 %v890_v5  ;;  %5200 = vmatprep.mubr.bf16.mxu1 %v890_v5  ;;  %v11944_v5 = vld [vmem:[#allocation8 + $0x108] ss:$16 sps:$4 sm:$0xff]  }
 0x3f7   : > { %3789 = vmatmul.mubr.bf16.vlgmr.msra.gmra.mrb[0].mxu0 %v889_v10  ;;  %5201 = vmatmul.mubr.bf16.vlgmr.msra.gmra.mrb[0].mxu1 %v889_v10  ;;  %v474_v10 = vld [vmem:[%s12581_s22 + $0x338] sm:$0xff] }
 0x3f8   : > { %6696 = vmatpush1.bf16.msra.mxu0 %v11893_v11  ;;  %7402 = vmatpush1.bf16.msra.mxu1 %v11896_v12  ;;  %v482_v11 = vld [vmem:[%s12581_s22 + $0x378] sm:$0xff]  ;;  %v11947_v12 = vld [vmem:[#allocation8 + $0x120] ss:$16 sps:$4 sm:$0xff]  }
 0x3f9   : > { %3798 = vmatprep.mubr.bf16.mxu0 %v898_v13  ;;  %5210 = vmatprep.mubr.bf16.mxu1 %v898_v13  ;;  %v11950_v13 = vld [vmem:[#allocation8 + $0x128] ss:$16 sps:$4 sm:$0xff]   ;;  %v938_v17 = vpack.c.bf16 %v482_v11, %v474_v10  ;;  %v585_v10 = vld [vmem:[%s12581_s22 + $0x6b0] sm:$0xff] }
 0x3fa   : > { %6697 = vmatprep.subr.bf16.mxu0 %v11901_v14  ;;  %7403 = vmatprep.subr.bf16.mxu1 %v11904_v15  ;;  %v11955_v14 = vld [vmem:[#allocation8 + $0x144] ss:$16 sps:$4 sm:$0xff]   ;;  %v11958_v15 = vld [vmem:[#allocation8 + $0x14c] ss:$16 sps:$4 sm:$0xff]  }
 0x3fb   : > { %v593_v11 = vld [vmem:[%s12581_s22 + $0x6f0] sm:$0xff] }
 0x3fc   : > { %6698 = vmatpush1.bf16.msra.mxu0 %v11899_v19  ;;  %7404 = vmatpush1.bf16.msra.mxu1 %v11902_v20  ;;  %v11956_v19 = vld [vmem:[#allocation8 + $0x148] ss:$16 sps:$4 sm:$0xff]   ;;  %v473_v20 = vld [vmem:[%s12581_s22 + $0x330] sm:$0xff] }
 0x3fd   : > { %6699 = vmatprep.subr.bf16.mxu0 %v11907_v22  ;;  %7405 = vmatprep.subr.bf16.mxu1 %v11910_v23  ;;  %v490_v22 = vld [vmem:[%s12581_s22 + $0x3b8] sm:$0xff] }
 0x3fe   : > { %v498_v23 = vld [vmem:[%s12581_s22 + $0x3f8] sm:$0xff] }
 0x3ff   : > { %3799 = vmatmul.mubr.bf16.gmra.mrb[4].mxu0 %v897_v24  ;;  %5211 = vmatmul.mubr.bf16.gmra.mrb[4].mxu1 %v897_v24  ;;  %v937_v24 = vpack.c.bf16 %v481_v21, %v473_v20  ;;  %v601_v20 = vld [vmem:[%s12581_s22 + $0x730] sm:$0xff] }
 0x400   : > { %3808 = vmatprep.mubr.bf16.mxu0 %v906_v25  ;;  %5220 = vmatprep.mubr.bf16.mxu1 %v906_v25  ;;  %v946_v25 = vpack.c.bf16 %v498_v23, %v490_v22  ;;  %v609_v21 = vld [vmem:[%s12581_s22 + $0x770] sm:$0xff]  ;;  %v618_v22 = vld [vmem:[%s12581_s22 + $0x7b8] sm:$0xff] }
 0x401   : > { %6700 = vmatpush1.bf16.msra.mxu0 %v11905_v26  ;;  %7406 = vmatpush1.bf16.msra.mxu1 %v11908_v27  ;;  %v11959_v26 = vld [vmem:[#allocation8 + $0x160] ss:$16 sps:$4 sm:$0xff]   ;;  %v11961_v27 = vld [vmem:[#allocation8 + $0x164] ss:$16 sps:$4 sm:$0xff]  }
 0x402   : > { %6701 = vmatprep.subr.bf16.mxu0 %v11913_v28  ;;  %7407 = vmatprep.subr.bf16.mxu1 %v11916_v29  ;;  %v11962_v28 = vld [vmem:[#allocation8 + $0x168] ss:$16 sps:$4 sm:$0xff]   ;;  %v489_v29 = vld [vmem:[%s12581_s22 + $0x3b0] sm:$0xff] }
 0x403   : > { %v626_v23 = vld [vmem:[%s12581_s22 + $0x7f8] sm:$0xff] }
 0x405   : > { %6702 = vmatpush1.bf16.msra.mxu0 %v11911_v34  ;;  %7408 = vmatpush1.bf16.msra.mxu1 %v11914_v35  ;;  %v945_v34 = vpack.c.bf16 %v497_v30, %v489_v29  ;;  %v954_v35 = vpack.c.bf16 %v514_v33, %v506_v32  ;;  %v642_v29 = vld [vmem:[%s12581_s22 + $0x878] sm:$0xff]  ;;  %v11983_v30 = vld [vmem:[#allocation8 + $0x1e0] ss:$16 sps:$4 sm:$0xff]  }
 0x406   : > { %6703 = vmatprep.subr.bf16.mxu0 %v11919_v36  ;;  %7409 = vmatprep.subr.bf16.mxu1 %v11922_v37  ;;  %v505_v36 = vld [vmem:[%s12581_s22 + $0x430] sm:$0xff] }
 0x407   : > { %3809 = vmatmul.mubr.bf16.gmra.mrb[8].mxu0 %v905_v38  ;;  %5221 = vmatmul.mubr.bf16.gmra.mrb[8].mxu1 %v905_v38  ;;  %v513_v37 = vld [vmem:[%s12581_s22 + $0x470] sm:$0xff]  ;;  %v522_v38 = vld [vmem:[%s12581_s22 + $0x4b8] sm:$0xff] }
 0x408   : > { %3818 = vmatprep.mubr.bf16.mxu0 %v914_v39  ;;  %5230 = vmatprep.mubr.bf16.mxu1 %v914_v39  ;;  %v530_v39 = vld [vmem:[%s12581_s22 + $0x4f8] sm:$0xff] }
 0x409   : > { %6704 = vmatpush1.bf16.msra.mxu0 %v11917_v40  ;;  %7410 = vmatpush1.bf16.msra.mxu1 %v11920_v41  ;;  %v953_v40 = vpack.c.bf16 %v513_v37, %v505_v36  ;;  %v962_v41 = vpack.c.bf16 %v530_v39, %v522_v38  ;;  %v633_v36 = vld [vmem:[%s12581_s22 + $0x830] sm:$0xff]  ;;  %v650_v38 = vld [vmem:[%s12581_s22 + $0x8b8] sm:$0xff] }
 0x40a   : > { %6705 = vmatprep.subr.bf16.mxu0 %v11925_v42  ;;  %7411 = vmatprep.subr.bf16.mxu1 %v11928_v43  ;;  %v11965_v42 = vld [vmem:[#allocation8 + $0x180] ss:$16 sps:$4 sm:$0xff]   ;;  %v11967_v43 = vld [vmem:[#allocation8 + $0x184] ss:$16 sps:$4 sm:$0xff]  }
 0x40b   : > { %v641_v37 = vld [vmem:[%s12581_s22 + $0x870] sm:$0xff]  ;;  %v658_v39 = vld [vmem:[%s12581_s22 + $0x8f8] sm:$0xff] }
 0x40d   : > { %6706 = vmatpush1.bf16.msra.mxu0 %v11923_v48  ;;  %7412 = vmatpush1.bf16.msra.mxu1 %v11926_v49  ;;  %v538_v48 = vld [vmem:[%s12581_s22 + $0x538] sm:$0xff] }
 0x40e   : > { %6707 = vmatprep.subr.bf16.mxu0 %v11931_v50  ;;  %7413 = vmatprep.subr.bf16.mxu1 %v11934_v51  ;;  %v546_v49 = vld [vmem:[%s12581_s22 + $0x578] sm:$0xff]  ;;  %v961_v50 = vpack.c.bf16 %v529_v46, %v521_v45 }
 0x40f   : > { %3819 = vmatmul.mubr.bf16.gmra.mrb[12].mxu0 %v913_v52  ;;  %5231 = vmatmul.mubr.bf16.gmra.mrb[12].mxu1 %v913_v52  ;;  %v970_v51 = vpack.c.bf16 %v546_v49, %v538_v48  ;;  %v537_v52 = vld [vmem:[%s12581_s22 + $0x530] sm:$0xff]  ;;  %v674_v45 = vld [vmem:[%s12581_s22 + $0x978] sm:$0xff] }
 0x410   : > { %3828 = vmatprep.mubr.bf16.mxu0 %v922_v53  ;;  %5240 = vmatprep.mubr.bf16.mxu1 %v922_v53  ;;  %v545_v53 = vld [vmem:[%s12581_s22 + $0x570] sm:$0xff]  ;;  %v11991_v46 = vld [vmem:[#allocation8 + $0x204] ss:$16 sps:$4 sm:$0xff]  }
 0x411   : > { %6708 = vmatpush1.bf16.msra.mxu0 %v11929_v54  ;;  %7414 = vmatpush1.bf16.msra.mxu1 %v11932_v55  ;;  %v554_v54 = vld [vmem:[%s12581_s22 + $0x5b8] sm:$0xff]  ;;  %v11994_v49 = vld [vmem:[#allocation8 + $0x20c] ss:$16 sps:$4 sm:$0xff]  }
 0x412   : > { %6709 = vmatprep.subr.bf16.mxu0 %v11937_v56  ;;  %7415 = vmatprep.subr.bf16.mxu1 %v11940_v57  ;;  %v562_v55 = vld [vmem:[%s12581_s22 + $0x5f8] sm:$0xff]  ;;  %v969_v56 = vpack.c.bf16 %v545_v53, %v537_v52 }
 0x413   : > { %v978_v57 = vpack.c.bf16 %v562_v55, %v554_v54  ;;  %v682_v52 = vld [vmem:[%s12581_s22 + $0x9b8] sm:$0xff] }
 0x414   : > { %v690_v53 = vld [vmem:[%s12581_s22 + $0x9f8] sm:$0xff] }
 0x415   : > { %6710 = vmatpush1.bf16.msra.mxu0 %v11935_v62  ;;  %7416 = vmatpush1.bf16.msra.mxu1 %v11938_v63  ;;  %v570_v62 = vld [vmem:[%s12581_s22 + $0x638] sm:$0xff]  ;;  %v1042_v55 = vpack.c.bf16 %v690_v53, %v682_v52 }
 0x416   : > { %6711 = vmatprep.subr.bf16.mxu0 %v11943_v0  ;;  %7417 = vmatprep.subr.bf16.mxu1 %v11946_v1  ;;  %v578_v63 = vld [vmem:[%s12581_s22 + $0x678] sm:$0xff]  ;;  %v977_v0 = vpack.c.bf16 %v561_v61, %v553_v60 }
 0x417   : > { %3829 = vmatmul.mubr.bf16.gmra.mrb[16].mxu0 %v921_v2  ;;  %5241 = vmatmul.mubr.bf16.gmra.mrb[16].mxu1 %v921_v2  ;;  %v986_v1 = vpack.c.bf16 %v578_v63, %v570_v62  ;;  %v11976_v2 = vld [vmem:[#allocation8 + $0x1ac] ss:$16 sps:$4 sm:$0xff]  }
 0x418   : > { %3838 = vmatprep.mubr.bf16.mxu0 %v930_v3  ;;  %5250 = vmatprep.mubr.bf16.mxu1 %v930_v3  ;;  %v11974_v3 = vld [vmem:[#allocation8 + $0x1a8] ss:$16 sps:$4 sm:$0xff]   ;;  %v697_v62 = vld [vmem:[%s12581_s22 + $0xa30] sm:$0xff] }
 0x419   : > { %6712 = vmatpush1.bf16.msra.mxu0 %v11941_v4  ;;  %7418 = vmatpush1.bf16.msra.mxu1 %v11944_v5  ;;  %v569_v4 = vld [vmem:[%s12581_s22 + $0x630] sm:$0xff] }
 0x41a   : > { %6713 = vmatprep.subr.bf16.mxu0 %v11949_v6  ;;  %7419 = vmatprep.subr.bf16.mxu1 %v11952_v7  ;;  %v577_v5 = vld [vmem:[%s12581_s22 + $0x670] sm:$0xff]  ;;  %v586_v6 = vld [vmem:[%s12581_s22 + $0x6b8] sm:$0xff] }
 0x41b   : > { %v594_v7 = vld [vmem:[%s12581_s22 + $0x6f8] sm:$0xff]  ;;  %v985_v8 = vpack.c.bf16 %v577_v5, %v569_v4  ;;  %v705_v63 = vld [vmem:[%s12581_s22 + $0xa70] sm:$0xff] }
 0x41c   : > { %v994_v9 = vpack.c.bf16 %v594_v7, %v586_v6  ;;  %v713_v4 = vld [vmem:[%s12581_s22 + $0xab0] sm:$0xff]  ;;  %v730_v6 = vld [vmem:[%s12581_s22 + $0xb38] sm:$0xff] }
 0x41d   : > { %6714 = vmatpush1.bf16.msra.mxu0 %v11947_v12  ;;  %7420 = vmatpush1.bf16.msra.mxu1 %v11950_v13  ;;  %v602_v12 = vld [vmem:[%s12581_s22 + $0x738] sm:$0xff]  ;;  %v721_v5 = vld [vmem:[%s12581_s22 + $0xaf0] sm:$0xff] }
 0x41e   : > { %6715 = vmatprep.subr.bf16.mxu0 %v11955_v14  ;;  %7421 = vmatprep.subr.bf16.mxu1 %v11958_v15  ;;  %v610_v13 = vld [vmem:[%s12581_s22 + $0x778] sm:$0xff]  ;;  %v11977_v14 = vld [vmem:[#allocation8 + $0x1c0] ss:$16 sps:$4 sm:$0xff]  }
 0x41f   : > { %3839 = vmatmul.mubr.bf16.gmra.mrb[20].mxu0 %v929_v16  ;;  %5251 = vmatmul.mubr.bf16.gmra.mrb[20].mxu1 %v929_v16  ;;  %v11979_v15 = vld [vmem:[#allocation8 + $0x1c4] ss:$16 sps:$4 sm:$0xff]   ;;  %v993_v16 = vpack.c.bf16 %v593_v11, %v585_v10  ;;  %v729_v10 = vld [vmem:[%s12581_s22 + $0xb30] sm:$0xff] }
 0x420   : > { %3848 = vmatprep.mubr.bf16.mxu0 %v938_v17  ;;  %5260 = vmatprep.mubr.bf16.mxu1 %v938_v17  ;;  %v1002_v17 = vpack.c.bf16 %v610_v13, %v602_v12  ;;  %v738_v7 = vld [vmem:[%s12581_s22 + $0xb78] sm:$0xff]  ;;  %v737_v11 = vld [vmem:[%s12581_s22 + $0xb70] sm:$0xff] }
 0x421   : > { %6716 = vmatpush1.bf16.msra.mxu0 %v11953_v18  ;;  %7422 = vmatpush1.bf16.msra.mxu1 %v11956_v19  ;;  %v11982_v18 = vld [vmem:[#allocation8 + $0x1cc] ss:$16 sps:$4 sm:$0xff]   ;;  %v11980_v19 = vld [vmem:[#allocation8 + $0x1c8] ss:$16 sps:$4 sm:$0xff]  }
 0x422   : > { %6717 = vmatprep.subr.bf16.mxu0 %v11961_v27  ;;  %7423 = vmatprep.subr.bf16.mxu1 %v11964_v31  ;;  %v625_v27 = vld [vmem:[%s12581_s22 + $0x7f0] sm:$0xff]  ;;  %v11985_v31 = vld [vmem:[#allocation8 + $0x1e4] ss:$16 sps:$4 sm:$0xff]  }
 0x423   : > { %v746_v12 = vld [vmem:[%s12581_s22 + $0xbb8] sm:$0xff] }
 0x424   : > { %v754_v13 = vld [vmem:[%s12581_s22 + $0xbf8] sm:$0xff] }
 0x425   : > { %6718 = vmatpush1.bf16.msra.mxu0 %v11959_v26  ;;  %7424 = vmatpush1.bf16.msra.mxu1 %v11962_v28  ;;  %v617_v26 = vld [vmem:[%s12581_s22 + $0x7b0] sm:$0xff]  ;;  %v634_v28 = vld [vmem:[%s12581_s22 + $0x838] sm:$0xff] }
 0x426   : > { %6719 = vmatprep.subr.bf16.mxu0 %v11967_v43  ;;  %7425 = vmatprep.subr.bf16.mxu1 %v11970_v47  ;;  %v1009_v32 = vpack.c.bf16 %v625_v27, %v617_v26  ;;  %v1018_v33 = vpack.c.bf16 %v642_v29, %v634_v28  ;;  %v657_v43 = vld [vmem:[%s12581_s22 + $0x8f0] sm:$0xff] }
 0x427   : > { %3849 = vmatmul.mubr.bf16.gmra.mrb[24].mxu0 %v937_v24  ;;  %5261 = vmatmul.mubr.bf16.gmra.mrb[24].mxu1 %v937_v24  ;;  %v1001_v24 = vpack.c.bf16 %v609_v21, %v601_v20  ;;  %v777_v28 = vld [vmem:[%s12581_s22 + $0xcb0] sm:$0xff] }
 0x428   : > { %3858 = vmatprep.mubr.bf16.mxu0 %v946_v25  ;;  %5270 = vmatprep.mubr.bf16.mxu1 %v946_v25  ;;  %v1010_v25 = vpack.c.bf16 %v626_v23, %v618_v22  ;;  %v761_v22 = vld [vmem:[%s12581_s22 + $0xc30] sm:$0xff] }
 0x429   : > { %6720 = vmatpush1.bf16.msra.mxu0 %v11965_v42  ;;  %7426 = vmatpush1.bf16.msra.mxu1 %v11968_v44  ;;  %v649_v42 = vld [vmem:[%s12581_s22 + $0x8b0] sm:$0xff]  ;;  %v666_v44 = vld [vmem:[%s12581_s22 + $0x938] sm:$0xff] }
 0x42a   : > { %6721 = vmatprep.subr.bf16.mxu0 %v11973_v59  ;;  %7427 = vmatprep.subr.bf16.mxu1 %v11976_v2  ;;  %v1025_v47 = vpack.c.bf16 %v657_v43, %v649_v42  ;;  %v1034_v48 = vpack.c.bf16 %v674_v45, %v666_v44  ;;  %v706_v59 = vld [vmem:[%s12581_s22 + $0xa78] sm:$0xff]  ;;  %v1049_v2 = vpack.c.bf16 %v705_v63, %v697_v62  ;;  %v769_v23 = vld [vmem:[%s12581_s22 + $0xc70] sm:$0xff] }
 0x42b   : > { %v1081_v26 = vpack.c.bf16 %v769_v23, %v761_v22  ;;  %v785_v29 = vld [vmem:[%s12581_s22 + $0xcf0] sm:$0xff]  ;;  %v826_v42 = vld [vmem:[%s12581_s22 + $0xe38] sm:$0xff]  ;;  %v1395_v23 = vld [vmem:[#allocation7] sm:$0xf] }
 0x42c   : > { %v834_v43 = vld [vmem:[%s12581_s22 + $0xe78] sm:$0xff]  ;;  %v865_v22 = vld [vmem:[%s12581_s22 + $0xf70] sm:$0xff] }
 0x42d   : > { %6722 = vmatpush1.bf16.msra.mxu0 %v11971_v58  ;;  %7428 = vmatpush1.bf16.msra.mxu1 %v11974_v3  ;;  %v698_v58 = vld [vmem:[%s12581_s22 + $0xa38] sm:$0xff] }
 0x42e   : > { %6723 = vmatprep.subr.bf16.mxu0 %v11979_v15  ;;  %7429 = vmatprep.subr.bf16.mxu1 %v11982_v18  ;;  %v1050_v61 = vpack.c.bf16 %v706_v59, %v698_v58  ;;  %v1074_v15 = vpack.c.bf16 %v754_v13, %v746_v12  ;;  %v762_v18 = vld [vmem:[%s12581_s22 + $0xc38] sm:$0xff] }
 0x42f   : > { %3859 = vmatmul.mubr.bf16.gmra.mrb[28].mxu0 %v945_v34  ;;  %5271 = vmatmul.mubr.bf16.gmra.mrb[28].mxu1 %v945_v34  ;;  %v11988_v34 = vld [vmem:[#allocation8 + $0x1ec] ss:$16 sps:$4 sm:$0xff]  }
 0x430   : > { %3868 = vmatprep.mubr.bf16.mxu0 %v954_v35  ;;  %5280 = vmatprep.mubr.bf16.mxu1 %v954_v35  ;;  %v11986_v35 = vld [vmem:[#allocation8 + $0x1e8] ss:$16 sps:$4 sm:$0xff]  }
 0x431   : > { %6724 = vmatpush1.bf16.msra.mxu0 %v11977_v14  ;;  %7430 = vmatpush1.bf16.msra.mxu1 %v11980_v19  ;;  %v1065_v14 = vpack.c.bf16 %v737_v11, %v729_v10  ;;  %v770_v19 = vld [vmem:[%s12581_s22 + $0xc78] sm:$0xff] }
 0x432   : > { %6725 = vmatprep.subr.bf16.mxu0 %v11985_v31  ;;  %7431 = vmatprep.subr.bf16.mxu1 %v11988_v34  ;;  %v1082_v21 = vpack.c.bf16 %v770_v19, %v762_v18  ;;  %v802_v31 = vld [vmem:[%s12581_s22 + $0xd78] sm:$0xff]  ;;  %v793_v34 = vld [vmem:[%s12581_s22 + $0xd30] sm:$0xff] }
 0x435   : > { %6726 = vmatpush1.bf16.msra.mxu0 %v11983_v30  ;;  %7432 = vmatpush1.bf16.msra.mxu1 %v11986_v35  ;;  %v794_v30 = vld [vmem:[%s12581_s22 + $0xd38] sm:$0xff]  ;;  %v801_v35 = vld [vmem:[%s12581_s22 + $0xd70] sm:$0xff] }
 0x436   : > { %7048 = vmatprep.subr.bf16.mxu0 %v11991_v46  ;;  %7754 = vmatprep.subr.bf16.mxu1 %v11994_v49 }
 0x437   : > { %3869 = vmatmul.mubr.bf16.gmra.mrb[32].mxu0 %v953_v40  ;;  %5281 = vmatmul.mubr.bf16.gmra.mrb[32].mxu1 %v953_v40  ;;  %v1017_v40 = vpack.c.bf16 %v641_v37, %v633_v36  ;;  %v810_v36 = vld [vmem:[%s12581_s22 + $0xdb8] sm:$0xff] }
 0x438   : > { %3878 = vmatprep.mubr.bf16.mxu0 %v962_v41  ;;  %5290 = vmatprep.mubr.bf16.mxu1 %v962_v41  ;;  %v1026_v41 = vpack.c.bf16 %v658_v39, %v650_v38  ;;  %v818_v37 = vld [vmem:[%s12581_s22 + $0xdf8] sm:$0xff]  ;;  %v1097_v38 = vpack.c.bf16 %v801_v35, %v793_v34 }
 0x439   : > { %v1106_v39 = vpack.c.bf16 %v818_v37, %v810_v36 }
 0x43f   : > { %3879 = vmatmul.mubr.bf16.gmra.mrb[36].mxu0 %v961_v50  ;;  %5291 = vmatmul.mubr.bf16.gmra.mrb[36].mxu1 %v961_v50  ;;  %v665_v50 = vld [vmem:[%s12581_s22 + $0x930] sm:$0xff] }
 0x440   : > { %3888 = vmatprep.mubr.bf16.mxu0 %v970_v51  ;;  %5300 = vmatprep.mubr.bf16.mxu1 %v970_v51  ;;  %v673_v51 = vld [vmem:[%s12581_s22 + $0x970] sm:$0xff] }
 0x441   : > { %v1033_v54 = vpack.c.bf16 %v673_v51, %v665_v50  ;;  %v1114_v51 = vpack.c.bf16 %v834_v43, %v826_v42 }
 0x447   : > { %3889 = vmatmul.mubr.bf16.gmra.mrb[40].mxu0 %v969_v56  ;;  %5301 = vmatmul.mubr.bf16.gmra.mrb[40].mxu1 %v969_v56  ;;  %v681_v56 = vld [vmem:[%s12581_s22 + $0x9b0] sm:$0xff] }
 0x448   : > { %3898 = vmatprep.mubr.bf16.mxu0 %v978_v57  ;;  %5310 = vmatprep.mubr.bf16.mxu1 %v978_v57  ;;  %v689_v57 = vld [vmem:[%s12581_s22 + $0x9f0] sm:$0xff] }
 0x449   : > { %v1041_v60 = vpack.c.bf16 %v689_v57, %v681_v56  ;;  %v842_v56 = vld [vmem:[%s12581_s22 + $0xeb8] sm:$0xff] }
 0x44a   : > { %v850_v57 = vld [vmem:[%s12581_s22 + $0xef8] sm:$0xff] }
 0x44f   : > { %3899 = vmatmul.mubr.bf16.gmra.mrb[44].mxu0 %v977_v0  ;;  %5311 = vmatmul.mubr.bf16.gmra.mrb[44].mxu1 %v977_v0  ;;  %v714_v0 = vld [vmem:[%s12581_s22 + $0xab8] sm:$0xff] }
 0x450   : > { %3908 = vmatprep.mubr.bf16.mxu0 %v986_v1  ;;  %5320 = vmatprep.mubr.bf16.mxu1 %v986_v1  ;;  %v722_v1 = vld [vmem:[%s12581_s22 + $0xaf8] sm:$0xff] }
 0x451   : > { %v1058_v3 = vpack.c.bf16 %v722_v1, %v714_v0  ;;  %v1122_v1 = vpack.c.bf16 %v850_v57, %v842_v56 }
 0x457   : > { %3909 = vmatmul.mubr.bf16.gmra.mrb[48].mxu0 %v985_v8  ;;  %5321 = vmatmul.mubr.bf16.gmra.mrb[48].mxu1 %v985_v8  ;;  %v1057_v8 = vpack.c.bf16 %v721_v5, %v713_v4  ;;  %v1397_v4 = vlaneseq  ;;  %v841_v5 = vld [vmem:[%s12581_s22 + $0xeb0] sm:$0xff] }
 0x458   : > { %3918 = vmatprep.mubr.bf16.mxu0 %v994_v9  ;;  %5330 = vmatprep.mubr.bf16.mxu1 %v994_v9  ;;  %v1066_v9 = vpack.c.bf16 %v738_v7, %v730_v6  ;;  %v849_v6 = vld [vmem:[%s12581_s22 + $0xef0] sm:$0xff]  ;;  %v858_v7 = vld [vmem:[%s12581_s22 + $0xf38] sm:$0xff] }
 0x459   : > { %v1121_v13 = vpack.c.bf16 %v849_v6, %v841_v5 }
 0x45f   : > { %3919 = vmatmul.mubr.bf16.gmra.mrb[52].mxu0 %v993_v16  ;;  %5331 = vmatmul.mubr.bf16.gmra.mrb[52].mxu1 %v993_v16  ;;  %v745_v16 = vld [vmem:[%s12581_s22 + $0xbb0] sm:$0xff] }
 0x460   : > { %3928 = vmatprep.mubr.bf16.mxu0 %v1002_v17  ;;  %5340 = vmatprep.mubr.bf16.mxu1 %v1002_v17  ;;  %v753_v17 = vld [vmem:[%s12581_s22 + $0xbf0] sm:$0xff] }
 0x461   : > { %v1073_v20 = vpack.c.bf16 %v753_v17, %v745_v16 }
 0x467   : > { %3929 = vmatmul.mubr.bf16.gmra.mrb[56].mxu0 %v1001_v24  ;;  %5341 = vmatmul.mubr.bf16.gmra.mrb[56].mxu1 %v1001_v24  ;;  %v778_v24 = vld [vmem:[%s12581_s22 + $0xcb8] sm:$0xff] }
 0x468   : > { %3938 = vmatprep.mubr.bf16.mxu0 %v1010_v25  ;;  %5350 = vmatprep.mubr.bf16.mxu1 %v1010_v25  ;;  %v786_v25 = vld [vmem:[%s12581_s22 + $0xcf8] sm:$0xff] }
 0x469   : > { %v1090_v27 = vpack.c.bf16 %v786_v25, %v778_v24  ;;  %v874_v24 = vld [vmem:[%s12581_s22 + $0xfb8] sm:$0xff] }
 0x46a   : > { %v882_v25 = vld [vmem:[%s12581_s22 + $0xff8] sm:$0xff] }
 0x46b   : > { %v1138_v34 = vpack.c.bf16 %v882_v25, %v874_v24  ;;  %v11989_v25 = vld [vmem:[#allocation8 + $0x200] ss:$16 sps:$4 sm:$0xff]  }
 0x46f   : > { %3939 = vmatmul.mubr.bf16.gmra.mrb[60].mxu0 %v1009_v32  ;;  %5351 = vmatmul.mubr.bf16.gmra.mrb[60].mxu1 %v1009_v32  ;;  %v1089_v32 = vpack.c.bf16 %v785_v29, %v777_v28 }
 0x470   : > { %3948 = vmatprep.mubr.bf16.mxu0 %v1018_v33  ;;  %5360 = vmatprep.mubr.bf16.mxu1 %v1018_v33  ;;  %v1098_v33 = vpack.c.bf16 %v802_v31, %v794_v30 }
 0x477   : > { %3949 = vmatmul.mubr.bf16.gmra.mrb[64].mxu0 %v1017_v40  ;;  %5361 = vmatmul.mubr.bf16.gmra.mrb[64].mxu1 %v1017_v40  ;;  %v809_v40 = vld [vmem:[%s12581_s22 + $0xdb0] sm:$0xff] }
 0x478   : > { %3958 = vmatprep.mubr.bf16.mxu0 %v1026_v41  ;;  %5370 = vmatprep.mubr.bf16.mxu1 %v1026_v41  ;;  %v817_v41 = vld [vmem:[%s12581_s22 + $0xdf0] sm:$0xff] }
 0x47f   : > { %3959 = vmatmul.mubr.bf16.gmra.mrb[68].mxu0 %v1025_v47  ;;  %5371 = vmatmul.mubr.bf16.gmra.mrb[68].mxu1 %v1025_v47 }
 0x480   : > { %3968 = vmatprep.mubr.bf16.mxu0 %v1034_v48  ;;  %5380 = vmatprep.mubr.bf16.mxu1 %v1034_v48  ;;  %v1105_v48 = vpack.c.bf16 %v817_v41, %v809_v40  ;;  %v873_v40 = vld [vmem:[%s12581_s22 + $0xfb0] sm:$0xff] }
 0x481   : > { %v881_v41 = vld [vmem:[%s12581_s22 + $0xff0] sm:$0xff] }
 0x487   : > { %3969 = vmatmul.mubr.bf16.gmra.mrb[72].mxu0 %v1033_v54  ;;  %5381 = vmatmul.mubr.bf16.gmra.mrb[72].mxu1 %v1033_v54  ;;  %v825_v54 = vld [vmem:[%s12581_s22 + $0xe30] sm:$0xff] }
 0x488   : > { %3978 = vmatprep.mubr.bf16.mxu0 %v1042_v55  ;;  %5390 = vmatprep.mubr.bf16.mxu1 %v1042_v55  ;;  %v833_v55 = vld [vmem:[%s12581_s22 + $0xe70] sm:$0xff] }
 0x489   : > { %v1113_v62 = vpack.c.bf16 %v833_v55, %v825_v54  ;;  %v1137_v55 = vpack.c.bf16 %v881_v41, %v873_v40 }
 0x48f   : > { %3979 = vmatmul.mubr.bf16.gmra.mrb[76].mxu0 %v1041_v60  ;;  %5391 = vmatmul.mubr.bf16.gmra.mrb[76].mxu1 %v1041_v60 }
 0x490   : > { %3988 = vmatprep.mubr.bf16.mxu0 %v1050_v61  ;;  %5400 = vmatprep.mubr.bf16.mxu1 %v1050_v61 }
 0x497   : > { %3989 = vmatmul.mubr.bf16.gmra.mrb[80].mxu0 %v1049_v2  ;;  %5401 = vmatmul.mubr.bf16.gmra.mrb[80].mxu1 %v1049_v2 }
 0x498   : > { %3998 = vmatprep.mubr.bf16.mxu0 %v1058_v3  ;;  %5410 = vmatprep.mubr.bf16.mxu1 %v1058_v3 }
 0x49f   : > { %3999 = vmatmul.mubr.bf16.gmra.mrb[84].mxu0 %v1057_v8  ;;  %5411 = vmatmul.mubr.bf16.gmra.mrb[84].mxu1 %v1057_v8  ;;  %v866_v8 = vld [vmem:[%s12581_s22 + $0xf78] sm:$0xff] }
 0x4a0   : > { %4008 = vmatprep.mubr.bf16.mxu0 %v1066_v9  ;;  %5420 = vmatprep.mubr.bf16.mxu1 %v1066_v9  ;;  %v1130_v17 = vpack.c.bf16 %v866_v8, %v858_v7 }
 0x4a7   : > { %4009 = vmatmul.mubr.bf16.gmra.mrb[88].mxu0 %v1065_v14  ;;  %5421 = vmatmul.mubr.bf16.gmra.mrb[88].mxu1 %v1065_v14  ;;  %v13143_v14 = vshrl.u32 %v1397_v4, 7 }
 0x4a8   : > { %4018 = vmatprep.mubr.bf16.mxu0 %v1074_v15  ;;  %5430 = vmatprep.mubr.bf16.mxu1 %v1074_v15 }
 0x4af   : > { %4019 = vmatmul.mubr.bf16.gmra.mrb[92].mxu0 %v1073_v20  ;;  %5431 = vmatmul.mubr.bf16.gmra.mrb[92].mxu1 %v1073_v20  ;;  %v13154_v20 = vsub.s32 1, %v13143_v14 }
 0x4b0   : > { %4028 = vmatprep.mubr.bf16.mxu0 %v1082_v21  ;;  %5440 = vmatprep.mubr.bf16.mxu1 %v1082_v21  ;;  %v857_v21 = vld [vmem:[%s12581_s22 + $0xf30] sm:$0xff] }
 0x4b1   : > { %18297 = vst [vmem:[#allocation17_spill] sm:$0xff] %v13154_v20  ;;  %v1129_v30 = vpack.c.bf16 %v865_v22, %v857_v21  ;;  %v13169_v31 = vrot.slane %v1395_v23, %v13154_v20  ;;  %v12004_v20 = vld [vmem:[#allocation8 + $0x248] ss:$16 sps:$4 sm:$0xff]  }
 0x4b7   : > { %4029 = vmatmul.mubr.bf16.gmra.mrb[96].mxu0 %v1081_v26  ;;  %5441 = vmatmul.mubr.bf16.gmra.mrb[96].mxu1 %v1081_v26 }
 0x4b8   : > { %4038 = vmatprep.mubr.bf16.mxu0 %v1090_v27  ;;  %5450 = vmatprep.mubr.bf16.mxu1 %v1090_v27 }
 0x4bf   : > { %4039 = vmatmul.mubr.bf16.gmra.mrb[100].mxu0 %v1089_v32  ;;  %5451 = vmatmul.mubr.bf16.gmra.mrb[100].mxu1 %v1089_v32 }
 0x4c0   : > { %4048 = vmatprep.mubr.bf16.mxu0 %v1098_v33  ;;  %5460 = vmatprep.mubr.bf16.mxu1 %v1098_v33 }
 0x4c7   : > { %4049 = vmatmul.mubr.bf16.gmra.mrb[104].mxu0 %v1097_v38  ;;  %5461 = vmatmul.mubr.bf16.gmra.mrb[104].mxu1 %v1097_v38  ;;  %v13183_v38 = vsub.s32 0, %v13143_v14 }
 0x4c8   : > { %4058 = vmatprep.mubr.bf16.mxu0 %v1106_v39  ;;  %5470 = vmatprep.mubr.bf16.mxu1 %v1106_v39 }
 0x4c9   : > { %18299 = vst [vmem:[#allocation19_spill] sm:$0xff] %v13183_v38 }
 0x4ca   : > { %v13097_v44 = vpop.f32.mrb[0].mxu0  ;;  %v13099_v45 = vpop.f32.mrb[0].mxu1 }
 0x4cb   : > { %v13101_v46 = vpop.f32.mrb[1].mxu0  ;;  %v13103_v47 = vpop.f32.mrb[1].mxu1 }
 0x4cc   : > { %v13105_v49 = vpop.f32.mrb[2].mxu0  ;;  %v13107_v50 = vpop.f32.mrb[2].mxu1  ;;  %v13187_v39 = vadd.f32 %v13101_v46, %v13169_v31 }
 0x4cd   : > { %v3796_v52 = vpop.f32.mrb[3].mxu0  ;;  %v13109_v53 = vpop.f32.mrb[3].mxu1 }
 0x4ce   : > { %v13180_v37 = vadd.f32 %v3796_v52, %v13169_v31  ;;  %18300 = vst [vmem:[#allocation20_spill] sm:$0xff] %v13187_v39  ;;  %v17859_v46 = vmax.f32 %v13187_v39, 0.0 }
 0x4cf   : > { %4059 = vmatmul.mubr.bf16.gmra.mrb[108].mxu0 %v1105_v48  ;;  %5471 = vmatmul.mubr.bf16.gmra.mrb[108].mxu1 %v1105_v48 }
 0x4d0   : > { %4068 = vmatprep.mubr.bf16.mxu0 %v1114_v51  ;;  %5480 = vmatprep.mubr.bf16.mxu1 %v1114_v51  ;;  %18298 = vst [vmem:[#allocation18_spill] sm:$0xff] %v13180_v37  ;;  %v17858_v42 = vmax.f32 %v13180_v37, 0.0  ;;  %v13197_v51 = vrot.slane %v1395_v23, %v13183_v38 }
 0x4d2   : > { %v13115_v58 = vpop.f32.mrb[4].mxu0  ;;  %v13117_v59 = vpop.f32.mrb[4].mxu1  ;;  %v5778_v5 = vpack.c.bf16 %v17858_v42, %v17859_v46  ;;  %v13226_v7 = vadd.f32 %v13097_v44, %v13197_v51  ;;  %v11997_v46 = vld [vmem:[#allocation8 + $0x224] ss:$16 sps:$4 sm:$0xff]  }
 0x4d3   : > { %v13119_v60 = vpop.f32.mrb[5].mxu0  ;;  %v13121_v61 = vpop.f32.mrb[5].mxu1 }
 0x4d4   : > { %v13123_v63 = vpop.f32.mrb[6].mxu0  ;;  %v13125_v0 = vpop.f32.mrb[6].mxu1  ;;  %18303 = vst [vmem:[#allocation23_spill] sm:$0xff] %v13226_v7  ;;  %v17861_v21 = vmax.f32 %v13226_v7, 0.0 }
 0x4d5   : > { %v13127_v2 = vpop.f32.mrb[7].mxu0  ;;  %v13129_v3 = vpop.f32.mrb[7].mxu1 }
 0x4d6   : > { %v13222_v6 = vadd.f32 %v13127_v2, %v13169_v31 }
 0x4d7   : > { %4069 = vmatmul.mubr.bf16.gmra.mrb[112].mxu0 %v1113_v62  ;;  %5481 = vmatmul.mubr.bf16.gmra.mrb[112].mxu1 %v1113_v62  ;;  %v13210_v62 = vadd.f32 %v13105_v49, %v13197_v51  ;;  %v13230_v49 = vadd.f32 %v13119_v60, %v13169_v31 }
 0x4d8   : > { %4078 = vmatprep.mubr.bf16.mxu0 %v1122_v1  ;;  %5490 = vmatprep.mubr.bf16.mxu1 %v1122_v1  ;;  %18302 = vst [vmem:[#allocation22_spill] sm:$0xff] %v13222_v6 }
 0x4d9   : > { %18301 = vst [vmem:[#allocation21_spill] sm:$0xff] %v13210_v62  ;;  %18304 = vst [vmem:[#allocation24_spill] sm:$0xff] %v13230_v49  ;;  %v17860_v8 = vmax.f32 %v13210_v62, 0.0  ;;  %v17864_v23 = vmax.f32 %v13230_v49, 0.0 }
 0x4da   : > { %v13135_v9 = vpop.f32.mrb[8].mxu0  ;;  %v13137_v10 = vpop.f32.mrb[8].mxu1 }
 0x4db   : > { %v13139_v11 = vpop.f32.mrb[9].mxu0  ;;  %v13141_v12 = vpop.f32.mrb[9].mxu1 }
 0x4dc   : > { %v13145_v15 = vpop.f32.mrb[10].mxu0  ;;  %v13147_v16 = vpop.f32.mrb[10].mxu1 }
 0x4dd   : > { %v13149_v18 = vpop.f32.mrb[11].mxu0  ;;  %v13151_v19 = vpop.f32.mrb[11].mxu1 }
 0x4de   : > { %v13266_v42 = vadd.f32 %v13149_v18, %v13169_v31  ;;  %v11998_v18 = vld [vmem:[#allocation8 + $0x228] ss:$16 sps:$4 sm:$0xff]  }
 0x4df   : > { %4079 = vmatmul.mubr.bf16.gmra.mrb[116].mxu0 %v1121_v13  ;;  %5491 = vmatmul.mubr.bf16.gmra.mrb[116].mxu1 %v1121_v13  ;;  %v17863_v13 = vmax.f32 %v13222_v6, 0.0  ;;  %v11995_v6 = vld [vmem:[#allocation8 + $0x220] ss:$16 sps:$4 sm:$0xff]  }
 0x4e0   : > { %4088 = vmatprep.mubr.bf16.mxu0 %v1130_v17  ;;  %5500 = vmatprep.mubr.bf16.mxu1 %v1130_v17  ;;  %18306 = vst [vmem:[#allocation26_spill] sm:$0xff] %v13266_v42 }
 0x4e2   : > { %v13160_v26 = vpop.f32.mrb[12].mxu0  ;;  %v13162_v27 = vpop.f32.mrb[12].mxu1 }
 0x4e3   : > { %v13164_v28 = vpop.f32.mrb[13].mxu0  ;;  %v13166_v29 = vpop.f32.mrb[13].mxu1 }
 0x4e4   : > { %v13171_v32 = vpop.f32.mrb[14].mxu0  ;;  %v13173_v33 = vpop.f32.mrb[14].mxu1 }
 0x4e5   : > { %v13175_v35 = vpop.f32.mrb[15].mxu0  ;;  %v13177_v36 = vpop.f32.mrb[15].mxu1 }
 0x4e7   : > { %4089 = vmatmul.mubr.bf16.gmra.mrb[120].mxu0 %v1129_v30  ;;  %5501 = vmatmul.mubr.bf16.gmra.mrb[120].mxu1 %v1129_v30  ;;  %v5777_v30 = vpack.c.bf16 %v17860_v8, %v17861_v21  ;;  %v12000_v8 = vld [vmem:[#allocation8 + $0x22c] ss:$16 sps:$4 sm:$0xff]   ;;  %v13274_v21 = vadd.f32 %v13139_v11, %v13169_v31 }
 0x4e8   : > { %4098 = vmatprep.mubr.bf16.mxu0 %v1138_v34  ;;  %5510 = vmatprep.mubr.bf16.mxu1 %v1138_v34  ;;  %v13254_v34 = vadd.f32 %v13123_v63, %v13197_v51  ;;  %v13270_v63 = vadd.f32 %v13115_v58, %v13197_v51 }
 0x4e9   : > { %18308 = vst [vmem:[#allocation28_spill] sm:$0xff] %v13274_v21  ;;  %v18313_v38 = vmax.f32 %v13274_v21, 0.0 }
 0x4ea   : > { %v13192_v43 = vpop.f32.mrb[16].mxu0  ;;  %v13194_v48 = vpop.f32.mrb[16].mxu1  ;;  %18305 = vst [vmem:[#allocation25_spill] sm:$0xff] %v13254_v34  ;;  %18307 = vst [vmem:[#allocation27_spill] sm:$0xff] %v13270_v63  ;;  %v17875_v11 = vmax.f32 %v13270_v63, 0.0  ;;  %v18311_v49 = vmax.f32 %v13254_v34, 0.0  ;;  %v13314_v34 = vadd.f32 %v13135_v9, %v13197_v51 }
 0x4eb   : > { %v13199_v52 = vpop.f32.mrb[17].mxu0  ;;  %v13201_v54 = vpop.f32.mrb[17].mxu1 }
 0x4ec   : > { %v13204_v56 = vpop.f32.mrb[18].mxu0  ;;  %v13206_v57 = vpop.f32.mrb[18].mxu1  ;;  %18316 = vst [vmem:[#allocation33_spill] sm:$0xff] %v13314_v34 }
 0x4ed   : > { %v13212_v1 = vpop.f32.mrb[19].mxu0  ;;  %v13214_v4 = vpop.f32.mrb[19].mxu1 }
 0x4ef   : > { %4099 = vmatmul.mubr.bf16.gmra.mrb[124].mxu0 %v1137_v55  ;;  %5511 = vmatmul.mubr.bf16.gmra.mrb[124].mxu1 %v1137_v55  ;;  %v11992_v55 = vld [vmem:[#allocation8 + $0x208] ss:$16 sps:$4 sm:$0xff]  }
 0x4f0   : > { %6727 = vmatprep.mubr.bf16.mxu0 %v5778_v5  ;;  %7433 = vmatprep.mubr.bf16.mxu1 %v5778_v5  ;;  %v5782_v5 = vpack.c.bf16 %v17863_v13, %v17864_v23  ;;  %v12003_v23 = vld [vmem:[#allocation8 + $0x244] ss:$16 sps:$4 sm:$0xff]  }
 0x4f2   : > { %v13234_v17 = vpop.f32.mrb[20].mxu0  ;;  %v13236_v2 = vpop.f32.mrb[20].mxu1 }
 0x4f3   : > { %v13239_v44 = vpop.f32.mrb[21].mxu0  ;;  %v13241_v22 = vpop.f32.mrb[21].mxu1 }
 0x4f4   : > { %v13244_v60 = vpop.f32.mrb[22].mxu0  ;;  %v13246_v24 = vpop.f32.mrb[22].mxu1 }
 0x4f5   : > { %v13256_v40 = vpop.f32.mrb[23].mxu0  ;;  %v13258_v41 = vpop.f32.mrb[23].mxu1 }
 0x4f7   : > { %6728 = vmatmul.mubr.bf16.vlgmr.msra.gmra.mrb[128].mxu0 %v5777_v30  ;;  %7434 = vmatmul.mubr.bf16.vlgmr.msra.gmra.mrb[128].mxu1 %v5777_v30  ;;  %v12006_v30 = vld [vmem:[#allocation8 + $0x24c] ss:$16 sps:$4 sm:$0xff]  }
 0x4f8   : > { %6737 = vmatprep.mubr.bf16.mxu0 %v5782_v5  ;;  %7049 = vmatpush1.bf16.msra.mxu0 %v11989_v25 }
 0x4f9   : > { %7443 = vmatprep.mubr.bf16.mxu1 %v5782_v5  ;;  %7755 = vmatpush1.bf16.msra.mxu1 %v11992_v55  ;;  %v12001_v5 = vld [vmem:[#allocation8 + $0x240] ss:$16 sps:$4 sm:$0xff]  }
 0x4fa   : > { %v13278_v37 = vpop.f32.mrb[24].mxu0  ;;  %v13280_v58 = vpop.f32.mrb[24].mxu1  ;;  %7050 = vmatprep.subr.bf16.mxu0 %v11997_v46  ;;  %7756 = vmatprep.subr.bf16.mxu1 %v12000_v8  ;;  %v5781_v46 = vpack.c.bf16 %v18311_v49, %v17875_v11  ;;  %v13298_v8 = vadd.f32 %v13145_v15, %v13197_v51  ;;  %v13310_v49 = vadd.f32 %v13175_v35, %v13169_v31  ;;  %v12009_v15 = vld [vmem:[#allocation8 + $0x264] ss:$16 sps:$4 sm:$0xff]   ;;  %v12012_v11 = vld [vmem:[#allocation8 + $0x26c] ss:$16 sps:$4 sm:$0xff]  }
 0x4fb   : > { %18309 = vst [vmem:[#allocation29_spill] sm:$0xff] %v13280_v58  ;;  %v13283_v62 = vpop.f32.mrb[25].mxu0  ;;  %v13285_v25 = vpop.f32.mrb[25].mxu1  ;;  %v12010_v35 = vld [vmem:[#allocation8 + $0x268] ss:$16 sps:$4 sm:$0xff]  }
 0x4fc   : > { %v13288_v55 = vpop.f32.mrb[26].mxu0  ;;  %v13290_v13 = vpop.f32.mrb[26].mxu1  ;;  %7051 = vmatpush1.bf16.msra.mxu0 %v11995_v6  ;;  %18312 = vst [vmem:[#allocation31_spill] sm:$0xff] %v13298_v8  ;;  %v18314_v6 = vmax.f32 %v13266_v42, 0.0  ;;  %18315 = vst [vmem:[#allocation32_spill] sm:$0xff] %v13310_v49 }
 0x4fd   : > { %18310 = vst [vmem:[#allocation30_spill] sm:$0xff] %v13290_v13  ;;  %v13300_v39 = vpop.f32.mrb[27].mxu0  ;;  %v13302_v7 = vpop.f32.mrb[27].mxu1  ;;  %7757 = vmatpush1.bf16.msra.mxu1 %v11998_v18  ;;  %7052 = vmatprep.subr.bf16.mxu0 %v12003_v23  ;;  %v13318_v23 = vadd.f32 %v13164_v28, %v13169_v31  ;;  %v17880_v28 = vmax.f32 %v13314_v34, 0.0 }
 0x4fe   : > { %v5786_v63 = vpack.c.bf16 %v18314_v6, %v18313_v38  ;;  %7758 = vmatprep.subr.bf16.mxu1 %v12006_v30  ;;  %v12007_v38 = vld [vmem:[#allocation8 + $0x260] ss:$16 sps:$4 sm:$0xff]   ;;  %v12015_v30 = vld [vmem:[#allocation8 + $0x284] ss:$16 sps:$4 sm:$0xff]   ;;  %v18321_v6 = vmax.f32 %v13298_v8, 0.0  ;;  %v13358_v8 = vadd.f32 %v13160_v26, %v13197_v51 }
 0x4ff   : > { %6738 = vmatmul.mubr.bf16.gmra.mrb[132].mxu0 %v5781_v46  ;;  %7444 = vmatmul.mubr.bf16.gmra.mrb[132].mxu1 %v5781_v46  ;;  %18317 = vst [vmem:[#allocation34_spill] sm:$0xff] %v13318_v23  ;;  %v12018_v46 = vld [vmem:[#allocation8 + $0x28c] ss:$16 sps:$4 sm:$0xff]   ;;  %v18324_v13 = vmax.f32 %v13318_v23, 0.0 }
 0x500   : > { %6747 = vmatprep.mubr.bf16.mxu0 %v5786_v63  ;;  %7453 = vmatprep.mubr.bf16.mxu1 %v5786_v63  ;;  %18327 = vst [vmem:[#allocation41_spill] sm:$0xff] %v13358_v8 }
 0x501   : > { %7053 = vmatpush1.bf16.msra.mxu0 %v12001_v5  ;;  %7759 = vmatpush1.bf16.msra.mxu1 %v12004_v20  ;;  %v12013_v5 = vld [vmem:[#allocation8 + $0x280] ss:$16 sps:$4 sm:$0xff]  }
 0x502   : > { %v13322_v42 = vpop.f32.mrb[28].mxu0  ;;  %v13324_v9 = vpop.f32.mrb[28].mxu1  ;;  %7054 = vmatprep.subr.bf16.mxu0 %v12009_v15  ;;  %7760 = vmatprep.subr.bf16.mxu1 %v12012_v11  ;;  %v13342_v11 = vadd.f32 %v13171_v32, %v13197_v51  ;;  %v12021_v32 = vld [vmem:[#allocation8 + $0x2a4] ss:$16 sps:$4 sm:$0xff]  }
 0x503   : > { %18318 = vst [vmem:[#allocation35_spill] sm:$0xff] %v13324_v9  ;;  %v13327_v21 = vpop.f32.mrb[29].mxu0  ;;  %v13329_v63 = vpop.f32.mrb[29].mxu1  ;;  %v5785_v9 = vpack.c.bf16 %v18321_v6, %v17880_v28  ;;  %v13354_v6 = vadd.f32 %v13212_v1, %v13169_v31  ;;  %v12024_v28 = vld [vmem:[#allocation8 + $0x2ac] ss:$16 sps:$4 sm:$0xff]  }
 0x504   : > { %18319 = vst [vmem:[#allocation36_spill] sm:$0xff] %v13329_v63  ;;  %v13332_v20 = vpop.f32.mrb[30].mxu0  ;;  %v13334_v18 = vpop.f32.mrb[30].mxu1  ;;  %18322 = vst [vmem:[#allocation38_spill] sm:$0xff] %v13342_v11  ;;  %v12016_v63 = vld [vmem:[#allocation8 + $0x288] ss:$16 sps:$4 sm:$0xff]  }
 0x505   : > { %18320 = vst [vmem:[#allocation37_spill] sm:$0xff] %v13334_v18  ;;  %v13344_v15 = vpop.f32.mrb[31].mxu0  ;;  %v13346_v58 = vpop.f32.mrb[31].mxu1  ;;  %7055 = vmatpush1.bf16.msra.mxu0 %v12007_v38  ;;  %7761 = vmatpush1.bf16.msra.mxu1 %v12010_v35  ;;  %v18325_v18 = vmax.f32 %v13310_v49, 0.0  ;;  %18326 = vst [vmem:[#allocation40_spill] sm:$0xff] %v13354_v6  ;;  %v13362_v38 = vadd.f32 %v13199_v52, %v13169_v31  ;;  %v17885_v52 = vmax.f32 %v13358_v8, 0.0 }
 0x506   : > { %18323 = vst [vmem:[#allocation39_spill] sm:$0xff] %v13346_v58  ;;  %7056 = vmatprep.subr.bf16.mxu0 %v12015_v30  ;;  %7762 = vmatprep.subr.bf16.mxu1 %v12018_v46  ;;  %v12027_v35 = vld [vmem:[#allocation8 + $0x2c4] ss:$16 sps:$4 sm:$0xff]   ;;  %v18332_v30 = vmax.f32 %v13342_v11, 0.0  ;;  %v12036_v11 = vld [vmem:[#allocation8 + $0x2ec] ss:$16 sps:$4 sm:$0xff]  }
 0x507   : > { %v5790_v34 = vpack.c.bf16 %v18325_v18, %v18324_v13  ;;  %6748 = vmatmul.mubr.bf16.gmra.mrb[136].mxu0 %v5785_v9  ;;  %7454 = vmatmul.mubr.bf16.gmra.mrb[136].mxu1 %v5785_v9  ;;  %18328 = vst [vmem:[#allocation42_spill] sm:$0xff] %v13362_v38  ;;  %v12019_v13 = vld [vmem:[#allocation8 + $0x2a0] ss:$16 sps:$4 sm:$0xff]   ;;  %v12022_v18 = vld [vmem:[#allocation8 + $0x2a8] ss:$16 sps:$4 sm:$0xff]   ;;  %v18336_v8 = vmax.f32 %v13362_v38, 0.0 }
 0x508   : > { %v12030_v9 = vld [vmem:[#allocation8 + $0x2cc] ss:$16 sps:$4 sm:$0xff]   ;;  %v5789_v23 = vpack.c.bf16 %v18332_v30, %v17885_v52  ;;  %v18337_v30 = vmax.f32 %v13354_v6, 0.0 }
 0x509   : > { %6757 = vmatprep.mubr.bf16.mxu0 %v5790_v34  ;;  %7463 = vmatprep.mubr.bf16.mxu1 %v5790_v34  ;;  %v12042_v6 = vld [vmem:[#allocation8 + $0x30c] ss:$16 sps:$4 sm:$0xff]  }
 0x50a   : > { %7057 = vmatpush1.bf16.msra.mxu0 %v12013_v5  ;;  %7763 = vmatpush1.bf16.msra.mxu1 %v12016_v63  ;;  %v13366_v46 = vpop.f32.mrb[32].mxu0  ;;  %v13368_v26 = vpop.f32.mrb[32].mxu1  ;;  %v5794_v52 = vpack.c.bf16 %v18337_v30, %v18336_v8  ;;  %v12037_v8 = vld [vmem:[#allocation8 + $0x300] ss:$16 sps:$4 sm:$0xff]  }
 0x50b   : > { %18329 = vst [vmem:[#allocation43_spill] sm:$0xff] %v13368_v26  ;;  %7058 = vmatprep.subr.bf16.mxu0 %v12021_v32  ;;  %7764 = vmatprep.subr.bf16.mxu1 %v12024_v28  ;;  %v13371_v49 = vpop.f32.mrb[33].mxu0  ;;  %v13373_v34 = vpop.f32.mrb[33].mxu1  ;;  %v13386_v28 = vadd.f32 %v13204_v56, %v13197_v51  ;;  %v13390_v32 = vadd.f32 %v13256_v40, %v13169_v31  ;;  %v12033_v56 = vld [vmem:[#allocation8 + $0x2e4] ss:$16 sps:$4 sm:$0xff]  }
 0x50c   : > { %18330 = vst [vmem:[#allocation44_spill] sm:$0xff] %v13373_v34  ;;  %v13376_v63 = vpop.f32.mrb[34].mxu0  ;;  %v13378_v1 = vpop.f32.mrb[34].mxu1  ;;  %v12028_v34 = vld [vmem:[#allocation8 + $0x2c8] ss:$16 sps:$4 sm:$0xff]   ;;  %v13402_v40 = vadd.f32 %v13192_v43, %v13197_v51 }
 0x50d   : > { %18331 = vst [vmem:[#allocation45_spill] sm:$0xff] %v13378_v1  ;;  %18333 = vst [vmem:[#allocation46_spill] sm:$0xff] %v13386_v28  ;;  %v13392_v26 = vpop.f32.mrb[35].mxu0  ;;  %v13394_v5 = vpop.f32.mrb[35].mxu1  ;;  %v12025_v1 = vld [vmem:[#allocation8 + $0x2c0] ss:$16 sps:$4 sm:$0xff]  }
 0x50e   : > { %18334 = vst [vmem:[#allocation47_spill] sm:$0xff] %v13390_v32  ;;  %18335 = vst [vmem:[#allocation48_spill] sm:$0xff] %v13394_v5  ;;  %7059 = vmatpush1.bf16.msra.mxu0 %v12019_v13  ;;  %7765 = vmatpush1.bf16.msra.mxu1 %v12022_v18  ;;  %v13406_v13 = vadd.f32 %v13239_v44, %v13169_v31  ;;  %v17890_v18 = vmax.f32 %v13386_v28, 0.0  ;;  %v17891_v44 = vmax.f32 %v13402_v40, 0.0 }
 0x50f   : > { %7060 = vmatprep.subr.bf16.mxu0 %v12027_v35  ;;  %7766 = vmatprep.subr.bf16.mxu1 %v12030_v9  ;;  %18338 = vst [vmem:[#allocation49_spill] sm:$0xff] %v13402_v40  ;;  %v12031_v35 = vld [vmem:[#allocation8 + $0x2e0] ss:$16 sps:$4 sm:$0xff]   ;;  %v12034_v9 = vld [vmem:[#allocation8 + $0x2e8] ss:$16 sps:$4 sm:$0xff]   ;;  %v13446_v28 = vadd.f32 %v13234_v17, %v13197_v51 }
 0x510   : > { %6758 = vmatmul.mubr.bf16.gmra.mrb[140].mxu0 %v5789_v23  ;;  %7464 = vmatmul.mubr.bf16.gmra.mrb[140].mxu1 %v5789_v23  ;;  %18339 = vst [vmem:[#allocation50_spill] sm:$0xff] %v13406_v13  ;;  %v12039_v23 = vld [vmem:[#allocation8 + $0x304] ss:$16 sps:$4 sm:$0xff]   ;;  %v18344_v58 = vmax.f32 %v13406_v13, 0.0 }
 0x511   : > { %6767 = vmatprep.mubr.bf16.mxu0 %v5794_v52  ;;  %7473 = vmatprep.mubr.bf16.mxu1 %v5794_v52  ;;  %18347 = vst [vmem:[#allocation56_spill] sm:$0xff] %v13446_v28 }
 0x512   : > { %7061 = vmatpush1.bf16.msra.mxu0 %v12025_v1  ;;  %7767 = vmatpush1.bf16.msra.mxu1 %v12028_v34  ;;  %v13410_v30 = vpop.f32.mrb[36].mxu0  ;;  %v13412_v43 = vpop.f32.mrb[36].mxu1 }
 0x513   : > { %18340 = vst [vmem:[#allocation51_spill] sm:$0xff] %v13412_v43  ;;  %7062 = vmatprep.subr.bf16.mxu0 %v12033_v56  ;;  %7768 = vmatprep.subr.bf16.mxu1 %v12036_v11  ;;  %v13415_v38 = vpop.f32.mrb[37].mxu0  ;;  %v13417_v52 = vpop.f32.mrb[37].mxu1  ;;  %v5793_v56 = vpack.c.bf16 %v17890_v18, %v17891_v44  ;;  %v13430_v11 = vadd.f32 %v13244_v60, %v13197_v51  ;;  %v12045_v60 = vld [vmem:[#allocation8 + $0x324] ss:$16 sps:$4 sm:$0xff]  }
 0x514   : > { %18341 = vst [vmem:[#allocation52_spill] sm:$0xff] %v13417_v52  ;;  %v13420_v1 = vpop.f32.mrb[38].mxu0  ;;  %v13422_v34 = vpop.f32.mrb[38].mxu1  ;;  %v12040_v52 = vld [vmem:[#allocation8 + $0x308] ss:$16 sps:$4 sm:$0xff]   ;;  %v13442_v18 = vadd.f32 %v13300_v39, %v13169_v31 }
 0x515   : > { %18342 = vst [vmem:[#allocation53_spill] sm:$0xff] %v13422_v34  ;;  %18343 = vst [vmem:[#allocation54_spill] sm:$0xff] %v13430_v11  ;;  %v13432_v43 = vpop.f32.mrb[39].mxu0  ;;  %v13434_v5 = vpop.f32.mrb[39].mxu1  ;;  %v18345_v34 = vmax.f32 %v13390_v32, 0.0 }
 0x516   : > { %7063 = vmatpush1.bf16.msra.mxu0 %v12031_v35  ;;  %7769 = vmatpush1.bf16.msra.mxu1 %v12034_v9  ;;  %18346 = vst [vmem:[#allocation55_spill] sm:$0xff] %v13442_v18  ;;  %v12048_v44 = vld [vmem:[#allocation8 + $0x32c] ss:$16 sps:$4 sm:$0xff]   ;;  %v13450_v35 = vadd.f32 %v13283_v62, %v13169_v31  ;;  %v12043_v39 = vld [vmem:[#allocation8 + $0x320] ss:$16 sps:$4 sm:$0xff]   ;;  %v17896_v62 = vmax.f32 %v13446_v28, 0.0 }
 0x517   : > { %v5798_v40 = vpack.c.bf16 %v18345_v34, %v18344_v58  ;;  %7064 = vmatprep.subr.bf16.mxu0 %v12039_v23  ;;  %7770 = vmatprep.subr.bf16.mxu1 %v12042_v6  ;;  %v12046_v6 = vld [vmem:[#allocation8 + $0x328] ss:$16 sps:$4 sm:$0xff]   ;;  %v12051_v34 = vld [vmem:[#allocation8 + $0x344] ss:$16 sps:$4 sm:$0xff]   ;;  %v18352_v9 = vmax.f32 %v13430_v11, 0.0  ;;  %v13486_v11 = vadd.f32 %v13344_v15, %v13169_v31  ;;  %v13522_v15 = vadd.f32 %v13392_v26, %v13169_v31 }
 0x518   : > { %6768 = vmatmul.mubr.bf16.gmra.mrb[144].mxu0 %v5793_v56  ;;  %7474 = vmatmul.mubr.bf16.gmra.mrb[144].mxu1 %v5793_v56  ;;  %18348 = vst [vmem:[#allocation57_spill] sm:$0xff] %v13450_v35 }
 0x519   : > { %6777 = vmatprep.mubr.bf16.mxu0 %v5798_v40  ;;  %7483 = vmatprep.mubr.bf16.mxu1 %v5798_v40  ;;  %v5797_v32 = vpack.c.bf16 %v18352_v9, %v17896_v62  ;;  %18356 = vst [vmem:[#allocation62_spill] sm:$0xff] %v13486_v11  ;;  %v12052_v9 = vld [vmem:[#allocation8 + $0x348] ss:$16 sps:$4 sm:$0xff]   ;;  %v13490_v62 = vadd.f32 %v13278_v37, %v13197_v51  ;;  %18364 = vst [vmem:[#allocation69_spill] sm:$0xff] %v13522_v15  ;;  %v18367_v28 = vmax.f32 %v13486_v11, 0.0 }
 0x51a   : > { %7065 = vmatpush1.bf16.msra.mxu0 %v12037_v8  ;;  %7771 = vmatpush1.bf16.msra.mxu1 %v12040_v52  ;;  %v13454_v23 = vpop.f32.mrb[40].mxu0  ;;  %v13456_v17 = vpop.f32.mrb[40].mxu1  ;;  %v12049_v8 = vld [vmem:[#allocation8 + $0x340] ss:$16 sps:$4 sm:$0xff]  }
 0x51b   : > { %18349 = vst [vmem:[#allocation58_spill] sm:$0xff] %v13456_v17  ;;  %7066 = vmatprep.subr.bf16.mxu0 %v12045_v60  ;;  %7772 = vmatprep.subr.bf16.mxu1 %v12048_v44  ;;  %v13459_v56 = vpop.f32.mrb[41].mxu0  ;;  %v13461_v40 = vpop.f32.mrb[41].mxu1  ;;  %v13474_v44 = vadd.f32 %v13288_v55, %v13197_v51  ;;  %v18354_v17 = vmax.f32 %v13450_v35, 0.0  ;;  %v12054_v55 = vld [vmem:[#allocation8 + $0x34c] ss:$16 sps:$4 sm:$0xff]  }
 0x51c   : > { %18350 = vst [vmem:[#allocation59_spill] sm:$0xff] %v13461_v40  ;;  %v13464_v52 = vpop.f32.mrb[42].mxu0  ;;  %v13466_v58 = vpop.f32.mrb[42].mxu1  ;;  %18357 = vst [vmem:[#allocation63_spill] sm:$0xff] %v13490_v62  ;;  %v17901_v37 = vmax.f32 %v13490_v62, 0.0 }
 0x51d   : > { %18351 = vst [vmem:[#allocation60_spill] sm:$0xff] %v13466_v58  ;;  %18353 = vst [vmem:[#allocation61_spill] sm:$0xff] %v13474_v44  ;;  %v13476_v60 = vpop.f32.mrb[43].mxu0  ;;  %v13478_v13 = vpop.f32.mrb[43].mxu1  ;;  %v18355_v58 = vmax.f32 %v13442_v18, 0.0 }
 0x51e   : > { %7067 = vmatpush1.bf16.msra.mxu0 %v12043_v39  ;;  %7773 = vmatpush1.bf16.msra.mxu1 %v12046_v6  ;;  %v13494_v39 = vadd.f32 %v13327_v21, %v13169_v31 }
 0x51f   : > { %v5802_v40 = vpack.c.bf16 %v18355_v58, %v18354_v17  ;;  %7068 = vmatprep.subr.bf16.mxu0 %v12051_v34  ;;  %7774 = vmatprep.subr.bf16.mxu1 %v12054_v55 }
 0x520   : > { %6778 = vmatmul.mubr.bf16.gmra.mrb[148].mxu0 %v5797_v32  ;;  %7484 = vmatmul.mubr.bf16.gmra.mrb[148].mxu1 %v5797_v32  ;;  %18358 = vst [vmem:[#allocation64_spill] sm:$0xff] %v13494_v39  ;;  %v18366_v35 = vmax.f32 %v13494_v39, 0.0 }
 0x521   : > { %6787 = vmatprep.mubr.bf16.mxu0 %v5802_v40  ;;  %7493 = vmatprep.mubr.bf16.mxu1 %v5802_v40 }
 0x522   : > { %7069 = vmatpush1.bf16.msra.mxu0 %v12049_v8  ;;  %v13498_v6 = vpop.f32.mrb[44].mxu0  ;;  %v13500_v17 = vpop.f32.mrb[44].mxu1  ;;  %7775 = vmatpush1.bf16.msra.mxu1 %v12052_v9  ;;  %v18362_v8 = vmax.f32 %v13474_v44, 0.0  ;;  %v13518_v9 = vadd.f32 %v13332_v20, %v13197_v51  ;;  %v5806_v62 = vpack.c.bf16 %v18367_v28, %v18366_v35  ;;  %v13538_v20 = vadd.f32 %v13371_v49, %v13169_v31  ;;  %v12055_v28 = vld [vmem:[#allocation8 + $0x360] ss:$16 sps:$4 sm:$0xff]  }
 0x523   : > { %18359 = vst [vmem:[#allocation65_spill] sm:$0xff] %v13500_v17  ;;  %v13503_v32 = vpop.f32.mrb[45].mxu0  ;;  %v13505_v34 = vpop.f32.mrb[45].mxu1  ;;  %v12057_v35 = vld [vmem:[#allocation8 + $0x364] ss:$16 sps:$4 sm:$0xff]  }
 0x524   : > { %18360 = vst [vmem:[#allocation66_spill] sm:$0xff] %v13505_v34  ;;  %v13508_v40 = vpop.f32.mrb[46].mxu0  ;;  %v13510_v58 = vpop.f32.mrb[46].mxu1  ;;  %v5801_v55 = vpack.c.bf16 %v18362_v8, %v17901_v37  ;;  %18363 = vst [vmem:[#allocation68_spill] sm:$0xff] %v13518_v9  ;;  %v13534_v8 = vadd.f32 %v13322_v42, %v13197_v51  ;;  %v17906_v26 = vmax.f32 %v13518_v9, 0.0  ;;  %v17907_v49 = vmax.f32 %v13538_v20, 0.0  ;;  %7070 = vmatprep.subr.bf16.mxu0 %v12057_v35 }
 0x525   : > { %18361 = vst [vmem:[#allocation67_spill] sm:$0xff] %v13510_v58  ;;  %v13524_v18 = vpop.f32.mrb[47].mxu0  ;;  %v13526_v21 = vpop.f32.mrb[47].mxu1  ;;  %18369 = vst [vmem:[#allocation72_spill] sm:$0xff] %v13538_v20  ;;  %v13574_v35 = vadd.f32 %v13432_v43, %v13169_v31  ;;  %v12058_v9 = vld [vmem:[#allocation8 + $0x368] ss:$16 sps:$4 sm:$0xff]   ;;  %v13610_v43 = vadd.f32 %v13476_v60, %v13169_v31 }
 0x526   : > { %18365 = vst [vmem:[#allocation70_spill] sm:$0xff] %v13526_v21  ;;  %18368 = vst [vmem:[#allocation71_spill] sm:$0xff] %v13534_v8  ;;  %v17908_v42 = vmax.f32 %v13534_v8, 0.0  ;;  %7071 = vmatpush1.bf16.msra.mxu0 %v12055_v28  ;;  %v13582_v28 = vadd.f32 %v13415_v38, %v13169_v31 }
 0x527   : > { %18376 = vst [vmem:[#allocation78_spill] sm:$0xff] %v13574_v35  ;;  %18383 = vst [vmem:[#allocation85_spill] sm:$0xff] %v13610_v43 }
 0x528   : > { %6788 = vmatmul.mubr.bf16.gmra.mrb[152].mxu0 %v5801_v55  ;;  %7494 = vmatmul.mubr.bf16.gmra.mrb[152].mxu1 %v5801_v55  ;;  %v5805_v37 = vpack.c.bf16 %v17906_v26, %v17908_v42  ;;  %v12060_v26 = vld [vmem:[#allocation8 + $0x36c] ss:$16 sps:$4 sm:$0xff]   ;;  %18378 = vst [vmem:[#allocation80_spill] sm:$0xff] %v13582_v28 }
 0x529   : > { %6797 = vmatprep.mubr.bf16.mxu0 %v5806_v62  ;;  %7503 = vmatprep.mubr.bf16.mxu1 %v5806_v62 }
 0x52a   : > { %v13542_v39 = vpop.f32.mrb[48].mxu0  ;;  %v13544_v11 = vpop.f32.mrb[48].mxu1  ;;  %7776 = vmatprep.subr.bf16.mxu1 %v12060_v26 }
 0x52b   : > { %18370 = vst [vmem:[#allocation73_spill] sm:$0xff] %v13544_v11  ;;  %v13547_v44 = vpop.f32.mrb[49].mxu0  ;;  %v13549_v55 = vpop.f32.mrb[49].mxu1  ;;  %v13562_v11 = vadd.f32 %v13376_v63, %v13197_v51  ;;  %v13578_v63 = vadd.f32 %v13366_v46, %v13197_v51  ;;  %7777 = vmatpush1.bf16.msra.mxu1 %v12058_v9  ;;  %v13606_v9 = vadd.f32 %v13420_v1, %v13197_v51 }
 0x52c   : > { %18371 = vst [vmem:[#allocation74_spill] sm:$0xff] %v13549_v55  ;;  %v13552_v17 = vpop.f32.mrb[50].mxu0  ;;  %v13554_v62 = vpop.f32.mrb[50].mxu1  ;;  %v18375_v55 = vmax.f32 %v13522_v15, 0.0  ;;  %v13626_v1 = vadd.f32 %v13459_v56, %v13169_v31 }
 0x52d   : > { %18372 = vst [vmem:[#allocation75_spill] sm:$0xff] %v13554_v62  ;;  %18373 = vst [vmem:[#allocation76_spill] sm:$0xff] %v13562_v11  ;;  %v13564_v58 = vpop.f32.mrb[51].mxu0  ;;  %v13566_v34 = vpop.f32.mrb[51].mxu1  ;;  %v17914_v46 = vmax.f32 %v13578_v63, 0.0  ;;  %v17919_v60 = vmax.f32 %v13606_v9, 0.0 }
 0x52e   : > { %18374 = vst [vmem:[#allocation77_spill] sm:$0xff] %v13566_v34  ;;  %v5810_v62 = vpack.c.bf16 %v18375_v55, %v17907_v49  ;;  %18377 = vst [vmem:[#allocation79_spill] sm:$0xff] %v13578_v63  ;;  %v17913_v55 = vmax.f32 %v13562_v11, 0.0  ;;  %v17920_v56 = vmax.f32 %v13626_v1, 0.0 }
 0x52f   : > { %18382 = vst [vmem:[#allocation84_spill] sm:$0xff] %v13606_v9  ;;  %18388 = vst [vmem:[#allocation88_spill] sm:$0xff] %v13626_v1  ;;  %v12064_v9 = vld [vmem:[#allocation8 + $0x388] ss:$16 sps:$4 sm:$0xff]  }
 0x530   : > { %6798 = vmatmul.mubr.bf16.gmra.mrb[156].mxu0 %v5805_v37  ;;  %7504 = vmatmul.mubr.bf16.gmra.mrb[156].mxu1 %v5805_v37  ;;  %v5809_v26 = vpack.c.bf16 %v17913_v55, %v17914_v46  ;;  %v13622_v55 = vadd.f32 %v13410_v30, %v13197_v51 }
 0x531   : > { %6807 = vmatprep.mubr.bf16.mxu0 %v5810_v62  ;;  %7513 = vmatprep.mubr.bf16.mxu1 %v5810_v62 }
 0x532   : > { %v13586_v49 = vpop.f32.mrb[52].mxu0  ;;  %v13588_v42 = vpop.f32.mrb[52].mxu1  ;;  %18387 = vst [vmem:[#allocation87_spill] sm:$0xff] %v13622_v55  ;;  %v17921_v30 = vmax.f32 %v13622_v55, 0.0 }
 0x533   : > { %18379 = vst [vmem:[#allocation81_spill] sm:$0xff] %v13588_v42  ;;  %v13591_v15 = vpop.f32.mrb[53].mxu0  ;;  %v13593_v37 = vpop.f32.mrb[53].mxu1  ;;  %v18385_v42 = vmax.f32 %v13582_v28, 0.0 }
 0x534   : > { %18380 = vst [vmem:[#allocation82_spill] sm:$0xff] %v13593_v37  ;;  %v13596_v20 = vpop.f32.mrb[54].mxu0  ;;  %v13598_v62 = vpop.f32.mrb[54].mxu1  ;;  %v5813_v46 = vpack.c.bf16 %v17919_v60, %v17921_v30  ;;  %v12066_v60 = vld [vmem:[#allocation8 + $0x38c] ss:$16 sps:$4 sm:$0xff]  }
 0x535   : > { %18381 = vst [vmem:[#allocation83_spill] sm:$0xff] %v13598_v62  ;;  %v13612_v8 = vpop.f32.mrb[55].mxu0  ;;  %v13614_v38 = vpop.f32.mrb[55].mxu1  ;;  %v18386_v62 = vmax.f32 %v13574_v35, 0.0  ;;  %7778 = vmatprep.subr.bf16.mxu1 %v12066_v60 }
 0x536   : > { %18384 = vst [vmem:[#allocation86_spill] sm:$0xff] %v13614_v38  ;;  %7779 = vmatpush1.bf16.msra.mxu1 %v12064_v9  ;;  %v13694_v9 = vadd.f32 %v13498_v6, %v13197_v51  ;;  %v13714_v6 = vadd.f32 %v13547_v44, %v13169_v31  ;;  %v12070_v44 = vld [vmem:[#allocation8 + $0x3a8] ss:$16 sps:$4 sm:$0xff]  }
 0x537   : > { %v5814_v63 = vpack.c.bf16 %v18386_v62, %v18385_v42  ;;  %v12061_v42 = vld [vmem:[#allocation8 + $0x380] ss:$16 sps:$4 sm:$0xff]   ;;  %v12063_v62 = vld [vmem:[#allocation8 + $0x384] ss:$16 sps:$4 sm:$0xff]  }
 0x538   : > { %6808 = vmatmul.mubr.bf16.gmra.mrb[160].mxu0 %v5809_v26  ;;  %7514 = vmatmul.mubr.bf16.gmra.mrb[160].mxu1 %v5809_v26  ;;  %18401 = vst [vmem:[#allocation100_spill] sm:$0xff] %v13694_v9  ;;  %18407 = vst [vmem:[#allocation104_spill] sm:$0xff] %v13714_v6 }
 0x539   : > { %6817 = vmatprep.mubr.bf16.mxu0 %v5814_v63  ;;  %7523 = vmatprep.mubr.bf16.mxu1 %v5814_v63 }
 0x53a   : > { %v13630_v28 = vpop.f32.mrb[56].mxu0  ;;  %v13632_v35 = vpop.f32.mrb[56].mxu1  ;;  %7072 = vmatprep.subr.bf16.mxu0 %v12063_v62  ;;  %v13662_v62 = vadd.f32 %v13524_v18, %v13169_v31  ;;  %v13698_v18 = vadd.f32 %v13508_v40, %v13197_v51 }
 0x53b   : > { %18389 = vst [vmem:[#allocation89_spill] sm:$0xff] %v13632_v35  ;;  %v13635_v11 = vpop.f32.mrb[57].mxu0  ;;  %v13637_v26 = vpop.f32.mrb[57].mxu1  ;;  %v13650_v35 = vadd.f32 %v13464_v52, %v13197_v51  ;;  %7073 = vmatpush1.bf16.msra.mxu0 %v12061_v42  ;;  %v13666_v52 = vadd.f32 %v13454_v23, %v13197_v51  ;;  %v13670_v42 = vadd.f32 %v13503_v32, %v13169_v31 }
 0x53c   : > { %18390 = vst [vmem:[#allocation90_spill] sm:$0xff] %v13637_v26  ;;  %v13640_v37 = vpop.f32.mrb[58].mxu0  ;;  %v13642_v63 = vpop.f32.mrb[58].mxu1  ;;  %v18394_v26 = vmax.f32 %v13610_v43, 0.0  ;;  %18395 = vst [vmem:[#allocation94_spill] sm:$0xff] %v13662_v62  ;;  %v13702_v32 = vadd.f32 %v13564_v58, %v13169_v31  ;;  %v17933_v40 = vmax.f32 %v13698_v18, 0.0 }
 0x53d   : > { %18391 = vst [vmem:[#allocation91_spill] sm:$0xff] %v13642_v63  ;;  %18392 = vst [vmem:[#allocation92_spill] sm:$0xff] %v13650_v35  ;;  %v13652_v38 = vpop.f32.mrb[59].mxu0  ;;  %v13654_v34 = vpop.f32.mrb[59].mxu1  ;;  %v17927_v23 = vmax.f32 %v13666_v52, 0.0 }
 0x53e   : > { %18393 = vst [vmem:[#allocation93_spill] sm:$0xff] %v13654_v34  ;;  %v5818_v63 = vpack.c.bf16 %v18394_v26, %v17920_v56  ;;  %18396 = vst [vmem:[#allocation95_spill] sm:$0xff] %v13666_v52  ;;  %v17926_v26 = vmax.f32 %v13650_v35, 0.0  ;;  %v18405_v52 = vmax.f32 %v13670_v42, 0.0  ;;  %v18411_v35 = vmax.f32 %v13694_v9, 0.0 }
 0x53f   : > { %18397 = vst [vmem:[#allocation96_spill] sm:$0xff] %v13670_v42  ;;  %18402 = vst [vmem:[#allocation101_spill] sm:$0xff] %v13698_v18  ;;  %v13738_v34 = vadd.f32 %v13552_v17, %v13197_v51  ;;  %v13750_v9 = vadd.f32 %v13612_v8, %v13169_v31  ;;  %v13754_v17 = vadd.f32 %v13542_v39, %v13197_v51 }
 0x540   : > { %6818 = vmatmul.mubr.bf16.gmra.mrb[164].mxu0 %v5813_v46  ;;  %7524 = vmatmul.mubr.bf16.gmra.mrb[164].mxu1 %v5813_v46  ;;  %v5817_v60 = vpack.c.bf16 %v17926_v26, %v17927_v23  ;;  %18403 = vst [vmem:[#allocation102_spill] sm:$0xff] %v13702_v32  ;;  %v18406_v26 = vmax.f32 %v13662_v62, 0.0  ;;  %v12067_v62 = vld [vmem:[#allocation8 + $0x3a0] ss:$16 sps:$4 sm:$0xff]  }
 0x541   : > { %6827 = vmatprep.mubr.bf16.mxu0 %v5818_v63  ;;  %7533 = vmatprep.mubr.bf16.mxu1 %v5818_v63  ;;  %18412 = vst [vmem:[#allocation108_spill] sm:$0xff] %v13738_v34  ;;  %18414 = vst [vmem:[#allocation109_spill] sm:$0xff] %v13750_v9  ;;  %v18421_v18 = vmax.f32 %v13750_v9, 0.0  ;;  %v12076_v9 = vld [vmem:[#allocation8 + $0x3c8] ss:$16 sps:$4 sm:$0xff]  }
 0x542   : > { %v13674_v56 = vpop.f32.mrb[60].mxu0  ;;  %v13676_v30 = vpop.f32.mrb[60].mxu1  ;;  %v5822_v23 = vpack.c.bf16 %v18406_v26, %v18405_v52  ;;  %v12069_v52 = vld [vmem:[#allocation8 + $0x3a4] ss:$16 sps:$4 sm:$0xff]   ;;  %18415 = vst [vmem:[#allocation110_spill] sm:$0xff] %v13754_v17 }
 0x543   : > { %18398 = vst [vmem:[#allocation97_spill] sm:$0xff] %v13676_v30  ;;  %v13679_v43 = vpop.f32.mrb[61].mxu0  ;;  %v13681_v46 = vpop.f32.mrb[61].mxu1  ;;  %7074 = vmatprep.subr.bf16.mxu0 %v12069_v52 }
 0x544   : > { %18399 = vst [vmem:[#allocation98_spill] sm:$0xff] %v13681_v46  ;;  %v13684_v1 = vpop.f32.mrb[62].mxu0  ;;  %v13686_v63 = vpop.f32.mrb[62].mxu1  ;;  %v12072_v46 = vld [vmem:[#allocation8 + $0x3ac] ss:$16 sps:$4 sm:$0xff]   ;;  %7075 = vmatpush1.bf16.msra.mxu0 %v12067_v62  ;;  %v17937_v62 = vmax.f32 %v13738_v34, 0.0  ;;  %v13802_v34 = vadd.f32 %v13635_v11, %v13169_v31 }
 0x545   : > { %18400 = vst [vmem:[#allocation99_spill] sm:$0xff] %v13686_v63  ;;  %v13704_v55 = vpop.f32.mrb[63].mxu0  ;;  %v13706_v30 = vpop.f32.mrb[63].mxu1  ;;  %7780 = vmatprep.subr.bf16.mxu1 %v12072_v46  ;;  %v13782_v46 = vadd.f32 %v13596_v20, %v13197_v51  ;;  %v12073_v20 = vld [vmem:[#allocation8 + $0x3c0] ss:$16 sps:$4 sm:$0xff]  }
 0x546   : > { %18404 = vst [vmem:[#allocation103_spill] sm:$0xff] %v13706_v30  ;;  %7781 = vmatpush1.bf16.msra.mxu1 %v12070_v44  ;;  %v17938_v44 = vmax.f32 %v13754_v17, 0.0  ;;  %18424 = vst [vmem:[#allocation118_spill] sm:$0xff] %v13802_v34 }
 0x547   : > { %18420 = vst [vmem:[#allocation115_spill] sm:$0xff] %v13782_v46 }
 0x548   : > { %6828 = vmatmul.mubr.bf16.gmra.mrb[168].mxu0 %v5817_v60  ;;  %7534 = vmatmul.mubr.bf16.gmra.mrb[168].mxu1 %v5817_v60 }
 0x549   : > { %6837 = vmatprep.mubr.bf16.mxu0 %v5822_v23  ;;  %7543 = vmatprep.mubr.bf16.mxu1 %v5822_v23  ;;  %v17932_v23 = vmax.f32 %v13714_v6, 0.0 }
 0x54a   : > { %v13719_v63 = vpop.f32.mrb[64].mxu0  ;;  %v13721_v42 = vpop.f32.mrb[64].mxu1 }
 0x54b   : > { %18408 = vst [vmem:[#allocation105_spill] sm:$0xff] %v13721_v42  ;;  %v13723_v26 = vpop.f32.mrb[65].mxu0  ;;  %v13725_v60 = vpop.f32.mrb[65].mxu1  ;;  %v5821_v42 = vpack.c.bf16 %v17933_v40, %v18411_v35  ;;  %v13758_v35 = vadd.f32 %v13591_v15, %v13169_v31 }
 0x54c   : > { %18409 = vst [vmem:[#allocation106_spill] sm:$0xff] %v13725_v60  ;;  %v13728_v30 = vpop.f32.mrb[66].mxu0  ;;  %v13730_v58 = vpop.f32.mrb[66].mxu1 }
 0x54d   : > { %18410 = vst [vmem:[#allocation107_spill] sm:$0xff] %v13730_v58  ;;  %v13740_v21 = vpop.f32.mrb[67].mxu0  ;;  %v13742_v60 = vpop.f32.mrb[67].mxu1  ;;  %v18413_v58 = vmax.f32 %v13702_v32, 0.0  ;;  %18416 = vst [vmem:[#allocation111_spill] sm:$0xff] %v13758_v35 }
 0x54f   : > { %v5826_v52 = vpack.c.bf16 %v18413_v58, %v17932_v23 }
 0x550   : > { %6838 = vmatmul.mubr.bf16.gmra.mrb[172].mxu0 %v5821_v42  ;;  %7544 = vmatmul.mubr.bf16.gmra.mrb[172].mxu1 %v5821_v42  ;;  %v17941_v42 = vmax.f32 %v13758_v35, 0.0 }
 0x551   : > { %6847 = vmatprep.mubr.bf16.mxu0 %v5826_v52  ;;  %7553 = vmatprep.mubr.bf16.mxu1 %v5826_v52  ;;  %v5825_v52 = vpack.c.bf16 %v17937_v62, %v17938_v44  ;;  %v13798_v62 = vadd.f32 %v13586_v49, %v13197_v51  ;;  %v12075_v44 = vld [vmem:[#allocation8 + $0x3c4] ss:$16 sps:$4 sm:$0xff]  }
 0x552   : > { %v13762_v58 = vpop.f32.mrb[68].mxu0  ;;  %v13764_v8 = vpop.f32.mrb[68].mxu1  ;;  %7076 = vmatprep.subr.bf16.mxu0 %v12075_v44 }
 0x553   : > { %18417 = vst [vmem:[#allocation112_spill] sm:$0xff] %v13764_v8  ;;  %v13767_v39 = vpop.f32.mrb[69].mxu0  ;;  %v13769_v23 = vpop.f32.mrb[69].mxu1  ;;  %v5830_v8 = vpack.c.bf16 %v18421_v18, %v17941_v42  ;;  %18423 = vst [vmem:[#allocation117_spill] sm:$0xff] %v13798_v62  ;;  %v12078_v18 = vld [vmem:[#allocation8 + $0x3cc] ss:$16 sps:$4 sm:$0xff]   ;;  %7077 = vmatpush1.bf16.msra.mxu0 %v12073_v20  ;;  %v13826_v20 = vadd.f32 %v13640_v37, %v13197_v51  ;;  %v13846_v37 = vadd.f32 %v13679_v43, %v13169_v31 }
 0x554   : > { %18418 = vst [vmem:[#allocation113_spill] sm:$0xff] %v13769_v23  ;;  %v13772_v15 = vpop.f32.mrb[70].mxu0  ;;  %v13774_v40 = vpop.f32.mrb[70].mxu1  ;;  %v17944_v42 = vmax.f32 %v13782_v46, 0.0  ;;  %7782 = vmatprep.subr.bf16.mxu1 %v12078_v18 }
 0x555   : > { %18419 = vst [vmem:[#allocation114_spill] sm:$0xff] %v13774_v40  ;;  %v13784_v32 = vpop.f32.mrb[71].mxu0  ;;  %v13786_v6 = vpop.f32.mrb[71].mxu1  ;;  %v13794_v40 = vadd.f32 %v13652_v38, %v13169_v31  ;;  %7783 = vmatpush1.bf16.msra.mxu1 %v12076_v9  ;;  %18428 = vst [vmem:[#allocation122_spill] sm:$0xff] %v13826_v20 }
 0x556   : > { %18433 = vst [vmem:[#allocation126_spill] sm:$0xff] %v13846_v37 }
 0x557   : > { %18422 = vst [vmem:[#allocation116_spill] sm:$0xff] %v13794_v40  ;;  %v18430_v9 = vmax.f32 %v13794_v40, 0.0 }
 0x558   : > { %6848 = vmatmul.mubr.bf16.gmra.mrb[176].mxu0 %v5825_v52  ;;  %7554 = vmatmul.mubr.bf16.gmra.mrb[176].mxu1 %v5825_v52  ;;  %v17945_v52 = vmax.f32 %v13798_v62, 0.0 }
 0x559   : > { %6857 = vmatprep.mubr.bf16.mxu0 %v5830_v8  ;;  %7563 = vmatprep.mubr.bf16.mxu1 %v5830_v8  ;;  %v17946_v8 = vmax.f32 %v13802_v34, 0.0 }
 0x55a   : > { %v13806_v35 = vpop.f32.mrb[72].mxu0  ;;  %v13808_v49 = vpop.f32.mrb[72].mxu1  ;;  %v5829_v38 = vpack.c.bf16 %v17944_v42, %v17945_v52  ;;  %v13842_v42 = vadd.f32 %v13630_v28, %v13197_v51  ;;  %v17951_v52 = vmax.f32 %v13826_v20, 0.0  ;;  %v13890_v20 = vadd.f32 %v13723_v26, %v13169_v31 }
 0x55b   : > { %18425 = vst [vmem:[#allocation119_spill] sm:$0xff] %v13808_v49  ;;  %v13811_v17 = vpop.f32.mrb[73].mxu0  ;;  %v13813_v11 = vpop.f32.mrb[73].mxu1 }
 0x55c   : > { %18426 = vst [vmem:[#allocation120_spill] sm:$0xff] %v13813_v11  ;;  %v13816_v23 = vpop.f32.mrb[74].mxu0  ;;  %v13818_v44 = vpop.f32.mrb[74].mxu1  ;;  %v5834_v11 = vpack.c.bf16 %v18430_v9, %v17946_v8  ;;  %18432 = vst [vmem:[#allocation125_spill] sm:$0xff] %v13842_v42  ;;  %v17952_v40 = vmax.f32 %v13842_v42, 0.0  ;;  %v13870_v9 = vadd.f32 %v13684_v1, %v13197_v51 }
 0x55d   : > { %18427 = vst [vmem:[#allocation121_spill] sm:$0xff] %v13818_v44  ;;  %v13828_v18 = vpop.f32.mrb[75].mxu0  ;;  %v13830_v49 = vpop.f32.mrb[75].mxu1  ;;  %v13838_v44 = vadd.f32 %v13704_v55, %v13169_v31  ;;  %v12079_v1 = vld [vmem:[#allocation8 + $0x3e0] ss:$16 sps:$4 sm:$0xff]   ;;  %18442 = vst [vmem:[#allocation134_spill] sm:$0xff] %v13890_v20 }
 0x55e   : > { %18429 = vst [vmem:[#allocation123_spill] sm:$0xff] %v13830_v49  ;;  %18437 = vst [vmem:[#allocation130_spill] sm:$0xff] %v13870_v9 }
 0x55f   : > { %18431 = vst [vmem:[#allocation124_spill] sm:$0xff] %v13838_v44 }
 0x560   : > { %6858 = vmatmul.mubr.bf16.gmra.mrb[180].mxu0 %v5829_v38  ;;  %7564 = vmatmul.mubr.bf16.gmra.mrb[180].mxu1 %v5829_v38  ;;  %v17955_v38 = vmax.f32 %v13846_v37, 0.0 }
 0x561   : > { %6867 = vmatprep.mubr.bf16.mxu0 %v5834_v11  ;;  %7573 = vmatprep.mubr.bf16.mxu1 %v5834_v11  ;;  %v5833_v11 = vpack.c.bf16 %v17951_v52, %v17952_v40  ;;  %v13886_v52 = vadd.f32 %v13674_v56, %v13197_v51  ;;  %v12081_v40 = vld [vmem:[#allocation8 + $0x3e4] ss:$16 sps:$4 sm:$0xff]  }
 0x562   : > { %v13850_v8 = vpop.f32.mrb[76].mxu0  ;;  %v13852_v55 = vpop.f32.mrb[76].mxu1  ;;  %7078 = vmatprep.subr.bf16.mxu0 %v12081_v40 }
 0x563   : > { %18434 = vst [vmem:[#allocation127_spill] sm:$0xff] %v13852_v55  ;;  %v13855_v28 = vpop.f32.mrb[77].mxu0  ;;  %v13857_v34 = vpop.f32.mrb[77].mxu1  ;;  %18441 = vst [vmem:[#allocation133_spill] sm:$0xff] %v13886_v52  ;;  %7079 = vmatpush1.bf16.msra.mxu0 %v12079_v1  ;;  %v13914_v1 = vadd.f32 %v13728_v30, %v13197_v51  ;;  %v13934_v30 = vadd.f32 %v13767_v39, %v13169_v31 }
 0x564   : > { %18435 = vst [vmem:[#allocation128_spill] sm:$0xff] %v13857_v34  ;;  %v13860_v43 = vpop.f32.mrb[78].mxu0  ;;  %v13862_v46 = vpop.f32.mrb[78].mxu1  ;;  %v18439_v34 = vmax.f32 %v13838_v44, 0.0  ;;  %v12082_v44 = vld [vmem:[#allocation8 + $0x3e8] ss:$16 sps:$4 sm:$0xff]  }
 0x565   : > { %18436 = vst [vmem:[#allocation129_spill] sm:$0xff] %v13862_v46  ;;  %v13872_v62 = vpop.f32.mrb[79].mxu0  ;;  %v13874_v55 = vpop.f32.mrb[79].mxu1  ;;  %v13882_v46 = vadd.f32 %v13740_v21, %v13169_v31  ;;  %18446 = vst [vmem:[#allocation138_spill] sm:$0xff] %v13914_v1 }
 0x566   : > { %18438 = vst [vmem:[#allocation131_spill] sm:$0xff] %v13874_v55  ;;  %v5838_v49 = vpack.c.bf16 %v18439_v34, %v17955_v38  ;;  %v12084_v34 = vld [vmem:[#allocation8 + $0x3ec] ss:$16 sps:$4 sm:$0xff]   ;;  %v17958_v38 = vmax.f32 %v13870_v9, 0.0  ;;  %18451 = vst [vmem:[#allocation142_spill] sm:$0xff] %v13934_v30 }
 0x567   : > { %18440 = vst [vmem:[#allocation132_spill] sm:$0xff] %v13882_v46  ;;  %7784 = vmatprep.subr.bf16.mxu1 %v12084_v34 }
 0x568   : > { %6868 = vmatmul.mubr.bf16.gmra.mrb[184].mxu0 %v5833_v11  ;;  %7574 = vmatmul.mubr.bf16.gmra.mrb[184].mxu1 %v5833_v11  ;;  %v17959_v11 = vmax.f32 %v13886_v52, 0.0 }
 0x569   : > { %6877 = vmatprep.mubr.bf16.mxu0 %v5838_v49  ;;  %7583 = vmatprep.mubr.bf16.mxu1 %v5838_v49  ;;  %v17960_v49 = vmax.f32 %v13890_v20, 0.0 }
 0x56a   : > { %v13894_v37 = vpop.f32.mrb[80].mxu0  ;;  %v13896_v56 = vpop.f32.mrb[80].mxu1  ;;  %7785 = vmatpush1.bf16.msra.mxu1 %v12082_v44  ;;  %v5837_v21 = vpack.c.bf16 %v17958_v38, %v17959_v11  ;;  %v18448_v44 = vmax.f32 %v13882_v46, 0.0  ;;  %v13930_v38 = vadd.f32 %v13719_v63, %v13197_v51  ;;  %v17965_v11 = vmax.f32 %v13914_v1, 0.0 }
 0x56b   : > { %18443 = vst [vmem:[#allocation135_spill] sm:$0xff] %v13896_v56  ;;  %v13899_v42 = vpop.f32.mrb[81].mxu0  ;;  %v13901_v26 = vpop.f32.mrb[81].mxu1 }
 0x56c   : > { %18444 = vst [vmem:[#allocation136_spill] sm:$0xff] %v13901_v26  ;;  %v13904_v55 = vpop.f32.mrb[82].mxu0  ;;  %v13906_v40 = vpop.f32.mrb[82].mxu1  ;;  %v5842_v26 = vpack.c.bf16 %v18448_v44, %v17960_v49  ;;  %18450 = vst [vmem:[#allocation141_spill] sm:$0xff] %v13930_v38  ;;  %v17966_v46 = vmax.f32 %v13930_v38, 0.0  ;;  %v13958_v44 = vadd.f32 %v13772_v15, %v13197_v51  ;;  %v13978_v15 = vadd.f32 %v13811_v17, %v13169_v31 }
 0x56d   : > { %18445 = vst [vmem:[#allocation137_spill] sm:$0xff] %v13906_v40  ;;  %v13916_v34 = vpop.f32.mrb[83].mxu0  ;;  %v13918_v56 = vpop.f32.mrb[83].mxu1  ;;  %v13926_v40 = vadd.f32 %v13784_v32, %v13169_v31 }
 0x56e   : > { %18447 = vst [vmem:[#allocation139_spill] sm:$0xff] %v13918_v56  ;;  %18455 = vst [vmem:[#allocation146_spill] sm:$0xff] %v13958_v44 }
 0x56f   : > { %18449 = vst [vmem:[#allocation140_spill] sm:$0xff] %v13926_v40  ;;  %18460 = vst [vmem:[#allocation150_spill] sm:$0xff] %v13978_v15 }
 0x570   : > { %6878 = vmatmul.mubr.bf16.gmra.mrb[188].mxu0 %v5837_v21  ;;  %7584 = vmatmul.mubr.bf16.gmra.mrb[188].mxu1 %v5837_v21  ;;  %v17967_v21 = vmax.f32 %v13934_v30, 0.0 }
 0x571   : > { %6887 = vmatprep.mubr.bf16.mxu0 %v5842_v26  ;;  %7593 = vmatprep.mubr.bf16.mxu1 %v5842_v26  ;;  %v5841_v26 = vpack.c.bf16 %v17965_v11, %v17966_v46  ;;  %v13974_v11 = vadd.f32 %v13762_v58, %v13197_v51  ;;  %v17972_v46 = vmax.f32 %v13958_v44, 0.0 }
 0x572   : > { %v13938_v49 = vpop.f32.mrb[84].mxu0  ;;  %v13940_v32 = vpop.f32.mrb[84].mxu1 }
 0x573   : > { %18452 = vst [vmem:[#allocation143_spill] sm:$0xff] %v13940_v32  ;;  %v13943_v63 = vpop.f32.mrb[85].mxu0  ;;  %v13945_v20 = vpop.f32.mrb[85].mxu1  ;;  %18459 = vst [vmem:[#allocation149_spill] sm:$0xff] %v13974_v11 }
 0x574   : > { %18453 = vst [vmem:[#allocation144_spill] sm:$0xff] %v13945_v20  ;;  %v13948_v39 = vpop.f32.mrb[86].mxu0  ;;  %v13950_v9 = vpop.f32.mrb[86].mxu1  ;;  %v18457_v20 = vmax.f32 %v13926_v40, 0.0  ;;  %v17973_v40 = vmax.f32 %v13974_v11, 0.0 }
 0x575   : > { %18454 = vst [vmem:[#allocation145_spill] sm:$0xff] %v13950_v9  ;;  %v13960_v52 = vpop.f32.mrb[87].mxu0  ;;  %v13962_v32 = vpop.f32.mrb[87].mxu1  ;;  %v13970_v9 = vadd.f32 %v13828_v18, %v13169_v31 }
 0x576   : > { %18456 = vst [vmem:[#allocation147_spill] sm:$0xff] %v13962_v32  ;;  %v5846_v56 = vpack.c.bf16 %v18457_v20, %v17967_v21  ;;  %v14002_v20 = vadd.f32 %v13816_v23, %v13197_v51  ;;  %v14022_v23 = vadd.f32 %v13855_v28, %v13169_v31 }
 0x577   : > { %18458 = vst [vmem:[#allocation148_spill] sm:$0xff] %v13970_v9 }
 0x578   : > { %6888 = vmatmul.mubr.bf16.gmra.mrb[192].mxu0 %v5841_v26  ;;  %7594 = vmatmul.mubr.bf16.gmra.mrb[192].mxu1 %v5841_v26  ;;  %v17974_v26 = vmax.f32 %v13978_v15, 0.0  ;;  %18464 = vst [vmem:[#allocation154_spill] sm:$0xff] %v14002_v20  ;;  %18469 = vst [vmem:[#allocation158_spill] sm:$0xff] %v14022_v23 }
 0x579   : > { %6897 = vmatprep.mubr.bf16.mxu0 %v5846_v56  ;;  %7603 = vmatprep.mubr.bf16.mxu1 %v5846_v56  ;;  %v5845_v56 = vpack.c.bf16 %v17972_v46, %v17973_v40  ;;  %v14018_v46 = vadd.f32 %v13806_v35, %v13197_v51  ;;  %v17979_v40 = vmax.f32 %v14002_v20, 0.0 }
 0x57a   : > { %v13982_v21 = vpop.f32.mrb[88].mxu0  ;;  %v13984_v18 = vpop.f32.mrb[88].mxu1 }
 0x57b   : > { %18461 = vst [vmem:[#allocation151_spill] sm:$0xff] %v13984_v18  ;;  %v13987_v58 = vpop.f32.mrb[89].mxu0  ;;  %v13989_v30 = vpop.f32.mrb[89].mxu1  ;;  %18468 = vst [vmem:[#allocation157_spill] sm:$0xff] %v14018_v46 }
 0x57c   : > { %18462 = vst [vmem:[#allocation152_spill] sm:$0xff] %v13989_v30  ;;  %v13992_v17 = vpop.f32.mrb[90].mxu0  ;;  %v13994_v1 = vpop.f32.mrb[90].mxu1  ;;  %v18466_v30 = vmax.f32 %v13970_v9, 0.0  ;;  %v17980_v9 = vmax.f32 %v14018_v46, 0.0 }
 0x57d   : > { %18463 = vst [vmem:[#allocation153_spill] sm:$0xff] %v13994_v1  ;;  %v14004_v38 = vpop.f32.mrb[91].mxu0  ;;  %v14006_v18 = vpop.f32.mrb[91].mxu1  ;;  %v14014_v1 = vadd.f32 %v13872_v62, %v13169_v31 }
 0x57e   : > { %18465 = vst [vmem:[#allocation155_spill] sm:$0xff] %v14006_v18  ;;  %v5850_v32 = vpack.c.bf16 %v18466_v30, %v17974_v26  ;;  %v14046_v30 = vadd.f32 %v13860_v43, %v13197_v51  ;;  %v14066_v43 = vadd.f32 %v13899_v42, %v13169_v31 }
 0x57f   : > { %18467 = vst [vmem:[#allocation156_spill] sm:$0xff] %v14014_v1 }
 0x580   : > { %6898 = vmatmul.mubr.bf16.gmra.mrb[196].mxu0 %v5845_v56  ;;  %7604 = vmatmul.mubr.bf16.gmra.mrb[196].mxu1 %v5845_v56  ;;  %v17981_v56 = vmax.f32 %v14022_v23, 0.0  ;;  %18473 = vst [vmem:[#allocation162_spill] sm:$0xff] %v14046_v30  ;;  %18478 = vst [vmem:[#allocation166_spill] sm:$0xff] %v14066_v43 }
 0x581   : > { %6907 = vmatprep.mubr.bf16.mxu0 %v5850_v32  ;;  %7613 = vmatprep.mubr.bf16.mxu1 %v5850_v32  ;;  %v5849_v32 = vpack.c.bf16 %v17979_v40, %v17980_v9  ;;  %v14062_v40 = vadd.f32 %v13850_v8, %v13197_v51  ;;  %v17986_v9 = vmax.f32 %v14046_v30, 0.0 }
 0x582   : > { %v14026_v26 = vpop.f32.mrb[92].mxu0  ;;  %v14028_v62 = vpop.f32.mrb[92].mxu1 }
 0x583   : > { %18470 = vst [vmem:[#allocation159_spill] sm:$0xff] %v14028_v62  ;;  %v14031_v35 = vpop.f32.mrb[93].mxu0  ;;  %v14033_v15 = vpop.f32.mrb[93].mxu1  ;;  %18477 = vst [vmem:[#allocation165_spill] sm:$0xff] %v14062_v40 }
 0x584   : > { %18471 = vst [vmem:[#allocation160_spill] sm:$0xff] %v14033_v15  ;;  %v14036_v28 = vpop.f32.mrb[94].mxu0  ;;  %v14038_v44 = vpop.f32.mrb[94].mxu1  ;;  %v18475_v15 = vmax.f32 %v14014_v1, 0.0  ;;  %v17987_v1 = vmax.f32 %v14062_v40, 0.0 }
 0x585   : > { %18472 = vst [vmem:[#allocation161_spill] sm:$0xff] %v14038_v44  ;;  %v14048_v11 = vpop.f32.mrb[95].mxu0  ;;  %v14050_v62 = vpop.f32.mrb[95].mxu1  ;;  %v14058_v44 = vadd.f32 %v13916_v34, %v13169_v31 }
 0x586   : > { %18474 = vst [vmem:[#allocation163_spill] sm:$0xff] %v14050_v62  ;;  %v5854_v18 = vpack.c.bf16 %v18475_v15, %v17981_v56  ;;  %v14090_v15 = vadd.f32 %v13904_v55, %v13197_v51  ;;  %v14110_v55 = vadd.f32 %v13943_v63, %v13169_v31 }
 0x587   : > { %18476 = vst [vmem:[#allocation164_spill] sm:$0xff] %v14058_v44 }
 0x588   : > { %6908 = vmatmul.mubr.bf16.gmra.mrb[200].mxu0 %v5849_v32  ;;  %7614 = vmatmul.mubr.bf16.gmra.mrb[200].mxu1 %v5849_v32  ;;  %v17988_v32 = vmax.f32 %v14066_v43, 0.0  ;;  %18482 = vst [vmem:[#allocation170_spill] sm:$0xff] %v14090_v15  ;;  %18487 = vst [vmem:[#allocation174_spill] sm:$0xff] %v14110_v55 }
 0x589   : > { %6917 = vmatprep.mubr.bf16.mxu0 %v5854_v18  ;;  %7623 = vmatprep.mubr.bf16.mxu1 %v5854_v18  ;;  %v5853_v18 = vpack.c.bf16 %v17986_v9, %v17987_v1  ;;  %v14106_v9 = vadd.f32 %v13894_v37, %v13197_v51  ;;  %v17993_v1 = vmax.f32 %v14090_v15, 0.0 }
 0x58a   : > { %v14070_v56 = vpop.f32.mrb[96].mxu0  ;;  %v14072_v34 = vpop.f32.mrb[96].mxu1 }
 0x58b   : > { %18479 = vst [vmem:[#allocation167_spill] sm:$0xff] %v14072_v34  ;;  %v14075_v8 = vpop.f32.mrb[97].mxu0  ;;  %v14077_v23 = vpop.f32.mrb[97].mxu1  ;;  %18486 = vst [vmem:[#allocation173_spill] sm:$0xff] %v14106_v9 }
 0x58c   : > { %18480 = vst [vmem:[#allocation168_spill] sm:$0xff] %v14077_v23  ;;  %v14080_v42 = vpop.f32.mrb[98].mxu0  ;;  %v14082_v20 = vpop.f32.mrb[98].mxu1  ;;  %v18484_v23 = vmax.f32 %v14058_v44, 0.0  ;;  %v17994_v44 = vmax.f32 %v14106_v9, 0.0 }
 0x58d   : > { %18481 = vst [vmem:[#allocation169_spill] sm:$0xff] %v14082_v20  ;;  %v14092_v46 = vpop.f32.mrb[99].mxu0  ;;  %v14094_v34 = vpop.f32.mrb[99].mxu1  ;;  %v14102_v20 = vadd.f32 %v13960_v52, %v13169_v31 }
 0x58e   : > { %18483 = vst [vmem:[#allocation171_spill] sm:$0xff] %v14094_v34  ;;  %v5858_v62 = vpack.c.bf16 %v18484_v23, %v17988_v32  ;;  %v14134_v23 = vadd.f32 %v13948_v39, %v13197_v51  ;;  %v14154_v39 = vadd.f32 %v13987_v58, %v13169_v31 }
 0x58f   : > { %18485 = vst [vmem:[#allocation172_spill] sm:$0xff] %v14102_v20 }
 0x590   : > { %6918 = vmatmul.mubr.bf16.gmra.mrb[204].mxu0 %v5853_v18  ;;  %7624 = vmatmul.mubr.bf16.gmra.mrb[204].mxu1 %v5853_v18  ;;  %v17995_v18 = vmax.f32 %v14110_v55, 0.0  ;;  %18491 = vst [vmem:[#allocation178_spill] sm:$0xff] %v14134_v23  ;;  %18496 = vst [vmem:[#allocation182_spill] sm:$0xff] %v14154_v39 }
 0x591   : > { %6927 = vmatprep.mubr.bf16.mxu0 %v5858_v62  ;;  %7633 = vmatprep.mubr.bf16.mxu1 %v5858_v62  ;;  %v5857_v62 = vpack.c.bf16 %v17993_v1, %v17994_v44  ;;  %v14150_v1 = vadd.f32 %v13938_v49, %v13197_v51  ;;  %v18000_v44 = vmax.f32 %v14134_v23, 0.0 }
 0x592   : > { %v14114_v32 = vpop.f32.mrb[100].mxu0  ;;  %v14116_v52 = vpop.f32.mrb[100].mxu1 }
 0x593   : > { %18488 = vst [vmem:[#allocation175_spill] sm:$0xff] %v14116_v52  ;;  %v14119_v37 = vpop.f32.mrb[101].mxu0  ;;  %v14121_v43 = vpop.f32.mrb[101].mxu1  ;;  %18495 = vst [vmem:[#allocation181_spill] sm:$0xff] %v14150_v1 }
 0x594   : > { %18489 = vst [vmem:[#allocation176_spill] sm:$0xff] %v14121_v43  ;;  %v14124_v63 = vpop.f32.mrb[102].mxu0  ;;  %v14126_v30 = vpop.f32.mrb[102].mxu1  ;;  %v18493_v43 = vmax.f32 %v14102_v20, 0.0  ;;  %v18001_v20 = vmax.f32 %v14150_v1, 0.0 }
 0x595   : > { %18490 = vst [vmem:[#allocation177_spill] sm:$0xff] %v14126_v30  ;;  %v14136_v40 = vpop.f32.mrb[103].mxu0  ;;  %v14138_v52 = vpop.f32.mrb[103].mxu1  ;;  %v14146_v30 = vadd.f32 %v14004_v38, %v13169_v31 }
 0x596   : > { %18492 = vst [vmem:[#allocation179_spill] sm:$0xff] %v14138_v52  ;;  %v5862_v34 = vpack.c.bf16 %v18493_v43, %v17995_v18  ;;  %v14178_v43 = vadd.f32 %v13992_v17, %v13197_v51  ;;  %v14198_v17 = vadd.f32 %v14031_v35, %v13169_v31 }
 0x597   : > { %18494 = vst [vmem:[#allocation180_spill] sm:$0xff] %v14146_v30 }
 0x598   : > { %6928 = vmatmul.mubr.bf16.gmra.mrb[208].mxu0 %v5857_v62  ;;  %7634 = vmatmul.mubr.bf16.gmra.mrb[208].mxu1 %v5857_v62  ;;  %v18002_v62 = vmax.f32 %v14154_v39, 0.0  ;;  %18500 = vst [vmem:[#allocation186_spill] sm:$0xff] %v14178_v43  ;;  %18505 = vst [vmem:[#allocation190_spill] sm:$0xff] %v14198_v17 }
 0x599   : > { %6937 = vmatprep.mubr.bf16.mxu0 %v5862_v34  ;;  %7643 = vmatprep.mubr.bf16.mxu1 %v5862_v34  ;;  %v5861_v34 = vpack.c.bf16 %v18000_v44, %v18001_v20  ;;  %v14194_v44 = vadd.f32 %v13982_v21, %v13197_v51  ;;  %v18007_v20 = vmax.f32 %v14178_v43, 0.0 }
 0x59a   : > { %v14158_v18 = vpop.f32.mrb[104].mxu0  ;;  %v14160_v38 = vpop.f32.mrb[104].mxu1 }
 0x59b   : > { %18497 = vst [vmem:[#allocation183_spill] sm:$0xff] %v14160_v38  ;;  %v14163_v49 = vpop.f32.mrb[105].mxu0  ;;  %v14165_v55 = vpop.f32.mrb[105].mxu1  ;;  %18504 = vst [vmem:[#allocation189_spill] sm:$0xff] %v14194_v44 }
 0x59c   : > { %18498 = vst [vmem:[#allocation184_spill] sm:$0xff] %v14165_v55  ;;  %v14168_v58 = vpop.f32.mrb[106].mxu0  ;;  %v14170_v15 = vpop.f32.mrb[106].mxu1  ;;  %v18502_v55 = vmax.f32 %v14146_v30, 0.0  ;;  %v18008_v30 = vmax.f32 %v14194_v44, 0.0 }
 0x59d   : > { %18499 = vst [vmem:[#allocation185_spill] sm:$0xff] %v14170_v15  ;;  %v14180_v9 = vpop.f32.mrb[107].mxu0  ;;  %v14182_v38 = vpop.f32.mrb[107].mxu1  ;;  %v14190_v15 = vadd.f32 %v14048_v11, %v13169_v31 }
 0x59e   : > { %18501 = vst [vmem:[#allocation187_spill] sm:$0xff] %v14182_v38  ;;  %v5866_v52 = vpack.c.bf16 %v18502_v55, %v18002_v62  ;;  %v14222_v55 = vadd.f32 %v14036_v28, %v13197_v51  ;;  %v14242_v28 = vadd.f32 %v14075_v8, %v13169_v31 }
 0x59f   : > { %18503 = vst [vmem:[#allocation188_spill] sm:$0xff] %v14190_v15 }
 0x5a0   : > { %6938 = vmatmul.mubr.bf16.gmra.mrb[212].mxu0 %v5861_v34  ;;  %7644 = vmatmul.mubr.bf16.gmra.mrb[212].mxu1 %v5861_v34  ;;  %v18009_v34 = vmax.f32 %v14198_v17, 0.0  ;;  %18509 = vst [vmem:[#allocation194_spill] sm:$0xff] %v14222_v55  ;;  %18514 = vst [vmem:[#allocation198_spill] sm:$0xff] %v14242_v28 }
 0x5a1   : > { %6947 = vmatprep.mubr.bf16.mxu0 %v5866_v52  ;;  %7653 = vmatprep.mubr.bf16.mxu1 %v5866_v52  ;;  %v5865_v52 = vpack.c.bf16 %v18007_v20, %v18008_v30  ;;  %v14238_v20 = vadd.f32 %v14026_v26, %v13197_v51  ;;  %v18014_v30 = vmax.f32 %v14222_v55, 0.0 }
 0x5a2   : > { %v14202_v62 = vpop.f32.mrb[108].mxu0  ;;  %v14204_v11 = vpop.f32.mrb[108].mxu1 }
 0x5a3   : > { %18506 = vst [vmem:[#allocation191_spill] sm:$0xff] %v14204_v11  ;;  %v14207_v21 = vpop.f32.mrb[109].mxu0  ;;  %v14209_v39 = vpop.f32.mrb[109].mxu1  ;;  %18513 = vst [vmem:[#allocation197_spill] sm:$0xff] %v14238_v20 }
 0x5a4   : > { %18507 = vst [vmem:[#allocation192_spill] sm:$0xff] %v14209_v39  ;;  %v14212_v35 = vpop.f32.mrb[110].mxu0  ;;  %v14214_v23 = vpop.f32.mrb[110].mxu1  ;;  %v18511_v39 = vmax.f32 %v14190_v15, 0.0  ;;  %v18015_v15 = vmax.f32 %v14238_v20, 0.0 }
 0x5a5   : > { %18508 = vst [vmem:[#allocation193_spill] sm:$0xff] %v14214_v23  ;;  %v14224_v1 = vpop.f32.mrb[111].mxu0  ;;  %v14226_v11 = vpop.f32.mrb[111].mxu1  ;;  %v14234_v23 = vadd.f32 %v14092_v46, %v13169_v31 }
 0x5a6   : > { %18510 = vst [vmem:[#allocation195_spill] sm:$0xff] %v14226_v11  ;;  %v5870_v38 = vpack.c.bf16 %v18511_v39, %v18009_v34  ;;  %v14266_v39 = vadd.f32 %v14080_v42, %v13197_v51  ;;  %v14286_v42 = vadd.f32 %v14119_v37, %v13169_v31 }
 0x5a7   : > { %18512 = vst [vmem:[#allocation196_spill] sm:$0xff] %v14234_v23 }
 0x5a8   : > { %6948 = vmatmul.mubr.bf16.gmra.mrb[216].mxu0 %v5865_v52  ;;  %7654 = vmatmul.mubr.bf16.gmra.mrb[216].mxu1 %v5865_v52  ;;  %v18016_v52 = vmax.f32 %v14242_v28, 0.0  ;;  %18518 = vst [vmem:[#allocation202_spill] sm:$0xff] %v14266_v39  ;;  %18523 = vst [vmem:[#allocation206_spill] sm:$0xff] %v14286_v42 }
 0x5a9   : > { %6957 = vmatprep.mubr.bf16.mxu0 %v5870_v38  ;;  %7663 = vmatprep.mubr.bf16.mxu1 %v5870_v38  ;;  %v5869_v38 = vpack.c.bf16 %v18014_v30, %v18015_v15  ;;  %v14282_v30 = vadd.f32 %v14070_v56, %v13197_v51  ;;  %v18022_v15 = vmax.f32 %v14266_v39, 0.0  ;;  %v14324_v39 = vadd.f32 %v14114_v32, %v13197_v51 }
 0x5aa   : > { %v14246_v34 = vpop.f32.mrb[112].mxu0  ;;  %v14248_v46 = vpop.f32.mrb[112].mxu1 }
 0x5ab   : > { %18515 = vst [vmem:[#allocation199_spill] sm:$0xff] %v14248_v46  ;;  %v14251_v26 = vpop.f32.mrb[113].mxu0  ;;  %v14253_v17 = vpop.f32.mrb[113].mxu1  ;;  %18522 = vst [vmem:[#allocation205_spill] sm:$0xff] %v14282_v30 }
 0x5ac   : > { %18516 = vst [vmem:[#allocation200_spill] sm:$0xff] %v14253_v17  ;;  %v14256_v8 = vpop.f32.mrb[114].mxu0  ;;  %v14258_v43 = vpop.f32.mrb[114].mxu1  ;;  %v18520_v17 = vmax.f32 %v14234_v23, 0.0  ;;  %v18024_v23 = vmax.f32 %v14282_v30, 0.0  ;;  %18531 = vst [vmem:[#allocation213_spill] sm:$0xff] %v14324_v39 }
 0x5ad   : > { %18517 = vst [vmem:[#allocation201_spill] sm:$0xff] %v14258_v43  ;;  %v14268_v44 = vpop.f32.mrb[115].mxu0  ;;  %v14270_v46 = vpop.f32.mrb[115].mxu1  ;;  %v14278_v43 = vadd.f32 %v14136_v40, %v13169_v31 }
 0x5ae   : > { %18519 = vst [vmem:[#allocation203_spill] sm:$0xff] %v14270_v46  ;;  %v5874_v11 = vpack.c.bf16 %v18520_v17, %v18016_v52  ;;  %v14310_v17 = vadd.f32 %v14124_v63, %v13197_v51  ;;  %v14328_v63 = vadd.f32 %v14163_v49, %v13169_v31 }
 0x5af   : > { %18521 = vst [vmem:[#allocation204_spill] sm:$0xff] %v14278_v43 }
 0x5b0   : > { %6958 = vmatmul.mubr.bf16.gmra.mrb[220].mxu0 %v5869_v38  ;;  %7664 = vmatmul.mubr.bf16.gmra.mrb[220].mxu1 %v5869_v38  ;;  %v18023_v38 = vmax.f32 %v14286_v42, 0.0  ;;  %18527 = vst [vmem:[#allocation210_spill] sm:$0xff] %v14310_v17  ;;  %18532 = vst [vmem:[#allocation214_spill] sm:$0xff] %v14328_v63 }
 0x5b1   : > { %6967 = vmatprep.mubr.bf16.mxu0 %v5874_v11  ;;  %7673 = vmatprep.mubr.bf16.mxu1 %v5874_v11  ;;  %v5873_v11 = vpack.c.bf16 %v18022_v15, %v18024_v23  ;;  %v18029_v15 = vmax.f32 %v14310_v17, 0.0  ;;  %v18031_v23 = vmax.f32 %v14324_v39, 0.0  ;;  %v14366_v17 = vadd.f32 %v14158_v18, %v13197_v51 }
 0x5b2   : > { %v14290_v52 = vpop.f32.mrb[116].mxu0  ;;  %v14292_v40 = vpop.f32.mrb[116].mxu1 }
 0x5b3   : > { %18524 = vst [vmem:[#allocation207_spill] sm:$0xff] %v14292_v40  ;;  %v14295_v56 = vpop.f32.mrb[117].mxu0  ;;  %v14297_v28 = vpop.f32.mrb[117].mxu1  ;;  %18540 = vst [vmem:[#allocation221_spill] sm:$0xff] %v14366_v17 }
 0x5b4   : > { %18525 = vst [vmem:[#allocation208_spill] sm:$0xff] %v14297_v28  ;;  %v14300_v37 = vpop.f32.mrb[118].mxu0  ;;  %v14302_v55 = vpop.f32.mrb[118].mxu1  ;;  %v18529_v28 = vmax.f32 %v14278_v43, 0.0 }
 0x5b5   : > { %18526 = vst [vmem:[#allocation209_spill] sm:$0xff] %v14302_v55  ;;  %v4086_v20 = vpop.f32.mrb[119].mxu0  ;;  %v14312_v40 = vpop.f32.mrb[119].mxu1  ;;  %v14320_v55 = vadd.f32 %v14180_v9, %v13169_v31 }
 0x5b6   : > { %18528 = vst [vmem:[#allocation211_spill] sm:$0xff] %v14312_v40  ;;  %v5878_v46 = vpack.c.bf16 %v18529_v28, %v18023_v38  ;;  %v14352_v28 = vadd.f32 %v14168_v58, %v13197_v51  ;;  %v14370_v58 = vadd.f32 %v14207_v21, %v13169_v31 }
 0x5b7   : > { %18530 = vst [vmem:[#allocation212_spill] sm:$0xff] %v14320_v55 }
 0x5b8   : > { %6968 = vmatmul.mubr.bf16.gmra.mrb[224].mxu0 %v5873_v11  ;;  %7674 = vmatmul.mubr.bf16.gmra.mrb[224].mxu1 %v5873_v11  ;;  %v18030_v11 = vmax.f32 %v14328_v63, 0.0  ;;  %18536 = vst [vmem:[#allocation218_spill] sm:$0xff] %v14352_v28  ;;  %18541 = vst [vmem:[#allocation222_spill] sm:$0xff] %v14370_v58 }
 0x5b9   : > { %6977 = vmatprep.mubr.bf16.mxu0 %v5878_v46  ;;  %7683 = vmatprep.mubr.bf16.mxu1 %v5878_v46  ;;  %v5877_v46 = vpack.c.bf16 %v18029_v15, %v18031_v23  ;;  %v18036_v15 = vmax.f32 %v14352_v28, 0.0  ;;  %v18038_v23 = vmax.f32 %v14366_v17, 0.0  ;;  %v14406_v28 = vadd.f32 %v14202_v62, %v13197_v51  ;;  %v18609_v17 = vld [vmem:[#allocation65_spill] sm:$0xff] }
 0x5ba   : > { %v14332_v38 = vpop.f32.mrb[120].mxu0  ;;  %v14334_v9 = vpop.f32.mrb[120].mxu1 }
 0x5bb   : > { %18533 = vst [vmem:[#allocation215_spill] sm:$0xff] %v14334_v9  ;;  %v14337_v32 = vpop.f32.mrb[121].mxu0  ;;  %v14339_v43 = vpop.f32.mrb[121].mxu1  ;;  %18548 = vst [vmem:[#allocation228_spill] sm:$0xff] %v14406_v28 }
 0x5bc   : > { %18534 = vst [vmem:[#allocation216_spill] sm:$0xff] %v14339_v43  ;;  %v14342_v49 = vpop.f32.mrb[122].mxu0  ;;  %v14344_v42 = vpop.f32.mrb[122].mxu1  ;;  %v18538_v43 = vmax.f32 %v14320_v55, 0.0 }
 0x5bd   : > { %18535 = vst [vmem:[#allocation217_spill] sm:$0xff] %v14344_v42  ;;  %v4096_v30 = vpop.f32.mrb[123].mxu0  ;;  %v14354_v9 = vpop.f32.mrb[123].mxu1  ;;  %v14362_v42 = vadd.f32 %v14224_v1, %v13169_v31 }
 0x5be   : > { %18537 = vst [vmem:[#allocation219_spill] sm:$0xff] %v14354_v9  ;;  %v5882_v40 = vpack.c.bf16 %v18538_v43, %v18030_v11  ;;  %v14392_v43 = vadd.f32 %v14212_v35, %v13197_v51  ;;  %v14410_v35 = vadd.f32 %v14251_v26, %v13169_v31 }
 0x5bf   : > { %18539 = vst [vmem:[#allocation220_spill] sm:$0xff] %v14362_v42 }
 0x5c0   : > { %6978 = vmatmul.mubr.bf16.gmra.mrb[228].mxu0 %v5877_v46  ;;  %7684 = vmatmul.mubr.bf16.gmra.mrb[228].mxu1 %v5877_v46  ;;  %v18037_v46 = vmax.f32 %v14370_v58, 0.0  ;;  %18545 = vst [vmem:[#allocation226_spill] sm:$0xff] %v14392_v43  ;;  %18549 = vst [vmem:[#allocation229_spill] sm:$0xff] %v14410_v35 }
 0x5c1   : > { %6987 = vmatprep.mubr.bf16.mxu0 %v5882_v40  ;;  %7693 = vmatprep.mubr.bf16.mxu1 %v5882_v40  ;;  %v5881_v40 = vpack.c.bf16 %v18036_v15, %v18038_v23  ;;  %v18039_v15 = vmax.f32 %v14392_v43, 0.0  ;;  %v14433_v23 = vadd.f32 %v14246_v34, %v13197_v51 }
 0x5c2   : > { %v14374_v11 = vpop.f32.mrb[124].mxu0  ;;  %v14376_v1 = vpop.f32.mrb[124].mxu1 }
 0x5c3   : > { %18542 = vst [vmem:[#allocation223_spill] sm:$0xff] %v14376_v1  ;;  %v4102_v18 = vpop.f32.mrb[125].mxu0  ;;  %v14379_v55 = vpop.f32.mrb[125].mxu1  ;;  %18552 = vst [vmem:[#allocation232_spill] sm:$0xff] %v14433_v23 }
 0x5c4   : > { %18543 = vst [vmem:[#allocation224_spill] sm:$0xff] %v14379_v55  ;;  %v14382_v63 = vpop.f32.mrb[126].mxu0  ;;  %v14384_v21 = vpop.f32.mrb[126].mxu1  ;;  %v18546_v55 = vmax.f32 %v14362_v42, 0.0  ;;  %v18601_v42 = vld [vmem:[#allocation58_spill] sm:$0xff] }
 0x5c5   : > { %18544 = vst [vmem:[#allocation225_spill] sm:$0xff] %v14384_v21  ;;  %v4106_v39 = vpop.f32.mrb[127].mxu0  ;;  %v14394_v1 = vpop.f32.mrb[127].mxu1  ;;  %v14402_v21 = vadd.f32 %v14268_v44, %v13169_v31  ;;  %v18042_v44 = vmax.f32 %v14410_v35, 0.0 }
 0x5c6   : > { %v5886_v9 = vpack.c.bf16 %v18546_v55, %v18037_v46  ;;  %v18040_v46 = vmax.f32 %v14406_v28, 0.0 }
 0x5c7   : > { %18547 = vst [vmem:[#allocation227_spill] sm:$0xff] %v14402_v21  ;;  %v18041_v55 = vmax.f32 %v14402_v21, 0.0  ;;  %v18593_v21 = vld [vmem:[#allocation51_spill] sm:$0xff] }
 0x5c8   : > { %6988 = vmatmul.mubr.bf16.gmra.mrb[232].mxu0 %v5881_v40  ;;  %7694 = vmatmul.mubr.bf16.gmra.mrb[232].mxu1 %v5881_v40  ;;  %v5885_v62 = vpack.c.bf16 %v18039_v15, %v18040_v46  ;;  %v14422_v40 = vadd.f32 %v14256_v8, %v13197_v51  ;;  %v14437_v15 = vadd.f32 %v14295_v56, %v13169_v31 }
 0x5c9   : > { %6997 = vmatprep.mubr.bf16.mxu0 %v5886_v9  ;;  %7703 = vmatprep.mubr.bf16.mxu1 %v5886_v9  ;;  %v5890_v26 = vpack.c.bf16 %v18041_v55, %v18042_v44  ;;  %v14429_v9 = vadd.f32 %v4086_v20, %v13169_v31  ;;  %v18044_v55 = vmax.f32 %v14433_v23, 0.0  ;;  %v14460_v44 = vadd.f32 %v14290_v52, %v13197_v51 }
 0x5ca   : > { %18550 = vst [vmem:[#allocation230_spill] sm:$0xff] %v14422_v40  ;;  %18553 = vst [vmem:[#allocation233_spill] sm:$0xff] %v14437_v15  ;;  %v18043_v8 = vmax.f32 %v14422_v40, 0.0  ;;  %v18046_v20 = vmax.f32 %v14437_v15, 0.0 }
 0x5cb   : > { %18551 = vst [vmem:[#allocation231_spill] sm:$0xff] %v14429_v9  ;;  %v18045_v46 = vmax.f32 %v14429_v9, 0.0  ;;  %18556 = vst [vmem:[#allocation236_spill] sm:$0xff] %v14460_v44 }
 0x5cc   : > { %v5889_v34 = vpack.c.bf16 %v18043_v8, %v18044_v55  ;;  %v14464_v8 = vadd.f32 %v14337_v32, %v13169_v31 }
 0x5cd   : > { %v5894_v56 = vpack.c.bf16 %v18045_v46, %v18046_v20  ;;  %v18048_v46 = vmax.f32 %v14460_v44, 0.0  ;;  %v14487_v20 = vadd.f32 %v14332_v38, %v13197_v51 }
 0x5ce   : > { %18557 = vst [vmem:[#allocation237_spill] sm:$0xff] %v14464_v8 }
 0x5cf   : > { %18560 = vst [vmem:[#allocation240_spill] sm:$0xff] %v14487_v20 }
 0x5d0   : > { %6998 = vmatmul.mubr.bf16.gmra.mrb[236].mxu0 %v5885_v62  ;;  %7704 = vmatmul.mubr.bf16.gmra.mrb[236].mxu1 %v5885_v62  ;;  %v14449_v62 = vadd.f32 %v14300_v37, %v13197_v51 }
 0x5d1   : > { %7007 = vmatprep.mubr.bf16.mxu0 %v5890_v26  ;;  %7713 = vmatprep.mubr.bf16.mxu1 %v5890_v26  ;;  %v14456_v26 = vadd.f32 %v4096_v30, %v13169_v31  ;;  %v18050_v30 = vmax.f32 %v14464_v8, 0.0  ;;  %v14519_v8 = vsub.s32 2, %v13143_v14 }
 0x5d2   : > { %18554 = vst [vmem:[#allocation234_spill] sm:$0xff] %v14449_v62  ;;  %v18047_v37 = vmax.f32 %v14449_v62, 0.0  ;;  %v18586_v62 = vld [vmem:[#allocation43_spill] sm:$0xff] }
 0x5d3   : > { %18555 = vst [vmem:[#allocation235_spill] sm:$0xff] %v14456_v26  ;;  %v18049_v55 = vmax.f32 %v14456_v26, 0.0 }
 0x5d4   : > { %v5893_v52 = vpack.c.bf16 %v18047_v37, %v18048_v46  ;;  %v14490_v37 = vsub.s32 3, %v13143_v14 }
 0x5d5   : > { %v5898_v32 = vpack.c.bf16 %v18049_v55, %v18050_v30  ;;  %v12085_v30 = vld [vmem:[#allocation7] sm:$0xf] }
 0x5d6   : > { %v14499_v38 = vrot.slane %v12085_v30, %v14490_v37 }
 0x5d8   : > { %7008 = vmatmul.mubr.bf16.gmra.mrb[240].mxu0 %v5889_v34  ;;  %7714 = vmatmul.mubr.bf16.gmra.mrb[240].mxu1 %v5889_v34  ;;  %v14476_v34 = vadd.f32 %v14342_v49, %v13197_v51  ;;  %v14493_v49 = vadd.f32 %v4102_v18, %v13169_v31  ;;  %v14508_v18 = vadd.f32 %v14382_v63, %v13197_v51 }
 0x5d9   : > { %7017 = vmatprep.mubr.bf16.mxu0 %v5894_v56  ;;  %7723 = vmatprep.mubr.bf16.mxu1 %v5894_v56  ;;  %v14483_v56 = vadd.f32 %v4106_v39, %v13169_v31  ;;  %v18059_v39 = vmax.f32 %v14487_v20, 0.0  ;;  %v14527_v63 = vadd.f32 %v13103_v47, %v14499_v38 }
 0x5da   : > { %18558 = vst [vmem:[#allocation238_spill] sm:$0xff] %v14476_v34  ;;  %18561 = vst [vmem:[#allocation241_spill] sm:$0xff] %v14493_v49  ;;  %v18054_v46 = vmax.f32 %v14476_v34, 0.0  ;;  %v14523_v34 = vadd.f32 %v14374_v11, %v13197_v51 }
 0x5db   : > { %18559 = vst [vmem:[#allocation239_spill] sm:$0xff] %v14483_v56  ;;  %v18055_v55 = vmax.f32 %v14483_v56, 0.0  ;;  %18562 = vst [vmem:[#allocation242_spill] sm:$0xff] %v14508_v18  ;;  %v18080_v51 = vmax.f32 %v14527_v63, 0.0 }
 0x5dc   : > { %v5897_v31 = vpack.c.bf16 %v18054_v46, %v18059_v39  ;;  %18563 = vst [vmem:[#allocation243_spill] sm:$0xff] %v14523_v34  ;;  %v18058_v14 = vmax.f32 %v14523_v34, 0.0  ;;  %v18579_v34 = vld [vmem:[#allocation35_spill] sm:$0xff] }
 0x5e0   : > { %7018 = vmatmul.mubr.bf16.gmra.mrb[244].mxu0 %v5893_v52  ;;  %7724 = vmatmul.mubr.bf16.gmra.mrb[244].mxu1 %v5893_v52  ;;  %v18057_v52 = vmax.f32 %v14493_v49, 0.0 }
 0x5e1   : > { %7027 = vmatprep.mubr.bf16.mxu0 %v5898_v32  ;;  %7733 = vmatprep.mubr.bf16.mxu1 %v5898_v32  ;;  %v14512_v32 = vadd.f32 %v13109_v53, %v14499_v38  ;;  %v18056_v53 = vmax.f32 %v14508_v18, 0.0 }
 0x5e2   : > { %v5902_v26 = vpack.c.bf16 %v18055_v55, %v18057_v52  ;;  %v14532_v55 = vrot.slane %v12085_v30, %v14519_v8  ;;  %v14550_v30 = vadd.f32 %v13129_v3, %v14499_v38 }
 0x5e3   : > { %v18060_v46 = vmax.f32 %v14512_v32, 0.0  ;;  %v5901_v47 = vpack.c.bf16 %v18056_v53, %v18058_v14 }
 0x5e4   : > { %v14538_v11 = vadd.f32 %v13107_v50, %v14532_v55  ;;  %v14558_v50 = vadd.f32 %v13121_v61, %v14499_v38  ;;  %v18061_v52 = vmax.f32 %v14550_v30, 0.0  ;;  %v14582_v39 = vadd.f32 %v13117_v59, %v14532_v55 }
 0x5e5   : > { %v14750_v20 = vadd.f32 %v18579_v34, %v14532_v55  ;;  %v14778_v15 = vadd.f32 %v18586_v62, %v14532_v55  ;;  %v14806_v40 = vadd.f32 %v18593_v21, %v14532_v55  ;;  %v14834_v43 = vadd.f32 %v18601_v42, %v14532_v55 }
 0x5e6   : > { %v18063_v53 = vmax.f32 %v14538_v11, 0.0  ;;  %v18062_v3 = vmax.f32 %v14558_v50, 0.0 }
 0x5e7   : > { %18580 = vst [vmem:[#allocation35_spill] sm:$0xff] %v14750_v20  ;;  %18587 = vst [vmem:[#allocation43_spill] sm:$0xff] %v14778_v15 }
 0x5e8   : > { %7028 = vmatmul.mubr.bf16.gmra.mrb[248].mxu0 %v5897_v31  ;;  %7734 = vmatmul.mubr.bf16.gmra.mrb[248].mxu1 %v5897_v31  ;;  %v14554_v31 = vadd.f32 %v13099_v45, %v14532_v55  ;;  %v5784_v61 = vpack.c.bf16 %v18061_v52, %v18062_v3  ;;  %v18067_v3 = vmax.f32 %v14582_v39, 0.0  ;;  %18594 = vst [vmem:[#allocation51_spill] sm:$0xff] %v14806_v40  ;;  %18602 = vst [vmem:[#allocation58_spill] sm:$0xff] %v14834_v43 }
 0x5e9   : > { %7037 = vmatprep.mubr.bf16.mxu0 %v5902_v26  ;;  %7743 = vmatprep.mubr.bf16.mxu1 %v5902_v26  ;;  %v5780_v26 = vpack.c.bf16 %v18060_v46, %v18080_v51  ;;  %v14586_v46 = vadd.f32 %v13141_v12, %v14499_v38 }
 0x5ea   : > { %v18081_v14 = vmax.f32 %v14554_v31, 0.0 }
 0x5ec   : > { %v5779_v45 = vpack.c.bf16 %v18063_v53, %v18081_v14  ;;  %v14610_v53 = vadd.f32 %v13137_v10, %v14532_v55  ;;  %v18571_v14 = vld [vmem:[#allocation29_spill] sm:$0xff] }
 0x5ed   : > { %v14722_v56 = vadd.f32 %v18571_v14, %v14532_v55 }
 0x5ef   : > { %18572 = vst [vmem:[#allocation29_spill] sm:$0xff] %v14722_v56 }
 0x5f0   : > { %7038 = vmatmul.mubr.bf16.gmra.mrb[252].mxu0 %v5901_v47  ;;  %7744 = vmatmul.mubr.bf16.gmra.mrb[252].mxu1 %v5901_v47  ;;  %v14570_v47 = vadd.f32 %v13125_v0, %v14532_v55 }
 0x5f1   : > { %7080 = vmatprep.mubr.bf16.mxu0 %v5780_v26  ;;  %7786 = vmatprep.mubr.bf16.mxu1 %v5780_v26  ;;  %v14578_v26 = vadd.f32 %v13151_v19, %v14499_v38  ;;  %v18066_v19 = vmax.f32 %v14586_v46, 0.0 }
 0x5f2   : > { %v18064_v0 = vmax.f32 %v14570_v47, 0.0 }
 0x5f3   : > { %v18065_v52 = vmax.f32 %v14578_v26, 0.0 }
 0x5f4   : > { %v5783_v59 = vpack.c.bf16 %v18064_v0, %v18067_v3  ;;  %v14614_v0 = vadd.f32 %v13166_v29, %v14499_v38  ;;  %v14638_v3 = vadd.f32 %v13162_v27, %v14532_v55 }
 0x5f5   : > { %v5788_v12 = vpack.c.bf16 %v18065_v52, %v18066_v19  ;;  %v18071_v19 = vmax.f32 %v14610_v53, 0.0 }
 0x5f8   : > { %7081 = vmatmul.mubr.bf16.vlgmr.msra.gmra.mrb[128].mxu0 %v5779_v45  ;;  %7787 = vmatmul.mubr.bf16.vlgmr.msra.gmra.mrb[128].mxu1 %v5779_v45  ;;  %v14598_v45 = vadd.f32 %v13147_v16, %v14532_v55 }
 0x5f9   : > { %7090 = vmatprep.mubr.bf16.mxu0 %v5784_v61  ;;  %7796 = vmatprep.mubr.bf16.mxu1 %v5784_v61  ;;  %v14606_v61 = vadd.f32 %v13177_v36, %v14499_v38  ;;  %v18070_v36 = vmax.f32 %v14614_v0, 0.0 }
 0x5fa   : > { %v18068_v16 = vmax.f32 %v14598_v45, 0.0 }
 0x5fb   : > { %v18069_v52 = vmax.f32 %v14606_v61, 0.0 }
 0x5fc   : > { %v5787_v10 = vpack.c.bf16 %v18068_v16, %v18071_v19  ;;  %v14642_v16 = vadd.f32 %v13201_v54, %v14499_v38  ;;  %v14666_v19 = vadd.f32 %v13194_v48, %v14532_v55 }
 0x5fd   : > { %v5792_v29 = vpack.c.bf16 %v18069_v52, %v18070_v36  ;;  %v18075_v36 = vmax.f32 %v14638_v3, 0.0 }
 0x600   : > { %7091 = vmatmul.mubr.bf16.gmra.mrb[132].mxu0 %v5783_v59  ;;  %7797 = vmatmul.mubr.bf16.gmra.mrb[132].mxu1 %v5783_v59  ;;  %v14626_v59 = vadd.f32 %v13173_v33, %v14532_v55 }
 0x601   : > { %7100 = vmatprep.mubr.bf16.mxu0 %v5788_v12  ;;  %7806 = vmatprep.mubr.bf16.mxu1 %v5788_v12  ;;  %v14634_v12 = vadd.f32 %v13214_v4, %v14499_v38  ;;  %v18074_v4 = vmax.f32 %v14642_v16, 0.0 }
 0x602   : > { %v18072_v33 = vmax.f32 %v14626_v59, 0.0 }
 0x603   : > { %v18073_v52 = vmax.f32 %v14634_v12, 0.0 }
 0x604   : > { %v5791_v27 = vpack.c.bf16 %v18072_v33, %v18075_v36  ;;  %v14670_v33 = vadd.f32 %v13241_v22, %v14499_v38  ;;  %v14694_v36 = vadd.f32 %v13236_v2, %v14532_v55 }
 0x605   : > { %v5796_v54 = vpack.c.bf16 %v18073_v52, %v18074_v4  ;;  %v18079_v4 = vmax.f32 %v14666_v19, 0.0 }
 0x608   : > { %7101 = vmatmul.mubr.bf16.gmra.mrb[136].mxu0 %v5787_v10  ;;  %7807 = vmatmul.mubr.bf16.gmra.mrb[136].mxu1 %v5787_v10  ;;  %v14654_v10 = vadd.f32 %v13206_v57, %v14532_v55 }
 0x609   : > { %7110 = vmatprep.mubr.bf16.mxu0 %v5792_v29  ;;  %7816 = vmatprep.mubr.bf16.mxu1 %v5792_v29  ;;  %v14662_v29 = vadd.f32 %v13258_v41, %v14499_v38  ;;  %v18078_v41 = vmax.f32 %v14670_v33, 0.0 }
 0x60a   : > { %v18076_v57 = vmax.f32 %v14654_v10, 0.0 }
 0x60b   : > { %18564 = vst [vmem:[#allocation244_spill] sm:$0xff] %v14662_v29  ;;  %v18077_v52 = vmax.f32 %v14662_v29, 0.0 }
 0x60c   : > { %v5795_v48 = vpack.c.bf16 %v18076_v57, %v18079_v4  ;;  %v14698_v57 = vadd.f32 %v13285_v25, %v14499_v38 }
 0x60d   : > { %v5800_v22 = vpack.c.bf16 %v18077_v52, %v18078_v41  ;;  %v18084_v41 = vmax.f32 %v14694_v36, 0.0 }
 0x60e   : > { %18566 = vst [vmem:[#allocation246_spill] sm:$0xff] %v14698_v57 }
 0x610   : > { %7111 = vmatmul.mubr.bf16.gmra.mrb[140].mxu0 %v5791_v27  ;;  %7817 = vmatmul.mubr.bf16.gmra.mrb[140].mxu1 %v5791_v27  ;;  %v14682_v27 = vadd.f32 %v13246_v24, %v14532_v55 }
 0x611   : > { %7120 = vmatprep.mubr.bf16.mxu0 %v5796_v54  ;;  %7826 = vmatprep.mubr.bf16.mxu1 %v5796_v54  ;;  %v14690_v54 = vadd.f32 %v13302_v7, %v14499_v38  ;;  %v18086_v7 = vmax.f32 %v14698_v57, 0.0 }
 0x612   : > { %v18083_v24 = vmax.f32 %v14682_v27, 0.0 }
 0x613   : > { %18565 = vst [vmem:[#allocation245_spill] sm:$0xff] %v14690_v54  ;;  %v18085_v52 = vmax.f32 %v14690_v54, 0.0 }
 0x614   : > { %v5799_v2 = vpack.c.bf16 %v18083_v24, %v18084_v41  ;;  %v18573_v24 = vld [vmem:[#allocation36_spill] sm:$0xff] }
 0x615   : > { %v5804_v25 = vpack.c.bf16 %v18085_v52, %v18086_v7  ;;  %v14726_v41 = vadd.f32 %v18573_v24, %v14499_v38  ;;  %v18092_v7 = vmax.f32 %v14722_v56, 0.0 }
 0x617   : > { %18574 = vst [vmem:[#allocation36_spill] sm:$0xff] %v14726_v41 }
 0x618   : > { %7121 = vmatmul.mubr.bf16.gmra.mrb[144].mxu0 %v5795_v48  ;;  %7827 = vmatmul.mubr.bf16.gmra.mrb[144].mxu1 %v5795_v48  ;;  %v18567_v48 = vld [vmem:[#allocation30_spill] sm:$0xff] }
 0x619   : > { %7130 = vmatprep.mubr.bf16.mxu0 %v5800_v22  ;;  %7836 = vmatprep.mubr.bf16.mxu1 %v5800_v22  ;;  %v14710_v4 = vadd.f32 %v18567_v48, %v14532_v55  ;;  %v18569_v22 = vld [vmem:[#allocation39_spill] sm:$0xff] }
 0x61a   : > { %v14718_v51 = vadd.f32 %v18569_v22, %v14499_v38  ;;  %v18094_v22 = vmax.f32 %v14726_v41, 0.0 }
 0x61b   : > { %18568 = vst [vmem:[#allocation30_spill] sm:$0xff] %v14710_v4  ;;  %v18091_v48 = vmax.f32 %v14710_v4, 0.0 }
 0x61c   : > { %18570 = vst [vmem:[#allocation39_spill] sm:$0xff] %v14718_v51  ;;  %v18093_v52 = vmax.f32 %v14718_v51, 0.0 }
 0x61d   : > { %v5803_v14 = vpack.c.bf16 %v18091_v48, %v18092_v7  ;;  %v18581_v48 = vld [vmem:[#allocation44_spill] sm:$0xff] }
 0x61e   : > { %v5808_v24 = vpack.c.bf16 %v18093_v52, %v18094_v22  ;;  %v14754_v7 = vadd.f32 %v18581_v48, %v14499_v38  ;;  %v18099_v22 = vmax.f32 %v14750_v20, 0.0 }
 0x620   : > { %7131 = vmatmul.mubr.bf16.gmra.mrb[148].mxu0 %v5799_v2  ;;  %7837 = vmatmul.mubr.bf16.gmra.mrb[148].mxu1 %v5799_v2  ;;  %v18575_v2 = vld [vmem:[#allocation37_spill] sm:$0xff]  ;;  %18582 = vst [vmem:[#allocation44_spill] sm:$0xff] %v14754_v7 }
 0x621   : > { %7140 = vmatprep.mubr.bf16.mxu0 %v5804_v25  ;;  %7846 = vmatprep.mubr.bf16.mxu1 %v5804_v25  ;;  %v14738_v18 = vadd.f32 %v18575_v2, %v14532_v55  ;;  %v18577_v25 = vld [vmem:[#allocation48_spill] sm:$0xff] }
 0x622   : > { %v14746_v49 = vadd.f32 %v18577_v25, %v14499_v38  ;;  %v18101_v25 = vmax.f32 %v14754_v7, 0.0 }
 0x623   : > { %18576 = vst [vmem:[#allocation37_spill] sm:$0xff] %v14738_v18  ;;  %v18098_v2 = vmax.f32 %v14738_v18, 0.0 }
 0x624   : > { %18578 = vst [vmem:[#allocation48_spill] sm:$0xff] %v14746_v49  ;;  %v18100_v52 = vmax.f32 %v14746_v49, 0.0 }
 0x625   : > { %v5807_v34 = vpack.c.bf16 %v18098_v2, %v18099_v22  ;;  %v18588_v2 = vld [vmem:[#allocation52_spill] sm:$0xff] }
 0x626   : > { %v5812_v48 = vpack.c.bf16 %v18100_v52, %v18101_v25  ;;  %v14782_v22 = vadd.f32 %v18588_v2, %v14499_v38  ;;  %v18106_v25 = vmax.f32 %v14778_v15, 0.0 }
 0x628   : > { %7141 = vmatmul.mubr.bf16.gmra.mrb[152].mxu0 %v5803_v14  ;;  %7847 = vmatmul.mubr.bf16.gmra.mrb[152].mxu1 %v5803_v14  ;;  %v18583_v14 = vld [vmem:[#allocation45_spill] sm:$0xff]  ;;  %18589 = vst [vmem:[#allocation52_spill] sm:$0xff] %v14782_v22 }
 0x629   : > { %7150 = vmatprep.mubr.bf16.mxu0 %v5808_v24  ;;  %7856 = vmatprep.mubr.bf16.mxu1 %v5808_v24  ;;  %v14766_v9 = vadd.f32 %v18583_v14, %v14532_v55  ;;  %v14774_v24 = vadd.f32 %v13434_v5, %v14499_v38  ;;  %v18108_v5 = vmax.f32 %v14782_v22, 0.0 }
 0x62b   : > { %18584 = vst [vmem:[#allocation45_spill] sm:$0xff] %v14766_v9  ;;  %18585 = vst [vmem:[#allocation247_spill] sm:$0xff] %v14774_v24  ;;  %v18105_v14 = vmax.f32 %v14766_v9, 0.0  ;;  %v18107_v52 = vmax.f32 %v14774_v24, 0.0 }
 0x62d   : > { %v5811_v62 = vpack.c.bf16 %v18105_v14, %v18106_v25  ;;  %v5816_v2 = vpack.c.bf16 %v18107_v52, %v18108_v5  ;;  %v18595_v14 = vld [vmem:[#allocation59_spill] sm:$0xff]  ;;  %v18114_v5 = vmax.f32 %v14806_v40, 0.0 }
 0x62e   : > { %v14810_v25 = vadd.f32 %v18595_v14, %v14499_v38 }
 0x630   : > { %7151 = vmatmul.mubr.bf16.gmra.mrb[156].mxu0 %v5807_v34  ;;  %7857 = vmatmul.mubr.bf16.gmra.mrb[156].mxu1 %v5807_v34  ;;  %v18590_v34 = vld [vmem:[#allocation53_spill] sm:$0xff]  ;;  %18596 = vst [vmem:[#allocation59_spill] sm:$0xff] %v14810_v25 }
 0x631   : > { %7160 = vmatprep.mubr.bf16.mxu0 %v5812_v48  ;;  %7866 = vmatprep.mubr.bf16.mxu1 %v5812_v48  ;;  %v14794_v44 = vadd.f32 %v18590_v34, %v14532_v55  ;;  %v14802_v48 = vadd.f32 %v13478_v13, %v14499_v38  ;;  %v18116_v13 = vmax.f32 %v14810_v25, 0.0  ;;  %v18617_v25 = vld [vmem:[#allocation73_spill] sm:$0xff] }
 0x633   : > { %18591 = vst [vmem:[#allocation53_spill] sm:$0xff] %v14794_v44  ;;  %18592 = vst [vmem:[#allocation248_spill] sm:$0xff] %v14802_v48  ;;  %v18113_v34 = vmax.f32 %v14794_v44, 0.0  ;;  %v18115_v52 = vmax.f32 %v14802_v48, 0.0  ;;  %v14862_v48 = vadd.f32 %v18609_v17, %v14532_v55  ;;  %v18739_v44 = vld [vmem:[#allocation199_spill] sm:$0xff] }
 0x635   : > { %v5815_v21 = vpack.c.bf16 %v18113_v34, %v18114_v5  ;;  %v5820_v14 = vpack.c.bf16 %v18115_v52, %v18116_v13  ;;  %v18603_v34 = vld [vmem:[#allocation66_spill] sm:$0xff]  ;;  %v18122_v13 = vmax.f32 %v14834_v43, 0.0  ;;  %18610 = vst [vmem:[#allocation65_spill] sm:$0xff] %v14862_v48 }
 0x636   : > { %v14838_v5 = vadd.f32 %v18603_v34, %v14499_v38 }
 0x638   : > { %7161 = vmatmul.mubr.bf16.gmra.mrb[160].mxu0 %v5811_v62  ;;  %7867 = vmatmul.mubr.bf16.gmra.mrb[160].mxu1 %v5811_v62  ;;  %v18597_v62 = vld [vmem:[#allocation60_spill] sm:$0xff]  ;;  %18604 = vst [vmem:[#allocation66_spill] sm:$0xff] %v14838_v5 }
 0x639   : > { %7170 = vmatprep.mubr.bf16.mxu0 %v5816_v2  ;;  %7876 = vmatprep.mubr.bf16.mxu1 %v5816_v2  ;;  %v14822_v35 = vadd.f32 %v18597_v62, %v14532_v55  ;;  %v18599_v2 = vld [vmem:[#allocation70_spill] sm:$0xff] }
 0x63a   : > { %v14830_v23 = vadd.f32 %v18599_v2, %v14499_v38  ;;  %v18124_v2 = vmax.f32 %v14838_v5, 0.0 }
 0x63b   : > { %18598 = vst [vmem:[#allocation60_spill] sm:$0xff] %v14822_v35  ;;  %v18121_v62 = vmax.f32 %v14822_v35, 0.0  ;;  %v14890_v35 = vadd.f32 %v18617_v25, %v14532_v55 }
 0x63c   : > { %18600 = vst [vmem:[#allocation70_spill] sm:$0xff] %v14830_v23  ;;  %v18123_v52 = vmax.f32 %v14830_v23, 0.0 }
 0x63d   : > { %v5819_v42 = vpack.c.bf16 %v18121_v62, %v18122_v13  ;;  %v18611_v62 = vld [vmem:[#allocation74_spill] sm:$0xff]  ;;  %18618 = vst [vmem:[#allocation73_spill] sm:$0xff] %v14890_v35 }
 0x63e   : > { %v5824_v34 = vpack.c.bf16 %v18123_v52, %v18124_v2  ;;  %v14866_v13 = vadd.f32 %v18611_v62, %v14499_v38  ;;  %v18130_v2 = vmax.f32 %v14862_v48, 0.0 }
 0x640   : > { %7171 = vmatmul.mubr.bf16.gmra.mrb[164].mxu0 %v5815_v21  ;;  %7877 = vmatmul.mubr.bf16.gmra.mrb[164].mxu1 %v5815_v21  ;;  %v18605_v21 = vld [vmem:[#allocation67_spill] sm:$0xff]  ;;  %18612 = vst [vmem:[#allocation74_spill] sm:$0xff] %v14866_v13 }
 0x641   : > { %7180 = vmatprep.mubr.bf16.mxu0 %v5820_v14  ;;  %7886 = vmatprep.mubr.bf16.mxu1 %v5820_v14  ;;  %v14850_v58 = vadd.f32 %v18605_v21, %v14532_v55  ;;  %v18607_v14 = vld [vmem:[#allocation77_spill] sm:$0xff] }
 0x642   : > { %v14858_v28 = vadd.f32 %v18607_v14, %v14499_v38  ;;  %v18132_v14 = vmax.f32 %v14866_v13, 0.0 }
 0x643   : > { %18606 = vst [vmem:[#allocation67_spill] sm:$0xff] %v14850_v58  ;;  %v18129_v21 = vmax.f32 %v14850_v58, 0.0  ;;  %v18625_v58 = vld [vmem:[#allocation81_spill] sm:$0xff] }
 0x644   : > { %18608 = vst [vmem:[#allocation77_spill] sm:$0xff] %v14858_v28  ;;  %v18131_v52 = vmax.f32 %v14858_v28, 0.0  ;;  %v14918_v48 = vadd.f32 %v18625_v58, %v14532_v55 }
 0x645   : > { %v5823_v17 = vpack.c.bf16 %v18129_v21, %v18130_v2  ;;  %v18619_v21 = vld [vmem:[#allocation82_spill] sm:$0xff] }
 0x646   : > { %v5828_v62 = vpack.c.bf16 %v18131_v52, %v18132_v14  ;;  %v14894_v2 = vadd.f32 %v18619_v21, %v14499_v38  ;;  %v18138_v14 = vmax.f32 %v14890_v35, 0.0  ;;  %18626 = vst [vmem:[#allocation81_spill] sm:$0xff] %v14918_v48 }
 0x648   : > { %7181 = vmatmul.mubr.bf16.gmra.mrb[168].mxu0 %v5819_v42  ;;  %7887 = vmatmul.mubr.bf16.gmra.mrb[168].mxu1 %v5819_v42  ;;  %v18613_v42 = vld [vmem:[#allocation75_spill] sm:$0xff]  ;;  %18620 = vst [vmem:[#allocation82_spill] sm:$0xff] %v14894_v2 }
 0x649   : > { %7190 = vmatprep.mubr.bf16.mxu0 %v5824_v34  ;;  %7896 = vmatprep.mubr.bf16.mxu1 %v5824_v34  ;;  %v14878_v23 = vadd.f32 %v18613_v42, %v14532_v55  ;;  %v18615_v34 = vld [vmem:[#allocation86_spill] sm:$0xff] }
 0x64a   : > { %v14886_v5 = vadd.f32 %v18615_v34, %v14499_v38  ;;  %v18140_v34 = vmax.f32 %v14894_v2, 0.0 }
 0x64b   : > { %18614 = vst [vmem:[#allocation75_spill] sm:$0xff] %v14878_v23  ;;  %v18137_v42 = vmax.f32 %v14878_v23, 0.0  ;;  %v18633_v23 = vld [vmem:[#allocation89_spill] sm:$0xff] }
 0x64c   : > { %18616 = vst [vmem:[#allocation86_spill] sm:$0xff] %v14886_v5  ;;  %v18139_v52 = vmax.f32 %v14886_v5, 0.0  ;;  %v14946_v35 = vadd.f32 %v18633_v23, %v14532_v55 }
 0x64d   : > { %v5827_v25 = vpack.c.bf16 %v18137_v42, %v18138_v14  ;;  %v18627_v42 = vld [vmem:[#allocation90_spill] sm:$0xff] }
 0x64e   : > { %v5832_v21 = vpack.c.bf16 %v18139_v52, %v18140_v34  ;;  %v14922_v14 = vadd.f32 %v18627_v42, %v14499_v38  ;;  %v18146_v34 = vmax.f32 %v14918_v48, 0.0  ;;  %18634 = vst [vmem:[#allocation89_spill] sm:$0xff] %v14946_v35 }
 0x650   : > { %7191 = vmatmul.mubr.bf16.gmra.mrb[172].mxu0 %v5823_v17  ;;  %7897 = vmatmul.mubr.bf16.gmra.mrb[172].mxu1 %v5823_v17  ;;  %v18621_v17 = vld [vmem:[#allocation83_spill] sm:$0xff]  ;;  %18628 = vst [vmem:[#allocation90_spill] sm:$0xff] %v14922_v14 }
 0x651   : > { %7200 = vmatprep.mubr.bf16.mxu0 %v5828_v62  ;;  %7906 = vmatprep.mubr.bf16.mxu1 %v5828_v62  ;;  %v14906_v28 = vadd.f32 %v18621_v17, %v14532_v55  ;;  %v18623_v62 = vld [vmem:[#allocation93_spill] sm:$0xff] }
 0x652   : > { %v14914_v13 = vadd.f32 %v18623_v62, %v14499_v38  ;;  %v18148_v62 = vmax.f32 %v14922_v14, 0.0  ;;  %v18640_v14 = vld [vmem:[#allocation97_spill] sm:$0xff] }
 0x653   : > { %18622 = vst [vmem:[#allocation83_spill] sm:$0xff] %v14906_v28  ;;  %v18145_v17 = vmax.f32 %v14906_v28, 0.0  ;;  %v14974_v28 = vadd.f32 %v18640_v14, %v14532_v55 }
 0x654   : > { %18624 = vst [vmem:[#allocation93_spill] sm:$0xff] %v14914_v13  ;;  %v18147_v52 = vmax.f32 %v14914_v13, 0.0 }
 0x655   : > { %v5831_v58 = vpack.c.bf16 %v18145_v17, %v18146_v34  ;;  %v18635_v17 = vld [vmem:[#allocation98_spill] sm:$0xff]  ;;  %18641 = vst [vmem:[#allocation97_spill] sm:$0xff] %v14974_v28 }
 0x656   : > { %v5836_v42 = vpack.c.bf16 %v18147_v52, %v18148_v62  ;;  %v14950_v34 = vadd.f32 %v18635_v17, %v14499_v38  ;;  %v18153_v62 = vmax.f32 %v14946_v35, 0.0  ;;  %v18735_v35 = vld [vmem:[#allocation201_spill] sm:$0xff] }
 0x658   : > { %7201 = vmatmul.mubr.bf16.gmra.mrb[176].mxu0 %v5827_v25  ;;  %7907 = vmatmul.mubr.bf16.gmra.mrb[176].mxu1 %v5827_v25  ;;  %v18629_v25 = vld [vmem:[#allocation91_spill] sm:$0xff]  ;;  %18636 = vst [vmem:[#allocation98_spill] sm:$0xff] %v14950_v34 }
 0x659   : > { %7210 = vmatprep.mubr.bf16.mxu0 %v5832_v21  ;;  %7916 = vmatprep.mubr.bf16.mxu1 %v5832_v21  ;;  %v14934_v5 = vadd.f32 %v18629_v25, %v14532_v55  ;;  %v18631_v21 = vld [vmem:[#allocation103_spill] sm:$0xff] }
 0x65a   : > { %v14942_v2 = vadd.f32 %v18631_v21, %v14499_v38  ;;  %v18155_v21 = vmax.f32 %v14950_v34, 0.0  ;;  %v18647_v34 = vld [vmem:[#allocation105_spill] sm:$0xff] }
 0x65b   : > { %18630 = vst [vmem:[#allocation91_spill] sm:$0xff] %v14934_v5  ;;  %v18152_v25 = vmax.f32 %v14934_v5, 0.0  ;;  %v15002_v5 = vadd.f32 %v18647_v34, %v14532_v55 }
 0x65c   : > { %18632 = vst [vmem:[#allocation103_spill] sm:$0xff] %v14942_v2  ;;  %v18154_v52 = vmax.f32 %v14942_v2, 0.0 }
 0x65d   : > { %v5835_v23 = vpack.c.bf16 %v18152_v25, %v18153_v62  ;;  %v18642_v25 = vld [vmem:[#allocation106_spill] sm:$0xff]  ;;  %18648 = vst [vmem:[#allocation105_spill] sm:$0xff] %v15002_v5 }
 0x65e   : > { %v5840_v17 = vpack.c.bf16 %v18154_v52, %v18155_v21  ;;  %v14978_v62 = vadd.f32 %v18642_v25, %v14499_v38  ;;  %v18160_v21 = vmax.f32 %v14974_v28, 0.0 }
 0x660   : > { %7211 = vmatmul.mubr.bf16.gmra.mrb[180].mxu0 %v5831_v58  ;;  %7917 = vmatmul.mubr.bf16.gmra.mrb[180].mxu1 %v5831_v58  ;;  %v18637_v58 = vld [vmem:[#allocation99_spill] sm:$0xff]  ;;  %18643 = vst [vmem:[#allocation106_spill] sm:$0xff] %v14978_v62 }
 0x661   : > { %7220 = vmatprep.mubr.bf16.mxu0 %v5836_v42  ;;  %7926 = vmatprep.mubr.bf16.mxu1 %v5836_v42  ;;  %v14962_v13 = vadd.f32 %v18637_v58, %v14532_v55  ;;  %v14970_v42 = vadd.f32 %v13742_v60, %v14499_v38  ;;  %v18162_v60 = vmax.f32 %v14978_v62, 0.0 }
 0x663   : > { %18638 = vst [vmem:[#allocation99_spill] sm:$0xff] %v14962_v13  ;;  %18639 = vst [vmem:[#allocation249_spill] sm:$0xff] %v14970_v42  ;;  %v18159_v58 = vmax.f32 %v14962_v13, 0.0  ;;  %v18161_v52 = vmax.f32 %v14970_v42, 0.0  ;;  %v18655_v13 = vld [vmem:[#allocation112_spill] sm:$0xff] }
 0x664   : > { %v15030_v28 = vadd.f32 %v18655_v13, %v14532_v55 }
 0x665   : > { %v5839_v14 = vpack.c.bf16 %v18159_v58, %v18160_v21  ;;  %v5844_v25 = vpack.c.bf16 %v18161_v52, %v18162_v60  ;;  %v18649_v58 = vld [vmem:[#allocation113_spill] sm:$0xff]  ;;  %v18168_v60 = vmax.f32 %v15002_v5, 0.0 }
 0x666   : > { %v15006_v21 = vadd.f32 %v18649_v58, %v14499_v38  ;;  %18656 = vst [vmem:[#allocation112_spill] sm:$0xff] %v15030_v28 }
 0x668   : > { %7221 = vmatmul.mubr.bf16.gmra.mrb[184].mxu0 %v5835_v23  ;;  %7927 = vmatmul.mubr.bf16.gmra.mrb[184].mxu1 %v5835_v23  ;;  %v18644_v23 = vld [vmem:[#allocation107_spill] sm:$0xff]  ;;  %18650 = vst [vmem:[#allocation113_spill] sm:$0xff] %v15006_v21 }
 0x669   : > { %7230 = vmatprep.mubr.bf16.mxu0 %v5840_v17  ;;  %7936 = vmatprep.mubr.bf16.mxu1 %v5840_v17  ;;  %v14990_v2 = vadd.f32 %v18644_v23, %v14532_v55  ;;  %v14998_v17 = vadd.f32 %v13786_v6, %v14499_v38  ;;  %v18170_v6 = vmax.f32 %v15006_v21, 0.0 }
 0x66b   : > { %18645 = vst [vmem:[#allocation107_spill] sm:$0xff] %v14990_v2  ;;  %18646 = vst [vmem:[#allocation250_spill] sm:$0xff] %v14998_v17  ;;  %v18167_v23 = vmax.f32 %v14990_v2, 0.0  ;;  %v18169_v52 = vmax.f32 %v14998_v17, 0.0  ;;  %v18663_v2 = vld [vmem:[#allocation119_spill] sm:$0xff] }
 0x66c   : > { %v15058_v5 = vadd.f32 %v18663_v2, %v14532_v55 }
 0x66d   : > { %v5843_v34 = vpack.c.bf16 %v18167_v23, %v18168_v60  ;;  %v5848_v58 = vpack.c.bf16 %v18169_v52, %v18170_v6  ;;  %v18657_v23 = vld [vmem:[#allocation120_spill] sm:$0xff]  ;;  %v18176_v6 = vmax.f32 %v15030_v28, 0.0 }
 0x66e   : > { %v15034_v60 = vadd.f32 %v18657_v23, %v14499_v38  ;;  %18664 = vst [vmem:[#allocation119_spill] sm:$0xff] %v15058_v5 }
 0x670   : > { %7231 = vmatmul.mubr.bf16.gmra.mrb[188].mxu0 %v5839_v14  ;;  %7937 = vmatmul.mubr.bf16.gmra.mrb[188].mxu1 %v5839_v14  ;;  %v18651_v14 = vld [vmem:[#allocation114_spill] sm:$0xff]  ;;  %18658 = vst [vmem:[#allocation120_spill] sm:$0xff] %v15034_v60 }
 0x671   : > { %7240 = vmatprep.mubr.bf16.mxu0 %v5844_v25  ;;  %7946 = vmatprep.mubr.bf16.mxu1 %v5844_v25  ;;  %v15018_v42 = vadd.f32 %v18651_v14, %v14532_v55  ;;  %v18653_v25 = vld [vmem:[#allocation123_spill] sm:$0xff] }
 0x672   : > { %v15026_v62 = vadd.f32 %v18653_v25, %v14499_v38  ;;  %v18178_v25 = vmax.f32 %v15034_v60, 0.0 }
 0x673   : > { %18652 = vst [vmem:[#allocation114_spill] sm:$0xff] %v15018_v42  ;;  %v18175_v14 = vmax.f32 %v15018_v42, 0.0  ;;  %v18671_v42 = vld [vmem:[#allocation127_spill] sm:$0xff] }
 0x674   : > { %18654 = vst [vmem:[#allocation123_spill] sm:$0xff] %v15026_v62  ;;  %v18177_v52 = vmax.f32 %v15026_v62, 0.0  ;;  %v15086_v28 = vadd.f32 %v18671_v42, %v14532_v55 }
 0x675   : > { %v5847_v13 = vpack.c.bf16 %v18175_v14, %v18176_v6  ;;  %v18665_v14 = vld [vmem:[#allocation128_spill] sm:$0xff] }
 0x676   : > { %v5852_v23 = vpack.c.bf16 %v18177_v52, %v18178_v25  ;;  %v15062_v6 = vadd.f32 %v18665_v14, %v14499_v38  ;;  %v18184_v25 = vmax.f32 %v15058_v5, 0.0  ;;  %18672 = vst [vmem:[#allocation127_spill] sm:$0xff] %v15086_v28 }
 0x678   : > { %7241 = vmatmul.mubr.bf16.gmra.mrb[192].mxu0 %v5843_v34  ;;  %7947 = vmatmul.mubr.bf16.gmra.mrb[192].mxu1 %v5843_v34  ;;  %v18659_v34 = vld [vmem:[#allocation121_spill] sm:$0xff]  ;;  %18666 = vst [vmem:[#allocation128_spill] sm:$0xff] %v15062_v6 }
 0x679   : > { %7250 = vmatprep.mubr.bf16.mxu0 %v5848_v58  ;;  %7956 = vmatprep.mubr.bf16.mxu1 %v5848_v58  ;;  %v15046_v17 = vadd.f32 %v18659_v34, %v14532_v55  ;;  %v18661_v58 = vld [vmem:[#allocation131_spill] sm:$0xff] }
 0x67a   : > { %v15054_v21 = vadd.f32 %v18661_v58, %v14499_v38  ;;  %v18186_v58 = vmax.f32 %v15062_v6, 0.0 }
 0x67b   : > { %18660 = vst [vmem:[#allocation121_spill] sm:$0xff] %v15046_v17  ;;  %v18183_v34 = vmax.f32 %v15046_v17, 0.0  ;;  %v18679_v17 = vld [vmem:[#allocation135_spill] sm:$0xff] }
 0x67c   : > { %18662 = vst [vmem:[#allocation131_spill] sm:$0xff] %v15054_v21  ;;  %v18185_v52 = vmax.f32 %v15054_v21, 0.0  ;;  %v15114_v5 = vadd.f32 %v18679_v17, %v14532_v55 }
 0x67d   : > { %v5851_v2 = vpack.c.bf16 %v18183_v34, %v18184_v25  ;;  %v18673_v34 = vld [vmem:[#allocation136_spill] sm:$0xff] }
 0x67e   : > { %v5856_v14 = vpack.c.bf16 %v18185_v52, %v18186_v58  ;;  %v15090_v25 = vadd.f32 %v18673_v34, %v14499_v38  ;;  %v18192_v58 = vmax.f32 %v15086_v28, 0.0  ;;  %18680 = vst [vmem:[#allocation135_spill] sm:$0xff] %v15114_v5 }
 0x680   : > { %7251 = vmatmul.mubr.bf16.gmra.mrb[196].mxu0 %v5847_v13  ;;  %7957 = vmatmul.mubr.bf16.gmra.mrb[196].mxu1 %v5847_v13  ;;  %v18667_v13 = vld [vmem:[#allocation129_spill] sm:$0xff]  ;;  %18674 = vst [vmem:[#allocation136_spill] sm:$0xff] %v15090_v25 }
 0x681   : > { %7260 = vmatprep.mubr.bf16.mxu0 %v5852_v23  ;;  %7966 = vmatprep.mubr.bf16.mxu1 %v5852_v23  ;;  %v15074_v62 = vadd.f32 %v18667_v13, %v14532_v55  ;;  %v18669_v23 = vld [vmem:[#allocation139_spill] sm:$0xff] }
 0x682   : > { %v15082_v60 = vadd.f32 %v18669_v23, %v14499_v38  ;;  %v18194_v23 = vmax.f32 %v15090_v25, 0.0 }
 0x683   : > { %18668 = vst [vmem:[#allocation129_spill] sm:$0xff] %v15074_v62  ;;  %v18191_v13 = vmax.f32 %v15074_v62, 0.0  ;;  %v18687_v62 = vld [vmem:[#allocation143_spill] sm:$0xff] }
 0x684   : > { %18670 = vst [vmem:[#allocation139_spill] sm:$0xff] %v15082_v60  ;;  %v18193_v52 = vmax.f32 %v15082_v60, 0.0  ;;  %v15142_v28 = vadd.f32 %v18687_v62, %v14532_v55 }
 0x685   : > { %v5855_v42 = vpack.c.bf16 %v18191_v13, %v18192_v58  ;;  %v18681_v13 = vld [vmem:[#allocation144_spill] sm:$0xff] }
 0x686   : > { %v5860_v34 = vpack.c.bf16 %v18193_v52, %v18194_v23  ;;  %v15118_v58 = vadd.f32 %v18681_v13, %v14499_v38  ;;  %v18200_v23 = vmax.f32 %v15114_v5, 0.0  ;;  %18688 = vst [vmem:[#allocation143_spill] sm:$0xff] %v15142_v28 }
 0x688   : > { %7261 = vmatmul.mubr.bf16.gmra.mrb[200].mxu0 %v5851_v2  ;;  %7967 = vmatmul.mubr.bf16.gmra.mrb[200].mxu1 %v5851_v2  ;;  %v18675_v2 = vld [vmem:[#allocation137_spill] sm:$0xff]  ;;  %18682 = vst [vmem:[#allocation144_spill] sm:$0xff] %v15118_v58 }
 0x689   : > { %7270 = vmatprep.mubr.bf16.mxu0 %v5856_v14  ;;  %7976 = vmatprep.mubr.bf16.mxu1 %v5856_v14  ;;  %v15102_v21 = vadd.f32 %v18675_v2, %v14532_v55  ;;  %v18677_v14 = vld [vmem:[#allocation147_spill] sm:$0xff] }
 0x68a   : > { %v15110_v6 = vadd.f32 %v18677_v14, %v14499_v38  ;;  %v18202_v14 = vmax.f32 %v15118_v58, 0.0 }
 0x68b   : > { %18676 = vst [vmem:[#allocation137_spill] sm:$0xff] %v15102_v21  ;;  %v18199_v2 = vmax.f32 %v15102_v21, 0.0  ;;  %v18695_v21 = vld [vmem:[#allocation151_spill] sm:$0xff] }
 0x68c   : > { %18678 = vst [vmem:[#allocation147_spill] sm:$0xff] %v15110_v6  ;;  %v18201_v52 = vmax.f32 %v15110_v6, 0.0  ;;  %v15170_v5 = vadd.f32 %v18695_v21, %v14532_v55 }
 0x68d   : > { %v5859_v17 = vpack.c.bf16 %v18199_v2, %v18200_v23  ;;  %v18689_v2 = vld [vmem:[#allocation152_spill] sm:$0xff] }
 0x68e   : > { %v5864_v13 = vpack.c.bf16 %v18201_v52, %v18202_v14  ;;  %v15146_v23 = vadd.f32 %v18689_v2, %v14499_v38  ;;  %v18208_v14 = vmax.f32 %v15142_v28, 0.0  ;;  %18696 = vst [vmem:[#allocation151_spill] sm:$0xff] %v15170_v5 }
 0x690   : > { %7271 = vmatmul.mubr.bf16.gmra.mrb[204].mxu0 %v5855_v42  ;;  %7977 = vmatmul.mubr.bf16.gmra.mrb[204].mxu1 %v5855_v42  ;;  %v18683_v42 = vld [vmem:[#allocation145_spill] sm:$0xff]  ;;  %18690 = vst [vmem:[#allocation152_spill] sm:$0xff] %v15146_v23 }
 0x691   : > { %7280 = vmatprep.mubr.bf16.mxu0 %v5860_v34  ;;  %7986 = vmatprep.mubr.bf16.mxu1 %v5860_v34  ;;  %v15130_v60 = vadd.f32 %v18683_v42, %v14532_v55  ;;  %v18685_v34 = vld [vmem:[#allocation155_spill] sm:$0xff] }
 0x692   : > { %v15138_v25 = vadd.f32 %v18685_v34, %v14499_v38  ;;  %v18210_v34 = vmax.f32 %v15146_v23, 0.0 }
 0x693   : > { %18684 = vst [vmem:[#allocation145_spill] sm:$0xff] %v15130_v60  ;;  %v18207_v42 = vmax.f32 %v15130_v60, 0.0  ;;  %v18703_v60 = vld [vmem:[#allocation159_spill] sm:$0xff] }
 0x694   : > { %18686 = vst [vmem:[#allocation155_spill] sm:$0xff] %v15138_v25  ;;  %v18209_v52 = vmax.f32 %v15138_v25, 0.0  ;;  %v15198_v28 = vadd.f32 %v18703_v60, %v14532_v55 }
 0x695   : > { %v5863_v62 = vpack.c.bf16 %v18207_v42, %v18208_v14  ;;  %v18697_v42 = vld [vmem:[#allocation160_spill] sm:$0xff] }
 0x696   : > { %v5868_v2 = vpack.c.bf16 %v18209_v52, %v18210_v34  ;;  %v15174_v14 = vadd.f32 %v18697_v42, %v14499_v38  ;;  %v18216_v34 = vmax.f32 %v15170_v5, 0.0  ;;  %18704 = vst [vmem:[#allocation159_spill] sm:$0xff] %v15198_v28 }
 0x698   : > { %7281 = vmatmul.mubr.bf16.gmra.mrb[208].mxu0 %v5859_v17  ;;  %7987 = vmatmul.mubr.bf16.gmra.mrb[208].mxu1 %v5859_v17  ;;  %v18691_v17 = vld [vmem:[#allocation153_spill] sm:$0xff]  ;;  %18698 = vst [vmem:[#allocation160_spill] sm:$0xff] %v15174_v14 }
 0x699   : > { %7290 = vmatprep.mubr.bf16.mxu0 %v5864_v13  ;;  %7996 = vmatprep.mubr.bf16.mxu1 %v5864_v13  ;;  %v15158_v6 = vadd.f32 %v18691_v17, %v14532_v55  ;;  %v18693_v13 = vld [vmem:[#allocation163_spill] sm:$0xff] }
 0x69a   : > { %v15166_v58 = vadd.f32 %v18693_v13, %v14499_v38  ;;  %v18218_v13 = vmax.f32 %v15174_v14, 0.0 }
 0x69b   : > { %18692 = vst [vmem:[#allocation153_spill] sm:$0xff] %v15158_v6  ;;  %v18215_v17 = vmax.f32 %v15158_v6, 0.0  ;;  %v18711_v6 = vld [vmem:[#allocation167_spill] sm:$0xff] }
 0x69c   : > { %18694 = vst [vmem:[#allocation163_spill] sm:$0xff] %v15166_v58  ;;  %v18217_v52 = vmax.f32 %v15166_v58, 0.0  ;;  %v15226_v5 = vadd.f32 %v18711_v6, %v14532_v55 }
 0x69d   : > { %v5867_v21 = vpack.c.bf16 %v18215_v17, %v18216_v34  ;;  %v18705_v17 = vld [vmem:[#allocation168_spill] sm:$0xff] }
 0x69e   : > { %v5872_v42 = vpack.c.bf16 %v18217_v52, %v18218_v13  ;;  %v15202_v34 = vadd.f32 %v18705_v17, %v14499_v38  ;;  %v18224_v13 = vmax.f32 %v15198_v28, 0.0  ;;  %18712 = vst [vmem:[#allocation167_spill] sm:$0xff] %v15226_v5 }
 0x6a0   : > { %7291 = vmatmul.mubr.bf16.gmra.mrb[212].mxu0 %v5863_v62  ;;  %7997 = vmatmul.mubr.bf16.gmra.mrb[212].mxu1 %v5863_v62  ;;  %v18699_v62 = vld [vmem:[#allocation161_spill] sm:$0xff]  ;;  %18706 = vst [vmem:[#allocation168_spill] sm:$0xff] %v15202_v34 }
 0x6a1   : > { %7300 = vmatprep.mubr.bf16.mxu0 %v5868_v2  ;;  %8006 = vmatprep.mubr.bf16.mxu1 %v5868_v2  ;;  %v15186_v25 = vadd.f32 %v18699_v62, %v14532_v55  ;;  %v18701_v2 = vld [vmem:[#allocation171_spill] sm:$0xff] }
 0x6a2   : > { %v15194_v23 = vadd.f32 %v18701_v2, %v14499_v38  ;;  %v18226_v2 = vmax.f32 %v15202_v34, 0.0 }
 0x6a3   : > { %18700 = vst [vmem:[#allocation161_spill] sm:$0xff] %v15186_v25  ;;  %v18223_v62 = vmax.f32 %v15186_v25, 0.0  ;;  %v18719_v25 = vld [vmem:[#allocation175_spill] sm:$0xff] }
 0x6a4   : > { %18702 = vst [vmem:[#allocation171_spill] sm:$0xff] %v15194_v23  ;;  %v18225_v52 = vmax.f32 %v15194_v23, 0.0  ;;  %v15254_v28 = vadd.f32 %v18719_v25, %v14532_v55 }
 0x6a5   : > { %v5871_v60 = vpack.c.bf16 %v18223_v62, %v18224_v13  ;;  %v18713_v62 = vld [vmem:[#allocation176_spill] sm:$0xff] }
 0x6a6   : > { %v5876_v17 = vpack.c.bf16 %v18225_v52, %v18226_v2  ;;  %v15230_v13 = vadd.f32 %v18713_v62, %v14499_v38  ;;  %v18232_v2 = vmax.f32 %v15226_v5, 0.0  ;;  %18720 = vst [vmem:[#allocation175_spill] sm:$0xff] %v15254_v28  ;;  %v18733_v5 = vld [vmem:[#allocation195_spill] sm:$0xff] }
 0x6a8   : > { %7301 = vmatmul.mubr.bf16.gmra.mrb[216].mxu0 %v5867_v21  ;;  %8007 = vmatmul.mubr.bf16.gmra.mrb[216].mxu1 %v5867_v21  ;;  %v18707_v21 = vld [vmem:[#allocation169_spill] sm:$0xff]  ;;  %18714 = vst [vmem:[#allocation176_spill] sm:$0xff] %v15230_v13 }
 0x6a9   : > { %7310 = vmatprep.mubr.bf16.mxu0 %v5872_v42  ;;  %8016 = vmatprep.mubr.bf16.mxu1 %v5872_v42  ;;  %v15214_v58 = vadd.f32 %v18707_v21, %v14532_v55  ;;  %v18709_v42 = vld [vmem:[#allocation179_spill] sm:$0xff] }
 0x6aa   : > { %v15222_v14 = vadd.f32 %v18709_v42, %v14499_v38  ;;  %v18234_v42 = vmax.f32 %v15230_v13, 0.0 }
 0x6ab   : > { %18708 = vst [vmem:[#allocation169_spill] sm:$0xff] %v15214_v58  ;;  %v18231_v21 = vmax.f32 %v15214_v58, 0.0 }
 0x6ac   : > { %18710 = vst [vmem:[#allocation179_spill] sm:$0xff] %v15222_v14  ;;  %v18233_v52 = vmax.f32 %v15222_v14, 0.0 }
 0x6ad   : > { %v5875_v6 = vpack.c.bf16 %v18231_v21, %v18232_v2  ;;  %v18721_v21 = vld [vmem:[#allocation184_spill] sm:$0xff] }
 0x6ae   : > { %v5880_v62 = vpack.c.bf16 %v18233_v52, %v18234_v42  ;;  %v15258_v2 = vadd.f32 %v18721_v21, %v14499_v38  ;;  %v18723_v52 = vld [vmem:[#allocation183_spill] sm:$0xff]  ;;  %v18247_v21 = vmax.f32 %v15254_v28, 0.0 }
 0x6af   : > { %v15263_v42 = vadd.f32 %v18723_v52, %v14532_v55 }
 0x6b0   : > { %7311 = vmatmul.mubr.bf16.gmra.mrb[220].mxu0 %v5871_v60  ;;  %8017 = vmatmul.mubr.bf16.gmra.mrb[220].mxu1 %v5871_v60  ;;  %v18715_v60 = vld [vmem:[#allocation177_spill] sm:$0xff]  ;;  %18722 = vst [vmem:[#allocation184_spill] sm:$0xff] %v15258_v2  ;;  %v18248_v25 = vmax.f32 %v15258_v2, 0.0 }
 0x6b1   : > { %7320 = vmatprep.mubr.bf16.mxu0 %v5876_v17  ;;  %8026 = vmatprep.mubr.bf16.mxu1 %v5876_v17  ;;  %v15242_v23 = vadd.f32 %v18715_v60, %v14532_v55  ;;  %v18717_v17 = vld [vmem:[#allocation187_spill] sm:$0xff]  ;;  %18724 = vst [vmem:[#allocation183_spill] sm:$0xff] %v15263_v42  ;;  %v18731_v60 = vld [vmem:[#allocation192_spill] sm:$0xff] }
 0x6b2   : > { %v15250_v34 = vadd.f32 %v18717_v17, %v14499_v38  ;;  %v18725_v17 = vld [vmem:[#allocation185_spill] sm:$0xff]  ;;  %v15281_v52 = vadd.f32 %v18731_v60, %v14499_v38 }
 0x6b3   : > { %18716 = vst [vmem:[#allocation177_spill] sm:$0xff] %v15242_v23  ;;  %v15267_v14 = vadd.f32 %v18725_v17, %v14532_v55  ;;  %v15285_v17 = vadd.f32 %v18733_v5, %v14499_v38  ;;  %v18737_v48 = vmax.f32 %v15242_v23, 0.0  ;;  %v18747_v23 = vld [vmem:[#allocation208_spill] sm:$0xff] }
 0x6b4   : > { %18718 = vst [vmem:[#allocation187_spill] sm:$0xff] %v15250_v34  ;;  %18732 = vst [vmem:[#allocation192_spill] sm:$0xff] %v15281_v52  ;;  %v18738_v5 = vmax.f32 %v15250_v34, 0.0  ;;  %v15325_v28 = vadd.f32 %v18747_v23, %v14499_v38  ;;  %v18757_v23 = vmax.f32 %v15263_v42, 0.0  ;;  %v18763_v42 = vld [vmem:[#allocation215_spill] sm:$0xff] }
 0x6b5   : > { %18726 = vst [vmem:[#allocation185_spill] sm:$0xff] %v15267_v14  ;;  %18734 = vst [vmem:[#allocation195_spill] sm:$0xff] %v15285_v17  ;;  %v18762_v9 = vmax.f32 %v15285_v17, 0.0  ;;  %v15361_v15 = vadd.f32 %v18763_v42, %v14532_v55  ;;  %v15394_v42 = vadd.f32 %v14394_v1, %v14499_v38  ;;  %v8619_v1 = vld [vmem:[#allocation11] sm:$0xf] }
 0x6b6   : > { %v5884_v43 = vpack.c.bf16 %v18738_v5, %v18248_v25  ;;  %v18743_v25 = vld [vmem:[#allocation203_spill] sm:$0xff]  ;;  %18748 = vst [vmem:[#allocation208_spill] sm:$0xff] %v15325_v28 }
 0x6b7   : > { %v15317_v22 = vadd.f32 %v18743_v25, %v14499_v38  ;;  %v18753_v25 = vld [vmem:[#allocation217_spill] sm:$0xff]  ;;  %18764 = vst [vmem:[#allocation215_spill] sm:$0xff] %v15361_v15  ;;  %18774 = vst [vmem:[#allocation251_spill] sm:$0xff] %v15394_v42 }
 0x6b8   : > { %7321 = vmatmul.mubr.bf16.gmra.mrb[224].mxu0 %v5875_v6  ;;  %8027 = vmatmul.mubr.bf16.gmra.mrb[224].mxu1 %v5875_v6  ;;  %v18727_v6 = vld [vmem:[#allocation193_spill] sm:$0xff]  ;;  %v15337_v34 = vadd.f32 %v18753_v25, %v14532_v55  ;;  %v18761_v25 = vmax.f32 %v15281_v52, 0.0 }
 0x6b9   : > { %7330 = vmatprep.mubr.bf16.mxu0 %v5880_v62  ;;  %8036 = vmatprep.mubr.bf16.mxu1 %v5880_v62  ;;  %v15272_v13 = vadd.f32 %v18727_v6, %v14532_v55  ;;  %v18729_v62 = vld [vmem:[#allocation191_spill] sm:$0xff]  ;;  %v15290_v6 = vadd.f32 %v18735_v35, %v14532_v55  ;;  %v15305_v35 = vadd.f32 %v18739_v44, %v14532_v55 }
 0x6ba   : > { %v15277_v58 = vadd.f32 %v18729_v62, %v14532_v55  ;;  %v5879_v62 = vpack.c.bf16 %v18737_v48, %v18247_v21  ;;  %v18741_v21 = vld [vmem:[#allocation200_spill] sm:$0xff]  ;;  %18744 = vst [vmem:[#allocation203_spill] sm:$0xff] %v15317_v22  ;;  %v18745_v44 = vld [vmem:[#allocation207_spill] sm:$0xff]  ;;  %18754 = vst [vmem:[#allocation217_spill] sm:$0xff] %v15337_v34  ;;  %v5888_v51 = vpack.c.bf16 %v18762_v9, %v18761_v25 }
 0x6bb   : > { %18728 = vst [vmem:[#allocation193_spill] sm:$0xff] %v15272_v13  ;;  %18736 = vst [vmem:[#allocation201_spill] sm:$0xff] %v15290_v6  ;;  %v15312_v60 = vadd.f32 %v18741_v21, %v14499_v38  ;;  %v15321_v24 = vadd.f32 %v18745_v44, %v14532_v55  ;;  %v18749_v21 = vld [vmem:[#allocation209_spill] sm:$0xff]  ;;  %v18755_v44 = vld [vmem:[#allocation219_spill] sm:$0xff]  ;;  %v18760_v49 = vmax.f32 %v15272_v13, 0.0 }
 0x6bc   : > { %18730 = vst [vmem:[#allocation191_spill] sm:$0xff] %v15277_v58  ;;  %18740 = vst [vmem:[#allocation199_spill] sm:$0xff] %v15305_v35  ;;  %v15329_v48 = vadd.f32 %v18749_v21, %v14532_v55  ;;  %v15341_v2 = vadd.f32 %v18755_v44, %v14499_v38  ;;  %v18759_v21 = vmax.f32 %v15277_v58, 0.0  ;;  %v6033_v44 = vld [vmem:[#allocation10] sm:$0xf]  ;;  %v18772_v9 = vld [vmem:[#allocation225_spill] sm:$0xff] }
 0x6bd   : > { %18742 = vst [vmem:[#allocation200_spill] sm:$0xff] %v15312_v60  ;;  %18746 = vst [vmem:[#allocation207_spill] sm:$0xff] %v15321_v24  ;;  %v15390_v25 = vadd.f32 %v18772_v9, %v14532_v55  ;;  %v18776_v13 = vmax.f32 %v15312_v60, 0.0  ;;  %v15412_v52 = vrot.slane %v6033_v44, %v14490_v37  ;;  %v18781_v60 = vmax.f32 %v15325_v28, 0.0 }
 0x6be   : > { %18750 = vst [vmem:[#allocation209_spill] sm:$0xff] %v15329_v48  ;;  %18756 = vst [vmem:[#allocation219_spill] sm:$0xff] %v15341_v2  ;;  %v15351_v7 = vpack.c.bf16 %v18760_v49, %v18759_v21  ;;  %v18767_v49 = vmax.f32 %v15290_v6, 0.0  ;;  %v18780_v58 = vmax.f32 %v15329_v48, 0.0 }
 0x6bf   : > { %18773 = vst [vmem:[#allocation225_spill] sm:$0xff] %v15390_v25 }
 0x6c0   : > { %7331 = vmatmul.mubr.bf16.gmra.mrb[228].mxu0 %v5879_v62  ;;  %8037 = vmatmul.mubr.bf16.gmra.mrb[228].mxu1 %v5879_v62  ;;  %v18751_v62 = vld [vmem:[#allocation211_spill] sm:$0xff] }
 0x6c1   : > { %7340 = vmatprep.mubr.bf16.mxu0 %v5884_v43  ;;  %8046 = vmatprep.mubr.bf16.mxu1 %v5884_v43  ;;  %v15333_v5 = vadd.f32 %v18751_v62, %v14499_v38  ;;  %v18758_v43 = vmax.f32 %v15267_v14, 0.0  ;;  %v18263_v62 = vmax.f32 %v15305_v35, 0.0  ;;  %v18768_v35 = vld [vmem:[#allocation223_spill] sm:$0xff] }
 0x6c2   : > { %v15382_v6 = vadd.f32 %v18768_v35, %v14532_v55  ;;  %v18775_v35 = vld [vmem:[#allocation19_spill] sm:$0xff]  ;;  %v18777_v55 = vmax.f32 %v15317_v22, 0.0 }
 0x6c3   : > { %18752 = vst [vmem:[#allocation211_spill] sm:$0xff] %v15333_v5  ;;  %v5883_v40 = vpack.c.bf16 %v18758_v43, %v18757_v23  ;;  %v18765_v23 = vld [vmem:[#allocation216_spill] sm:$0xff]  ;;  %v15371_v21 = vpack.c.bf16 %v18767_v49, %v18263_v62  ;;  %v15399_v17 = vrot.slane %v6033_v44, %v18775_v35  ;;  %v18782_v22 = vmax.f32 %v15333_v5, 0.0 }
 0x6c4   : > { %v15365_v43 = vadd.f32 %v18765_v23, %v14499_v38  ;;  %18769 = vst [vmem:[#allocation223_spill] sm:$0xff] %v15382_v6  ;;  %v18770_v49 = vld [vmem:[#allocation224_spill] sm:$0xff]  ;;  %v5892_v9 = vpack.c.bf16 %v18777_v55, %v18776_v13  ;;  %v18784_v55 = vmax.f32 %v15337_v34, 0.0 }
 0x6c5   : > { %v15386_v62 = vadd.f32 %v18770_v49, %v14499_v38  ;;  %v15402_v49 = vrot.slane %v6033_v44, %v14519_v8  ;;  %v18778_v38 = vld [vmem:[#allocation17_spill] sm:$0xff]  ;;  %v15424_v13 = vpack.c.bf16 %v18782_v22, %v18781_v60 }
 0x6c6   : > { %18766 = vst [vmem:[#allocation216_spill] sm:$0xff] %v15365_v43  ;;  %v15409_v23 = vrot.slane %v6033_v44, %v18778_v38  ;;  %v18785_v44 = vmax.f32 %v15365_v43, 0.0  ;;  %v15452_v5 = vrot.slane %v8619_v1, %v18778_v38 }
 0x6c7   : > { %18771 = vst [vmem:[#allocation224_spill] sm:$0xff] %v15386_v62 }
 0x6c8   : > { %7341 = vmatmul.mubr.bf16.gmra.mrb[232].mxu0 %v5883_v40  ;;  %8047 = vmatmul.mubr.bf16.gmra.mrb[232].mxu1 %v5883_v40  ;;  %v18779_v40 = vmax.f32 %v15321_v24, 0.0  ;;  %v18786_v24 = vmax.f32 %v15341_v2, 0.0 }
 0x6c9   : > { %7350 = vmatprep.mubr.bf16.mxu0 %v5888_v51  ;;  %8056 = vmatprep.mubr.bf16.mxu1 %v5888_v51  ;;  %v18783_v51 = vmax.f32 %v15361_v15, 0.0 }
 0x6ca   : > { %v15418_v14 = vpack.c.bf16 %v18780_v58, %v18779_v40  ;;  %v15436_v18 = vpack.c.bf16 %v18786_v24, %v18785_v44  ;;  %v15448_v44 = vrot.slane %v8619_v1, %v14519_v8 }
 0x6cb   : > { %v15430_v41 = vpack.c.bf16 %v18784_v55, %v18783_v51  ;;  %v7082_v60 = vpop.f32.mrb[128].mxu0  ;;  %v7788_v15 = vpop.f32.mrb[128].mxu1  ;;  %v15444_v51 = vrot.slane %v8619_v1, %v18775_v35 }
 0x6cc   : > { %v10135_v34 = vadd.f32 %v7082_v60, %v15399_v17  ;;  %v10263_v55 = vadd.f32 %v7788_v15, %v15402_v49  ;;  %v7084_v2 = vpop.f32.mrb[129].mxu0  ;;  %v7790_v24 = vpop.f32.mrb[129].mxu1  ;;  %v15456_v60 = vrot.slane %v8619_v1, %v14490_v37  ;;  %v18789_v37 = vmax.f32 %v14554_v31, 0.0 }
 0x6cd   : > { %v10136_v40 = vadd.f32 %v7084_v2, %v15409_v23  ;;  %v10264_v22 = vadd.f32 %v7790_v24, %v15412_v52  ;;  %v7086_v58 = vpop.f32.mrb[130].mxu0  ;;  %v7792_v43 = vpop.f32.mrb[130].mxu1  ;;  %v18787_v24 = vld [vmem:[#allocation23_spill] sm:$0xff]  ;;  %v18794_v31 = vmax.f32 %v15390_v25, 0.0 }
 0x6ce   : > { %v8107_v35 = vmax.f32 %v10135_v34, 0.0  ;;  %v8109_v48 = vmax.f32 %v10263_v55, 0.0  ;;  %v10137_v15 = vadd.f32 %v7086_v58, %v15399_v17  ;;  %v10265_v28 = vadd.f32 %v7792_v43, %v15402_v49  ;;  %v7088_v8 = vpop.f32.mrb[131].mxu0  ;;  %v7794_v20 = vpop.f32.mrb[131].mxu1  ;;  %v18790_v43 = vld [vmem:[#allocation20_spill] sm:$0xff] }
 0x6cf   : > { %v8108_v54 = vmax.f32 %v10136_v40, 0.0  ;;  %v8110_v2 = vmax.f32 %v10264_v22, 0.0  ;;  %v10138_v38 = vadd.f32 %v7088_v8, %v15409_v23  ;;  %v10266_v57 = vadd.f32 %v7794_v20, %v15412_v52 }
 0x6d0   : > { %v18788_v4 = vmax.f32 %v18787_v24, 0.0  ;;  %v8365_v1 = vadd.f32 %v8109_v48, %v18789_v37  ;;  %v8111_v34 = vmax.f32 %v10137_v15, 0.0  ;;  %v8113_v55 = vmax.f32 %v10265_v28, 0.0  ;;  %7351 = vmatmul.mubr.bf16.gmra.mrb[236].mxu0 %v15351_v7  ;;  %8057 = vmatmul.mubr.bf16.gmra.mrb[236].mxu1 %v15351_v7  ;;  %v18800_v24 = vld [vmem:[#allocation18_spill] sm:$0xff] }
 0x6d1   : > { %v18791_v58 = vmax.f32 %v18790_v43, 0.0  ;;  %v18792_v22 = vmax.f32 %v14527_v63, 0.0  ;;  %v8112_v56 = vmax.f32 %v10138_v38, 0.0  ;;  %v8114_v20 = vmax.f32 %v10266_v57, 0.0  ;;  %7360 = vmatprep.mubr.bf16.mxu0 %v5892_v9  ;;  %8066 = vmatprep.mubr.bf16.mxu1 %v5892_v9  ;;  %v18797_v63 = vld [vmem:[#allocation21_spill] sm:$0xff] }
 0x6d2   : > { %v8363_v29 = vadd.f32 %v8107_v35, %v18788_v4  ;;  %v18793_v4 = vmax.f32 %v15382_v6, 0.0  ;;  %v18795_v28 = vmax.f32 %v15386_v62, 0.0  ;;  %v18796_v7 = vmax.f32 %v15394_v42, 0.0 }
 0x6d3   : > { %v8364_v40 = vadd.f32 %v8108_v54, %v18791_v58  ;;  %v8366_v8 = vadd.f32 %v8110_v2, %v18792_v22  ;;  %v18798_v15 = vmax.f32 %v18797_v63, 0.0  ;;  %v18799_v9 = vmax.f32 %v14538_v11, 0.0  ;;  %v7092_v58 = vpop.f32.mrb[132].mxu0  ;;  %v7798_v22 = vpop.f32.mrb[132].mxu1 }
 0x6d4   : > { %v15476_v48 = vpack.c.bf16 %v18794_v31, %v18793_v4  ;;  %v15482_v35 = vpack.c.bf16 %v18796_v7, %v18795_v28  ;;  %v8641_v54 = vmul.f32 %v15444_v51, %v8363_v29  ;;  %v18801_v37 = vmax.f32 %v18800_v24, 0.0  ;;  %v7800_v63 = vpop.f32.mrb[133].mxu1 }
 0x6d5   : > { %v8367_v2 = vadd.f32 %v8111_v34, %v18798_v15  ;;  %v8642_v57 = vmul.f32 %v15452_v5, %v8364_v40  ;;  %v8369_v38 = vadd.f32 %v8113_v55, %v18799_v9  ;;  %v8643_v4 = vmul.f32 %v15448_v44, %v8365_v1  ;;  %v7094_v34 = vpop.f32.mrb[133].mxu0  ;;  %v7802_v1 = vpop.f32.mrb[134].mxu1 }
 0x6d6   : > { %v8368_v43 = vadd.f32 %v8112_v56, %v18801_v37  ;;  %v18802_v31 = vmax.f32 %v14512_v32, 0.0  ;;  %v10139_v29 = vadd.f32 %v7092_v58, %v15399_v17  ;;  %v10267_v7 = vadd.f32 %v7798_v22, %v15402_v49  ;;  %v7096_v15 = vpop.f32.mrb[134].mxu0  ;;  %v7804_v22 = vpop.f32.mrb[135].mxu1 }
 0x6d7   : > { %v8644_v40 = vmul.f32 %v15456_v60, %v8366_v8  ;;  %v15499_v11 = vmul.f32 %v15444_v51, %v8367_v2  ;;  %v10140_v56 = vadd.f32 %v7094_v34, %v15409_v23  ;;  %v10268_v55 = vadd.f32 %v7800_v63, %v15412_v52  ;;  %v7098_v58 = vpop.f32.mrb[135].mxu0  ;;  %v18803_v63 = vld [vmem:[#allocation27_spill] sm:$0xff] }
 0x6d8   : > { %v8370_v28 = vadd.f32 %v8114_v20, %v18802_v31  ;;  %v8897_v9 = vadd.f32 %v8642_v57, %v8641_v54  ;;  %v8115_v32 = vmax.f32 %v10139_v29, 0.0  ;;  %v8117_v20 = vmax.f32 %v10267_v7, 0.0  ;;  %7361 = vmatmul.mubr.bf16.gmra.mrb[240].mxu0 %v15371_v21  ;;  %8067 = vmatmul.mubr.bf16.gmra.mrb[240].mxu1 %v15371_v21  ;;  %v18809_v21 = vld [vmem:[#allocation25_spill] sm:$0xff] }
 0x6d9   : > { %v10141_v24 = vadd.f32 %v7096_v15, %v15399_v17  ;;  %v10269_v37 = vadd.f32 %v7802_v1, %v15402_v49  ;;  %v8116_v31 = vmax.f32 %v10140_v56, 0.0  ;;  %v8118_v8 = vmax.f32 %v10268_v55, 0.0  ;;  %v18805_v56 = vld [vmem:[#allocation24_spill] sm:$0xff]  ;;  %7370 = vmatprep.mubr.bf16.mxu0 %v15424_v13  ;;  %8076 = vmatprep.mubr.bf16.mxu1 %v15424_v13 }
 0x6da   : > { %v10142_v2 = vadd.f32 %v7098_v58, %v15409_v23  ;;  %v10270_v42 = vadd.f32 %v7804_v22, %v15412_v52  ;;  %v15508_v34 = vmul.f32 %v15448_v44, %v8369_v38  ;;  %v18804_v25 = vmax.f32 %v18803_v63, 0.0 }
 0x6db   : > { %v8119_v57 = vmax.f32 %v10141_v24, 0.0  ;;  %v8121_v29 = vmax.f32 %v10269_v37, 0.0  ;;  %v8646_v7 = vmul.f32 %v15452_v5, %v8368_v43  ;;  %v18806_v55 = vmax.f32 %v18805_v56, 0.0  ;;  %v7102_v56 = vpop.f32.mrb[136].mxu0 }
 0x6dc   : > { %v8371_v54 = vadd.f32 %v8115_v32, %v18804_v25  ;;  %v8120_v1 = vmax.f32 %v10142_v2, 0.0  ;;  %v8122_v58 = vmax.f32 %v10270_v42, 0.0  ;;  %v18807_v38 = vmax.f32 %v14582_v39, 0.0  ;;  %v18812_v39 = vld [vmem:[#allocation22_spill] sm:$0xff] }
 0x6dd   : > { %v8372_v15 = vadd.f32 %v8116_v31, %v18806_v55  ;;  %v18808_v32 = vmax.f32 %v14558_v50, 0.0  ;;  %v18810_v37 = vmax.f32 %v18809_v21, 0.0  ;;  %v8898_v22 = vadd.f32 %v8897_v9, %v8643_v4  ;;  %v7808_v50 = vpop.f32.mrb[136].mxu1 }
 0x6de   : > { %v15521_v25 = vadd.f32 %v8117_v20, %v18807_v38  ;;  %v15530_v31 = vmul.f32 %v15444_v51, %v8371_v54  ;;  %v18811_v13 = vmax.f32 %v14570_v47, 0.0  ;;  %v18813_v20 = vmax.f32 %v18812_v39, 0.0  ;;  %v7104_v54 = vpop.f32.mrb[137].mxu0 }
 0x6df   : > { %v15525_v24 = vadd.f32 %v8118_v8, %v18808_v32  ;;  %v8375_v43 = vadd.f32 %v8119_v57, %v18810_v37  ;;  %v15533_v42 = vmul.f32 %v15452_v5, %v8372_v15  ;;  %v18814_v8 = vmax.f32 %v14550_v30, 0.0  ;;  %v7810_v57 = vpop.f32.mrb[137].mxu1  ;;  %v7106_v32 = vpop.f32.mrb[138].mxu0 }
 0x6e0   : > { %v8377_v2 = vadd.f32 %v8121_v29, %v18811_v13  ;;  %v8376_v63 = vadd.f32 %v8120_v1, %v18813_v20  ;;  %v10143_v4 = vadd.f32 %v7102_v56, %v15399_v17  ;;  %v10271_v9 = vadd.f32 %v7808_v50, %v15402_v49  ;;  %v7812_v30 = vpop.f32.mrb[138].mxu1  ;;  %v7108_v39 = vpop.f32.mrb[139].mxu0  ;;  %7371 = vmatmul.mubr.bf16.gmra.mrb[244].mxu0 %v15418_v14 }
 0x6e1   : > { %v15541_v55 = vadd.f32 %v8122_v58, %v18814_v8  ;;  %v8648_v15 = vmul.f32 %v15456_v60, %v8370_v28  ;;  %v15547_v47 = vmul.f32 %v15444_v51, %v8375_v43  ;;  %v8899_v29 = vadd.f32 %v8898_v22, %v8644_v40  ;;  %v7814_v20 = vpop.f32.mrb[139].mxu1  ;;  %v18815_v22 = vld [vmem:[#allocation33_spill] sm:$0xff]  ;;  %8077 = vmatmul.mubr.bf16.gmra.mrb[244].mxu1 %v15418_v14 }
 0x6e2   : > { %v10144_v1 = vadd.f32 %v7104_v54, %v15409_v23  ;;  %v10272_v38 = vadd.f32 %v7810_v57, %v15412_v52  ;;  %v8123_v58 = vmax.f32 %v10143_v4, 0.0  ;;  %v8125_v21 = vmax.f32 %v10271_v9, 0.0  ;;  %7380 = vmatprep.mubr.bf16.mxu0 %v15436_v18  ;;  %8086 = vmatprep.mubr.bf16.mxu1 %v15436_v18 }
 0x6e3   : > { %v10145_v37 = vadd.f32 %v7106_v32, %v15399_v17  ;;  %v10273_v13 = vadd.f32 %v7812_v30, %v15402_v49  ;;  %8900 = vadd.xlane.f32.xlu0 %v8899_v29  ;;  %v10146_v43 = vadd.f32 %v7108_v39, %v15409_v23  ;;  %v10274_v40 = vadd.f32 %v7814_v20, %v15412_v52 }
 0x6e4   : > { %v8124_v28 = vmax.f32 %v10144_v1, 0.0  ;;  %v8126_v56 = vmax.f32 %v10272_v38, 0.0  ;;  %v18816_v50 = vmax.f32 %v18815_v22, 0.0  ;;  %v18817_v54 = vmax.f32 %v14610_v53, 0.0  ;;  %v18818_v1 = vld [vmem:[#allocation28_spill] sm:$0xff]  ;;  %v7818_v22 = vpop.f32.mrb[140].mxu1 }
 0x6e5   : > { %v8127_v9 = vmax.f32 %v10145_v37, 0.0  ;;  %v8129_v57 = vmax.f32 %v10273_v13, 0.0  ;;  %v15562_v29 = vmul.f32 %v15448_v44, %v8377_v2  ;;  %v18819_v38 = vmax.f32 %v18818_v1, 0.0  ;;  %v18821_v2 = vld [vmem:[#allocation31_spill] sm:$0xff] }
 0x6e6   : > { %v8379_v8 = vadd.f32 %v8123_v58, %v18816_v50  ;;  %v8381_v4 = vadd.f32 %v8125_v21, %v18817_v54  ;;  %v8128_v30 = vmax.f32 %v10146_v43, 0.0  ;;  %v8130_v39 = vmax.f32 %v10274_v40, 0.0  ;;  %v7112_v40 = vpop.f32.mrb[140].mxu0  ;;  %v18824_v50 = vld [vmem:[#allocation26_spill] sm:$0xff] }
 0x6e7   : > { %v8380_v32 = vadd.f32 %v8124_v28, %v18819_v38  ;;  %v8654_v53 = vmul.f32 %v15452_v5, %v8376_v63  ;;  %v18820_v21 = vmax.f32 %v14586_v46, 0.0  ;;  %v18822_v37 = vmax.f32 %v18821_v2, 0.0  ;;  %v7114_v1 = vpop.f32.mrb[141].mxu0  ;;  %v7820_v38 = vpop.f32.mrb[141].mxu1 }
 0x6e8   : > { %v15570_v58 = vmul.f32 %v15444_v51, %v8379_v8  ;;  %v15579_v20 = vmul.f32 %v15448_v44, %v8381_v4  ;;  %v18823_v18 = vmax.f32 %v14598_v45, 0.0  ;;  %v8902_v63 = vadd.f32 %v8646_v7, %v15499_v11  ;;  %7381 = vmatmul.mubr.bf16.gmra.mrb[248].mxu0 %v15430_v41 }
 0x6e9   : > { %v15574_v14 = vadd.f32 %v8126_v56, %v18820_v21  ;;  %v8383_v13 = vadd.f32 %v8127_v9, %v18822_v37  ;;  %v15582_v28 = vmul.f32 %v15452_v5, %v8380_v32  ;;  %v18825_v46 = vmax.f32 %v18824_v50, 0.0  ;;  %v7822_v32 = vpop.f32.mrb[142].mxu1  ;;  %8087 = vmatmul.mubr.bf16.gmra.mrb[248].mxu1 %v15430_v41  ;;  %7390 = vmatprep.mubr.bf16.mxu0 %v15482_v35 }
 0x6ea   : > { %v8385_v43 = vadd.f32 %v8129_v57, %v18823_v18  ;;  %v18826_v8 = vmax.f32 %v14578_v26, 0.0  ;;  %v10147_v4 = vadd.f32 %v7112_v40, %v15399_v17  ;;  %v10275_v9 = vadd.f32 %v7818_v22, %v15402_v49  ;;  %v7116_v26 = vpop.f32.mrb[142].mxu0  ;;  %v18827_v40 = vld [vmem:[#allocation41_spill] sm:$0xff]  ;;  %8096 = vmatprep.mubr.bf16.mxu1 %v15482_v35 }
 0x6eb   : > { %v8384_v56 = vadd.f32 %v8128_v30, %v18825_v46  ;;  %v15596_v45 = vmul.f32 %v15444_v51, %v8383_v13  ;;  %v8903_v11 = vadd.f32 %v8902_v63, %v15508_v34  ;;  %v8651_v7 = vmul.f32 %v15448_v44, %v15521_v25  ;;  %v7118_v37 = vpop.f32.mrb[143].mxu0  ;;  %v7824_v13 = vpop.f32.mrb[143].mxu1 }
 0x6ec   : > { %v15591_v54 = vadd.f32 %v8130_v39, %v18826_v8  ;;  %v8652_v57 = vmul.f32 %v15456_v60, %v15525_v24  ;;  %v8131_v30 = vmax.f32 %v10147_v4, 0.0  ;;  %v8133_v39 = vmax.f32 %v10275_v9, 0.0 }
 0x6ed   : > { %v8907_v21 = vadd.f32 %v15533_v42, %v15530_v31  ;;  %v10148_v2 = vadd.f32 %v7114_v1, %v15409_v23  ;;  %v8904_v18 = vadd.f32 %v8903_v11, %v8648_v15  ;;  %v10276_v34 = vadd.f32 %v7820_v38, %v15412_v52  ;;  %v18830_v11 = vld [vmem:[#allocation34_spill] sm:$0xff] }
 0x6ee   : > { %v10149_v63 = vadd.f32 %v7116_v26, %v15399_v17  ;;  %v10277_v25 = vadd.f32 %v7822_v32, %v15402_v49  ;;  %v18828_v24 = vmax.f32 %v18827_v40, 0.0  ;;  %v18829_v50 = vmax.f32 %v14638_v3, 0.0  ;;  %v18832_v32 = vld [vmem:[#allocation38_spill] sm:$0xff] }
 0x6ef   : > { %v8908_v8 = vadd.f32 %v8907_v21, %v8651_v7  ;;  %v8132_v4 = vmax.f32 %v10148_v2, 0.0  ;;  %8905 = vadd.xlane.f32.xlu0 %v8904_v18  ;;  %v8134_v31 = vmax.f32 %v10276_v34, 0.0  ;;  %v10150_v9 = vadd.f32 %v7118_v37, %v15409_v23  ;;  %v7828_v18 = vpop.f32.mrb[144].mxu1 }
 0x6f0   : > { %v8387_v22 = vadd.f32 %v8131_v30, %v18828_v24  ;;  %v8389_v46 = vadd.f32 %v8133_v39, %v18829_v50  ;;  %v8135_v42 = vmax.f32 %v10149_v63, 0.0  ;;  %v8137_v15 = vmax.f32 %v10277_v25, 0.0  ;;  %v7830_v40 = vpop.f32.mrb[145].mxu1  ;;  %7391 = vmatmul.mubr.bf16.gmra.mrb[252].mxu0 %v15476_v48 }
 0x6f1   : > { %v15618_v1 = vmul.f32 %v15448_v44, %v8385_v43  ;;  %v8662_v3 = vmul.f32 %v15452_v5, %v8384_v56  ;;  %v8909_v38 = vadd.f32 %v8908_v8, %v8652_v57  ;;  %v18831_v7 = vmax.f32 %v18830_v11, 0.0  ;;  %v7122_v43 = vpop.f32.mrb[144].mxu0  ;;  %8097 = vmatmul.mubr.bf16.gmra.mrb[252].mxu1 %v15476_v48 }
 0x6f2   : > { %v15625_v41 = vmul.f32 %v15444_v51, %v8387_v22  ;;  %v18833_v30 = vmax.f32 %v18832_v32, 0.0  ;;  %v18834_v21 = vmax.f32 %v14626_v59, 0.0  ;;  %v8136_v37 = vmax.f32 %v10150_v9, 0.0  ;;  %v7124_v25 = vpop.f32.mrb[145].mxu0 }
 0x6f3   : > { %v8388_v26 = vadd.f32 %v8132_v4, %v18831_v7  ;;  %v15632_v56 = vmul.f32 %v15448_v44, %v8389_v46  ;;  %8910 = vadd.xlane.f32.xlu1 %v8909_v38  ;;  %v18835_v57 = vmax.f32 %v14614_v0, 0.0  ;;  %v10278_v35 = vadd.f32 %v7824_v13, %v15412_v52  ;;  %v7126_v0 = vpop.f32.mrb[146].mxu0  ;;  %v7832_v46 = vpop.f32.mrb[146].mxu1  ;;  %v18836_v13 = vld [vmem:[#allocation32_spill] sm:$0xff] }
 0x6f4   : > { %v8391_v39 = vadd.f32 %v8135_v42, %v18833_v30  ;;  %v8393_v2 = vadd.f32 %v8137_v15, %v18834_v21  ;;  %v8912_v63 = vadd.f32 %v8654_v53, %v15547_v47  ;;  %v8656_v22 = vmul.f32 %v15456_v60, %v15541_v55  ;;  %v7128_v42 = vpop.f32.mrb[147].mxu0  ;;  %v7834_v15 = vpop.f32.mrb[147].mxu1 }
 0x6f5   : > { %v15636_v34 = vadd.f32 %v8134_v31, %v18835_v57  ;;  %v15641_v59 = vmul.f32 %v15452_v5, %v8388_v26  ;;  %v10151_v50 = vadd.f32 %v7122_v43, %v15399_v17  ;;  %v18837_v47 = vmax.f32 %v18836_v13, 0.0 }
 0x6f6   : > { %v15644_v24 = vmul.f32 %v15444_v51, %v8391_v39  ;;  %v15650_v8 = vmul.f32 %v15448_v44, %v8393_v2  ;;  %v8913_v4 = vadd.f32 %v8912_v63, %v15562_v29  ;;  %v10279_v31 = vadd.f32 %v7828_v18, %v15402_v49  ;;  %v18838_v29 = vld [vmem:[#allocation49_spill] sm:$0xff] }
 0x6f7   : > { %v8392_v53 = vadd.f32 %v8136_v37, %v18837_v47  ;;  %v8138_v9 = vmax.f32 %v10278_v35, 0.0  ;;  %v8139_v38 = vmax.f32 %v10151_v50, 0.0  ;;  %v8917_v55 = vadd.f32 %v15582_v28, %v15570_v58  ;;  %v7132_v50 = vpop.f32.mrb[148].mxu0 }
 0x6f8   : > { %v10152_v11 = vadd.f32 %v7124_v25, %v15409_v23  ;;  %v8914_v7 = vadd.f32 %v8913_v4, %v8656_v22  ;;  %v8141_v26 = vmax.f32 %v10279_v31, 0.0  ;;  %v8660_v32 = vmul.f32 %v15456_v60, %v15574_v14  ;;  %v18842_v25 = vld [vmem:[#allocation42_spill] sm:$0xff] }
 0x6f9   : > { %v10280_v30 = vadd.f32 %v7830_v40, %v15412_v52  ;;  %v18839_v39 = vmax.f32 %v18838_v29, 0.0  ;;  %v8918_v2 = vadd.f32 %v8917_v55, %v15579_v20  ;;  %v10153_v58 = vadd.f32 %v7126_v0, %v15399_v17  ;;  %v7838_v0 = vpop.f32.mrb[148].mxu1  ;;  %v18844_v31 = vld [vmem:[#allocation46_spill] sm:$0xff] }
 0x6fa   : > { %v8140_v37 = vmax.f32 %v10152_v11, 0.0  ;;  %v15669_v28 = vmul.f32 %v15452_v5, %v8392_v53  ;;  %8915 = vadd.xlane.f32.xlu1 %v8914_v7  ;;  %v18840_v14 = vmax.f32 %v14666_v19, 0.0  ;;  %v10281_v57 = vadd.f32 %v7832_v46, %v15402_v49  ;;  %v7134_v53 = vpop.f32.mrb[149].mxu0 }
 0x6fb   : > { %v8395_v21 = vadd.f32 %v8139_v38, %v18839_v39  ;;  %v8142_v18 = vmax.f32 %v10280_v30, 0.0  ;;  %v18841_v48 = vmax.f32 %v14606_v61, 0.0  ;;  %v8919_v63 = vadd.f32 %v8918_v2, %v8660_v32  ;;  %v7840_v61 = vpop.f32.mrb[149].mxu1  ;;  %v7136_v7 = vpop.f32.mrb[150].mxu0 }
 0x6fc   : > { %v8397_v43 = vadd.f32 %v8141_v26, %v18840_v14  ;;  %v18843_v20 = vmax.f32 %v18842_v25, 0.0  ;;  %v8143_v22 = vmax.f32 %v10153_v58, 0.0  ;;  %v8145_v47 = vmax.f32 %v10281_v57, 0.0  ;;  %v7842_v26 = vpop.f32.mrb[150].mxu1  ;;  %v7138_v29 = vpop.f32.mrb[151].mxu0 }
 0x6fd   : > { %v15676_v35 = vadd.f32 %v8138_v9, %v18841_v48  ;;  %v15681_v13 = vmul.f32 %v15444_v51, %v8395_v21  ;;  %v8664_v19 = vmul.f32 %v15456_v60, %v15591_v54  ;;  %v8922_v46 = vadd.f32 %v8662_v3, %v15596_v45  ;;  %8920 = vadd.xlane.f32.xlu0 %v8919_v63  ;;  %v7844_v39 = vpop.f32.mrb[151].mxu1 }
 0x6fe   : > { %v8396_v40 = vadd.f32 %v8140_v37, %v18843_v20  ;;  %v15687_v4 = vmul.f32 %v15448_v44, %v8397_v43  ;;  %v18845_v9 = vmax.f32 %v18844_v31, 0.0  ;;  %v10154_v55 = vadd.f32 %v7128_v42, %v15409_v23  ;;  %v18850_v20 = vld [vmem:[#allocation56_spill] sm:$0xff] }
 0x6ff   : > { %v10282_v11 = vadd.f32 %v7834_v15, %v15412_v52  ;;  %v18846_v32 = vmax.f32 %v14642_v16, 0.0  ;;  %v8923_v45 = vadd.f32 %v8922_v46, %v15618_v1  ;;  %v10155_v3 = vadd.f32 %v7132_v50, %v15399_v17  ;;  %v18848_v1 = vld [vmem:[#allocation40_spill] sm:$0xff] }
 0x700   : > { %v8399_v38 = vadd.f32 %v8143_v22, %v18845_v9  ;;  %v10283_v30 = vadd.f32 %v7838_v0, %v15402_v49  ;;  %v8674_v21 = vmul.f32 %v15452_v5, %v8396_v40  ;;  %v18847_v15 = vmax.f32 %v14654_v10, 0.0 }
 0x701   : > { %v15695_v54 = vadd.f32 %v8142_v18, %v18846_v32  ;;  %v8144_v37 = vmax.f32 %v10154_v55, 0.0  ;;  %v8924_v16 = vadd.f32 %v8923_v45, %v8664_v19  ;;  %v8146_v58 = vmax.f32 %v10282_v11, 0.0  ;;  %v18854_v32 = vld [vmem:[#allocation50_spill] sm:$0xff] }
 0x702   : > { %v15702_v42 = vmul.f32 %v15444_v51, %v8399_v38  ;;  %v8401_v2 = vadd.f32 %v8145_v47, %v18847_v15  ;;  %v8147_v14 = vmax.f32 %v10155_v3, 0.0  ;;  %v8149_v43 = vmax.f32 %v10283_v30, 0.0 }
 0x703   : > { %v18849_v18 = vmax.f32 %v18848_v1, 0.0  ;;  %v8668_v48 = vmul.f32 %v15456_v60, %v15636_v34  ;;  %v8927_v63 = vadd.f32 %v15641_v59, %v15625_v41  ;;  %v10156_v25 = vadd.f32 %v7134_v53, %v15409_v23  ;;  %8925 = vadd.xlane.f32.xlu1 %v8924_v16  ;;  %v7142_v59 = vpop.f32.mrb[152].mxu0  ;;  %v7848_v53 = vpop.f32.mrb[152].mxu1 }
 0x704   : > { %v18851_v10 = vmax.f32 %v18850_v20, 0.0  ;;  %v18852_v22 = vmax.f32 %v14694_v36, 0.0  ;;  %v10284_v0 = vadd.f32 %v7840_v61, %v15412_v52  ;;  %v10157_v47 = vadd.f32 %v7136_v7, %v15399_v17  ;;  %v7144_v55 = vpop.f32.mrb[153].mxu0  ;;  %v7850_v11 = vpop.f32.mrb[153].mxu1 }
 0x705   : > { %v8400_v57 = vadd.f32 %v8144_v37, %v18849_v18  ;;  %v15720_v19 = vmul.f32 %v15448_v44, %v8401_v2  ;;  %v8928_v34 = vadd.f32 %v8927_v63, %v15632_v56  ;;  %v8148_v46 = vmax.f32 %v10156_v25, 0.0  ;;  %v7146_v30 = vpop.f32.mrb[154].mxu0  ;;  %v7852_v15 = vpop.f32.mrb[154].mxu1 }
 0x706   : > { %v8403_v40 = vadd.f32 %v8147_v14, %v18851_v10  ;;  %v8405_v50 = vadd.f32 %v8149_v43, %v18852_v22  ;;  %v10285_v41 = vadd.f32 %v7842_v26, %v15402_v49  ;;  %v18853_v36 = vmax.f32 %v14634_v12, 0.0  ;;  %v18856_v12 = vld [vmem:[#allocation54_spill] sm:$0xff]  ;;  %v7148_v43 = vpop.f32.mrb[155].mxu0  ;;  %v7854_v1 = vpop.f32.mrb[155].mxu1 }
 0x707   : > { %v15725_v31 = vmul.f32 %v15452_v5, %v8400_v57  ;;  %v8150_v61 = vmax.f32 %v10284_v0, 0.0  ;;  %v8151_v38 = vmax.f32 %v10157_v47, 0.0  ;;  %v8929_v56 = vadd.f32 %v8928_v34, %v8668_v48 }
 0x708   : > { %v15729_v9 = vadd.f32 %v8146_v58, %v18853_v36  ;;  %v15732_v7 = vmul.f32 %v15444_v51, %v8403_v40  ;;  %v18855_v45 = vmax.f32 %v18854_v32, 0.0  ;;  %v8153_v3 = vmax.f32 %v10285_v41, 0.0 }
 0x709   : > { %v15737_v2 = vmul.f32 %v15448_v44, %v8405_v50  ;;  %v18857_v37 = vmax.f32 %v18856_v12, 0.0  ;;  %v8932_v58 = vadd.f32 %v15669_v28, %v15644_v24  ;;  %v10158_v14 = vadd.f32 %v7138_v29, %v15409_v23  ;;  %8930 = vadd.xlane.f32.xlu0 %v8929_v56  ;;  %v18864_v56 = vld [vmem:[#allocation29_spill] sm:$0xff] }
 0x70a   : > { %v8404_v26 = vadd.f32 %v8148_v46, %v18855_v45  ;;  %v18858_v18 = vmax.f32 %v14682_v27, 0.0  ;;  %v8672_v48 = vmul.f32 %v15456_v60, %v15676_v35  ;;  %v10286_v63 = vadd.f32 %v7844_v39, %v15412_v52  ;;  %v18860_v39 = vld [vmem:[#allocation47_spill] sm:$0xff] }
 0x70b   : > { %v8407_v16 = vadd.f32 %v8151_v38, %v18857_v37  ;;  %v10159_v25 = vadd.f32 %v7142_v59, %v15399_v17  ;;  %v18859_v20 = vmax.f32 %v14670_v33, 0.0  ;;  %v8933_v24 = vadd.f32 %v8932_v58, %v15650_v8  ;;  %v18862_v8 = vld [vmem:[#allocation63_spill] sm:$0xff]  ;;  %v7858_v38 = vpop.f32.mrb[156].mxu1 }
 0x70c   : > { %v8409_v57 = vadd.f32 %v8153_v3, %v18858_v18  ;;  %v8152_v28 = vmax.f32 %v10158_v14, 0.0  ;;  %v10287_v29 = vadd.f32 %v7848_v53, %v15402_v49  ;;  %v8682_v40 = vmul.f32 %v15452_v5, %v8404_v26  ;;  %v7860_v12 = vpop.f32.mrb[157].mxu1 }
 0x70d   : > { %v15752_v10 = vadd.f32 %v8150_v61, %v18859_v20  ;;  %v15758_v27 = vmul.f32 %v15444_v51, %v8407_v16  ;;  %v8154_v22 = vmax.f32 %v10286_v63, 0.0  ;;  %v8155_v35 = vmax.f32 %v10159_v25, 0.0  ;;  %v7152_v61 = vpop.f32.mrb[156].mxu0 }
 0x70e   : > { %v8934_v50 = vadd.f32 %v8933_v24, %v8672_v48  ;;  %v18861_v0 = vmax.f32 %v18860_v39, 0.0  ;;  %v8157_v34 = vmax.f32 %v10287_v29, 0.0  ;;  %v8937_v33 = vadd.f32 %v8674_v21, %v15681_v13  ;;  %v7154_v3 = vpop.f32.mrb[157].mxu0  ;;  %v18868_v24 = vld [vmem:[#allocation57_spill] sm:$0xff] }
 0x70f   : > { %v15764_v46 = vmul.f32 %v15448_v44, %v8409_v57  ;;  %v18863_v41 = vmax.f32 %v18862_v8, 0.0  ;;  %v10160_v53 = vadd.f32 %v7144_v55, %v15409_v23  ;;  %v10288_v36 = vadd.f32 %v7850_v11, %v15412_v52  ;;  %v18866_v55 = vld [vmem:[#allocation244_spill] sm:$0xff]  ;;  %v7156_v18 = vpop.f32.mrb[158].mxu0  ;;  %v7862_v57 = vpop.f32.mrb[158].mxu1 }
 0x710   : > { %v8408_v47 = vadd.f32 %v8152_v28, %v18861_v0  ;;  %8935 = vadd.xlane.f32.xlu1 %v8934_v50  ;;  %v18865_v32 = vmax.f32 %v18864_v56, 0.0  ;;  %v8676_v26 = vmul.f32 %v15456_v60, %v15695_v54  ;;  %v8938_v13 = vadd.f32 %v8937_v33, %v15687_v4  ;;  %v7864_v25 = vpop.f32.mrb[159].mxu1  ;;  %v18872_v33 = vld [vmem:[#allocation30_spill] sm:$0xff] }
 0x711   : > { %v8411_v59 = vadd.f32 %v8155_v35, %v18863_v41  ;;  %v10161_v21 = vadd.f32 %v7146_v30, %v15399_v17  ;;  %v18867_v16 = vmax.f32 %v18866_v55, 0.0  ;;  %v8156_v58 = vmax.f32 %v10160_v53, 0.0  ;;  %v7158_v30 = vpop.f32.mrb[159].mxu0  ;;  %v18870_v35 = vld [vmem:[#allocation61_spill] sm:$0xff] }
 0x712   : > { %v8413_v45 = vadd.f32 %v8157_v34, %v18865_v32  ;;  %v8686_v37 = vmul.f32 %v15452_v5, %v8408_v47  ;;  %v10289_v14 = vadd.f32 %v7852_v15, %v15402_v49  ;;  %v8939_v54 = vadd.f32 %v8938_v13, %v8676_v26 }
 0x713   : > { %v15779_v11 = vadd.f32 %v8154_v22, %v18867_v16  ;;  %v15783_v48 = vmul.f32 %v15444_v51, %v8411_v59  ;;  %v8158_v4 = vmax.f32 %v10288_v36, 0.0  ;;  %v8159_v63 = vmax.f32 %v10161_v21, 0.0  ;;  %v7162_v21 = vpop.f32.mrb[160].mxu0 }
 0x714   : > { %v15786_v20 = vmul.f32 %v15448_v44, %v8413_v45  ;;  %v18869_v28 = vmax.f32 %v18868_v24, 0.0  ;;  %v8161_v22 = vmax.f32 %v10289_v14, 0.0  ;;  %v8942_v15 = vadd.f32 %v15725_v31, %v15702_v42  ;;  %8940 = vadd.xlane.f32.xlu0 %v8939_v54  ;;  %v18874_v31 = vld [vmem:[#allocation246_spill] sm:$0xff] }
 0x715   : > { %v18871_v50 = vmax.f32 %v18870_v35, 0.0  ;;  %v10162_v0 = vadd.f32 %v7148_v43, %v15409_v23  ;;  %v10290_v47 = vadd.f32 %v7854_v1, %v15412_v52  ;;  %v10163_v34 = vadd.f32 %v7152_v61, %v15399_v17 }
 0x716   : > { %v8412_v29 = vadd.f32 %v8156_v58, %v18869_v28  ;;  %v18873_v8 = vmax.f32 %v18872_v33, 0.0  ;;  %v8680_v59 = vmul.f32 %v15456_v60, %v15729_v9  ;;  %v8943_v53 = vadd.f32 %v8942_v15, %v15720_v19  ;;  %v7868_v9 = vpop.f32.mrb[160].mxu1  ;;  %v18878_v58 = vld [vmem:[#allocation71_spill] sm:$0xff] }
 0x717   : > { %v8415_v39 = vadd.f32 %v8159_v63, %v18871_v50  ;;  %v10291_v42 = vadd.f32 %v7858_v38, %v15402_v49  ;;  %v18875_v36 = vmax.f32 %v18874_v31, 0.0  ;;  %v8160_v32 = vmax.f32 %v10162_v0, 0.0  ;;  %v18876_v38 = vld [vmem:[#allocation55_spill] sm:$0xff]  ;;  %v7164_v63 = vpop.f32.mrb[161].mxu0  ;;  %v7870_v24 = vpop.f32.mrb[161].mxu1 }
 0x718   : > { %v8417_v41 = vadd.f32 %v8161_v22, %v18873_v8  ;;  %v8162_v43 = vmax.f32 %v10290_v47, 0.0  ;;  %v8163_v45 = vmax.f32 %v10163_v34, 0.0  ;;  %v8690_v1 = vmul.f32 %v15452_v5, %v8412_v29  ;;  %v7166_v35 = vpop.f32.mrb[162].mxu0  ;;  %v7872_v50 = vpop.f32.mrb[162].mxu1  ;;  %v18882_v34 = vld [vmem:[#allocation35_spill] sm:$0xff] }
 0x719   : > { %v15805_v56 = vadd.f32 %v8158_v4, %v18875_v36  ;;  %v15809_v61 = vmul.f32 %v15444_v51, %v8415_v39  ;;  %v8944_v26 = vadd.f32 %v8943_v53, %v8680_v59  ;;  %v8165_v13 = vmax.f32 %v10291_v42, 0.0  ;;  %v18880_v39 = vld [vmem:[#allocation245_spill] sm:$0xff] }
 0x71a   : > { %v15812_v19 = vmul.f32 %v15448_v44, %v8417_v41  ;;  %v18877_v55 = vmax.f32 %v18876_v38, 0.0  ;;  %v18879_v14 = vmax.f32 %v18878_v58, 0.0  ;;  %v8947_v4 = vadd.f32 %v8682_v40, %v15732_v7  ;;  %v7874_v41 = vpop.f32.mrb[163].mxu1 }
 0x71b   : > { %8945 = vadd.xlane.f32.xlu1 %v8944_v26  ;;  %v8684_v28 = vmul.f32 %v15456_v60, %v15752_v10  ;;  %v10164_v29 = vadd.f32 %v7154_v3, %v15409_v23  ;;  %v10292_v22 = vadd.f32 %v7860_v12, %v15412_v52  ;;  %v10165_v15 = vadd.f32 %v7156_v18, %v15399_v17  ;;  %v7168_v10 = vpop.f32.mrb[163].mxu0 }
 0x71c   : > { %v8416_v16 = vadd.f32 %v8160_v32, %v18877_v55  ;;  %v8419_v54 = vadd.f32 %v8163_v45, %v18879_v14  ;;  %v18881_v0 = vmax.f32 %v18880_v39, 0.0  ;;  %v18883_v7 = vmax.f32 %v18882_v34, 0.0  ;;  %v18884_v32 = vld [vmem:[#allocation64_spill] sm:$0xff]  ;;  %v18888_v55 = vld [vmem:[#allocation37_spill] sm:$0xff] }
 0x71d   : > { %v8948_v33 = vadd.f32 %v8947_v4, %v15737_v2  ;;  %v10293_v8 = vadd.f32 %v7862_v57, %v15402_v49  ;;  %v8164_v12 = vmax.f32 %v10164_v29, 0.0  ;;  %v8166_v59 = vmax.f32 %v10292_v22, 0.0  ;;  %v18886_v2 = vld [vmem:[#allocation68_spill] sm:$0xff]  ;;  %v7172_v22 = vpop.f32.mrb[164].mxu0 }
 0x71e   : > { %v15826_v47 = vadd.f32 %v8162_v43, %v18881_v0  ;;  %v8421_v40 = vadd.f32 %v8165_v13, %v18883_v7  ;;  %v8694_v3 = vmul.f32 %v15452_v5, %v8416_v16  ;;  %v8167_v18 = vmax.f32 %v10165_v15, 0.0  ;;  %v18890_v4 = vld [vmem:[#allocation36_spill] sm:$0xff]  ;;  %v7878_v15 = vpop.f32.mrb[164].mxu1  ;;  %v7174_v34 = vpop.f32.mrb[165].mxu0 }
 0x71f   : > { %v15834_v53 = vmul.f32 %v15444_v51, %v8419_v54  ;;  %v8949_v42 = vadd.f32 %v8948_v33, %v8684_v28  ;;  %v8169_v31 = vmax.f32 %v10293_v8, 0.0  ;;  %v8952_v36 = vadd.f32 %v8686_v37, %v15758_v27 }
 0x720   : > { %v18885_v43 = vmax.f32 %v18884_v32, 0.0  ;;  %v18887_v26 = vmax.f32 %v18886_v2, 0.0  ;;  %v8688_v13 = vmul.f32 %v15456_v60, %v15779_v11  ;;  %v10166_v38 = vadd.f32 %v7158_v30, %v15409_v23 }
 0x721   : > { %8950 = vadd.xlane.f32.xlu0 %v8949_v42  ;;  %v18889_v16 = vmax.f32 %v18888_v55, 0.0  ;;  %v8953_v14 = vadd.f32 %v8952_v36, %v15764_v46  ;;  %v10294_v54 = vadd.f32 %v7864_v25, %v15412_v52  ;;  %v10167_v27 = vadd.f32 %v7162_v21, %v15399_v17  ;;  %v7880_v21 = vpop.f32.mrb[165].mxu1 }
 0x722   : > { %v8420_v45 = vadd.f32 %v8164_v12, %v18885_v43  ;;  %v8423_v57 = vadd.f32 %v8167_v18, %v18887_v26  ;;  %v15850_v37 = vmul.f32 %v15448_v44, %v8421_v40  ;;  %v18891_v28 = vmax.f32 %v18890_v4, 0.0  ;;  %v18892_v40 = vld [vmem:[#allocation62_spill] sm:$0xff]  ;;  %v7882_v18 = vpop.f32.mrb[166].mxu1 }
 0x723   : > { %v8425_v58 = vadd.f32 %v8169_v31, %v18889_v16  ;;  %v8168_v11 = vmax.f32 %v10166_v38, 0.0  ;;  %v10295_v30 = vadd.f32 %v7868_v9, %v15402_v49  ;;  %v8954_v46 = vadd.f32 %v8953_v14, %v8688_v13  ;;  %v7176_v9 = vpop.f32.mrb[166].mxu0  ;;  %v18894_v31 = vld [vmem:[#allocation79_spill] sm:$0xff]  ;;  %v15875_v26 = vpop.f32.mrb[167].mxu1 }
 0x724   : > { %v15854_v29 = vadd.f32 %v8166_v59, %v18891_v28  ;;  %v15858_v39 = vmul.f32 %v15452_v5, %v8420_v45  ;;  %v8170_v0 = vmax.f32 %v10294_v54, 0.0  ;;  %v8171_v25 = vmax.f32 %v10167_v27, 0.0  ;;  %v15873_v2 = vpop.f32.mrb[167].mxu0 }
 0x725   : > { %v15861_v7 = vmul.f32 %v15444_v51, %v8423_v57  ;;  %v18893_v33 = vmax.f32 %v18892_v40, 0.0  ;;  %v8173_v12 = vmax.f32 %v10295_v30, 0.0  ;;  %v8957_v59 = vadd.f32 %v8690_v1, %v15783_v48  ;;  %8955 = vadd.xlane.f32.xlu1 %v8954_v46  ;;  %v18896_v57 = vld [vmem:[#allocation43_spill] sm:$0xff] }
 0x726   : > { %v15867_v42 = vmul.f32 %v15448_v44, %v8425_v58  ;;  %v18895_v36 = vmax.f32 %v18894_v31, 0.0  ;;  %v10168_v43 = vadd.f32 %v7164_v63, %v15409_v23  ;;  %v10296_v45 = vadd.f32 %v7870_v24, %v15412_v52  ;;  %v18898_v58 = vld [vmem:[#allocation39_spill] sm:$0xff]  ;;  %v7888_v31 = vpop.f32.mrb[168].mxu1 }
 0x727   : > { %v8424_v8 = vadd.f32 %v8168_v11, %v18893_v33  ;;  %v18897_v13 = vmax.f32 %v18896_v57, 0.0  ;;  %v8692_v1 = vmul.f32 %v15456_v60, %v15805_v56  ;;  %v8958_v38 = vadd.f32 %v8957_v59, %v15786_v20  ;;  %v18900_v20 = vld [vmem:[#allocation72_spill] sm:$0xff]  ;;  %v7182_v59 = vpop.f32.mrb[168].mxu0 }
 0x728   : > { %v8427_v32 = vadd.f32 %v8171_v25, %v18895_v36  ;;  %v10169_v55 = vadd.f32 %v7166_v35, %v15399_v17  ;;  %v18899_v63 = vmax.f32 %v18898_v58, 0.0  ;;  %v8172_v24 = vmax.f32 %v10168_v43, 0.0  ;;  %v18904_v36 = vld [vmem:[#allocation45_spill] sm:$0xff]  ;;  %v15907_v57 = vpop.f32.mrb[169].mxu0 }
 0x729   : > { %v8429_v48 = vadd.f32 %v8173_v12, %v18897_v13  ;;  %v8702_v16 = vmul.f32 %v15452_v5, %v8424_v8  ;;  %v10297_v54 = vadd.f32 %v7872_v50, %v15402_v49  ;;  %v8959_v4 = vadd.f32 %v8958_v38, %v8692_v1  ;;  %v15909_v13 = vpop.f32.mrb[169].mxu1 }
 0x72a   : > { %v8426_v14 = vadd.f32 %v8170_v0, %v18899_v63  ;;  %v15888_v27 = vmul.f32 %v15444_v51, %v8427_v32  ;;  %v8174_v28 = vmax.f32 %v10296_v45, 0.0  ;;  %v8175_v11 = vmax.f32 %v10169_v55, 0.0  ;;  %v18902_v0 = vld [vmem:[#allocation76_spill] sm:$0xff]  ;;  %v15915_v55 = vpop.f32.mrb[170].mxu0  ;;  %v15917_v58 = vpop.f32.mrb[170].mxu1 }
 0x72b   : > { %v15891_v56 = vmul.f32 %v15448_v44, %v8429_v48  ;;  %v18901_v30 = vmax.f32 %v18900_v20, 0.0  ;;  %v8177_v46 = vmax.f32 %v10297_v54, 0.0  ;;  %v8962_v25 = vadd.f32 %v8694_v3, %v15809_v61  ;;  %8960 = vadd.xlane.f32.xlu0 %v8959_v4  ;;  %v15925_v54 = vpop.f32.mrb[171].mxu1 }
 0x72c   : > { %v18903_v40 = vmax.f32 %v18902_v0, 0.0  ;;  %v10170_v50 = vadd.f32 %v7168_v10, %v15409_v23  ;;  %v10298_v8 = vadd.f32 %v7874_v41, %v15412_v52  ;;  %v10171_v12 = vadd.f32 %v7172_v22, %v15399_v17  ;;  %v18906_v10 = vld [vmem:[#allocation44_spill] sm:$0xff] }
 0x72d   : > { %v8428_v35 = vadd.f32 %v8172_v24, %v18901_v30  ;;  %v18905_v32 = vmax.f32 %v18904_v36, 0.0  ;;  %v8696_v45 = vmul.f32 %v15456_v60, %v15826_v47  ;;  %v8963_v61 = vadd.f32 %v8962_v25, %v15812_v19  ;;  %v15923_v24 = vpop.f32.mrb[171].mxu0  ;;  %v18910_v30 = vld [vmem:[#allocation87_spill] sm:$0xff] }
 0x72e   : > { %v8431_v33 = vadd.f32 %v8175_v11, %v18903_v40  ;;  %v10299_v3 = vadd.f32 %v7878_v15, %v15402_v49  ;;  %v18907_v41 = vmax.f32 %v18906_v10, 0.0  ;;  %v8176_v22 = vmax.f32 %v10170_v50, 0.0 }
 0x72f   : > { %v8433_v43 = vadd.f32 %v8177_v46, %v18905_v32  ;;  %v8178_v1 = vmax.f32 %v10298_v8, 0.0  ;;  %v8179_v38 = vmax.f32 %v10171_v12, 0.0  ;;  %v8706_v47 = vmul.f32 %v15452_v5, %v8428_v35  ;;  %v18912_v8 = vld [vmem:[#allocation48_spill] sm:$0xff]  ;;  %v18914_v32 = vld [vmem:[#allocation51_spill] sm:$0xff] }
 0x730   : > { %v15913_v48 = vadd.f32 %v8174_v28, %v18907_v41  ;;  %v15921_v19 = vmul.f32 %v15444_v51, %v8431_v33  ;;  %v8964_v15 = vadd.f32 %v8963_v61, %v8696_v45  ;;  %v8181_v63 = vmax.f32 %v10299_v3, 0.0  ;;  %v18908_v28 = vld [vmem:[#allocation69_spill] sm:$0xff] }
 0x731   : > { %v15928_v4 = vmul.f32 %v15448_v44, %v8433_v43  ;;  %v18909_v11 = vmax.f32 %v18908_v28, 0.0  ;;  %v18911_v46 = vmax.f32 %v18910_v30, 0.0  ;;  %v8967_v35 = vadd.f32 %v15858_v39, %v15834_v53 }
 0x732   : > { %8965 = vadd.xlane.f32.xlu1 %v8964_v15  ;;  %v8700_v0 = vmul.f32 %v15456_v60, %v15854_v29  ;;  %v10172_v40 = vadd.f32 %v7174_v34, %v15409_v23  ;;  %v10300_v33 = vadd.f32 %v7880_v21, %v15412_v52  ;;  %v10173_v50 = vadd.f32 %v7176_v9, %v15399_v17 }
 0x733   : > { %v8432_v20 = vadd.f32 %v8176_v22, %v18909_v11  ;;  %v8435_v25 = vadd.f32 %v8179_v38, %v18911_v46  ;;  %v18913_v12 = vmax.f32 %v18912_v8, 0.0  ;;  %v18915_v43 = vmax.f32 %v18914_v32, 0.0  ;;  %v7192_v22 = vpop.f32.mrb[172].mxu0  ;;  %v18916_v38 = vld [vmem:[#allocation80_spill] sm:$0xff] }
 0x734   : > { %v8968_v61 = vadd.f32 %v8967_v35, %v15850_v37  ;;  %v10301_v53 = vadd.f32 %v7882_v18, %v15402_v49  ;;  %v8180_v29 = vmax.f32 %v10172_v40, 0.0  ;;  %v8182_v3 = vmax.f32 %v10300_v33, 0.0  ;;  %v15963_v30 = vpop.f32.mrb[173].mxu0 }
 0x735   : > { %v15943_v36 = vadd.f32 %v8178_v1, %v18913_v12  ;;  %v8437_v45 = vadd.f32 %v8181_v63, %v18915_v43  ;;  %v8710_v39 = vmul.f32 %v15452_v5, %v8432_v20  ;;  %v8183_v34 = vmax.f32 %v10173_v50, 0.0  ;;  %v15954_v1 = vpop.f32.mrb[172].mxu1  ;;  %v18918_v63 = vld [vmem:[#allocation84_spill] sm:$0xff]  ;;  %v15973_v33 = vpop.f32.mrb[174].mxu0 }
 0x736   : > { %v15951_v21 = vmul.f32 %v15444_v51, %v8435_v25  ;;  %v8969_v9 = vadd.f32 %v8968_v61, %v8700_v0  ;;  %v8185_v10 = vmax.f32 %v10301_v53, 0.0  ;;  %v8972_v41 = vadd.f32 %v8702_v16, %v15861_v7  ;;  %v15965_v46 = vpop.f32.mrb[173].mxu1  ;;  %v18920_v7 = vld [vmem:[#allocation53_spill] sm:$0xff]  ;;  %v18922_v50 = vld [vmem:[#allocation52_spill] sm:$0xff] }
 0x737   : > { %v18917_v15 = vmax.f32 %v18916_v38, 0.0  ;;  %v18919_v18 = vmax.f32 %v18918_v63, 0.0  ;;  %v8704_v11 = vmul.f32 %v15456_v60, %v8426_v14  ;;  %v10174_v20 = vadd.f32 %v15873_v2, %v15409_v23  ;;  %v15975_v14 = vpop.f32.mrb[174].mxu1  ;;  %v18926_v38 = vld [vmem:[#allocation95_spill] sm:$0xff] }
 0x738   : > { %8970 = vadd.xlane.f32.xlu0 %v8969_v9  ;;  %v18921_v16 = vmax.f32 %v18920_v7, 0.0  ;;  %v8973_v35 = vadd.f32 %v8972_v41, %v15867_v42  ;;  %v10302_v0 = vadd.f32 %v15875_v26, %v15412_v52  ;;  %v10175_v40 = vadd.f32 %v7182_v59, %v15399_v17  ;;  %v15985_v42 = vpop.f32.mrb[175].mxu0  ;;  %v15987_v61 = vpop.f32.mrb[175].mxu1 }
 0x739   : > { %v8436_v37 = vadd.f32 %v8180_v29, %v18917_v15  ;;  %v8439_v28 = vadd.f32 %v8183_v34, %v18919_v18  ;;  %v15978_v2 = vmul.f32 %v15448_v44, %v8437_v45  ;;  %v18923_v8 = vmax.f32 %v18922_v50, 0.0  ;;  %v18924_v45 = vld [vmem:[#allocation78_spill] sm:$0xff]  ;;  %v16023_v50 = vpop.f32.mrb[176].mxu1 }
 0x73a   : > { %v8441_v25 = vadd.f32 %v8185_v10, %v18921_v16  ;;  %v8184_v32 = vmax.f32 %v10174_v20, 0.0  ;;  %v10303_v43 = vadd.f32 %v7888_v31, %v15402_v49  ;;  %v8974_v59 = vadd.f32 %v8973_v35, %v8704_v11 }
 0x73b   : > { %v15982_v12 = vadd.f32 %v8182_v3, %v18923_v8  ;;  %v8714_v26 = vmul.f32 %v15452_v5, %v8436_v37  ;;  %v8186_v53 = vmax.f32 %v10302_v0, 0.0  ;;  %v8187_v29 = vmax.f32 %v10175_v40, 0.0  ;;  %v16021_v40 = vpop.f32.mrb[176].mxu0 }
 0x73c   : > { %v15991_v34 = vmul.f32 %v15444_v51, %v8439_v28  ;;  %v18925_v9 = vmax.f32 %v18924_v45, 0.0  ;;  %v8189_v3 = vmax.f32 %v10303_v43, 0.0  ;;  %v8977_v41 = vadd.f32 %v8706_v47, %v15888_v27  ;;  %8975 = vadd.xlane.f32.xlu1 %v8974_v59  ;;  %v18928_v28 = vld [vmem:[#allocation58_spill] sm:$0xff]  ;;  %v16030_v43 = vpop.f32.mrb[177].mxu1 }
 0x73d   : > { %v15997_v31 = vmul.f32 %v15448_v44, %v8441_v25  ;;  %v18927_v15 = vmax.f32 %v18926_v38, 0.0  ;;  %v10176_v37 = vadd.f32 %v15907_v57, %v15409_v23  ;;  %v10304_v18 = vadd.f32 %v15909_v13, %v15412_v52  ;;  %v18930_v25 = vld [vmem:[#allocation247_spill] sm:$0xff] }
 0x73e   : > { %v8440_v10 = vadd.f32 %v8184_v32, %v18925_v9  ;;  %v18929_v11 = vmax.f32 %v18928_v28, 0.0  ;;  %v8708_v7 = vmul.f32 %v15456_v60, %v15913_v48  ;;  %v8978_v27 = vadd.f32 %v8977_v41, %v15891_v56  ;;  %v16028_v32 = vpop.f32.mrb[177].mxu0  ;;  %v18934_v41 = vld [vmem:[#allocation92_spill] sm:$0xff] }
 0x73f   : > { %v8443_v63 = vadd.f32 %v8187_v29, %v18927_v15  ;;  %v10177_v47 = vadd.f32 %v15915_v55, %v15399_v17  ;;  %v18931_v35 = vmax.f32 %v18930_v25, 0.0  ;;  %v8188_v0 = vmax.f32 %v10176_v37, 0.0 }
 0x740   : > { %v8445_v20 = vadd.f32 %v8189_v3, %v18929_v11  ;;  %v16013_v16 = vmul.f32 %v15452_v5, %v8440_v10  ;;  %v10305_v13 = vadd.f32 %v15917_v58, %v15402_v49  ;;  %v8979_v48 = vadd.f32 %v8978_v27, %v8708_v7  ;;  %v16038_v10 = vpop.f32.mrb[178].mxu0  ;;  %v16040_v3 = vpop.f32.mrb[178].mxu1 }
 0x741   : > { %v16017_v57 = vadd.f32 %v8186_v53, %v18931_v35  ;;  %v16026_v56 = vmul.f32 %v15444_v51, %v8443_v63  ;;  %v8190_v55 = vmax.f32 %v10304_v18, 0.0  ;;  %v8191_v8 = vmax.f32 %v10177_v47, 0.0  ;;  %v18932_v53 = vld [vmem:[#allocation88_spill] sm:$0xff]  ;;  %v16049_v28 = vpop.f32.mrb[179].mxu0  ;;  %v16051_v11 = vpop.f32.mrb[179].mxu1  ;;  %v18938_v47 = vld [vmem:[#allocation59_spill] sm:$0xff] }
 0x742   : > { %v16033_v59 = vmul.f32 %v15448_v44, %v8445_v20  ;;  %v18933_v29 = vmax.f32 %v18932_v53, 0.0  ;;  %v8193_v45 = vmax.f32 %v10305_v13, 0.0  ;;  %v8982_v9 = vadd.f32 %v8710_v39, %v15921_v19  ;;  %8980 = vadd.xlane.f32.xlu0 %v8979_v48  ;;  %v18936_v19 = vld [vmem:[#allocation60_spill] sm:$0xff] }
 0x743   : > { %v18935_v38 = vmax.f32 %v18934_v41, 0.0  ;;  %v10178_v63 = vadd.f32 %v15923_v24, %v15409_v23  ;;  %v10306_v37 = vadd.f32 %v15925_v54, %v15412_v52  ;;  %v10179_v18 = vadd.f32 %v7192_v22, %v15399_v17 }
 0x744   : > { %v8444_v58 = vadd.f32 %v8188_v0, %v18933_v29  ;;  %v18937_v39 = vmax.f32 %v18936_v19, 0.0  ;;  %v8712_v7 = vmul.f32 %v15456_v60, %v15943_v36  ;;  %v8983_v27 = vadd.f32 %v8982_v9, %v15928_v4  ;;  %v18940_v4 = vld [vmem:[#allocation85_spill] sm:$0xff]  ;;  %v18944_v19 = vld [vmem:[#allocation248_spill] sm:$0xff] }
 0x745   : > { %v8447_v15 = vadd.f32 %v8191_v8, %v18935_v38  ;;  %v10307_v24 = vadd.f32 %v15954_v1, %v15402_v49  ;;  %v18939_v25 = vmax.f32 %v18938_v47, 0.0  ;;  %v8192_v22 = vmax.f32 %v10178_v63, 0.0 }
 0x746   : > { %v8449_v20 = vadd.f32 %v8193_v45, %v18937_v39  ;;  %v8194_v35 = vmax.f32 %v10306_v37, 0.0  ;;  %v8195_v0 = vmax.f32 %v10179_v18, 0.0  ;;  %v8722_v13 = vmul.f32 %v15452_v5, %v8444_v58  ;;  %v18942_v45 = vld [vmem:[#allocation100_spill] sm:$0xff]  ;;  %v16084_v37 = vpop.f32.mrb[180].mxu0  ;;  %v16086_v18 = vpop.f32.mrb[180].mxu1 }
 0x747   : > { %v16062_v54 = vadd.f32 %v8190_v55, %v18939_v25  ;;  %v16066_v48 = vmul.f32 %v15444_v51, %v8447_v15  ;;  %v8984_v8 = vadd.f32 %v8983_v27, %v8712_v7  ;;  %v8197_v53 = vmax.f32 %v10307_v24, 0.0  ;;  %v16099_v27 = vpop.f32.mrb[181].mxu1 }
 0x748   : > { %v16069_v36 = vmul.f32 %v15448_v44, %v8449_v20  ;;  %v18941_v29 = vmax.f32 %v18940_v4, 0.0  ;;  %v18943_v9 = vmax.f32 %v18942_v45, 0.0  ;;  %v8987_v41 = vadd.f32 %v8714_v26, %v15951_v21  ;;  %v18946_v26 = vld [vmem:[#allocation65_spill] sm:$0xff] }
 0x749   : > { %8985 = vadd.xlane.f32.xlu1 %v8984_v8  ;;  %v8716_v58 = vmul.f32 %v15456_v60, %v15982_v12  ;;  %v10180_v38 = vadd.f32 %v15963_v30, %v15409_v23  ;;  %v10308_v15 = vadd.f32 %v15965_v46, %v15412_v52  ;;  %v10181_v63 = vadd.f32 %v15973_v33, %v15399_v17  ;;  %v16097_v46 = vpop.f32.mrb[181].mxu0 }
 0x74a   : > { %v8448_v1 = vadd.f32 %v8192_v22, %v18941_v29  ;;  %v8451_v55 = vadd.f32 %v8195_v0, %v18943_v9  ;;  %v18945_v39 = vmax.f32 %v18944_v19, 0.0  ;;  %v18947_v20 = vmax.f32 %v18946_v26, 0.0  ;;  %v16102_v22 = vpop.f32.mrb[182].mxu0  ;;  %v18948_v29 = vld [vmem:[#allocation96_spill] sm:$0xff]  ;;  %v18950_v9 = vld [vmem:[#allocation101_spill] sm:$0xff] }
 0x74b   : > { %v8988_v7 = vadd.f32 %v8987_v41, %v15978_v2  ;;  %v10309_v30 = vadd.f32 %v15975_v14, %v15402_v49  ;;  %v8196_v24 = vmax.f32 %v10180_v38, 0.0  ;;  %v8198_v47 = vmax.f32 %v10308_v15, 0.0 }
 0x74c   : > { %v16090_v21 = vadd.f32 %v8194_v35, %v18945_v39  ;;  %v8453_v12 = vadd.f32 %v8197_v53, %v18947_v20  ;;  %v8726_v33 = vmul.f32 %v15452_v5, %v8448_v1  ;;  %v8199_v25 = vmax.f32 %v10181_v63, 0.0  ;;  %v16104_v35 = vpop.f32.mrb[182].mxu1  ;;  %v16111_v53 = vpop.f32.mrb[183].mxu0  ;;  %v18954_v20 = vld [vmem:[#allocation66_spill] sm:$0xff] }
 0x74d   : > { %v16107_v0 = vmul.f32 %v15444_v51, %v8451_v55  ;;  %v8989_v2 = vadd.f32 %v8988_v7, %v8716_v58  ;;  %v8201_v8 = vmax.f32 %v10309_v30, 0.0  ;;  %v8992_v14 = vadd.f32 %v16013_v16, %v15991_v34  ;;  %v16113_v4 = vpop.f32.mrb[183].mxu1  ;;  %v18952_v58 = vld [vmem:[#allocation67_spill] sm:$0xff] }
 0x74e   : > { %v18949_v1 = vmax.f32 %v18948_v29, 0.0  ;;  %v18951_v41 = vmax.f32 %v18950_v9, 0.0  ;;  %v8720_v15 = vmul.f32 %v15456_v60, %v16017_v57  ;;  %v10182_v55 = vadd.f32 %v15985_v42, %v15409_v23 }
 0x74f   : > { %8990 = vadd.xlane.f32.xlu0 %v8989_v2  ;;  %v18953_v63 = vmax.f32 %v18952_v58, 0.0  ;;  %v8993_v16 = vadd.f32 %v8992_v14, %v15997_v31  ;;  %v10310_v19 = vadd.f32 %v15987_v61, %v15412_v52  ;;  %v10183_v39 = vadd.f32 %v16021_v40, %v15399_v17  ;;  %v18956_v40 = vld [vmem:[#allocation94_spill] sm:$0xff] }
 0x750   : > { %v8452_v45 = vadd.f32 %v8196_v24, %v18949_v1  ;;  %v8455_v38 = vadd.f32 %v8199_v25, %v18951_v41  ;;  %v16131_v26 = vmul.f32 %v15448_v44, %v8453_v12  ;;  %v18955_v57 = vmax.f32 %v18954_v20, 0.0  ;;  %v16148_v1 = vpop.f32.mrb[184].mxu1  ;;  %v18962_v20 = vld [vmem:[#allocation70_spill] sm:$0xff] }
 0x751   : > { %v8457_v34 = vadd.f32 %v8201_v8, %v18953_v63  ;;  %v8200_v42 = vmax.f32 %v10182_v55, 0.0  ;;  %v10311_v30 = vadd.f32 %v16023_v50, %v15402_v49  ;;  %v8994_v31 = vadd.f32 %v8993_v16, %v8720_v15 }
 0x752   : > { %v16135_v7 = vadd.f32 %v8198_v47, %v18955_v57  ;;  %v8730_v24 = vmul.f32 %v15452_v5, %v8452_v45  ;;  %v8202_v25 = vmax.f32 %v10310_v19, 0.0  ;;  %v8203_v2 = vmax.f32 %v10183_v39, 0.0  ;;  %v16146_v47 = vpop.f32.mrb[184].mxu0  ;;  %v18958_v45 = vld [vmem:[#allocation110_spill] sm:$0xff] }
 0x753   : > { %v16141_v61 = vmul.f32 %v15444_v51, %v8455_v38  ;;  %v18957_v8 = vmax.f32 %v18956_v40, 0.0  ;;  %v8205_v14 = vmax.f32 %v10311_v30, 0.0  ;;  %v8997_v29 = vadd.f32 %v8722_v13, %v16026_v56  ;;  %8995 = vadd.xlane.f32.xlu1 %v8994_v31  ;;  %v16159_v55 = vpop.f32.mrb[185].mxu0  ;;  %v16161_v56 = vpop.f32.mrb[185].mxu1  ;;  %v18960_v13 = vld [vmem:[#allocation73_spill] sm:$0xff] }
 0x754   : > { %v16151_v50 = vmul.f32 %v15448_v44, %v8457_v34  ;;  %v18959_v9 = vmax.f32 %v18958_v45, 0.0  ;;  %v10184_v38 = vadd.f32 %v16028_v32, %v15409_v23  ;;  %v10312_v15 = vadd.f32 %v16030_v43, %v15412_v52  ;;  %v16170_v39 = vpop.f32.mrb[186].mxu0  ;;  %v16172_v32 = vpop.f32.mrb[186].mxu1 }
 0x755   : > { %v8456_v12 = vadd.f32 %v8200_v42, %v18957_v8  ;;  %v18961_v58 = vmax.f32 %v18960_v13, 0.0  ;;  %v8724_v34 = vmul.f32 %v15456_v60, %v16062_v54  ;;  %v8998_v16 = vadd.f32 %v8997_v29, %v16033_v59  ;;  %v16181_v54 = vpop.f32.mrb[187].mxu1 }
 0x756   : > { %v8459_v41 = vadd.f32 %v8203_v2, %v18959_v9  ;;  %v10185_v19 = vadd.f32 %v16038_v10, %v15399_v17  ;;  %v18963_v57 = vmax.f32 %v18962_v20, 0.0  ;;  %v8204_v30 = vmax.f32 %v10184_v38, 0.0  ;;  %v16179_v2 = vpop.f32.mrb[187].mxu0  ;;  %v18970_v20 = vld [vmem:[#allocation74_spill] sm:$0xff] }
 0x757   : > { %v8461_v63 = vadd.f32 %v8205_v14, %v18961_v58  ;;  %v8734_v43 = vmul.f32 %v15452_v5, %v8456_v12  ;;  %v10313_v31 = vadd.f32 %v16040_v3, %v15402_v49  ;;  %v8999_v10 = vadd.f32 %v8998_v16, %v8724_v34  ;;  %v18964_v12 = vld [vmem:[#allocation104_spill] sm:$0xff] }
 0x758   : > { %v8458_v42 = vadd.f32 %v8202_v25, %v18963_v57  ;;  %v16184_v59 = vmul.f32 %v15444_v51, %v8459_v41  ;;  %v8206_v40 = vmax.f32 %v10312_v15, 0.0  ;;  %v8207_v8 = vmax.f32 %v10185_v19, 0.0  ;;  %v18966_v3 = vld [vmem:[#allocation108_spill] sm:$0xff] }
 0x759   : > { %v16187_v14 = vmul.f32 %v15448_v44, %v8461_v63  ;;  %v18965_v29 = vmax.f32 %v18964_v12, 0.0  ;;  %v8209_v45 = vmax.f32 %v10313_v31, 0.0  ;;  %v9002_v9 = vadd.f32 %v8726_v33, %v16066_v48  ;;  %9000 = vadd.xlane.f32.xlu0 %v8999_v10  ;;  %v18968_v63 = vld [vmem:[#allocation75_spill] sm:$0xff]  ;;  %v16211_v10 = vpop.f32.mrb[188].mxu0 }
 0x75a   : > { %v18967_v38 = vmax.f32 %v18966_v3, 0.0  ;;  %v10186_v41 = vadd.f32 %v16049_v28, %v15409_v23  ;;  %v10314_v15 = vadd.f32 %v16051_v11, %v15412_v52  ;;  %v10187_v58 = vadd.f32 %v16084_v37, %v15399_v17  ;;  %v16213_v37 = vpop.f32.mrb[188].mxu1 }
 0x75b   : > { %v8460_v25 = vadd.f32 %v8204_v30, %v18965_v29  ;;  %v18969_v34 = vmax.f32 %v18968_v63, 0.0  ;;  %v8728_v19 = vmul.f32 %v15456_v60, %v16090_v21  ;;  %v9003_v48 = vadd.f32 %v9002_v9, %v16069_v36  ;;  %v16219_v29 = vpop.f32.mrb[189].mxu0 }
 0x75c   : > { %v8463_v13 = vadd.f32 %v8207_v8, %v18967_v38  ;;  %v10315_v33 = vadd.f32 %v16086_v18, %v15402_v49  ;;  %v18971_v57 = vmax.f32 %v18970_v20, 0.0  ;;  %v8208_v30 = vmax.f32 %v10186_v41, 0.0  ;;  %v16221_v18 = vpop.f32.mrb[189].mxu1  ;;  %v18974_v38 = vld [vmem:[#allocation117_spill] sm:$0xff] }
 0x75d   : > { %v8465_v16 = vadd.f32 %v8209_v45, %v18969_v34  ;;  %v8210_v11 = vmax.f32 %v10314_v15, 0.0  ;;  %v8211_v31 = vmax.f32 %v10187_v58, 0.0  ;;  %v8738_v8 = vmul.f32 %v15452_v5, %v8460_v25  ;;  %v18972_v45 = vld [vmem:[#allocation102_spill] sm:$0xff]  ;;  %v16231_v58 = vpop.f32.mrb[190].mxu0 }
 0x75e   : > { %v16209_v28 = vadd.f32 %v8206_v40, %v18971_v57  ;;  %v16217_v21 = vmul.f32 %v15444_v51, %v8463_v13  ;;  %v9004_v36 = vadd.f32 %v9003_v48, %v8728_v19  ;;  %v8213_v12 = vmax.f32 %v10315_v33, 0.0  ;;  %v16233_v13 = vpop.f32.mrb[190].mxu1  ;;  %v16243_v48 = vpop.f32.mrb[191].mxu0  ;;  %v18978_v57 = vld [vmem:[#allocation81_spill] sm:$0xff] }
 0x75f   : > { %v16224_v40 = vmul.f32 %v15448_v44, %v8465_v16  ;;  %v18973_v9 = vmax.f32 %v18972_v45, 0.0  ;;  %v18975_v41 = vmax.f32 %v18974_v38, 0.0  ;;  %v9007_v25 = vadd.f32 %v8730_v24, %v16107_v0  ;;  %v16245_v0 = vpop.f32.mrb[191].mxu1  ;;  %v18976_v24 = vld [vmem:[#allocation77_spill] sm:$0xff] }
 0x760   : > { %9005 = vadd.xlane.f32.xlu1 %v9004_v36  ;;  %v8732_v63 = vmul.f32 %v15456_v60, %v16135_v7  ;;  %v10188_v34 = vadd.f32 %v16097_v46, %v15409_v23  ;;  %v10316_v16 = vadd.f32 %v16099_v27, %v15412_v52  ;;  %v10189_v19 = vadd.f32 %v16102_v22, %v15399_v17 }
 0x761   : > { %v8464_v3 = vadd.f32 %v8208_v30, %v18973_v9  ;;  %v8467_v15 = vadd.f32 %v8211_v31, %v18975_v41  ;;  %v18977_v33 = vmax.f32 %v18976_v24, 0.0  ;;  %v18979_v30 = vmax.f32 %v18978_v57, 0.0  ;;  %v18980_v24 = vld [vmem:[#allocation111_spill] sm:$0xff] }
 0x762   : > { %v9008_v31 = vadd.f32 %v9007_v25, %v16131_v26  ;;  %v10317_v46 = vadd.f32 %v16104_v35, %v15402_v49  ;;  %v8212_v36 = vmax.f32 %v10188_v34, 0.0  ;;  %v8214_v22 = vmax.f32 %v10316_v16, 0.0  ;;  %v18982_v57 = vld [vmem:[#allocation115_spill] sm:$0xff] }
 0x763   : > { %v16249_v20 = vadd.f32 %v8210_v11, %v18977_v33  ;;  %v8469_v7 = vadd.f32 %v8213_v12, %v18979_v30  ;;  %v8742_v27 = vmul.f32 %v15452_v5, %v8464_v3  ;;  %v8215_v45 = vmax.f32 %v10189_v19, 0.0  ;;  %v18984_v34 = vld [vmem:[#allocation83_spill] sm:$0xff]  ;;  %v16275_v19 = vpop.f32.mrb[192].mxu0  ;;  %v16277_v30 = vpop.f32.mrb[192].mxu1 }
 0x764   : > { %v16258_v9 = vmul.f32 %v15444_v51, %v8467_v15  ;;  %v9009_v38 = vadd.f32 %v9008_v31, %v8732_v63  ;;  %v8217_v41 = vmax.f32 %v10317_v46, 0.0  ;;  %v9012_v11 = vadd.f32 %v8734_v43, %v16141_v61 }
 0x765   : > { %v18981_v33 = vmax.f32 %v18980_v24, 0.0  ;;  %v18983_v26 = vmax.f32 %v18982_v57, 0.0  ;;  %v8736_v35 = vmul.f32 %v15456_v60, %v8458_v42  ;;  %v10190_v3 = vadd.f32 %v16111_v53, %v15409_v23  ;;  %v18986_v53 = vld [vmem:[#allocation82_spill] sm:$0xff] }
 0x766   : > { %9010 = vadd.xlane.f32.xlu0 %v9009_v38  ;;  %v18985_v16 = vmax.f32 %v18984_v34, 0.0  ;;  %v9013_v63 = vadd.f32 %v9012_v11, %v16151_v50  ;;  %v10318_v61 = vadd.f32 %v16113_v4, %v15412_v52  ;;  %v10191_v43 = vadd.f32 %v16146_v47, %v15399_v17  ;;  %v16290_v4 = vpop.f32.mrb[193].mxu1 }
 0x767   : > { %v8468_v12 = vadd.f32 %v8212_v36, %v18981_v33  ;;  %v8471_v25 = vadd.f32 %v8215_v45, %v18983_v26  ;;  %v16280_v42 = vmul.f32 %v15448_v44, %v8469_v7  ;;  %v18987_v31 = vmax.f32 %v18986_v53, 0.0  ;;  %v16288_v45 = vpop.f32.mrb[193].mxu0  ;;  %v16295_v7 = vpop.f32.mrb[194].mxu1  ;;  %v18988_v33 = vld [vmem:[#allocation109_spill] sm:$0xff] }
 0x768   : > { %v8473_v15 = vadd.f32 %v8217_v41, %v18985_v16  ;;  %v8216_v36 = vmax.f32 %v10190_v3, 0.0  ;;  %v10319_v50 = vadd.f32 %v16148_v1, %v15402_v49  ;;  %v9014_v38 = vadd.f32 %v9013_v63, %v8736_v35  ;;  %v16293_v24 = vpop.f32.mrb[194].mxu0  ;;  %v16305_v16 = vpop.f32.mrb[195].mxu1  ;;  %v18990_v35 = vld [vmem:[#allocation125_spill] sm:$0xff] }
 0x769   : > { %v16284_v46 = vadd.f32 %v8214_v22, %v18987_v31  ;;  %v8746_v47 = vmul.f32 %v15452_v5, %v8468_v12  ;;  %v8218_v41 = vmax.f32 %v10318_v61, 0.0  ;;  %v8219_v11 = vmax.f32 %v10191_v43, 0.0  ;;  %v16303_v34 = vpop.f32.mrb[195].mxu0  ;;  %v18992_v53 = vld [vmem:[#allocation89_spill] sm:$0xff] }
 0x76a   : > { %v16298_v22 = vmul.f32 %v15444_v51, %v8471_v25  ;;  %v18989_v57 = vmax.f32 %v18988_v33, 0.0  ;;  %v8221_v1 = vmax.f32 %v10319_v50, 0.0  ;;  %v9017_v3 = vadd.f32 %v8738_v8, %v16184_v59  ;;  %9015 = vadd.xlane.f32.xlu1 %v9014_v38  ;;  %v18994_v38 = vld [vmem:[#allocation86_spill] sm:$0xff] }
 0x76b   : > { %v16308_v12 = vmul.f32 %v15448_v44, %v8473_v15  ;;  %v18991_v63 = vmax.f32 %v18990_v35, 0.0  ;;  %v10192_v25 = vadd.f32 %v16159_v55, %v15409_v23  ;;  %v10320_v43 = vadd.f32 %v16161_v56, %v15412_v52 }
 0x76c   : > { %v8472_v26 = vadd.f32 %v8216_v36, %v18989_v57  ;;  %v18993_v31 = vmax.f32 %v18992_v53, 0.0  ;;  %v8740_v8 = vmul.f32 %v15456_v60, %v16209_v28  ;;  %v9018_v36 = vadd.f32 %v9017_v3, %v16187_v14  ;;  %v16339_v53 = vpop.f32.mrb[196].mxu0 }
 0x76d   : > { %v8475_v61 = vadd.f32 %v8219_v11, %v18991_v63  ;;  %v10193_v15 = vadd.f32 %v16170_v39, %v15399_v17  ;;  %v18995_v11 = vmax.f32 %v18994_v38, 0.0  ;;  %v8220_v55 = vmax.f32 %v10192_v25, 0.0  ;;  %v18996_v39 = vld [vmem:[#allocation118_spill] sm:$0xff]  ;;  %v16341_v25 = vpop.f32.mrb[196].mxu1 }
 0x76e   : > { %v8477_v59 = vadd.f32 %v8221_v1, %v18993_v31  ;;  %v8750_v50 = vmul.f32 %v15452_v5, %v8472_v26  ;;  %v10321_v56 = vadd.f32 %v16172_v32, %v15402_v49  ;;  %v9019_v1 = vadd.f32 %v9018_v36, %v8740_v8  ;;  %v18998_v32 = vld [vmem:[#allocation122_spill] sm:$0xff]  ;;  %v16351_v36 = vpop.f32.mrb[197].mxu0 }
 0x76f   : > { %v16326_v33 = vadd.f32 %v8218_v41, %v18995_v11  ;;  %v16331_v57 = vmul.f32 %v15444_v51, %v8475_v61  ;;  %v8222_v28 = vmax.f32 %v10320_v43, 0.0  ;;  %v8223_v35 = vmax.f32 %v10193_v15, 0.0 }
 0x770   : > { %v16334_v14 = vmul.f32 %v15448_v44, %v8477_v59  ;;  %v18997_v3 = vmax.f32 %v18996_v39, 0.0  ;;  %v8225_v63 = vmax.f32 %v10321_v56, 0.0  ;;  %v9022_v41 = vadd.f32 %v8742_v27, %v16217_v21  ;;  %9020 = vadd.xlane.f32.xlu0 %v9019_v1  ;;  %v16353_v21 = vpop.f32.mrb[197].mxu1  ;;  %v19000_v27 = vld [vmem:[#allocation91_spill] sm:$0xff]  ;;  %v16362_v56 = vpop.f32.mrb[198].mxu0 }
 0x771   : > { %v18999_v61 = vmax.f32 %v18998_v32, 0.0  ;;  %v10194_v43 = vadd.f32 %v16179_v2, %v15409_v23  ;;  %v10322_v59 = vadd.f32 %v16181_v54, %v15412_v52  ;;  %v10195_v8 = vadd.f32 %v16211_v10, %v15399_v17  ;;  %v16364_v54 = vpop.f32.mrb[198].mxu1  ;;  %v19002_v10 = vld [vmem:[#allocation90_spill] sm:$0xff] }
 0x772   : > { %v8476_v26 = vadd.f32 %v8220_v55, %v18997_v3  ;;  %v19001_v15 = vmax.f32 %v19000_v27, 0.0  ;;  %v8744_v11 = vmul.f32 %v15456_v60, %v16249_v20  ;;  %v9023_v55 = vadd.f32 %v9022_v41, %v16224_v40 }
 0x773   : > { %v8479_v31 = vadd.f32 %v8223_v35, %v18999_v61  ;;  %v10323_v2 = vadd.f32 %v16213_v37, %v15402_v49  ;;  %v19003_v1 = vmax.f32 %v19002_v10, 0.0  ;;  %v8224_v39 = vmax.f32 %v10194_v43, 0.0  ;;  %v16372_v61 = vpop.f32.mrb[199].mxu1  ;;  %v19006_v43 = vld [vmem:[#allocation133_spill] sm:$0xff] }
 0x774   : > { %v8481_v38 = vadd.f32 %v8225_v63, %v19001_v15  ;;  %v8226_v3 = vmax.f32 %v10322_v59, 0.0  ;;  %v8227_v32 = vmax.f32 %v10195_v8, 0.0  ;;  %v16370_v63 = vpop.f32.mrb[199].mxu0  ;;  %v8754_v40 = vmul.f32 %v15452_v5, %v8476_v26  ;;  %v19004_v15 = vld [vmem:[#allocation116_spill] sm:$0xff] }
 0x775   : > { %v16368_v35 = vadd.f32 %v8222_v28, %v19003_v1  ;;  %v16376_v20 = vmul.f32 %v15444_v51, %v8479_v31  ;;  %v9024_v37 = vadd.f32 %v9023_v55, %v8744_v11  ;;  %v8229_v41 = vmax.f32 %v10323_v2, 0.0  ;;  %v19008_v55 = vld [vmem:[#allocation93_spill] sm:$0xff] }
 0x776   : > { %v16379_v27 = vmul.f32 %v15448_v44, %v8481_v38  ;;  %v19005_v28 = vmax.f32 %v19004_v15, 0.0  ;;  %v19007_v59 = vmax.f32 %v19006_v43, 0.0  ;;  %v9027_v1 = vadd.f32 %v8746_v47, %v16258_v9  ;;  %v16406_v43 = vpop.f32.mrb[200].mxu0 }
 0x777   : > { %9025 = vadd.xlane.f32.xlu1 %v9024_v37  ;;  %v8748_v26 = vmul.f32 %v15456_v60, %v16284_v46  ;;  %v10196_v31 = vadd.f32 %v16219_v29, %v15409_v23  ;;  %v10324_v11 = vadd.f32 %v16221_v18, %v15412_v52  ;;  %v10197_v38 = vadd.f32 %v16231_v58, %v15399_v17  ;;  %v16408_v58 = vpop.f32.mrb[200].mxu1 }
 0x778   : > { %v8480_v10 = vadd.f32 %v8224_v39, %v19005_v28  ;;  %v8483_v8 = vadd.f32 %v8227_v32, %v19007_v59  ;;  %v19009_v2 = vmax.f32 %v19008_v55, 0.0  ;;  %v19010_v32 = vld [vmem:[#allocation97_spill] sm:$0xff]  ;;  %v9028_v47 = vadd.f32 %v9027_v1, %v16280_v42  ;;  %v16414_v1 = vpop.f32.mrb[201].mxu0 }
 0x779   : > { %v19011_v15 = vmax.f32 %v19010_v32, 0.0  ;;  %v10325_v46 = vadd.f32 %v16233_v13, %v15402_v49  ;;  %v8228_v37 = vmax.f32 %v10196_v31, 0.0  ;;  %v8230_v18 = vmax.f32 %v10324_v11, 0.0  ;;  %v16416_v13 = vpop.f32.mrb[201].mxu1  ;;  %v19014_v11 = vld [vmem:[#allocation130_spill] sm:$0xff] }
 0x77a   : > { %v16396_v39 = vadd.f32 %v8226_v3, %v19009_v2  ;;  %v16404_v29 = vmul.f32 %v15452_v5, %v8480_v10  ;;  %v8231_v28 = vmax.f32 %v10197_v38, 0.0  ;;  %v16411_v3 = vmul.f32 %v15444_v51, %v8483_v8  ;;  %v19012_v10 = vld [vmem:[#allocation126_spill] sm:$0xff] }
 0x77b   : > { %v8485_v9 = vadd.f32 %v8229_v41, %v19011_v15  ;;  %v9029_v59 = vadd.f32 %v9028_v47, %v8748_v26  ;;  %v8233_v41 = vmax.f32 %v10325_v46, 0.0  ;;  %v9032_v42 = vadd.f32 %v8750_v50, %v16298_v22  ;;  %v16426_v26 = vpop.f32.mrb[202].mxu0  ;;  %v16428_v15 = vpop.f32.mrb[202].mxu1  ;;  %v19016_v22 = vld [vmem:[#allocation99_spill] sm:$0xff] }
 0x77c   : > { %v19013_v55 = vmax.f32 %v19012_v10, 0.0  ;;  %v19015_v38 = vmax.f32 %v19014_v11, 0.0  ;;  %v8752_v32 = vmul.f32 %v15456_v60, %v16326_v33  ;;  %v10198_v8 = vadd.f32 %v16243_v48, %v15409_v23  ;;  %v16437_v33 = vpop.f32.mrb[203].mxu0  ;;  %v16439_v10 = vpop.f32.mrb[203].mxu1 }
 0x77d   : > { %9030 = vadd.xlane.f32.xlu0 %v9029_v59  ;;  %v19017_v50 = vmax.f32 %v19016_v22, 0.0  ;;  %v9033_v46 = vadd.f32 %v9032_v42, %v16308_v12  ;;  %v16442_v48 = vmul.f32 %v15448_v44, %v8485_v9  ;;  %v10327_v12 = vadd.f32 %v16277_v30, %v15402_v49 }
 0x77e   : > { %v8484_v31 = vadd.f32 %v8228_v37, %v19013_v55  ;;  %v8487_v2 = vadd.f32 %v8231_v28, %v19015_v38  ;;  %v10326_v37 = vadd.f32 %v16245_v0, %v15412_v52  ;;  %v10199_v28 = vadd.f32 %v16275_v19, %v15399_v17  ;;  %v19018_v55 = vld [vmem:[#allocation98_spill] sm:$0xff] }
 0x77f   : > { %v8489_v47 = vadd.f32 %v8233_v41, %v19017_v50  ;;  %v19019_v59 = vmax.f32 %v19018_v55, 0.0  ;;  %v8232_v41 = vmax.f32 %v10198_v8, 0.0  ;;  %v9034_v42 = vadd.f32 %v9033_v46, %v8752_v32  ;;  %v19020_v50 = vld [vmem:[#allocation124_spill] sm:$0xff]  ;;  %v19022_v8 = vld [vmem:[#allocation141_spill] sm:$0xff] }
 0x780   : > { %v8762_v0 = vmul.f32 %v15452_v5, %v8484_v31  ;;  %v8234_v38 = vmax.f32 %v10326_v37, 0.0  ;;  %v8235_v19 = vmax.f32 %v10199_v28, 0.0  ;;  %v16452_v22 = vmul.f32 %v15444_v51, %v8487_v2  ;;  %v19024_v32 = vld [vmem:[#allocation105_spill] sm:$0xff]  ;;  %v16475_v28 = vpop.f32.mrb[204].mxu1 }
 0x781   : > { %v16446_v11 = vadd.f32 %v8230_v18, %v19019_v59  ;;  %v19021_v62 = vmax.f32 %v19020_v50, 0.0  ;;  %v8237_v6 = vmax.f32 %v10327_v12, 0.0  ;;  %v9037_v55 = vadd.f32 %v8754_v40, %v16331_v57  ;;  %9035 = vadd.xlane.f32.xlu1 %v9034_v42 }
 0x782   : > { %v16458_v18 = vmul.f32 %v15448_v44, %v8489_v47  ;;  %v19023_v30 = vmax.f32 %v19022_v8, 0.0  ;;  %v10200_v31 = vadd.f32 %v16288_v45, %v15409_v23  ;;  %v10328_v2 = vadd.f32 %v16290_v4, %v15412_v52  ;;  %v16473_v47 = vpop.f32.mrb[204].mxu0 }
 0x783   : > { %v8488_v9 = vadd.f32 %v8232_v41, %v19021_v62  ;;  %v19025_v46 = vmax.f32 %v19024_v32, 0.0  ;;  %v8756_v62 = vmul.f32 %v15456_v60, %v16368_v35  ;;  %v9038_v57 = vadd.f32 %v9037_v55, %v16334_v14  ;;  %v19026_v41 = vld [vmem:[#allocation103_spill] sm:$0xff]  ;;  %v16484_v35 = vpop.f32.mrb[205].mxu0  ;;  %v16486_v14 = vpop.f32.mrb[205].mxu1 }
 0x784   : > { %v8491_v59 = vadd.f32 %v8235_v19, %v19023_v30  ;;  %v10201_v40 = vadd.f32 %v16293_v24, %v15399_v17  ;;  %v19027_v12 = vmax.f32 %v19026_v41, 0.0  ;;  %v8236_v42 = vmax.f32 %v10200_v31, 0.0  ;;  %v16491_v8 = vpop.f32.mrb[206].mxu0  ;;  %v19028_v30 = vld [vmem:[#allocation134_spill] sm:$0xff] }
 0x785   : > { %v8493_v37 = vadd.f32 %v8237_v6, %v19025_v46  ;;  %v8766_v45 = vmul.f32 %v15452_v5, %v8488_v9  ;;  %v10329_v6 = vadd.f32 %v16295_v7, %v15402_v49  ;;  %v9039_v19 = vadd.f32 %v9038_v57, %v8756_v62  ;;  %v16493_v9 = vpop.f32.mrb[206].mxu1  ;;  %v16502_v41 = vpop.f32.mrb[207].mxu0 }
 0x786   : > { %v16480_v4 = vadd.f32 %v8234_v38, %v19027_v12  ;;  %v16489_v24 = vmul.f32 %v15444_v51, %v8491_v59  ;;  %v8238_v50 = vmax.f32 %v10328_v2, 0.0  ;;  %v8239_v55 = vmax.f32 %v10201_v40, 0.0  ;;  %v16504_v59 = vpop.f32.mrb[207].mxu1  ;;  %v19031_v2 = vld [vmem:[#allocation138_spill] sm:$0xff] }
 0x787   : > { %v16496_v38 = vmul.f32 %v15448_v44, %v8493_v37  ;;  %v19029_v31 = vmax.f32 %v19028_v30, 0.0  ;;  %v8241_v32 = vmax.f32 %v10329_v6, 0.0  ;;  %v9042_v46 = vadd.f32 %v16404_v29, %v16376_v20  ;;  %19030 = vst [vmem:[#allocation19_spill] sm:$0xff] %v16504_v59  ;;  %9040 = vadd.xlane.f32.xlu0 %v9039_v19  ;;  %v19035_v30 = vld [vmem:[#allocation106_spill] sm:$0xff]  ;;  %v19039_v59 = vld [vmem:[#allocation149_spill] sm:$0xff] }
 0x788   : > { %v19032_v62 = vmax.f32 %v19031_v2, 0.0  ;;  %v10202_v40 = vadd.f32 %v16303_v34, %v15409_v23  ;;  %v10330_v37 = vadd.f32 %v16305_v16, %v15412_v52  ;;  %v10203_v12 = vadd.f32 %v16339_v53, %v15399_v17 }
 0x789   : > { %v8492_v7 = vadd.f32 %v8236_v42, %v19029_v31  ;;  %v19033_v42 = vld [vmem:[#allocation107_spill] sm:$0xff]  ;;  %v8760_v29 = vmul.f32 %v15456_v60, %v16396_v39  ;;  %v9043_v19 = vadd.f32 %v9042_v46, %v16379_v27  ;;  %v19036_v31 = vmax.f32 %v19035_v30, 0.0  ;;  %v19037_v27 = vld [vmem:[#allocation132_spill] sm:$0xff] }
 0x78a   : > { %v8495_v57 = vadd.f32 %v8239_v55, %v19032_v62  ;;  %v19034_v6 = vmax.f32 %v19033_v42, 0.0  ;;  %v10331_v55 = vadd.f32 %v16341_v25, %v15402_v49  ;;  %v8240_v2 = vmax.f32 %v10202_v40, 0.0 }
 0x78b   : > { %v16523_v34 = vadd.f32 %v8238_v50, %v19036_v31  ;;  %v8242_v16 = vmax.f32 %v10330_v37, 0.0  ;;  %v8243_v62 = vmax.f32 %v10203_v12, 0.0  ;;  %v8770_v53 = vmul.f32 %v15452_v5, %v8492_v7  ;;  %v16537_v37 = vpop.f32.mrb[208].mxu0  ;;  %v16539_v12 = vpop.f32.mrb[208].mxu1 }
 0x78c   : > { %v8497_v20 = vadd.f32 %v8241_v32, %v19034_v6  ;;  %v16527_v42 = vmul.f32 %v15444_v51, %v8495_v57  ;;  %v9044_v32 = vadd.f32 %v9043_v19, %v8760_v29  ;;  %v8245_v6 = vmax.f32 %v10331_v55, 0.0  ;;  %v16549_v29 = vpop.f32.mrb[209].mxu0  ;;  %v19043_v55 = vld [vmem:[#allocation112_spill] sm:$0xff] }
 0x78d   : > { %v19038_v46 = vmax.f32 %v19037_v27, 0.0  ;;  %v19040_v30 = vmax.f32 %v19039_v59, 0.0  ;;  %v9047_v40 = vadd.f32 %v8762_v0, %v16411_v3  ;;  %v8764_v7 = vmul.f32 %v15456_v60, %v16446_v11  ;;  %v19041_v3 = vld [vmem:[#allocation249_spill] sm:$0xff] }
 0x78e   : > { %v16530_v39 = vmul.f32 %v15448_v44, %v8497_v20  ;;  %9045 = vadd.xlane.f32.xlu1 %v9044_v32  ;;  %v10204_v57 = vadd.f32 %v16351_v36, %v15409_v23  ;;  %v10332_v20 = vadd.f32 %v16353_v21, %v15412_v52  ;;  %v10205_v59 = vadd.f32 %v16362_v56, %v15399_v17  ;;  %v16562_v21 = vpop.f32.mrb[210].mxu0 }
 0x78f   : > { %v8496_v25 = vadd.f32 %v8240_v2, %v19038_v46  ;;  %v8499_v50 = vadd.f32 %v8243_v62, %v19040_v30  ;;  %v19042_v0 = vmax.f32 %v19041_v3, 0.0  ;;  %v19044_v31 = vmax.f32 %v19043_v55, 0.0  ;;  %v16560_v62 = vpop.f32.mrb[209].mxu1 }
 0x790   : > { %v9048_v11 = vadd.f32 %v9047_v40, %v16442_v48  ;;  %v10333_v36 = vadd.f32 %v16364_v54, %v15402_v49  ;;  %v8244_v32 = vmax.f32 %v10204_v57, 0.0  ;;  %v8246_v27 = vmax.f32 %v10332_v20, 0.0  ;;  %v16565_v30 = vpop.f32.mrb[210].mxu1 }
 0x791   : > { %v16553_v19 = vadd.f32 %v8242_v16, %v19042_v0  ;;  %v8501_v2 = vadd.f32 %v8245_v6, %v19044_v31  ;;  %v8774_v56 = vmul.f32 %v15452_v5, %v8496_v25  ;;  %v8247_v46 = vmax.f32 %v10205_v59, 0.0  ;;  %v16567_v16 = vpop.f32.mrb[211].mxu0  ;;  %v16573_v3 = vpop.f32.mrb[211].mxu1  ;;  %v19046_v0 = vld [vmem:[#allocation142_spill] sm:$0xff] }
 0x792   : > { %19045 = vst [vmem:[#allocation17_spill] sm:$0xff] %v16567_v16  ;;  %v16570_v6 = vmul.f32 %v15444_v51, %v8499_v50  ;;  %v9049_v48 = vadd.f32 %v9048_v11, %v8764_v7  ;;  %v8249_v40 = vmax.f32 %v10333_v36, 0.0  ;;  %v9052_v54 = vadd.f32 %v8766_v45, %v16452_v22  ;;  %v19048_v25 = vld [vmem:[#allocation146_spill] sm:$0xff] }
 0x793   : > { %v19047_v55 = vmax.f32 %v19046_v0, 0.0  ;;  %v19049_v57 = vmax.f32 %v19048_v25, 0.0  ;;  %v8768_v59 = vmul.f32 %v15456_v60, %v16480_v4  ;;  %v10206_v16 = vadd.f32 %v16370_v63, %v15409_v23  ;;  %v19050_v50 = vld [vmem:[#allocation114_spill] sm:$0xff]  ;;  %v19054_v25 = vld [vmem:[#allocation140_spill] sm:$0xff] }
 0x794   : > { %9050 = vadd.xlane.f32.xlu0 %v9049_v48  ;;  %v19051_v7 = vmax.f32 %v19050_v50, 0.0  ;;  %v9053_v22 = vadd.f32 %v9052_v54, %v16458_v18  ;;  %v10334_v45 = vadd.f32 %v16372_v61, %v15412_v52  ;;  %v10207_v36 = vadd.f32 %v16406_v43, %v15399_v17  ;;  %v16604_v43 = vpop.f32.mrb[212].mxu1 }
 0x795   : > { %v8500_v31 = vadd.f32 %v8244_v32, %v19047_v55  ;;  %v8503_v20 = vadd.f32 %v8247_v46, %v19049_v57  ;;  %v16591_v32 = vmul.f32 %v15448_v44, %v8501_v2  ;;  %v19052_v46 = vld [vmem:[#allocation113_spill] sm:$0xff]  ;;  %v8248_v63 = vmax.f32 %v10206_v16, 0.0  ;;  %v16602_v55 = vpop.f32.mrb[212].mxu0 }
 0x796   : > { %v8505_v11 = vadd.f32 %v8249_v40, %v19051_v7  ;;  %v19053_v4 = vmax.f32 %v19052_v46, 0.0  ;;  %v10335_v48 = vadd.f32 %v16408_v58, %v15402_v49  ;;  %v9054_v18 = vadd.f32 %v9053_v22, %v8768_v59  ;;  %v16612_v50 = vpop.f32.mrb[213].mxu0  ;;  %v19056_v7 = vld [vmem:[#allocation157_spill] sm:$0xff] }
 0x797   : > { %v16600_v40 = vmul.f32 %v15452_v5, %v8500_v31  ;;  %v8250_v54 = vmax.f32 %v10334_v45, 0.0  ;;  %v8251_v61 = vmax.f32 %v10207_v36, 0.0  ;;  %v16607_v2 = vmul.f32 %v15444_v51, %v8503_v20  ;;  %v16614_v31 = vpop.f32.mrb[213].mxu1  ;;  %v16625_v46 = vpop.f32.mrb[214].mxu0 }
 0x798   : > { %v16595_v0 = vadd.f32 %v8246_v27, %v19053_v4  ;;  %v19055_v27 = vmax.f32 %v19054_v25, 0.0  ;;  %v8253_v16 = vmax.f32 %v10335_v48, 0.0  ;;  %v9057_v58 = vadd.f32 %v8770_v53, %v16489_v24  ;;  %9055 = vadd.xlane.f32.xlu1 %v9054_v18  ;;  %v16627_v24 = vpop.f32.mrb[214].mxu1  ;;  %v19058_v53 = vld [vmem:[#allocation119_spill] sm:$0xff] }
 0x799   : > { %v16617_v59 = vmul.f32 %v15448_v44, %v8505_v11  ;;  %v19057_v22 = vmax.f32 %v19056_v7, 0.0  ;;  %v10208_v20 = vadd.f32 %v16414_v1, %v15409_v23  ;;  %v10336_v36 = vadd.f32 %v16416_v13, %v15412_v52  ;;  %v16640_v1 = vpop.f32.mrb[215].mxu0 }
 0x79a   : > { %v8504_v57 = vadd.f32 %v8248_v63, %v19055_v27  ;;  %v19059_v4 = vmax.f32 %v19058_v53, 0.0  ;;  %v8772_v11 = vmul.f32 %v15456_v60, %v16523_v34  ;;  %v9058_v48 = vadd.f32 %v9057_v58, %v16496_v38  ;;  %v16649_v38 = vpop.f32.mrb[215].mxu1 }
 0x79b   : > { %v8507_v45 = vadd.f32 %v8251_v61, %v19057_v22  ;;  %v10209_v18 = vadd.f32 %v16426_v26, %v15399_v17  ;;  %v19060_v61 = vld [vmem:[#allocation250_spill] sm:$0xff]  ;;  %v10337_v34 = vadd.f32 %v16428_v15, %v15402_v49  ;;  %19062 = vst [vmem:[#allocation23_spill] sm:$0xff] %v16649_v38  ;;  %v8254_v7 = vmax.f32 %v10336_v36, 0.0 }
 0x79c   : > { %v8509_v63 = vadd.f32 %v8253_v16, %v19059_v4  ;;  %v8782_v13 = vmul.f32 %v15452_v5, %v8504_v57  ;;  %v19061_v25 = vmax.f32 %v19060_v61, 0.0  ;;  %v8252_v16 = vmax.f32 %v10208_v20, 0.0  ;;  %v19063_v57 = vld [vmem:[#allocation150_spill] sm:$0xff] }
 0x79d   : > { %v16652_v26 = vmul.f32 %v15444_v51, %v8507_v45  ;;  %v9059_v58 = vadd.f32 %v9058_v48, %v8772_v11  ;;  %v8255_v22 = vmax.f32 %v10209_v18, 0.0  ;;  %v19064_v4 = vmax.f32 %v19063_v57, 0.0  ;;  %v19065_v15 = vld [vmem:[#allocation154_spill] sm:$0xff]  ;;  %v16669_v11 = vpop.xlane.xlu0 %8900  ;;  %v19067_v48 = vld [vmem:[#allocation121_spill] sm:$0xff] }
 0x79e   : > { %v16645_v27 = vadd.f32 %v8250_v54, %v19061_v25  ;;  %v16655_v53 = vmul.f32 %v15448_v44, %v8509_v63  ;;  %v8257_v54 = vmax.f32 %v10337_v34, 0.0  ;;  %v9062_v20 = vadd.f32 %v8774_v56, %v16527_v42  ;;  %v16678_v34 = vpop.f32.mrb[216].mxu0 }
 0x79f   : > { %v8508_v61 = vadd.f32 %v8252_v16, %v19064_v4  ;;  %9060 = vadd.xlane.f32.xlu0 %v9059_v58  ;;  %v19066_v25 = vmax.f32 %v19065_v15, 0.0  ;;  %v10210_v45 = vadd.f32 %v16437_v33, %v15409_v23  ;;  %v10338_v36 = vadd.f32 %v16439_v10, %v15412_v52  ;;  %v16680_v10 = vpop.f32.mrb[216].mxu1  ;;  %v16686_v15 = vpop.f32.mrb[217].mxu0 }
 0x7a0   : > { %v10211_v63 = vadd.f32 %v16473_v47, %v15399_v17  ;;  %v19068_v18 = vmax.f32 %v19067_v48, 0.0  ;;  %v8776_v42 = vmul.f32 %v15456_v60, %v16553_v19  ;;  %v9063_v56 = vadd.f32 %v9062_v20, %v16530_v39  ;;  %v19069_v47 = vld [vmem:[#allocation120_spill] sm:$0xff] }
 0x7a1   : > { %v8511_v38 = vadd.f32 %v8255_v22, %v19066_v25  ;;  %v10339_v33 = vadd.f32 %v16475_v28, %v15402_v49  ;;  %v19070_v58 = vmax.f32 %v19069_v47, 0.0  ;;  %v8256_v57 = vmax.f32 %v10210_v45, 0.0  ;;  %v16688_v25 = vpop.f32.mrb[217].mxu1 }
 0x7a2   : > { %v8513_v16 = vadd.f32 %v8257_v54, %v19068_v18  ;;  %v8258_v4 = vmax.f32 %v10338_v36, 0.0  ;;  %v8259_v54 = vmax.f32 %v10211_v63, 0.0  ;;  %v16691_v39 = vmul.f32 %v15452_v5, %v8508_v61  ;;  %v16703_v45 = vpop.f32.mrb[218].mxu1  ;;  %v19072_v63 = vld [vmem:[#allocation148_spill] sm:$0xff]  ;;  %v19074_v61 = vld [vmem:[#allocation165_spill] sm:$0xff] }
 0x7a3   : > { %v16684_v22 = vadd.f32 %v8254_v7, %v19070_v58  ;;  %v16694_v28 = vmul.f32 %v15444_v51, %v8511_v38  ;;  %v9064_v19 = vadd.f32 %v9063_v56, %v8776_v42  ;;  %v8261_v20 = vmax.f32 %v10339_v33, 0.0  ;;  %v16701_v7 = vpop.f32.mrb[218].mxu0  ;;  %19071 = vst [vmem:[#allocation20_spill] sm:$0xff] %v16703_v45  ;;  %v16716_v56 = vpop.f32.mrb[219].mxu1 }
 0x7a4   : > { %v16706_v36 = vmul.f32 %v15448_v44, %v8513_v16  ;;  %v19073_v48 = vmax.f32 %v19072_v63, 0.0  ;;  %v19075_v47 = vmax.f32 %v19074_v61, 0.0  ;;  %v9067_v38 = vadd.f32 %v16600_v40, %v16570_v6  ;;  %v16714_v42 = vpop.f32.mrb[219].mxu0  ;;  %19077 = vst [vmem:[#allocation18_spill] sm:$0xff] %v16716_v56  ;;  %v19078_v63 = vld [vmem:[#allocation123_spill] sm:$0xff] }
 0x7a5   : > { %19076 = vst [vmem:[#allocation21_spill] sm:$0xff] %v16714_v42  ;;  %9065 = vadd.xlane.f32.xlu1 %v9064_v19  ;;  %v8780_v33 = vmul.f32 %v15456_v60, %v16595_v0  ;;  %v10212_v16 = vadd.f32 %v16484_v35, %v15409_v23  ;;  %v19079_v6 = vmax.f32 %v19078_v63, 0.0  ;;  %v10341_v0 = vadd.f32 %v16493_v9, %v15402_v49 }
 0x7a6   : > { %v8512_v18 = vadd.f32 %v8256_v57, %v19073_v48  ;;  %v8515_v58 = vadd.f32 %v8259_v54, %v19075_v47  ;;  %v10340_v57 = vadd.f32 %v16486_v14, %v15412_v52  ;;  %v10213_v54 = vadd.f32 %v16491_v8, %v15399_v17  ;;  %v19080_v48 = vld [vmem:[#allocation127_spill] sm:$0xff] }
 0x7a7   : > { %v16728_v40 = vadd.f32 %v8258_v4, %v19079_v6  ;;  %v19081_v61 = vmax.f32 %v19080_v48, 0.0  ;;  %v9068_v19 = vadd.f32 %v9067_v38, %v16591_v32  ;;  %v8260_v56 = vmax.f32 %v10212_v16, 0.0  ;;  %v8906_v32 = vpop.xlane.xlu0 %8905  ;;  %v19082_v38 = vld [vmem:[#allocation158_spill] sm:$0xff] }
 0x7a8   : > { %v16736_v35 = vmul.f32 %v15452_v5, %v8512_v18  ;;  %v8262_v14 = vmax.f32 %v10340_v57, 0.0  ;;  %v8263_v42 = vmax.f32 %v10213_v54, 0.0  ;;  %v16740_v8 = vmul.f32 %v15444_v51, %v8515_v58  ;;  %v16753_v57 = vpop.f32.mrb[220].mxu0 }
 0x7a9   : > { %v8517_v47 = vadd.f32 %v8261_v20, %v19081_v61  ;;  %v9069_v4 = vadd.f32 %v9068_v19, %v8780_v33  ;;  %v8265_v63 = vmax.f32 %v10341_v0, 0.0  ;;  %v9072_v6 = vadd.f32 %v8782_v13, %v16607_v2  ;;  %v16743_v20 = vld [vmem:[#allocation2] ss:$0 sm:$0xff]  ;;  %v19084_v61 = vld [vmem:[#allocation162_spill] sm:$0xff]  ;;  %v16755_v33 = vpop.f32.mrb[220].mxu1  ;;  %v19086_v2 = vld [vmem:[#allocation129_spill] sm:$0xff] }
 0x7aa   : > { %v19083_v48 = vmax.f32 %v19082_v38, 0.0  ;;  %v19085_v18 = vmax.f32 %v19084_v61, 0.0  ;;  %v8784_v16 = vmul.f32 %v15456_v60, %v16645_v27  ;;  %v10214_v58 = vadd.f32 %v16502_v41, %v15409_v23  ;;  %v16767_v41 = vpop.f32.mrb[221].mxu0  ;;  %v16769_v27 = vpop.f32.mrb[221].mxu1 }
 0x7ab   : > { %9070 = vadd.xlane.f32.xlu0 %v9069_v4  ;;  %v19087_v13 = vmax.f32 %v19086_v2, 0.0  ;;  %v9073_v19 = vadd.f32 %v9072_v6, %v16617_v59  ;;  %v19089_v4 = vld [vmem:[#allocation128_spill] sm:$0xff]  ;;  %v9224_v38 = vadd.f32 %v16743_v20, %v16669_v11  ;;  %v16782_v61 = vpop.f32.mrb[222].mxu1 }
 0x7ac   : > { %v8516_v9 = vadd.f32 %v8260_v56, %v19083_v48  ;;  %v8519_v45 = vadd.f32 %v8263_v42, %v19085_v18  ;;  %v19088_v56 = vld [vmem:[#allocation19_spill] sm:$0xff]  ;;  %v16772_v42 = vmul.f32 %v15448_v44, %v8517_v47  ;;  %v8264_v6 = vmax.f32 %v10214_v58, 0.0  ;;  %v16780_v48 = vpop.f32.mrb[222].mxu0  ;;  %v16794_v58 = vpop.f32.mrb[223].mxu1 }
 0x7ad   : > { %v8521_v54 = vadd.f32 %v8265_v63, %v19087_v13  ;;  %v10342_v0 = vadd.f32 %v19088_v56, %v15412_v52  ;;  %v19090_v63 = vmax.f32 %v19089_v4, 0.0  ;;  %v9074_v47 = vadd.f32 %v9073_v19, %v8784_v16  ;;  %19092 = vst [vmem:[#allocation24_spill] sm:$0xff] %v16794_v58  ;;  %v19093_v56 = vld [vmem:[#allocation156_spill] sm:$0xff]  ;;  %9289 = vst.msk [vmem:[%s16765_s12] sm:$0xff] %vm9288_vm0, %v9224_v38 }
 0x7ae   : > { %v16785_v18 = vmul.f32 %v15452_v5, %v8516_v9  ;;  %v16788_v2 = vmul.f32 %v15444_v51, %v8519_v45  ;;  %v10215_v13 = vadd.f32 %v16537_v37, %v15399_v17  ;;  %v19094_v11 = vmax.f32 %v19093_v56, 0.0 }
 0x7af   : > { %v16776_v59 = vadd.f32 %v8262_v14, %v19090_v63  ;;  %v16792_v14 = vpop.f32.mrb[223].mxu0  ;;  %v8266_v63 = vmax.f32 %v10342_v0, 0.0  ;;  %v10343_v9 = vadd.f32 %v16539_v12, %v15402_v49  ;;  %v9077_v45 = vadd.f32 %v16691_v39, %v16652_v26  ;;  %9075 = vadd.xlane.f32.xlu1 %v9074_v47  ;;  %v19095_v39 = vld [vmem:[#allocation173_spill] sm:$0xff] }
 0x7b0   : > { %19091 = vst [vmem:[#allocation27_spill] sm:$0xff] %v16792_v14  ;;  %v8520_v4 = vadd.f32 %v8264_v6, %v19094_v11  ;;  %v16805_v16 = vmul.f32 %v15448_v44, %v8521_v54  ;;  %v8267_v37 = vmax.f32 %v10215_v13, 0.0  ;;  %v10216_v19 = vadd.f32 %v16549_v29, %v15409_v23  ;;  %v8911_v29 = vpop.xlane.xlu1 %8910 }
 0x7b1   : > { %v10344_v0 = vadd.f32 %v16560_v62, %v15412_v52  ;;  %v8269_v6 = vmax.f32 %v10343_v9, 0.0  ;;  %v8788_v38 = vmul.f32 %v15456_v60, %v16684_v22  ;;  %v9078_v12 = vadd.f32 %v9077_v45, %v16655_v53  ;;  %v19097_v62 = vld [vmem:[#allocation131_spill] sm:$0xff]  ;;  %v16832_v45 = vpop.f32.mrb[224].mxu1 }
 0x7b2   : > { %v9225_v26 = vadd.f32 %v16743_v20, %v8906_v32  ;;  %v19096_v54 = vmax.f32 %v19095_v39, 0.0  ;;  %v8268_v47 = vmax.f32 %v10216_v19, 0.0  ;;  %v10217_v13 = vadd.f32 %v16562_v21, %v15399_v17  ;;  %v16830_v32 = vpop.f32.mrb[224].mxu0 }
 0x7b3   : > { %v8270_v11 = vmax.f32 %v10344_v0, 0.0  ;;  %v16820_v58 = vmul.f32 %v15452_v5, %v8520_v4  ;;  %v19098_v9 = vmax.f32 %v19097_v62, 0.0  ;;  %v9079_v22 = vadd.f32 %v9078_v12, %v8788_v38  ;;  %v19101_v0 = vld [vmem:[#allocation166_spill] sm:$0xff]  ;;  %v16840_v38 = vpop.f32.mrb[225].mxu0  ;;  %v19103_v62 = vld [vmem:[#allocation17_spill] sm:$0xff] }
 0x7b4   : > { %v8523_v56 = vadd.f32 %v8267_v37, %v19096_v54  ;;  %9290 = vst.msk [vmem:[%s16765_s12 + $0x8] sm:$0xff] %vm9288_vm0, %v9225_v26  ;;  %v10345_v53 = vadd.f32 %v16565_v30, %v15402_v49  ;;  %v19099_v37 = vld [vmem:[#allocation135_spill] sm:$0xff]  ;;  %v19102_v4 = vmax.f32 %v19101_v0, 0.0  ;;  %v8271_v54 = vmax.f32 %v10217_v13, 0.0  ;;  %v19106_v13 = vld [vmem:[#allocation136_spill] sm:$0xff] }
 0x7b5   : > { %v16824_v14 = vadd.f32 %v8266_v63, %v19098_v9  ;;  %v19100_v21 = vmax.f32 %v19099_v37, 0.0  ;;  %v8792_v63 = vmul.f32 %v15456_v60, %v16728_v40  ;;  %9080 = vadd.xlane.f32.xlu0 %v9079_v22  ;;  %v9082_v26 = vadd.f32 %v16736_v35, %v16694_v28  ;;  %v16849_v9 = vpop.f32.mrb[225].mxu1 }
 0x7b6   : > { %v8524_v39 = vadd.f32 %v8268_v47, %v19102_v4  ;;  %v16843_v12 = vmul.f32 %v15444_v51, %v8523_v56  ;;  %v8273_v30 = vmax.f32 %v10345_v53, 0.0  ;;  %19104 = vst [vmem:[#allocation25_spill] sm:$0xff] %v16849_v9  ;;  %v16851_v47 = vpop.f32.mrb[226].mxu0  ;;  %v19107_v40 = vmax.f32 %v19106_v13, 0.0  ;;  %v16862_v35 = vpop.f32.mrb[226].mxu1  ;;  %v19110_v4 = vld [vmem:[#allocation137_spill] sm:$0xff] }
 0x7b7   : > { %v8525_v19 = vadd.f32 %v8269_v6, %v19100_v21  ;;  %v10218_v6 = vadd.f32 %v19103_v62, %v15409_v23  ;;  %19105 = vst [vmem:[#allocation22_spill] sm:$0xff] %v16851_v47  ;;  %v19108_v21 = vld [vmem:[#allocation170_spill] sm:$0xff]  ;;  %v10346_v22 = vadd.f32 %v16573_v3, %v15412_v52  ;;  %v9226_v28 = vadd.f32 %v16743_v20, %v8911_v29  ;;  %v16864_v53 = vpop.f32.mrb[227].mxu0 }
 0x7b8   : > { %v16855_v37 = vadd.f32 %v8270_v11, %v19107_v40  ;;  %v19109_v56 = vmax.f32 %v19108_v21, 0.0  ;;  %v19111_v62 = vmax.f32 %v19110_v4, 0.0  ;;  %v9083_v47 = vadd.f32 %v9082_v26, %v16706_v36  ;;  %v16871_v40 = vpop.f32.mrb[227].mxu1 }
 0x7b9   : > { %v8272_v13 = vmax.f32 %v10218_v6, 0.0  ;;  %v10219_v11 = vadd.f32 %v16602_v55, %v15399_v17  ;;  %v16877_v3 = vmul.f32 %v15452_v5, %v8524_v39  ;;  %9291 = vst.msk [vmem:[%s16765_s12 + $0x10] sm:$0xff] %vm9288_vm0, %v9226_v28  ;;  %v10347_v36 = vadd.f32 %v16604_v43, %v15402_v49  ;;  %v19112_v6 = vld [vmem:[#allocation164_spill] sm:$0xff] }
 0x7ba   : > { %v8527_v0 = vadd.f32 %v8271_v54, %v19109_v56  ;;  %v8529_v9 = vadd.f32 %v8273_v30, %v19111_v62  ;;  %v16874_v54 = vmul.f32 %v15448_v44, %v8525_v19  ;;  %v8916_v30 = vpop.xlane.xlu1 %8915  ;;  %v9084_v26 = vadd.f32 %v9083_v47, %v8792_v63  ;;  %v8921_v62 = vpop.xlane.xlu0 %8920  ;;  %v19114_v63 = vld [vmem:[#allocation181_spill] sm:$0xff] }
 0x7bb   : > { %v19113_v55 = vmax.f32 %v19112_v6, 0.0  ;;  %v8274_v56 = vmax.f32 %v10346_v22, 0.0  ;;  %v8275_v4 = vmax.f32 %v10219_v11, 0.0  ;;  %v8277_v19 = vmax.f32 %v10347_v36, 0.0  ;;  %v16902_v11 = vpop.f32.mrb[228].mxu0 }
 0x7bc   : > { %v16880_v29 = vmul.f32 %v15444_v51, %v8527_v0  ;;  %v8796_v39 = vmul.f32 %v15456_v60, %v16776_v59  ;;  %v9087_v0 = vadd.f32 %v16785_v18, %v16740_v8  ;;  %v10220_v28 = vadd.f32 %v16612_v50, %v15409_v23  ;;  %9085 = vadd.xlane.f32.xlu1 %v9084_v26  ;;  %v16904_v8 = vpop.f32.mrb[228].mxu1  ;;  %v19116_v18 = vld [vmem:[#allocation143_spill] sm:$0xff] }
 0x7bd   : > { %v8528_v21 = vadd.f32 %v8272_v13, %v19113_v55  ;;  %v16895_v43 = vmul.f32 %v15448_v44, %v8529_v9  ;;  %v19115_v47 = vmax.f32 %v19114_v63, 0.0  ;;  %v10348_v13 = vadd.f32 %v16614_v31, %v15412_v52  ;;  %v16911_v55 = vpop.f32.mrb[229].mxu0 }
 0x7be   : > { %v9227_v59 = vadd.f32 %v16743_v20, %v8916_v30  ;;  %v19117_v50 = vmax.f32 %v19116_v18, 0.0  ;;  %v9088_v9 = vadd.f32 %v9087_v0, %v16772_v42  ;;  %v8276_v6 = vmax.f32 %v10220_v28, 0.0  ;;  %19118 = vst [vmem:[#allocation33_spill] sm:$0xff] %v16911_v55  ;;  %v19120_v30 = vld [vmem:[#allocation139_spill] sm:$0xff]  ;;  %v19122_v28 = vld [vmem:[#allocation174_spill] sm:$0xff] }
 0x7bf   : > { %v8531_v22 = vadd.f32 %v8275_v4, %v19115_v47  ;;  %v10221_v26 = vadd.f32 %v16625_v46, %v15399_v17  ;;  %v16913_v4 = vpop.f32.mrb[229].mxu1  ;;  %v16916_v31 = vmul.f32 %v15452_v5, %v8528_v21  ;;  %v19121_v63 = vmax.f32 %v19120_v30, 0.0  ;;  %v8926_v46 = vpop.xlane.xlu1 %8925 }
 0x7c0   : > { %v8533_v36 = vadd.f32 %v8277_v19, %v19117_v50  ;;  %19119 = vst [vmem:[#allocation28_spill] sm:$0xff] %v16913_v4  ;;  %9292 = vst.msk [vmem:[%s16765_s12 + $0x18] sm:$0xff] %vm9288_vm0, %v9227_v59  ;;  %v10349_v42 = vadd.f32 %v16627_v24, %v15402_v49  ;;  %v16929_v19 = vpop.f32.mrb[230].mxu0  ;;  %v9089_v0 = vadd.f32 %v9088_v9, %v8796_v39  ;;  %v19123_v50 = vmax.f32 %v19122_v28, 0.0  ;;  %v16933_v30 = vpop.f32.mrb[230].mxu1 }
 0x7c1   : > { %v16920_v47 = vadd.f32 %v8274_v56, %v19121_v63  ;;  %v16923_v18 = vmul.f32 %v15444_v51, %v8531_v22  ;;  %v8278_v4 = vmax.f32 %v10348_v13, 0.0  ;;  %v8279_v55 = vmax.f32 %v10221_v26, 0.0  ;;  %v16935_v56 = vpop.f32.mrb[231].mxu0  ;;  %v16943_v9 = vpop.f32.mrb[231].mxu1 }
 0x7c2   : > { %v8532_v21 = vadd.f32 %v8276_v6, %v19123_v50  ;;  %19124 = vst [vmem:[#allocation31_spill] sm:$0xff] %v16935_v56  ;;  %v8281_v22 = vmax.f32 %v10349_v42, 0.0  ;;  %v8800_v59 = vmul.f32 %v15456_v60, %v16824_v14  ;;  %v9092_v24 = vadd.f32 %v16820_v58, %v16788_v2  ;;  %19125 = vst [vmem:[#allocation26_spill] sm:$0xff] %v16943_v9  ;;  %v19126_v6 = vld [vmem:[#allocation178_spill] sm:$0xff]  ;;  %v19128_v42 = vld [vmem:[#allocation23_spill] sm:$0xff] }
 0x7c3   : > { %v10222_v39 = vadd.f32 %v16640_v1, %v15409_v23  ;;  %v16946_v13 = vmul.f32 %v15448_v44, %v8533_v36  ;;  %9090 = vadd.xlane.f32.xlu0 %v9089_v0  ;;  %v19127_v26 = vmax.f32 %v19126_v6, 0.0  ;;  %v10350_v28 = vadd.f32 %v19128_v42, %v15412_v52  ;;  %v19129_v50 = vld [vmem:[#allocation145_spill] sm:$0xff]  ;;  %v19131_v0 = vld [vmem:[#allocation144_spill] sm:$0xff] }
 0x7c4   : > { %v9228_v14 = vadd.f32 %v16743_v20, %v8921_v62  ;;  %v19130_v2 = vmax.f32 %v19129_v50, 0.0  ;;  %v9093_v1 = vadd.f32 %v9092_v24, %v16805_v16  ;;  %v9229_v9 = vadd.f32 %v16743_v20, %v8926_v46 }
 0x7c5   : > { %v8535_v63 = vadd.f32 %v8279_v55, %v19127_v26  ;;  %v8280_v56 = vmax.f32 %v10222_v39, 0.0  ;;  %v16958_v36 = vmul.f32 %v15452_v5, %v8532_v21  ;;  %v19132_v6 = vmax.f32 %v19131_v0, 0.0  ;;  %v16980_v39 = vpop.f32.mrb[232].mxu1  ;;  %v19133_v26 = vld [vmem:[#allocation172_spill] sm:$0xff] }
 0x7c6   : > { %v8537_v58 = vadd.f32 %v8281_v22, %v19130_v2  ;;  %9293 = vst.msk [vmem:[%s16765_s12 + $0x20] sm:$0xff] %vm9288_vm0, %v9228_v14  ;;  %v10223_v62 = vadd.f32 %v16678_v34, %v15399_v17  ;;  %v10351_v22 = vadd.f32 %v16680_v10, %v15402_v49  ;;  %v9094_v21 = vadd.f32 %v9093_v1, %v8800_v59  ;;  %v16988_v2 = vpop.f32.mrb[233].mxu1 }
 0x7c7   : > { %v16962_v55 = vadd.f32 %v8278_v4, %v19132_v6  ;;  %v16971_v16 = vmul.f32 %v15444_v51, %v8535_v63  ;;  %v8282_v24 = vmax.f32 %v10350_v28, 0.0  ;;  %9294 = vst.msk [vmem:[%s16765_s12 + $0x28] sm:$0xff] %vm9288_vm0, %v9229_v9  ;;  %v16978_v4 = vpop.f32.mrb[232].mxu0  ;;  %v19134_v42 = vmax.f32 %v19133_v26, 0.0  ;;  %19135 = vst [vmem:[#allocation41_spill] sm:$0xff] %v16988_v2  ;;  %v19140_v6 = vld [vmem:[#allocation151_spill] sm:$0xff] }
 0x7c8   : > { %v16974_v46 = vmul.f32 %v15448_v44, %v8537_v58  ;;  %v8283_v14 = vmax.f32 %v10223_v62, 0.0  ;;  %v8285_v50 = vmax.f32 %v10351_v22, 0.0  ;;  %v9097_v10 = vadd.f32 %v16877_v3, %v16843_v12  ;;  %v16986_v63 = vpop.f32.mrb[233].mxu0  ;;  %9095 = vadd.xlane.f32.xlu1 %v9094_v21  ;;  %v17000_v12 = vpop.f32.mrb[234].mxu1  ;;  %v19138_v3 = vld [vmem:[#allocation189_spill] sm:$0xff] }
 0x7c9   : > { %v8536_v34 = vadd.f32 %v8280_v56, %v19134_v42  ;;  %v8804_v59 = vmul.f32 %v15456_v60, %v16855_v37  ;;  %v10224_v9 = vadd.f32 %v16686_v15, %v15409_v23  ;;  %v10352_v28 = vadd.f32 %v16688_v25, %v15412_v52  ;;  %v16998_v58 = vpop.f32.mrb[234].mxu0  ;;  %19137 = vst [vmem:[#allocation38_spill] sm:$0xff] %v17000_v12  ;;  %v19142_v15 = vld [vmem:[#allocation20_spill] sm:$0xff]  ;;  %v17011_v25 = vpop.f32.mrb[235].mxu1 }
 0x7ca   : > { %v10225_v56 = vadd.f32 %v16701_v7, %v15399_v17  ;;  %19136 = vst [vmem:[#allocation34_spill] sm:$0xff] %v16998_v58  ;;  %v19139_v1 = vmax.f32 %v19138_v3, 0.0  ;;  %v19141_v62 = vmax.f32 %v19140_v6, 0.0  ;;  %v9098_v37 = vadd.f32 %v9097_v10, %v16874_v54  ;;  %v17009_v26 = vpop.f32.mrb[235].mxu0  ;;  %v19143_v7 = vld [vmem:[#allocation147_spill] sm:$0xff]  ;;  %v8936_v6 = vpop.xlane.xlu1 %8935 }
 0x7cb   : > { %v10353_v21 = vadd.f32 %v19142_v15, %v15402_v49  ;;  %v19144_v42 = vmax.f32 %v19143_v7, 0.0  ;;  %v8284_v12 = vmax.f32 %v10224_v9, 0.0  ;;  %v8286_v2 = vmax.f32 %v10352_v28, 0.0  ;;  %v19145_v15 = vld [vmem:[#allocation182_spill] sm:$0xff] }
 0x7cc   : > { %v8539_v0 = vadd.f32 %v8283_v14, %v19139_v1  ;;  %v8541_v22 = vadd.f32 %v8285_v50, %v19141_v62  ;;  %v8287_v3 = vmax.f32 %v10225_v56, 0.0  ;;  %v8931_v14 = vpop.xlane.xlu0 %8930  ;;  %v17018_v1 = vmul.f32 %v15452_v5, %v8536_v34 }
 0x7cd   : > { %v17015_v58 = vadd.f32 %v8282_v24, %v19144_v42  ;;  %v9099_v50 = vadd.f32 %v9098_v37, %v8804_v59  ;;  %v8289_v54 = vmax.f32 %v10353_v21, 0.0  ;;  %v8808_v10 = vmul.f32 %v15456_v60, %v16920_v47  ;;  %v19147_v42 = vld [vmem:[#allocation186_spill] sm:$0xff]  ;;  %v19149_v47 = vld [vmem:[#allocation21_spill] sm:$0xff]  ;;  %v19151_v21 = vld [vmem:[#allocation152_spill] sm:$0xff] }
 0x7ce   : > { %v17023_v62 = vmul.f32 %v15444_v51, %v8539_v0  ;;  %v19146_v7 = vmax.f32 %v19145_v15, 0.0  ;;  %v19148_v9 = vmax.f32 %v19147_v42, 0.0  ;;  %v9102_v34 = vadd.f32 %v16916_v31, %v16880_v29  ;;  %v19150_v0 = vld [vmem:[#allocation18_spill] sm:$0xff] }
 0x7cf   : > { %v17032_v59 = vmul.f32 %v15448_v44, %v8541_v22  ;;  %9100 = vadd.xlane.f32.xlu0 %v9099_v50  ;;  %v10226_v56 = vadd.f32 %v19149_v47, %v15409_v23  ;;  %v10354_v37 = vadd.f32 %v19150_v0, %v15412_v52  ;;  %v19152_v15 = vmax.f32 %v19151_v21, 0.0  ;;  %v17047_v50 = vpop.f32.mrb[236].mxu0  ;;  %v17059_v0 = vpop.f32.mrb[236].mxu1 }
 0x7d0   : > { %v8540_v24 = vadd.f32 %v8284_v12, %v19146_v7  ;;  %v8543_v28 = vadd.f32 %v8287_v3, %v19148_v9  ;;  %v9230_v12 = vadd.f32 %v16743_v20, %v8931_v14  ;;  %v19153_v3 = vld [vmem:[#allocation153_spill] sm:$0xff]  ;;  %v9103_v31 = vadd.f32 %v9102_v34, %v16895_v43  ;;  %v17069_v34 = vpop.f32.mrb[237].mxu1 }
 0x7d1   : > { %v17041_v7 = vadd.f32 %v8286_v2, %v19152_v15  ;;  %v19154_v42 = vmax.f32 %v19153_v3, 0.0  ;;  %v9231_v22 = vadd.f32 %v16743_v20, %v8936_v6  ;;  %v8288_v14 = vmax.f32 %v10226_v56, 0.0  ;;  %19155 = vst [vmem:[#allocation32_spill] sm:$0xff] %v17069_v34  ;;  %v17079_v3 = vpop.f32.mrb[238].mxu1  ;;  %v8946_v34 = vpop.xlane.xlu1 %8945 }
 0x7d2   : > { %v17050_v9 = vmul.f32 %v15452_v5, %v8540_v24  ;;  %v17053_v47 = vmul.f32 %v15444_v51, %v8543_v28  ;;  %9295 = vst.msk [vmem:[%s16765_s12 + $0x30] sm:$0xff] %vm9288_vm0, %v9230_v12  ;;  %v10227_v2 = vadd.f32 %v16753_v57, %v15399_v17  ;;  %v9104_v43 = vadd.f32 %v9103_v31, %v8808_v10  ;;  %v19157_v12 = vld [vmem:[#allocation180_spill] sm:$0xff] }
 0x7d3   : > { %v8545_v29 = vadd.f32 %v8289_v54, %v19154_v42  ;;  %v17061_v54 = vpop.f32.mrb[237].mxu0  ;;  %v8290_v6 = vmax.f32 %v10354_v37, 0.0  ;;  %9296 = vst.msk [vmem:[%s16765_s12 + $0x38] sm:$0xff] %vm9288_vm0, %v9231_v22  ;;  %v10355_v24 = vadd.f32 %v16755_v33, %v15402_v49  ;;  %v9107_v28 = vadd.f32 %v16958_v36, %v16923_v18  ;;  %19159 = vst [vmem:[#allocation42_spill] sm:$0xff] %v17079_v3  ;;  %v17088_v22 = vpop.f32.mrb[239].mxu1 }
 0x7d4   : > { %v17071_v56 = vpop.f32.mrb[238].mxu0  ;;  %v19158_v57 = vmax.f32 %v19157_v12, 0.0  ;;  %v8291_v15 = vmax.f32 %v10227_v2, 0.0  ;;  %v8812_v10 = vmul.f32 %v15456_v60, %v16962_v55  ;;  %v10228_v37 = vadd.f32 %v16767_v41, %v15409_v23  ;;  %9105 = vadd.xlane.f32.xlu1 %v9104_v43  ;;  %19161 = vst [vmem:[#allocation40_spill] sm:$0xff] %v17088_v22  ;;  %v19162_v41 = vld [vmem:[#allocation197_spill] sm:$0xff]  ;;  %v19166_v22 = vld [vmem:[#allocation155_spill] sm:$0xff] }
 0x7d5   : > { %19156 = vst [vmem:[#allocation49_spill] sm:$0xff] %v17071_v56  ;;  %v17081_v33 = vpop.f32.mrb[239].mxu0  ;;  %v8293_v18 = vmax.f32 %v10355_v24, 0.0  ;;  %v9108_v36 = vadd.f32 %v9107_v28, %v16946_v13  ;;  %v10356_v42 = vadd.f32 %v16769_v27, %v15412_v52  ;;  %v10229_v31 = vadd.f32 %v16780_v48, %v15399_v17  ;;  %v19164_v24 = vld [vmem:[#allocation159_spill] sm:$0xff]  ;;  %v19168_v56 = vld [vmem:[#allocation190_spill] sm:$0xff] }
 0x7d6   : > { %v8544_v21 = vadd.f32 %v8288_v14, %v19158_v57  ;;  %19160 = vst [vmem:[#allocation46_spill] sm:$0xff] %v17081_v33  ;;  %v17091_v55 = vmul.f32 %v15448_v44, %v8545_v29  ;;  %v19163_v14 = vmax.f32 %v19162_v41, 0.0  ;;  %v8292_v12 = vmax.f32 %v10228_v37, 0.0 }
 0x7d7   : > { %v10357_v43 = vadd.f32 %v16782_v61, %v15402_v49  ;;  %v19165_v13 = vmax.f32 %v19164_v24, 0.0  ;;  %v9109_v57 = vadd.f32 %v9108_v36, %v8812_v10  ;;  %v8294_v27 = vmax.f32 %v10356_v42, 0.0  ;;  %v19170_v10 = vld [vmem:[#allocation194_spill] sm:$0xff] }
 0x7d8   : > { %v8547_v2 = vadd.f32 %v8291_v15, %v19163_v14  ;;  %v8295_v33 = vmax.f32 %v10229_v31, 0.0  ;;  %v17100_v48 = vmul.f32 %v15452_v5, %v8544_v21  ;;  %v19167_v3 = vmax.f32 %v19166_v22, 0.0  ;;  %v8941_v14 = vpop.xlane.xlu0 %8940  ;;  %v19172_v31 = vld [vmem:[#allocation160_spill] sm:$0xff] }
 0x7d9   : > { %v8549_v28 = vadd.f32 %v8293_v18, %v19165_v13  ;;  %v19169_v41 = vmax.f32 %v19168_v56, 0.0  ;;  %v8297_v37 = vmax.f32 %v10357_v43, 0.0  ;;  %9110 = vadd.xlane.f32.xlu0 %v9109_v57  ;;  %v19171_v18 = vmax.f32 %v19170_v10, 0.0  ;;  %v17119_v56 = vpop.f32.mrb[240].mxu1  ;;  %v19175_v43 = vld [vmem:[#allocation24_spill] sm:$0xff]  ;;  %v19178_v10 = vld [vmem:[#allocation161_spill] sm:$0xff] }
 0x7da   : > { %v17104_v29 = vadd.f32 %v8290_v6, %v19167_v3  ;;  %v17109_v61 = vmul.f32 %v15444_v51, %v8547_v2  ;;  %v8816_v21 = vmul.f32 %v15456_v60, %v17015_v58  ;;  %v9112_v6 = vadd.f32 %v17018_v1, %v16971_v16  ;;  %v17117_v3 = vpop.f32.mrb[240].mxu0  ;;  %v17134_v16 = vpop.f32.mrb[241].mxu1 }
 0x7db   : > { %v8548_v15 = vadd.f32 %v8292_v12, %v19169_v41  ;;  %v8551_v36 = vadd.f32 %v8295_v33, %v19171_v18  ;;  %v17122_v42 = vmul.f32 %v15448_v44, %v8549_v28  ;;  %v19173_v22 = vmax.f32 %v19172_v31, 0.0  ;;  %v19174_v12 = vld [vmem:[#allocation27_spill] sm:$0xff]  ;;  %v17132_v24 = vpop.f32.mrb[241].mxu0  ;;  %19176 = vst [vmem:[#allocation56_spill] sm:$0xff] %v17134_v16 }
 0x7dc   : > { %v10230_v33 = vadd.f32 %v19174_v12, %v15409_v23  ;;  %v10358_v58 = vadd.f32 %v19175_v43, %v15412_v52  ;;  %v9113_v13 = vadd.f32 %v9112_v6, %v16974_v46  ;;  %v9232_v28 = vadd.f32 %v16743_v20, %v8941_v14  ;;  %v19183_v6 = vld [vmem:[#allocation188_spill] sm:$0xff] }
 0x7dd   : > { %v17126_v2 = vadd.f32 %v8294_v27, %v19173_v22  ;;  %v17137_v1 = vmul.f32 %v15452_v5, %v8548_v15  ;;  %v9233_v57 = vadd.f32 %v16743_v20, %v8946_v34  ;;  %v17142_v27 = vpop.f32.mrb[242].mxu0  ;;  %v17145_v41 = vmul.f32 %v15444_v51, %v8551_v36  ;;  %v17151_v15 = vpop.f32.mrb[242].mxu1 }
 0x7de   : > { %19177 = vst [vmem:[#allocation50_spill] sm:$0xff] %v17142_v27  ;;  %v19179_v18 = vmax.f32 %v19178_v10, 0.0  ;;  %v8296_v22 = vmax.f32 %v10230_v33, 0.0  ;;  %v10231_v12 = vadd.f32 %v16830_v32, %v15399_v17  ;;  %19180 = vst [vmem:[#allocation54_spill] sm:$0xff] %v17151_v15  ;;  %v17153_v43 = vpop.f32.mrb[243].mxu0  ;;  %v9114_v46 = vadd.f32 %v9113_v13, %v8816_v21  ;;  %v17163_v36 = vpop.f32.mrb[243].mxu1 }
 0x7df   : > { %19181 = vst [vmem:[#allocation47_spill] sm:$0xff] %v17153_v43  ;;  %v8298_v14 = vmax.f32 %v10358_v58, 0.0  ;;  %9297 = vst.msk [vmem:[%s16765_s12 + $0x40] sm:$0xff] %vm9288_vm0, %v9232_v28  ;;  %v10359_v34 = vadd.f32 %v16832_v45, %v15402_v49  ;;  %v19184_v32 = vmax.f32 %v19183_v6, 0.0  ;;  %v8820_v21 = vmul.f32 %v15456_v60, %v17041_v7  ;;  %v19185_v45 = vld [vmem:[#allocation25_spill] sm:$0xff]  ;;  %v17185_v15 = vpop.f32.mrb[244].mxu0 }
 0x7e0   : > { %v8553_v31 = vadd.f32 %v8297_v37, %v19179_v18  ;;  %9298 = vst.msk [vmem:[%s16765_s12 + $0x48] sm:$0xff] %vm9288_vm0, %v9233_v57  ;;  %v9117_v37 = vadd.f32 %v17050_v9, %v17023_v62  ;;  %19182 = vst [vmem:[#allocation63_spill] sm:$0xff] %v17163_v36  ;;  %v8299_v10 = vmax.f32 %v10231_v12, 0.0  ;;  %v10232_v58 = vadd.f32 %v16840_v38, %v15409_v23  ;;  %v19186_v62 = vld [vmem:[#allocation22_spill] sm:$0xff] }
 0x7e1   : > { %v8552_v33 = vadd.f32 %v8296_v22, %v19184_v32  ;;  %9115 = vadd.xlane.f32.xlu1 %v9114_v46  ;;  %v8301_v13 = vmax.f32 %v10359_v34, 0.0  ;;  %v10360_v57 = vadd.f32 %v19185_v45, %v15412_v52  ;;  %v10233_v9 = vadd.f32 %v19186_v62, %v15399_v17  ;;  %v19187_v22 = vld [vmem:[#allocation205_spill] sm:$0xff]  ;;  %v8951_v46 = vpop.xlane.xlu0 %8950  ;;  %v8956_v34 = vpop.xlane.xlu1 %8955  ;;  %v19189_v32 = vld [vmem:[#allocation167_spill] sm:$0xff] }
 0x7e2   : > { %v9118_v28 = vadd.f32 %v9117_v37, %v17032_v59  ;;  %v17177_v18 = vmul.f32 %v15448_v44, %v8553_v31  ;;  %v19188_v12 = vmax.f32 %v19187_v22, 0.0  ;;  %v8300_v7 = vmax.f32 %v10232_v58, 0.0  ;;  %v17187_v62 = vpop.f32.mrb[244].mxu1 }
 0x7e3   : > { %v10361_v38 = vadd.f32 %v16862_v35, %v15402_v49  ;;  %v19190_v59 = vmax.f32 %v19189_v32, 0.0  ;;  %v8302_v45 = vmax.f32 %v10360_v57, 0.0  ;;  %v8303_v43 = vmax.f32 %v10233_v9, 0.0  ;;  %v19193_v35 = vld [vmem:[#allocation198_spill] sm:$0xff]  ;;  %v17198_v32 = vpop.f32.mrb[245].mxu0 }
 0x7e4   : > { %v8555_v6 = vadd.f32 %v8299_v10, %v19188_v12  ;;  %v9119_v36 = vadd.f32 %v9118_v28, %v8820_v21  ;;  %v17190_v31 = vmul.f32 %v15452_v5, %v8552_v33  ;;  %v19191_v10 = vld [vmem:[#allocation163_spill] sm:$0xff]  ;;  %v19194_v12 = vmax.f32 %v19193_v35, 0.0  ;;  %v17200_v21 = vpop.f32.mrb[245].mxu1  ;;  %v19195_v28 = vld [vmem:[#allocation202_spill] sm:$0xff] }
 0x7e5   : > { %v8557_v37 = vadd.f32 %v8301_v13, %v19190_v59  ;;  %v19192_v58 = vmax.f32 %v19191_v10, 0.0  ;;  %v8305_v16 = vmax.f32 %v10361_v38, 0.0  ;;  %v19196_v57 = vmax.f32 %v19195_v28, 0.0  ;;  %v17211_v59 = vpop.f32.mrb[246].mxu0  ;;  %v19197_v10 = vld [vmem:[#allocation168_spill] sm:$0xff] }
 0x7e6   : > { %v8556_v27 = vadd.f32 %v8300_v7, %v19194_v12  ;;  %v17203_v13 = vmul.f32 %v15444_v51, %v8555_v6  ;;  %9120 = vadd.xlane.f32.xlu0 %v9119_v36  ;;  %v8824_v9 = vmul.f32 %v15456_v60, %v17104_v29  ;;  %v17213_v7 = vpop.f32.mrb[246].mxu1  ;;  %v19198_v6 = vmax.f32 %v19197_v10, 0.0 }
 0x7e7   : > { %v17194_v22 = vadd.f32 %v8298_v14, %v19192_v58  ;;  %v8559_v33 = vadd.f32 %v8303_v43, %v19196_v57  ;;  %v9122_v14 = vadd.f32 %v17100_v48, %v17053_v47  ;;  %v17216_v38 = vmul.f32 %v15448_v44, %v8557_v37  ;;  %v17226_v47 = vpop.f32.mrb[247].mxu0 }
 0x7e8   : > { %v17220_v36 = vadd.f32 %v8302_v45, %v19198_v6  ;;  %v10234_v43 = vadd.f32 %v16864_v53, %v15409_v23  ;;  %v10362_v29 = vadd.f32 %v16871_v40, %v15412_v52  ;;  %19199 = vst [vmem:[#allocation29_spill] sm:$0xff] %v17226_v47  ;;  %v17229_v48 = vmul.f32 %v15452_v5, %v8556_v27  ;;  %v17234_v45 = vpop.f32.mrb[247].mxu1  ;;  %v19201_v53 = vld [vmem:[#allocation169_spill] sm:$0xff] }
 0x7e9   : > { %v9123_v37 = vadd.f32 %v9122_v14, %v17091_v55  ;;  %v9234_v58 = vadd.f32 %v16743_v20, %v8951_v46  ;;  %v9235_v35 = vadd.f32 %v16743_v20, %v8956_v34  ;;  %19200 = vst [vmem:[#allocation244_spill] sm:$0xff] %v17234_v45  ;;  %v17237_v12 = vmul.f32 %v15444_v51, %v8559_v33  ;;  %v19203_v34 = vld [vmem:[#allocation196_spill] sm:$0xff] }
 0x7ea   : > { %v19202_v28 = vmax.f32 %v19201_v53, 0.0  ;;  %v8304_v40 = vmax.f32 %v10234_v43, 0.0  ;;  %v10235_v10 = vadd.f32 %v16902_v11, %v15399_v17  ;;  %v8306_v6 = vmax.f32 %v10362_v29, 0.0  ;;  %v19205_v11 = vld [vmem:[#allocation33_spill] sm:$0xff]  ;;  %v8961_v29 = vpop.xlane.xlu0 %8960  ;;  %v17262_v53 = vpop.f32.mrb[248].mxu0 }
 0x7eb   : > { %v9124_v27 = vadd.f32 %v9123_v37, %v8824_v9  ;;  %9299 = vst.msk [vmem:[%s16765_s12 + $0x50] sm:$0xff] %vm9288_vm0, %v9234_v58  ;;  %9300 = vst.msk [vmem:[%s16765_s12 + $0x58] sm:$0xff] %vm9288_vm0, %v9235_v35  ;;  %v10363_v55 = vadd.f32 %v16904_v8, %v15402_v49  ;;  %v9127_v46 = vadd.f32 %v17137_v1, %v17109_v61  ;;  %v19204_v33 = vmax.f32 %v19203_v34, 0.0  ;;  %v19206_v8 = vld [vmem:[#allocation28_spill] sm:$0xff]  ;;  %v8966_v1 = vpop.xlane.xlu1 %8965 }
 0x7ec   : > { %v8561_v57 = vadd.f32 %v8305_v16, %v19202_v28  ;;  %v8307_v16 = vmax.f32 %v10235_v10, 0.0  ;;  %v8828_v43 = vmul.f32 %v15456_v60, %v17126_v2  ;;  %v10236_v9 = vadd.f32 %v19205_v11, %v15409_v23  ;;  %19207 = vst [vmem:[#allocation57_spill] sm:$0xff] %v17262_v53  ;;  %v19208_v2 = vld [vmem:[#allocation213_spill] sm:$0xff] }
 0x7ed   : > { %v8560_v14 = vadd.f32 %v8304_v40, %v19204_v33  ;;  %9125 = vadd.xlane.f32.xlu1 %v9124_v27  ;;  %v8309_v37 = vmax.f32 %v10363_v55, 0.0  ;;  %v9128_v58 = vadd.f32 %v9127_v46, %v17122_v42  ;;  %v10364_v35 = vadd.f32 %v19206_v8, %v15412_v52  ;;  %v17271_v42 = vpop.f32.mrb[248].mxu1  ;;  %v17273_v55 = vpop.f32.mrb[249].mxu0  ;;  %v19212_v46 = vld [vmem:[#allocation175_spill] sm:$0xff] }
 0x7ee   : > { %v10237_v61 = vadd.f32 %v16929_v19, %v15399_v17  ;;  %v17265_v28 = vmul.f32 %v15448_v44, %v8561_v57  ;;  %v19209_v40 = vmax.f32 %v19208_v2, 0.0  ;;  %v8308_v34 = vmax.f32 %v10236_v9, 0.0  ;;  %19210 = vst [vmem:[#allocation61_spill] sm:$0xff] %v17271_v42  ;;  %19211 = vst [vmem:[#allocation30_spill] sm:$0xff] %v17273_v55  ;;  %v17277_v45 = vpop.f32.mrb[249].mxu1  ;;  %v17279_v57 = vpop.f32.mrb[250].mxu0 }
 0x7ef   : > { %v10365_v27 = vadd.f32 %v16933_v30, %v15402_v49  ;;  %v19213_v33 = vmax.f32 %v19212_v46, 0.0  ;;  %v9129_v11 = vadd.f32 %v9128_v58, %v8828_v43  ;;  %v8310_v8 = vmax.f32 %v10364_v35, 0.0  ;;  %v19214_v9 = vld [vmem:[#allocation171_spill] sm:$0xff]  ;;  %v17290_v46 = vpop.f32.mrb[250].mxu1  ;;  %v17292_v43 = vpop.f32.mrb[251].mxu0  ;;  %v19219_v58 = vld [vmem:[#allocation210_spill] sm:$0xff] }
 0x7f0   : > { %v8563_v10 = vadd.f32 %v8307_v16, %v19209_v40  ;;  %v8311_v53 = vmax.f32 %v10237_v61, 0.0  ;;  %v17282_v16 = vmul.f32 %v15452_v5, %v8560_v14  ;;  %v19215_v2 = vmax.f32 %v19214_v9, 0.0  ;;  %v19216_v40 = vld [vmem:[#allocation206_spill] sm:$0xff]  ;;  %19218 = vst [vmem:[#allocation246_spill] sm:$0xff] %v17292_v43  ;;  %v8976_v43 = vpop.xlane.xlu1 %8975 }
 0x7f1   : > { %v8565_v19 = vadd.f32 %v8309_v37, %v19213_v33  ;;  %v19217_v42 = vmax.f32 %v19216_v40, 0.0  ;;  %v8313_v47 = vmax.f32 %v10365_v27, 0.0  ;;  %9130 = vadd.xlane.f32.xlu0 %v9129_v11  ;;  %v19220_v35 = vmax.f32 %v19219_v58, 0.0  ;;  %v19224_v11 = vld [vmem:[#allocation31_spill] sm:$0xff]  ;;  %v19225_v9 = vld [vmem:[#allocation26_spill] sm:$0xff] }
 0x7f2   : > { %v17286_v30 = vadd.f32 %v8306_v6, %v19215_v2  ;;  %v17295_v37 = vmul.f32 %v15444_v51, %v8563_v10  ;;  %v8832_v61 = vmul.f32 %v15456_v60, %v17194_v22  ;;  %v9132_v6 = vadd.f32 %v17190_v31, %v17145_v41 }
 0x7f3   : > { %v8564_v55 = vadd.f32 %v8308_v34, %v19217_v42  ;;  %v8567_v14 = vadd.f32 %v8311_v53, %v19220_v35  ;;  %v17303_v34 = vpop.f32.mrb[251].mxu1  ;;  %v17306_v27 = vmul.f32 %v15448_v44, %v8565_v19  ;;  %v19222_v42 = vld [vmem:[#allocation176_spill] sm:$0xff]  ;;  %v10238_v53 = vadd.f32 %v19224_v11, %v15409_v23 }
 0x7f4   : > { %19221 = vst [vmem:[#allocation55_spill] sm:$0xff] %v17303_v34  ;;  %v19223_v10 = vmax.f32 %v19222_v42, 0.0  ;;  %v10366_v22 = vadd.f32 %v19225_v9, %v15412_v52  ;;  %v9133_v41 = vadd.f32 %v9132_v6, %v17177_v18  ;;  %v9236_v31 = vadd.f32 %v16743_v20, %v8961_v29 }
 0x7f5   : > { %v17317_v2 = vmul.f32 %v15452_v5, %v8564_v55  ;;  %v9237_v19 = vadd.f32 %v16743_v20, %v8966_v1  ;;  %v17323_v40 = vmul.f32 %v15444_v51, %v8567_v14  ;;  %v8312_v42 = vmax.f32 %v10238_v53, 0.0  ;;  %v17337_v1 = vpop.f32.mrb[252].mxu0  ;;  %v17339_v55 = vpop.f32.mrb[252].mxu1 }
 0x7f6   : > { %v17310_v33 = vadd.f32 %v8310_v8, %v19223_v10  ;;  %v19226_v8 = vld [vmem:[#allocation177_spill] sm:$0xff]  ;;  %v10239_v10 = vadd.f32 %v16978_v4, %v15399_v17  ;;  %v9134_v11 = vadd.f32 %v9133_v41, %v8832_v61  ;;  %v8314_v9 = vmax.f32 %v10366_v22, 0.0  ;;  %9301 = vst.msk [vmem:[%s16765_s12 + $0x60] sm:$0xff] %vm9288_vm0, %v9236_v31  ;;  %19228 = vst [vmem:[#allocation71_spill] sm:$0xff] %v17337_v1  ;;  %v17347_v22 = vpop.f32.mrb[253].mxu0 }
 0x7f7   : > { %v19227_v58 = vmax.f32 %v19226_v8, 0.0  ;;  %9302 = vst.msk [vmem:[%s16765_s12 + $0x68] sm:$0xff] %vm9288_vm0, %v9237_v19  ;;  %v10367_v18 = vadd.f32 %v16980_v39, %v15402_v49  ;;  %v9137_v29 = vadd.f32 %v17229_v48, %v17203_v13  ;;  %19229 = vst [vmem:[#allocation245_spill] sm:$0xff] %v17339_v55  ;;  %v8836_v61 = vmul.f32 %v15456_v60, %v17220_v36  ;;  %v17349_v39 = vpop.f32.mrb[253].mxu1  ;;  %v19234_v41 = vld [vmem:[#allocation41_spill] sm:$0xff]  ;;  %v19235_v19 = vld [vmem:[#allocation34_spill] sm:$0xff] }
 0x7f8   : > { %v8315_v4 = vmax.f32 %v10239_v10, 0.0  ;;  %v10240_v53 = vadd.f32 %v16986_v63, %v15409_v23  ;;  %19232 = vst [vmem:[#allocation35_spill] sm:$0xff] %v17347_v22  ;;  %19233 = vst [vmem:[#allocation64_spill] sm:$0xff] %v17349_v39  ;;  %9135 = vadd.xlane.f32.xlu1 %v9134_v11  ;;  %v10368_v31 = vadd.f32 %v19234_v41, %v15412_v52  ;;  %v19237_v63 = vld [vmem:[#allocation221_spill] sm:$0xff]  ;;  %v19239_v11 = vld [vmem:[#allocation38_spill] sm:$0xff] }
 0x7f9   : > { %v8569_v35 = vadd.f32 %v8313_v47, %v19227_v58  ;;  %v19230_v47 = vld [vmem:[#allocation204_spill] sm:$0xff]  ;;  %v8317_v13 = vmax.f32 %v10367_v18, 0.0  ;;  %v9138_v48 = vadd.f32 %v9137_v29, %v17216_v38  ;;  %v10241_v8 = vadd.f32 %v19235_v19, %v15399_v17  ;;  %v17356_v58 = vpop.f32.mrb[254].mxu0  ;;  %v19242_v29 = vld [vmem:[#allocation183_spill] sm:$0xff] }
 0x7fa   : > { %v19231_v14 = vmax.f32 %v19230_v47, 0.0  ;;  %19236 = vst [vmem:[#allocation68_spill] sm:$0xff] %v17356_v58  ;;  %v8316_v47 = vmax.f32 %v10240_v53, 0.0  ;;  %v10369_v18 = vadd.f32 %v19239_v11, %v15402_v49  ;;  %v17367_v38 = vpop.f32.mrb[255].mxu0  ;;  %v19243_v41 = vmax.f32 %v19242_v29, 0.0  ;;  %v19252_v29 = vld [vmem:[#allocation185_spill] sm:$0xff] }
 0x7fb   : > { %v17359_v36 = vmul.f32 %v15448_v44, %v8569_v35  ;;  %19241 = vst [vmem:[#allocation36_spill] sm:$0xff] %v17367_v38  ;;  %v9139_v19 = vadd.f32 %v9138_v48, %v8836_v61  ;;  %v8318_v22 = vmax.f32 %v10368_v31, 0.0  ;;  %v8319_v58 = vmax.f32 %v10241_v8, 0.0  ;;  %v19248_v61 = vld [vmem:[#allocation218_spill] sm:$0xff] }
 0x7fc   : > { %v8568_v6 = vadd.f32 %v8312_v42, %v19231_v14  ;;  %v19238_v42 = vmax.f32 %v19237_v63, 0.0  ;;  %v17365_v14 = vpop.f32.mrb[254].mxu1  ;;  %v8573_v39 = vadd.f32 %v8317_v13, %v19243_v41  ;;  %v19244_v63 = vld [vmem:[#allocation179_spill] sm:$0xff]  ;;  %v8321_v34 = vmax.f32 %v10369_v18, 0.0 }
 0x7fd   : > { %19240 = vst [vmem:[#allocation37_spill] sm:$0xff] %v17365_v14  ;;  %v17371_v55 = vpop.f32.mrb[255].mxu1  ;;  %v8971_v14 = vpop.xlane.xlu0 %8970  ;;  %9140 = vadd.xlane.f32.xlu0 %v9139_v19  ;;  %v19249_v13 = vmax.f32 %v19248_v61, 0.0  ;;  %v8840_v31 = vmul.f32 %v15456_v60, %v17286_v30 }
 0x7fe   : > { %v8571_v10 = vadd.f32 %v8315_v4, %v19238_v42  ;;  %v8846_v35 = vmul.f32 %v15452_v5, %v8568_v6  ;;  %v19245_v4 = vmax.f32 %v19244_v63, 0.0  ;;  %v19246_v42 = vld [vmem:[#allocation214_spill] sm:$0xff]  ;;  %v19250_v6 = vld [vmem:[#allocation184_spill] sm:$0xff] }
 0x7ff   : > { %v19247_v1 = vmax.f32 %v19246_v42, 0.0  ;;  %v8575_v48 = vadd.f32 %v8319_v58, %v19249_v13  ;;  %v19251_v8 = vmax.f32 %v19250_v6, 0.0  ;;  %v10370_v58 = vadd.f32 %v17011_v25, %v15412_v52 }
 0x800   : > { %v8570_v53 = vadd.f32 %v8314_v9, %v19245_v4  ;;  %v17379_v38 = vmul.f32 %v15444_v51, %v8571_v10  ;;  %v9142_v9 = vadd.f32 %v17282_v16, %v17237_v12  ;;  %v10242_v10 = vadd.f32 %v17009_v26, %v15409_v23 }
 0x801   : > { %v8572_v11 = vadd.f32 %v8316_v47, %v19247_v1  ;;  %v17388_v1 = vmul.f32 %v15448_v44, %v8573_v39  ;;  %v17392_v47 = vadd.f32 %v8318_v22, %v19251_v8  ;;  %v9238_v12 = vadd.f32 %v16743_v20, %v8971_v14  ;;  %v19254_v14 = vld [vmem:[#allocation212_spill] sm:$0xff] }
 0x802   : > { %v9143_v18 = vadd.f32 %v9142_v9, %v17265_v28  ;;  %v9239_v16 = vadd.f32 %v16743_v20, %v8976_v43  ;;  %v17403_v39 = vmul.f32 %v15444_v51, %v8575_v48  ;;  %v19253_v22 = vmax.f32 %v19252_v29, 0.0  ;;  %v19256_v48 = vld [vmem:[#allocation32_spill] sm:$0xff] }
 0x803   : > { %v8850_v30 = vmul.f32 %v15452_v5, %v8572_v11  ;;  %v8320_v19 = vmax.f32 %v10242_v10, 0.0  ;;  %v10243_v26 = vadd.f32 %v17047_v50, %v15399_v17  ;;  %v8322_v25 = vmax.f32 %v10370_v58, 0.0  ;;  %9303 = vst.msk [vmem:[%s16765_s12 + $0x70] sm:$0xff] %vm9288_vm0, %v9238_v12  ;;  %v19258_v9 = vld [vmem:[#allocation228_spill] sm:$0xff]  ;;  %v19260_v10 = vld [vmem:[#allocation42_spill] sm:$0xff]  ;;  %v19261_v58 = vld [vmem:[#allocation191_spill] sm:$0xff] }
 0x804   : > { %v8577_v41 = vadd.f32 %v8321_v34, %v19253_v22  ;;  %v9144_v63 = vadd.f32 %v9143_v18, %v8840_v31  ;;  %9304 = vst.msk [vmem:[%s16765_s12 + $0x78] sm:$0xff] %vm9288_vm0, %v9239_v16  ;;  %v10371_v28 = vadd.f32 %v17059_v0, %v15402_v49  ;;  %v9147_v43 = vadd.f32 %v17317_v2, %v17295_v37  ;;  %v19257_v31 = vld [vmem:[#allocation49_spill] sm:$0xff] }
 0x805   : > { %v19255_v4 = vmax.f32 %v19254_v14, 0.0  ;;  %v8323_v34 = vmax.f32 %v10243_v26, 0.0  ;;  %v8844_v11 = vmul.f32 %v15456_v60, %v17310_v33  ;;  %v10244_v50 = vadd.f32 %v17061_v54, %v15409_v23 }
 0x806   : > { %9145 = vadd.xlane.f32.xlu1 %v9144_v63  ;;  %v8325_v61 = vmax.f32 %v10371_v28, 0.0  ;;  %v9148_v13 = vadd.f32 %v9147_v43, %v17306_v27  ;;  %v10372_v0 = vadd.f32 %v19256_v48, %v15412_v52  ;;  %v10245_v37 = vadd.f32 %v19257_v31, %v15399_v17  ;;  %v19267_v48 = vld [vmem:[#allocation226_spill] sm:$0xff] }
 0x807   : > { %v8576_v42 = vadd.f32 %v8320_v19, %v19255_v4  ;;  %v17429_v2 = vmul.f32 %v15448_v44, %v8577_v41  ;;  %v19259_v6 = vmax.f32 %v19258_v9, 0.0  ;;  %v8324_v33 = vmax.f32 %v10244_v50, 0.0  ;;  %v19263_v19 = vld [vmem:[#allocation187_spill] sm:$0xff]  ;;  %v19265_v41 = vld [vmem:[#allocation222_spill] sm:$0xff]  ;;  %v8981_v4 = vpop.xlane.xlu0 %8980 }
 0x808   : > { %v10373_v54 = vadd.f32 %v19260_v10, %v15402_v49  ;;  %v19262_v18 = vmax.f32 %v19261_v58, 0.0  ;;  %v9149_v27 = vadd.f32 %v9148_v13, %v8844_v11  ;;  %v8326_v16 = vmax.f32 %v10372_v0, 0.0  ;;  %v19269_v0 = vld [vmem:[#allocation192_spill] sm:$0xff]  ;;  %v19271_v9 = vld [vmem:[#allocation46_spill] sm:$0xff]  ;;  %v19273_v58 = vld [vmem:[#allocation193_spill] sm:$0xff] }
 0x809   : > { %v8579_v8 = vadd.f32 %v8323_v34, %v19259_v6  ;;  %v8327_v29 = vmax.f32 %v10245_v37, 0.0  ;;  %v8854_v22 = vmul.f32 %v15452_v5, %v8576_v42  ;;  %v19264_v26 = vmax.f32 %v19263_v19, 0.0  ;;  %v8986_v34 = vpop.xlane.xlu1 %8985 }
 0x80a   : > { %v8581_v12 = vadd.f32 %v8325_v61, %v19262_v18  ;;  %v19266_v28 = vmax.f32 %v19265_v41, 0.0  ;;  %v8329_v14 = vmax.f32 %v10373_v54, 0.0  ;;  %9150 = vadd.xlane.f32.xlu0 %v9149_v27  ;;  %v19268_v61 = vmax.f32 %v19267_v48, 0.0  ;;  %v19275_v41 = vld [vmem:[#allocation220_spill] sm:$0xff] }
 0x80b   : > { %v8578_v63 = vadd.f32 %v8322_v25, %v19264_v26  ;;  %v17443_v50 = vmul.f32 %v15444_v51, %v8579_v8  ;;  %v8848_v13 = vmul.f32 %v15456_v60, %v8570_v53  ;;  %v9152_v42 = vadd.f32 %v8846_v35, %v17323_v40  ;;  %v19272_v8 = vld [vmem:[#allocation40_spill] sm:$0xff] }
 0x80c   : > { %v8580_v43 = vadd.f32 %v8324_v33, %v19266_v28  ;;  %v8583_v11 = vadd.f32 %v8327_v29, %v19268_v61  ;;  %v17450_v25 = vmul.f32 %v15448_v44, %v8581_v12  ;;  %v19270_v31 = vmax.f32 %v19269_v0, 0.0  ;;  %v19277_v61 = vld [vmem:[#allocation56_spill] sm:$0xff] }
 0x80d   : > { %v10246_v6 = vadd.f32 %v19271_v9, %v15409_v23  ;;  %v10374_v33 = vadd.f32 %v19272_v8, %v15412_v52  ;;  %v9153_v53 = vadd.f32 %v9152_v42, %v17359_v36  ;;  %v9240_v40 = vadd.f32 %v16743_v20, %v8981_v4  ;;  %v19282_v9 = vld [vmem:[#allocation199_spill] sm:$0xff] }
 0x80e   : > { %v17454_v37 = vadd.f32 %v8326_v16, %v19270_v31  ;;  %v8858_v10 = vmul.f32 %v15452_v5, %v8580_v43  ;;  %v9241_v35 = vadd.f32 %v16743_v20, %v8986_v34  ;;  %v17465_v54 = vmul.f32 %v15444_v51, %v8583_v11  ;;  %v19281_v31 = vld [vmem:[#allocation54_spill] sm:$0xff] }
 0x80f   : > { %v19274_v18 = vmax.f32 %v19273_v58, 0.0  ;;  %v8328_v27 = vmax.f32 %v10246_v6, 0.0  ;;  %v10247_v16 = vadd.f32 %v17117_v3, %v15399_v17  ;;  %v9154_v29 = vadd.f32 %v9153_v53, %v8848_v13  ;;  %9305 = vst.msk [vmem:[%s16765_s12 + $0x80] sm:$0xff] %vm9288_vm0, %v9240_v40  ;;  %v19279_v13 = vld [vmem:[#allocation232_spill] sm:$0xff] }
 0x810   : > { %v8330_v19 = vmax.f32 %v10374_v33, 0.0  ;;  %9306 = vst.msk [vmem:[%s16765_s12 + $0x88] sm:$0xff] %vm9288_vm0, %v9241_v35  ;;  %v10375_v36 = vadd.f32 %v17119_v56, %v15402_v49  ;;  %v9157_v26 = vadd.f32 %v8850_v30, %v17379_v38  ;;  %v19276_v28 = vmax.f32 %v19275_v41, 0.0  ;;  %v19278_v56 = vld [vmem:[#allocation50_spill] sm:$0xff]  ;;  %v19284_v35 = vld [vmem:[#allocation195_spill] sm:$0xff] }
 0x811   : > { %v8585_v12 = vadd.f32 %v8329_v14, %v19274_v18  ;;  %v8331_v4 = vmax.f32 %v10247_v16, 0.0  ;;  %v8852_v14 = vmul.f32 %v15456_v60, %v17392_v47  ;;  %v10248_v3 = vadd.f32 %v17132_v24, %v15409_v23  ;;  %9155 = vadd.xlane.f32.xlu1 %v9154_v29 }
 0x812   : > { %v8584_v43 = vadd.f32 %v8328_v27, %v19276_v28  ;;  %v8333_v34 = vmax.f32 %v10375_v36, 0.0  ;;  %v9158_v48 = vadd.f32 %v9157_v26, %v17388_v1  ;;  %v10376_v11 = vadd.f32 %v19277_v61, %v15412_v52  ;;  %v8991_v36 = vpop.xlane.xlu0 %8990  ;;  %v8996_v26 = vpop.xlane.xlu1 %8995  ;;  %v19288_v28 = vld [vmem:[#allocation230_spill] sm:$0xff] }
 0x813   : > { %v10249_v38 = vadd.f32 %v19278_v56, %v15399_v17  ;;  %v17490_v30 = vmul.f32 %v15448_v44, %v8585_v12  ;;  %v19280_v42 = vmax.f32 %v19279_v13, 0.0  ;;  %v8332_v47 = vmax.f32 %v10248_v3, 0.0  ;;  %v19286_v12 = vld [vmem:[#allocation229_spill] sm:$0xff] }
 0x814   : > { %v10377_v24 = vadd.f32 %v19281_v31, %v15402_v49  ;;  %v19283_v6 = vmax.f32 %v19282_v9, 0.0  ;;  %v9159_v1 = vadd.f32 %v9158_v48, %v8852_v14  ;;  %v8334_v33 = vmax.f32 %v10376_v11, 0.0  ;;  %v19292_v11 = vld [vmem:[#allocation47_spill] sm:$0xff] }
 0x815   : > { %v8587_v0 = vadd.f32 %v8331_v4, %v19280_v42  ;;  %v8335_v53 = vmax.f32 %v10249_v38, 0.0  ;;  %v8862_v40 = vmul.f32 %v15452_v5, %v8584_v43  ;;  %v19285_v58 = vmax.f32 %v19284_v35, 0.0  ;;  %v19293_v38 = vld [vmem:[#allocation63_spill] sm:$0xff] }
 0x816   : > { %v8589_v8 = vadd.f32 %v8333_v34, %v19283_v6  ;;  %v19287_v27 = vmax.f32 %v19286_v12, 0.0  ;;  %v8337_v29 = vmax.f32 %v10377_v24, 0.0  ;;  %9160 = vadd.xlane.f32.xlu0 %v9159_v1  ;;  %v19289_v4 = vmax.f32 %v19288_v28, 0.0  ;;  %v19290_v34 = vld [vmem:[#allocation200_spill] sm:$0xff]  ;;  %v19300_v28 = vld [vmem:[#allocation207_spill] sm:$0xff] }
 0x817   : > { %v8586_v18 = vadd.f32 %v8330_v19, %v19285_v58  ;;  %v17504_v41 = vmul.f32 %v15444_v51, %v8587_v0  ;;  %v8856_v3 = vmul.f32 %v15456_v60, %v8578_v63  ;;  %v9162_v43 = vadd.f32 %v8854_v22, %v17403_v39 }
 0x818   : > { %v8588_v16 = vadd.f32 %v8332_v47, %v19287_v27  ;;  %v8591_v14 = vadd.f32 %v8335_v53, %v19289_v4  ;;  %v17511_v19 = vmul.f32 %v15448_v44, %v8589_v8  ;;  %v19291_v48 = vmax.f32 %v19290_v34, 0.0  ;;  %v19294_v47 = vld [vmem:[#allocation201_spill] sm:$0xff]  ;;  %v19302_v34 = vld [vmem:[#allocation203_spill] sm:$0xff] }
 0x819   : > { %v10250_v56 = vadd.f32 %v19292_v11, %v15409_v23  ;;  %v10378_v13 = vadd.f32 %v19293_v38, %v15412_v52  ;;  %v9163_v63 = vadd.f32 %v9162_v43, %v17429_v2  ;;  %v9242_v39 = vadd.f32 %v16743_v20, %v8991_v36  ;;  %v19304_v11 = vld [vmem:[#allocation233_spill] sm:$0xff] }
 0x81a   : > { %v17515_v61 = vadd.f32 %v8334_v33, %v19291_v48  ;;  %v8866_v42 = vmul.f32 %v15452_v5, %v8588_v16  ;;  %v9243_v22 = vadd.f32 %v16743_v20, %v8996_v26  ;;  %v17526_v0 = vmul.f32 %v15444_v51, %v8591_v14  ;;  %v19296_v33 = vld [vmem:[#allocation227_spill] sm:$0xff] }
 0x81b   : > { %v19295_v31 = vmax.f32 %v19294_v47, 0.0  ;;  %v8336_v9 = vmax.f32 %v10250_v56, 0.0  ;;  %v10251_v6 = vadd.f32 %v17185_v15, %v15399_v17  ;;  %v9164_v8 = vadd.f32 %v9163_v63, %v8856_v3  ;;  %9307 = vst.msk [vmem:[%s16765_s12 + $0x90] sm:$0xff] %vm9288_vm0, %v9242_v39  ;;  %v9001_v63 = vpop.xlane.xlu0 %9000  ;;  %v9006_v39 = vpop.xlane.xlu1 %9005 }
 0x81c   : > { %v8338_v1 = vmax.f32 %v10378_v13, 0.0  ;;  %9308 = vst.msk [vmem:[%s16765_s12 + $0x98] sm:$0xff] %vm9288_vm0, %v9243_v22  ;;  %v10379_v2 = vadd.f32 %v17187_v62, %v15402_v49  ;;  %v9167_v20 = vadd.f32 %v8858_v10, %v17443_v50  ;;  %v19297_v53 = vmax.f32 %v19296_v33, 0.0  ;;  %v19298_v10 = vld [vmem:[#allocation236_spill] sm:$0xff] }
 0x81d   : > { %v8593_v24 = vadd.f32 %v8337_v29, %v19295_v31  ;;  %v8339_v58 = vmax.f32 %v10251_v6, 0.0  ;;  %v8860_v12 = vmul.f32 %v15456_v60, %v17454_v37  ;;  %v10252_v15 = vadd.f32 %v17198_v32, %v15409_v23  ;;  %9165 = vadd.xlane.f32.xlu1 %v9164_v8  ;;  %v19308_v8 = vld [vmem:[#allocation208_spill] sm:$0xff] }
 0x81e   : > { %v8592_v35 = vadd.f32 %v8336_v9, %v19297_v53  ;;  %v8341_v27 = vmax.f32 %v10379_v2, 0.0  ;;  %v9168_v16 = vadd.f32 %v9167_v20, %v17450_v25  ;;  %v10380_v29 = vadd.f32 %v17200_v21, %v15412_v52  ;;  %v19310_v20 = vld [vmem:[#allocation29_spill] sm:$0xff]  ;;  %v19311_v53 = vld [vmem:[#allocation244_spill] sm:$0xff] }
 0x81f   : > { %v10253_v62 = vadd.f32 %v17211_v59, %v15399_v17  ;;  %v17551_v50 = vmul.f32 %v15448_v44, %v8593_v24  ;;  %v19299_v36 = vmax.f32 %v19298_v10, 0.0  ;;  %v8340_v37 = vmax.f32 %v10252_v15, 0.0  ;;  %v19314_v10 = vld [vmem:[#allocation57_spill] sm:$0xff] }
 0x820   : > { %v10381_v32 = vadd.f32 %v17213_v7, %v15402_v49  ;;  %v19301_v4 = vmax.f32 %v19300_v28, 0.0  ;;  %v9169_v25 = vadd.f32 %v9168_v16, %v8860_v12  ;;  %v8342_v3 = vmax.f32 %v10380_v29, 0.0  ;;  %v19306_v7 = vld [vmem:[#allocation234_spill] sm:$0xff] }
 0x821   : > { %v8595_v26 = vadd.f32 %v8339_v58, %v19299_v36  ;;  %v8343_v43 = vmax.f32 %v10253_v62, 0.0  ;;  %v8870_v21 = vmul.f32 %v15452_v5, %v8592_v35  ;;  %v19303_v59 = vmax.f32 %v19302_v34, 0.0  ;;  %v19318_v34 = vld [vmem:[#allocation30_spill] sm:$0xff] }
 0x822   : > { %v8597_v14 = vadd.f32 %v8341_v27, %v19301_v4  ;;  %v19305_v56 = vmax.f32 %v19304_v11, 0.0  ;;  %v8345_v13 = vmax.f32 %v10381_v32, 0.0  ;;  %9170 = vadd.xlane.f32.xlu0 %v9169_v25  ;;  %v19307_v47 = vmax.f32 %v19306_v7, 0.0  ;;  %v19312_v27 = vld [vmem:[#allocation209_spill] sm:$0xff]  ;;  %v19316_v4 = vld [vmem:[#allocation231_spill] sm:$0xff] }
 0x823   : > { %v8594_v48 = vadd.f32 %v8338_v1, %v19303_v59  ;;  %v17565_v22 = vmul.f32 %v15444_v51, %v8595_v26  ;;  %v8864_v24 = vmul.f32 %v15456_v60, %v8586_v18  ;;  %v9172_v9 = vadd.f32 %v8862_v40, %v17465_v54  ;;  %v17584_v54 = vld [vmem:[#allocation2] ss:$0 sm:$0xff] }
 0x824   : > { %v8596_v38 = vadd.f32 %v8340_v37, %v19305_v56  ;;  %v8599_v31 = vadd.f32 %v8343_v43, %v19307_v47  ;;  %v17572_v6 = vmul.f32 %v15448_v44, %v8597_v14  ;;  %v19309_v1 = vmax.f32 %v19308_v8, 0.0  ;;  %v19321_v47 = vld [vmem:[#allocation215_spill] sm:$0xff] }
 0x825   : > { %v10254_v33 = vadd.f32 %v19310_v20, %v15409_v23  ;;  %v10382_v35 = vadd.f32 %v19311_v53, %v15412_v52  ;;  %v9173_v18 = vadd.f32 %v9172_v9, %v17490_v30  ;;  %v9244_v40 = vadd.f32 %v17584_v54, %v9001_v63  ;;  %v19315_v30 = vld [vmem:[#allocation61_spill] sm:$0xff] }
 0x826   : > { %v17576_v2 = vadd.f32 %v8342_v3, %v19309_v1  ;;  %v8874_v58 = vmul.f32 %v15452_v5, %v8596_v38  ;;  %v9245_v12 = vadd.f32 %v17584_v54, %v9006_v39  ;;  %v17589_v15 = vmul.f32 %v15444_v51, %v8599_v31  ;;  %v19323_v1 = vld [vmem:[#allocation211_spill] sm:$0xff] }
 0x827   : > { %v19313_v16 = vmax.f32 %v19312_v27, 0.0  ;;  %v8344_v62 = vmax.f32 %v10254_v33, 0.0  ;;  %v10255_v36 = vadd.f32 %v19314_v10, %v15399_v17  ;;  %v9174_v26 = vadd.f32 %v9173_v18, %v8864_v24  ;;  %9309 = vst.msk [vmem:[%s16765_s12 + $0xa0] sm:$0xff] %vm9288_vm0, %v9244_v40  ;;  %v19325_v33 = vld [vmem:[#allocation237_spill] sm:$0xff]  ;;  %v9011_v40 = vpop.xlane.xlu0 %9010 }
 0x828   : > { %v8346_v37 = vmax.f32 %v10382_v35, 0.0  ;;  %9310 = vst.msk [vmem:[%s16765_s12 + $0xa8] sm:$0xff] %vm9288_vm0, %v9245_v12  ;;  %v10383_v32 = vadd.f32 %v19315_v30, %v15402_v49  ;;  %v9177_v28 = vadd.f32 %v8866_v42, %v17504_v41  ;;  %v19317_v14 = vmax.f32 %v19316_v4, 0.0  ;;  %v9016_v12 = vpop.xlane.xlu1 %9015  ;;  %v19332_v4 = vld [vmem:[#allocation55_spill] sm:$0xff] }
 0x829   : > { %v8601_v29 = vadd.f32 %v8345_v13, %v19313_v16  ;;  %v8347_v3 = vmax.f32 %v10255_v36, 0.0  ;;  %v8868_v43 = vmul.f32 %v15456_v60, %v17515_v61  ;;  %v10256_v59 = vadd.f32 %v19318_v34, %v15409_v23  ;;  %9175 = vadd.xlane.f32.xlu1 %v9174_v26  ;;  %v19319_v13 = vld [vmem:[#allocation240_spill] sm:$0xff] }
 0x82a   : > { %v8600_v25 = vadd.f32 %v8344_v62, %v19317_v14  ;;  %v8349_v11 = vmax.f32 %v10383_v32, 0.0  ;;  %v9178_v56 = vadd.f32 %v9177_v28, %v17511_v19  ;;  %v10384_v38 = vadd.f32 %v17277_v45, %v15412_v52  ;;  %v19329_v26 = vld [vmem:[#allocation216_spill] sm:$0xff]  ;;  %v19331_v32 = vld [vmem:[#allocation246_spill] sm:$0xff] }
 0x82b   : > { %v10257_v41 = vadd.f32 %v17279_v57, %v15399_v17  ;;  %v17614_v42 = vmul.f32 %v15448_v44, %v8601_v29  ;;  %v19320_v63 = vmax.f32 %v19319_v13, 0.0  ;;  %v8348_v61 = vmax.f32 %v10256_v59, 0.0 }
 0x82c   : > { %v10385_v7 = vadd.f32 %v17290_v46, %v15402_v49  ;;  %v19322_v31 = vmax.f32 %v19321_v47, 0.0  ;;  %v9179_v19 = vadd.f32 %v9178_v56, %v8868_v43  ;;  %v8350_v9 = vmax.f32 %v10384_v38, 0.0  ;;  %v19327_v46 = vld [vmem:[#allocation238_spill] sm:$0xff]  ;;  %v19333_v43 = vld [vmem:[#allocation217_spill] sm:$0xff]  ;;  %v19335_v56 = vld [vmem:[#allocation71_spill] sm:$0xff] }
 0x82d   : > { %v8603_v39 = vadd.f32 %v8347_v3, %v19320_v63  ;;  %v8351_v8 = vmax.f32 %v10257_v41, 0.0  ;;  %v8878_v45 = vmul.f32 %v15452_v5, %v8600_v25  ;;  %v19324_v57 = vmax.f32 %v19323_v1, 0.0  ;;  %v9021_v41 = vpop.xlane.xlu0 %9020  ;;  %v9026_v1 = vpop.xlane.xlu1 %9025 }
 0x82e   : > { %v8605_v24 = vadd.f32 %v8349_v11, %v19322_v31  ;;  %v19326_v53 = vmax.f32 %v19325_v33, 0.0  ;;  %v8353_v18 = vmax.f32 %v10385_v7, 0.0  ;;  %9180 = vadd.xlane.f32.xlu0 %v9179_v19  ;;  %v19328_v16 = vmax.f32 %v19327_v46, 0.0  ;;  %v19337_v7 = vld [vmem:[#allocation235_spill] sm:$0xff] }
 0x82f   : > { %v8602_v20 = vadd.f32 %v8346_v37, %v19324_v57  ;;  %v17628_v27 = vmul.f32 %v15444_v51, %v8603_v39  ;;  %v8872_v62 = vmul.f32 %v15456_v60, %v8594_v48  ;;  %v9182_v10 = vadd.f32 %v8870_v21, %v17526_v0 }
 0x830   : > { %v8604_v35 = vadd.f32 %v8348_v61, %v19326_v53  ;;  %v8607_v29 = vadd.f32 %v8351_v8, %v19328_v16  ;;  %v17635_v36 = vmul.f32 %v15448_v44, %v8605_v24  ;;  %v19330_v37 = vmax.f32 %v19329_v26, 0.0  ;;  %v19340_v53 = vld [vmem:[#allocation64_spill] sm:$0xff]  ;;  %v19344_v16 = vld [vmem:[#allocation37_spill] sm:$0xff] }
 0x831   : > { %v10258_v28 = vadd.f32 %v19331_v32, %v15409_v23  ;;  %v10386_v14 = vadd.f32 %v19332_v4, %v15412_v52  ;;  %v9183_v48 = vadd.f32 %v9182_v10, %v17551_v50  ;;  %v9246_v0 = vadd.f32 %v17584_v54, %v9011_v40  ;;  %v19336_v50 = vld [vmem:[#allocation245_spill] sm:$0xff]  ;;  %v19342_v40 = vld [vmem:[#allocation243_spill] sm:$0xff] }
 0x832   : > { %v17639_v30 = vadd.f32 %v8350_v9, %v19330_v37  ;;  %v8882_v25 = vmul.f32 %v15452_v5, %v8604_v35  ;;  %v9247_v21 = vadd.f32 %v17584_v54, %v9016_v12  ;;  %v8885_v3 = vmul.f32 %v15444_v51, %v8607_v29  ;;  %v19339_v9 = vld [vmem:[#allocation35_spill] sm:$0xff] }
 0x833   : > { %v19334_v34 = vmax.f32 %v19333_v43, 0.0  ;;  %v8352_v11 = vmax.f32 %v10258_v28, 0.0  ;;  %v10259_v38 = vadd.f32 %v19335_v56, %v15399_v17  ;;  %v9184_v13 = vadd.f32 %v9183_v48, %v8872_v62  ;;  %9311 = vst.msk [vmem:[%s16765_s12 + $0xb0] sm:$0xff] %vm9288_vm0, %v9246_v0  ;;  %v9031_v62 = vpop.xlane.xlu0 %9030  ;;  %v19345_v10 = vld [vmem:[#allocation223_spill] sm:$0xff]  ;;  %v19349_v0 = vld [vmem:[#allocation241_spill] sm:$0xff] }
 0x834   : > { %v8354_v63 = vmax.f32 %v10386_v14, 0.0  ;;  %9312 = vst.msk [vmem:[%s16765_s12 + $0xb8] sm:$0xff] %vm9288_vm0, %v9247_v21  ;;  %v10387_v39 = vadd.f32 %v19336_v50, %v15402_v49  ;;  %v9187_v61 = vadd.f32 %v8874_v58, %v17565_v22  ;;  %v19338_v47 = vmax.f32 %v19337_v7, 0.0  ;;  %v19341_v22 = vld [vmem:[#allocation68_spill] sm:$0xff]  ;;  %v19347_v14 = vld [vmem:[#allocation219_spill] sm:$0xff] }
 0x835   : > { %v8609_v59 = vadd.f32 %v8353_v18, %v19334_v34  ;;  %v8355_v24 = vmax.f32 %v10259_v38, 0.0  ;;  %v8876_v19 = vmul.f32 %v15456_v60, %v17576_v2  ;;  %v10260_v8 = vadd.f32 %v19339_v9, %v15409_v23  ;;  %9185 = vadd.xlane.f32.xlu1 %v9184_v13 }
 0x836   : > { %v8608_v31 = vadd.f32 %v8352_v11, %v19338_v47  ;;  %v8357_v57 = vmax.f32 %v10387_v39, 0.0  ;;  %v9188_v33 = vadd.f32 %v9187_v61, %v17572_v6  ;;  %v10388_v35 = vadd.f32 %v19340_v53, %v15412_v52  ;;  %v19353_v61 = vld [vmem:[#allocation224_spill] sm:$0xff] }
 0x837   : > { %v10261_v58 = vadd.f32 %v19341_v22, %v15399_v17  ;;  %v8887_v18 = vmul.f32 %v15448_v44, %v8609_v59  ;;  %v19343_v12 = vmax.f32 %v19342_v40, 0.0  ;;  %v8356_v2 = vmax.f32 %v10260_v8, 0.0  ;;  %v9036_v59 = vpop.xlane.xlu1 %9035  ;;  %v19355_v47 = vld [vmem:[#allocation36_spill] sm:$0xff] }
 0x838   : > { %v10389_v29 = vadd.f32 %v19344_v16, %v15402_v49  ;;  %v19346_v26 = vmax.f32 %v19345_v10, 0.0  ;;  %v9189_v6 = vadd.f32 %v9188_v33, %v8876_v19  ;;  %v8358_v32 = vmax.f32 %v10388_v35, 0.0  ;;  %v19351_v49 = vld [vmem:[#allocation242_spill] sm:$0xff]  ;;  %v9041_v19 = vpop.xlane.xlu0 %9040  ;;  %v19360_v16 = vld [vmem:[#allocation251_spill] sm:$0xff] }
 0x839   : > { %v8611_v46 = vadd.f32 %v8355_v24, %v19343_v12  ;;  %v8359_v28 = vmax.f32 %v10261_v58, 0.0  ;;  %v8886_v4 = vmul.f32 %v15452_v5, %v8608_v31  ;;  %v19348_v17 = vmax.f32 %v19347_v14, 0.0 }
 0x83a   : > { %v8613_v37 = vadd.f32 %v8357_v57, %v19346_v26  ;;  %v19350_v21 = vmax.f32 %v19349_v0, 0.0  ;;  %v8361_v34 = vmax.f32 %v10389_v29, 0.0  ;;  %9190 = vadd.xlane.f32.xlu0 %v9189_v6  ;;  %v19352_v56 = vmax.f32 %v19351_v49, 0.0  ;;  %v19356_v57 = vld [vmem:[#allocation225_spill] sm:$0xff] }
 0x83b   : > { %v8610_v48 = vadd.f32 %v8354_v63, %v19348_v17  ;;  %v8889_v11 = vmul.f32 %v15444_v51, %v8611_v46  ;;  %v8880_v13 = vmul.f32 %v15456_v60, %v8602_v20  ;;  %v9192_v50 = vadd.f32 %v8878_v45, %v17589_v15 }
 0x83c   : > { %v8612_v43 = vadd.f32 %v8356_v2, %v19350_v21  ;;  %v8615_v38 = vadd.f32 %v8359_v28, %v19352_v56  ;;  %v8891_v39 = vmul.f32 %v15448_v44, %v8613_v37  ;;  %v19354_v63 = vmax.f32 %v19353_v61, 0.0  ;;  %v9051_v2 = vpop.xlane.xlu0 %9050 }
 0x83d   : > { %v10262_v31 = vadd.f32 %v19355_v47, %v15409_v23  ;;  %v10390_v24 = vadd.f32 %v17371_v55, %v15412_v52  ;;  %v9193_v20 = vadd.f32 %v9192_v50, %v17614_v42  ;;  %v9248_v15 = vadd.f32 %v17584_v54, %v9021_v41  ;;  %v9046_v23 = vpop.xlane.xlu1 %9045 }
 0x83e   : > { %v8614_v7 = vadd.f32 %v8358_v32, %v19354_v63  ;;  %v8890_v9 = vmul.f32 %v15452_v5, %v8612_v43  ;;  %v9249_v45 = vadd.f32 %v17584_v54, %v9026_v1  ;;  %v8893_v8 = vmul.f32 %v15444_v51, %v8615_v38  ;;  %v19358_v51 = vld [vmem:[#allocation239_spill] sm:$0xff] }
 0x83f   : > { %v19357_v33 = vmax.f32 %v19356_v57, 0.0  ;;  %v8360_v35 = vmax.f32 %v10262_v31, 0.0  ;;  %v8362_v22 = vmax.f32 %v10390_v24, 0.0  ;;  %v9194_v58 = vadd.f32 %v9193_v20, %v8880_v13  ;;  %9313 = vst.msk [vmem:[%s16765_s12 + $0xc0] sm:$0xff] %vm9288_vm0, %v9248_v15 }
 0x840   : > { %9314 = vst.msk [vmem:[%s16765_s12 + $0xc8] sm:$0xff] %vm9288_vm0, %v9249_v45  ;;  %v8884_v52 = vmul.f32 %v15456_v60, %v17639_v30  ;;  %v9197_v55 = vadd.f32 %v8882_v25, %v17628_v27  ;;  %v9202_v42 = vadd.f32 %v8886_v4, %v8885_v3  ;;  %v19359_v41 = vmax.f32 %v19358_v51, 0.0 }
 0x841   : > { %v8617_v53 = vadd.f32 %v8361_v34, %v19357_v33  ;;  %v8888_v40 = vmul.f32 %v15456_v60, %v8610_v48  ;;  %v9250_v12 = vadd.f32 %v17584_v54, %v9031_v62  ;;  %v9251_v46 = vadd.f32 %v17584_v54, %v9036_v59  ;;  %9195 = vadd.xlane.f32.xlu1 %v9194_v58  ;;  %v9056_v6 = vpop.xlane.xlu1 %9055 }
 0x842   : > { %v8616_v1 = vadd.f32 %v8360_v35, %v19359_v41  ;;  %v19361_v29 = vmax.f32 %v19360_v16, 0.0  ;;  %v9198_v26 = vadd.f32 %v9197_v55, %v17635_v36  ;;  %v9203_v30 = vadd.f32 %v9202_v42, %v8887_v18 }
 0x843   : > { %v9207_v27 = vadd.f32 %v8890_v9, %v8889_v11  ;;  %9315 = vst.msk [vmem:[%s16765_s12 + $0xd0] sm:$0xff] %vm9288_vm0, %v9250_v12  ;;  %9316 = vst.msk [vmem:[%s16765_s12 + $0xd8] sm:$0xff] %vm9288_vm0, %v9251_v46  ;;  %v8892_v3 = vmul.f32 %v15456_v60, %v8614_v7  ;;  %v9252_v62 = vadd.f32 %v17584_v54, %v9041_v19 }
 0x844   : > { %v8618_v10 = vadd.f32 %v8362_v22, %v19361_v29  ;;  %v8894_v25 = vmul.f32 %v15452_v5, %v8616_v1  ;;  %v9253_v37 = vadd.f32 %v17584_v54, %v9046_v23  ;;  %v9199_v36 = vadd.f32 %v9198_v26, %v8884_v52 }
 0x845   : > { %v9204_v32 = vadd.f32 %v9203_v30, %v8888_v40  ;;  %v9208_v18 = vadd.f32 %v9207_v27, %v8891_v39  ;;  %v9254_v28 = vadd.f32 %v17584_v54, %v9051_v2  ;;  %v8895_v5 = vmul.f32 %v15448_v44, %v8617_v53  ;;  %9317 = vst.msk [vmem:[%s16765_s12 + $0xe0] sm:$0xff] %vm9288_vm0, %v9252_v62  ;;  %v9061_v44 = vpop.xlane.xlu0 %9060  ;;  %v9066_v34 = vpop.xlane.xlu1 %9065 }
 0x846   : > { %v9212_v4 = vadd.f32 %v8894_v25, %v8893_v8  ;;  %9318 = vst.msk [vmem:[%s16765_s12 + $0xe8] sm:$0xff] %vm9288_vm0, %v9253_v37  ;;  %v9255_v14 = vadd.f32 %v17584_v54, %v9056_v6  ;;  %9200 = vadd.xlane.f32.xlu0 %v9199_v36  ;;  %v8896_v48 = vmul.f32 %v15456_v60, %v8618_v10 }
 0x847   : > { %9205 = vadd.xlane.f32.xlu1 %v9204_v32  ;;  %v9209_v17 = vadd.f32 %v9208_v18, %v8892_v3  ;;  %9319 = vst.msk [vmem:[%s16765_s12 + $0xf0] sm:$0xff] %vm9288_vm0, %v9254_v28  ;;  %v9256_v43 = vadd.f32 %v17584_v54, %v9061_v44  ;;  %v9257_v59 = vadd.f32 %v17584_v54, %v9066_v34 }
 0x848   : > { %v9213_v0 = vadd.f32 %v9212_v4, %v8895_v5  ;;  %9320 = vst.msk [vmem:[%s16765_s12 + $0xf8] sm:$0xff] %vm9288_vm0, %v9255_v14 }
 0x849   : > { %9321 = vst.msk [vmem:[%s16765_s12 + $0x100] sm:$0xff] %vm9288_vm0, %v9256_v43  ;;  %9322 = vst.msk [vmem:[%s16765_s12 + $0x108] sm:$0xff] %vm9288_vm0, %v9257_v59  ;;  %v9071_v60 = vpop.xlane.xlu0 %9070  ;;  %v9076_v49 = vpop.xlane.xlu1 %9075 }
 0x84a   : > { %v9214_v21 = vadd.f32 %v9213_v0, %v8896_v48  ;;  %9210 = vadd.xlane.f32.xlu0 %v9209_v17  ;;  %v9258_v11 = vadd.f32 %v17584_v54, %v9071_v60  ;;  %v9259_v56 = vadd.f32 %v17584_v54, %v9076_v49 }
 0x84c   : > { %9215 = vadd.xlane.f32.xlu1 %v9214_v21  ;;  %9323 = vst.msk [vmem:[%s16765_s12 + $0x110] sm:$0xff] %vm9288_vm0, %v9258_v11  ;;  %9324 = vst.msk [vmem:[%s16765_s12 + $0x118] sm:$0xff] %vm9288_vm0, %v9259_v56 }
 0x84d   : > { %v9081_v38 = vpop.xlane.xlu0 %9080  ;;  %v9086_v50 = vpop.xlane.xlu1 %9085 }
 0x84e   : > { %v9260_v13 = vadd.f32 %v17584_v54, %v9081_v38  ;;  %v9261_v39 = vadd.f32 %v17584_v54, %v9086_v50 }
 0x850   : > { %9325 = vst.msk [vmem:[%s16765_s12 + $0x120] sm:$0xff] %vm9288_vm0, %v9260_v13  ;;  %9326 = vst.msk [vmem:[%s16765_s12 + $0x128] sm:$0xff] %vm9288_vm0, %v9261_v39 }
 0x851   : > { %v9091_v61 = vpop.xlane.xlu0 %9090 }
 0x852   : > { %v9262_v63 = vadd.f32 %v17584_v54, %v9091_v61 }
 0x854   : > { %9327 = vst.msk [vmem:[%s16765_s12 + $0x130] sm:$0xff] %vm9288_vm0, %v9262_v63 }
 0x855   : > { %v9096_v7 = vpop.xlane.xlu1 %9095 }
 0x856   : > { %v9263_v47 = vadd.f32 %v17584_v54, %v9096_v7 }
 0x858   : > { %9328 = vst.msk [vmem:[%s16765_s12 + $0x138] sm:$0xff] %vm9288_vm0, %v9263_v47 }
 0x85c   : > { %v9101_v31 = vpop.xlane.xlu0 %9100 }
 0x85d   : > { %v9264_v24 = vadd.f32 %v17584_v54, %v9101_v31 }
 0x85f   : > { %9329 = vst.msk [vmem:[%s16765_s12 + $0x140] sm:$0xff] %vm9288_vm0, %v9264_v24 }
 0x861   : > { %v9106_v19 = vpop.xlane.xlu1 %9105 }
 0x862   : > { %v9265_v9 = vadd.f32 %v17584_v54, %v9106_v19 }
 0x864   : > { %9330 = vst.msk [vmem:[%s16765_s12 + $0x148] sm:$0xff] %vm9288_vm0, %v9265_v9 }
 0x866   : > { %v9111_v20 = vpop.xlane.xlu0 %9110 }
 0x867   : > { %v9266_v15 = vadd.f32 %v17584_v54, %v9111_v20 }
 0x869   : > { %9331 = vst.msk [vmem:[%s16765_s12 + $0x150] sm:$0xff] %vm9288_vm0, %v9266_v15 }
 0x86e   : > { %v9116_v45 = vpop.xlane.xlu1 %9115 }
 0x86f   : > { %v9267_v8 = vadd.f32 %v17584_v54, %v9116_v45 }
 0x871   : > { %9332 = vst.msk [vmem:[%s16765_s12 + $0x158] sm:$0xff] %vm9288_vm0, %v9267_v8 }
 0x873   : > { %v9121_v57 = vpop.xlane.xlu0 %9120 }
 0x874   : > { %v9268_v33 = vadd.f32 %v17584_v54, %v9121_v57 }
 0x876   : > { %9333 = vst.msk [vmem:[%s16765_s12 + $0x160] sm:$0xff] %vm9288_vm0, %v9268_v33 }
 0x87a   : > { %v9126_v53 = vpop.xlane.xlu1 %9125 }
 0x87b   : > { %v9269_v35 = vadd.f32 %v17584_v54, %v9126_v53 }
 0x87d   : > { %9334 = vst.msk [vmem:[%s16765_s12 + $0x168] sm:$0xff] %vm9288_vm0, %v9269_v35 }
 0x87e   : > { %v9131_v22 = vpop.xlane.xlu0 %9130 }
 0x87f   : > { %v9270_v23 = vadd.f32 %v17584_v54, %v9131_v22 }
 0x881   : > { %9335 = vst.msk [vmem:[%s16765_s12 + $0x170] sm:$0xff] %vm9288_vm0, %v9270_v23 }
 0x885   : > { %v9136_v58 = vpop.xlane.xlu1 %9135 }
 0x886   : > { %v9271_v52 = vadd.f32 %v17584_v54, %v9136_v58 }
 0x888   : > { %9336 = vst.msk [vmem:[%s16765_s12 + $0x178] sm:$0xff] %vm9288_vm0, %v9271_v52 }
 0x88a   : > { %v9141_v55 = vpop.xlane.xlu0 %9140 }
 0x88b   : > { %v9272_v42 = vadd.f32 %v17584_v54, %v9141_v55 }
 0x88d   : > { %9337 = vst.msk [vmem:[%s16765_s12 + $0x180] sm:$0xff] %vm9288_vm0, %v9272_v42 }
 0x893   : > { %v9146_v51 = vpop.xlane.xlu1 %9145 }
 0x894   : > { %v9273_v41 = vadd.f32 %v17584_v54, %v9146_v51 }
 0x896   : > { %9338 = vst.msk [vmem:[%s16765_s12 + $0x188] sm:$0xff] %vm9288_vm0, %v9273_v41 }
 0x897   : > { %v9151_v1 = vpop.xlane.xlu0 %9150 }
 0x898   : > { %v9274_v40 = vadd.f32 %v17584_v54, %v9151_v1 }
 0x89a   : > { %9339 = vst.msk [vmem:[%s16765_s12 + $0x190] sm:$0xff] %vm9288_vm0, %v9274_v40 }
 0x89e   : > { %v9156_v12 = vpop.xlane.xlu1 %9155 }
 0x89f   : > { %v9275_v46 = vadd.f32 %v17584_v54, %v9156_v12 }
 0x8a1   : > { %9340 = vst.msk [vmem:[%s16765_s12 + $0x198] sm:$0xff] %vm9288_vm0, %v9275_v46 }
 0x8a3   : > { %v9161_v2 = vpop.xlane.xlu0 %9160 }
 0x8a4   : > { %v9276_v16 = vadd.f32 %v17584_v54, %v9161_v2 }
 0x8a6   : > { %9341 = vst.msk [vmem:[%s16765_s12 + $0x1a0] sm:$0xff] %vm9288_vm0, %v9276_v16 }
 0x8aa   : > { %v9166_v29 = vpop.xlane.xlu1 %9165 }
 0x8ab   : > { %v9277_v10 = vadd.f32 %v17584_v54, %v9166_v29 }
 0x8ad   : > { %9342 = vst.msk [vmem:[%s16765_s12 + $0x1a8] sm:$0xff] %vm9288_vm0, %v9277_v10 }
 0x8af   : > { %v9171_v26 = vpop.xlane.xlu0 %9170 }
 0x8b0   : > { %v9278_v30 = vadd.f32 %v17584_v54, %v9171_v26 }
 0x8b2   : > { %9343 = vst.msk [vmem:[%s16765_s12 + $0x1b0] sm:$0xff] %vm9288_vm0, %v9278_v30 }
 0x8b6   : > { %v9176_v27 = vpop.xlane.xlu1 %9175 }
 0x8b7   : > { %v9279_v25 = vadd.f32 %v17584_v54, %v9176_v27 }
 0x8b9   : > { %9344 = vst.msk [vmem:[%s16765_s12 + $0x1b8] sm:$0xff] %vm9288_vm0, %v9279_v25 }
 0x8bb   : > { %v9181_v3 = vpop.xlane.xlu0 %9180 }
 0x8bc   : > { %v9280_v62 = vadd.f32 %v17584_v54, %v9181_v3 }
 0x8be   : > { %9345 = vst.msk [vmem:[%s16765_s12 + $0x1c0] sm:$0xff] %vm9288_vm0, %v9280_v62 }
 0x8c2   : > { %v9186_v37 = vpop.xlane.xlu1 %9185 }
 0x8c3   : > { %v9281_v6 = vadd.f32 %v17584_v54, %v9186_v37 }
 0x8c5   : > { %9346 = vst.msk [vmem:[%s16765_s12 + $0x1c8] sm:$0xff] %vm9288_vm0, %v9281_v6 }
 0x8c7   : > { %v9191_v36 = vpop.xlane.xlu0 %9190 }
 0x8c8   : > { %v9282_v32 = vadd.f32 %v17584_v54, %v9191_v36 }
 0x8ca   : > { %9347 = vst.msk [vmem:[%s16765_s12 + $0x1d0] sm:$0xff] %vm9288_vm0, %v9282_v32 }
 0x8ce   : > { %v9196_v18 = vpop.xlane.xlu1 %9195 }
 0x8cf   : > { %v9283_v28 = vadd.f32 %v17584_v54, %v9196_v18 }
 0x8d1   : > { %9348 = vst.msk [vmem:[%s16765_s12 + $0x1d8] sm:$0xff] %vm9288_vm0, %v9283_v28 }
 0x8d3   : > { %v9201_v5 = vpop.xlane.xlu0 %9200 }
 0x8d4   : > { %v9206_v4 = vpop.xlane.xlu1 %9205  ;;  %v9284_v14 = vadd.f32 %v17584_v54, %v9201_v5 }
 0x8d5   : > { %v9285_v17 = vadd.f32 %v17584_v54, %v9206_v4 }
 0x8d6   : > { %9349 = vst.msk [vmem:[%s16765_s12 + $0x1e0] sm:$0xff] %vm9288_vm0, %v9284_v14 }
 0x8d7   : > { %9350 = vst.msk [vmem:[%s16765_s12 + $0x1e8] sm:$0xff] %vm9288_vm0, %v9285_v17  ;;  %v9211_v48 = vpop.xlane.xlu0 %9210 }
 0x8d8   : > { %v9286_v0 = vadd.f32 %v17584_v54, %v9211_v48 }
 0x8d9   : > { %v9216_v44 = vpop.xlane.xlu1 %9215 }
 0x8da   : > { %v9287_v21 = vadd.f32 %v17584_v54, %v9216_v44  ;;  %9351 = vst.msk [vmem:[%s16765_s12 + $0x1f0] sm:$0xff] %vm9288_vm0, %v9286_v0 }
 0x8dc   : > { %9352 = vst.msk [vmem:[%s16765_s12 + $0x1f8] sm:$0xff] %vm9288_vm0, %v9287_v21 }
 0x8dd PF: > { %p22_p5 = scmp.ge.s32.totalorder %s12517_s21, 6   ;;  %s19362_s26 = smov %s12295_s27 }
 0x8de   : > { %s19363_s27 = smov %s12299_s28  ;;  %s19364_s28 = smov %s12528_s15 }
 0x8df   : > { %s19365_s29 = smov %s12517_s21  ;;  %24 = sbr.rel (!%p22_p5) target bundleno = 9 (0x9), region = 108 }
 0x8e6   :  { %9375 = vsyncpa [#allocation4], 1 }
 0x8e7   :  { %9377 = vsyncpa [#allocation4 + $0x1], 1 }
 0x8e8   :  { %9378 = vsyncpa [#allocation6], 1 }
 0x8e9   :  { %9379 = vsyncpa [#allocation9], 1 }
 0x8ea   :  { %9380 = vsyncpa [#allocation12], 1 }

</bundles_post_ra>
